<compile_context>
chip_gen: v6e
topology: v6e:2x2x1
jax: 0.10.0
libtpu: 0.0.40
codegen_flags: <defaults>
</compile_context>

<pallas_src>
import functools

import jax
import jax.numpy as jnp
from jax import lax
from jax.experimental import pallas as pl
from jax.experimental.pallas import tpu as pltpu


# ----------------------------- Pallas kernel ------------------------------- #

def _conv3x3_acc(src_ref, w_ref, B, H, W, acc):
    """Accumulate a 3x3 conv as 9 K=C matmuls. src_ref: (B,H+2,W+2,C) padded."""
    C = src_ref.shape[-1]
    for ky in range(3):
        for kx in range(3):
            lhs = src_ref[:, ky:ky + H, kx:kx + W, :].reshape(B * H * W, C)
            acc = acc + jnp.dot(lhs, w_ref[3 * ky + kx],
                                preferred_element_type=jnp.float32)
    return acc


def _basic_block_kernel(x_ref, w1_ref, w2_ref, ws_ref, b_ref,
                        o_ref, xpad_ref, mid_ref):
    """Fused BasicBlock forward for one batch tile.

    x_ref   : (B, H, W, Cin_p)        input tile (bf16, channels zero-padded)
    w1_ref  : (9, Cin_p, Cm_p)        conv1 taps, BN1 scale folded in (bf16)
    w2_ref  : (9, Cm_p,  Cm_p)        conv2 taps, BN2 scale folded in (bf16)
    ws_ref  : (Cin_p, Cm_p)           1x1 shortcut weight, BNs scale folded in
    b_ref   : (3, Cm_p)               packed folded BN biases [b1, b2, bs] (f32)
    o_ref   : (B*H*W, Cm_p)           lane-dense output (f32)
    xpad_ref: VMEM (B, H+2, W+2, Cin_p) scratch, 1-pixel zero halo
    mid_ref : VMEM (B, H+2, W+2, Cm_p)  scratch, 1-pixel zero halo
    """
    B, H, W, Cin = x_ref.shape
    Cm = mid_ref.shape[-1]
    Hp, Wp = H + 2, W + 2
    M = B * H * W

    # ---- zero ONLY the 1-pixel halo (interiors are fully overwritten) ----- #
    # Unconditional each step (scratch is per-core under megacore).
    xpad_ref[:, 0:1, :, :] = jnp.zeros((B, 1, Wp, Cin), xpad_ref.dtype)
    xpad_ref[:, Hp - 1:Hp, :, :] = jnp.zeros((B, 1, Wp, Cin), xpad_ref.dtype)
    xpad_ref[:, 1:H + 1, 0:1, :] = jnp.zeros((B, H, 1, Cin), xpad_ref.dtype)
    xpad_ref[:, 1:H + 1, Wp - 1:Wp, :] = jnp.zeros((B, H, 1, Cin), xpad_ref.dtype)
    mid_ref[:, 0:1, :, :] = jnp.zeros((B, 1, Wp, Cm), mid_ref.dtype)
    mid_ref[:, Hp - 1:Hp, :, :] = jnp.zeros((B, 1, Wp, Cm), mid_ref.dtype)
    mid_ref[:, 1:H + 1, 0:1, :] = jnp.zeros((B, H, 1, Cm), mid_ref.dtype)
    mid_ref[:, 1:H + 1, Wp - 1:Wp, :] = jnp.zeros((B, H, 1, Cm), mid_ref.dtype)

    # ---- in-VMEM zero padding of the input tile ---------------------------- #
    x = x_ref[...]                                    # (B, H, W, Cin_p)
    xpad_ref[:, 1:H + 1, 1:W + 1, :] = x

    # ---- stage 1: conv1 (BN1 scale pre-folded) + bias + ReLU -> mid (bf16) - #
    b1 = b_ref[0:1, :]
    a1 = _conv3x3_acc(xpad_ref, w1_ref, B, H, W,
                      jnp.zeros((M, Cm), jnp.float32))
    mid = jnp.maximum(a1 + b1, 0.0)
    mid_ref[:, 1:H + 1, 1:W + 1, :] = mid.reshape(B, H, W, Cm).astype(
        mid_ref.dtype)

    # ---- shortcut first (fewer live f32 temps), then conv2 accumulates ----- #
    sc = jnp.dot(x.reshape(M, Cin), ws_ref[...],
                 preferred_element_type=jnp.float32)
    acc = sc + (b_ref[1:2, :] + b_ref[2:3, :])        # + b2 + bs
    acc = _conv3x3_acc(mid_ref, w2_ref, B, H, W, acc)

    # ---- residual ReLU; lane-dense (B*H*W, Cm_p) store ---------------------- #
    o_ref[...] = jnp.maximum(acc, 0.0).astype(o_ref.dtype)


# ------------------------------- glue / wrapper ----------------------------- #

def _fold_bn(gamma, beta, mean, var, eps=1e-5):
    scale = gamma.astype(jnp.float32) / jnp.sqrt(var.astype(jnp.float32) + eps)
    bias = beta.astype(jnp.float32) - mean.astype(jnp.float32) * scale
    return scale, bias


def _prep_conv3x3(w_oihw, scale, cin_p, cout_p, dtype):
    # (Cout, Cin, 3, 3) with BN scale folded -> (9, Cin_p, Cout_p);
    # tap index t = 3*ky + kx, matching the kernel loop.
    cout, cin = w_oihw.shape[0], w_oihw.shape[1]
    w = w_oihw.astype(jnp.float32) * scale.reshape(cout, 1, 1, 1)
    w = jnp.transpose(w, (2, 3, 1, 0)).reshape(9, cin, cout)
    w = jnp.pad(w, ((0, 0), (0, cin_p - cin), (0, cout_p - cout)))
    return w.astype(dtype)


def _prep_conv1x1(w_oihw, scale, cin_p, cout_p, dtype):
    cout, cin = w_oihw.shape[0], w_oihw.shape[1]
    w = w_oihw[:, :, 0, 0].astype(jnp.float32) * scale.reshape(cout, 1)
    w = jnp.transpose(w, (1, 0))                      # (Cin, Cout)
    w = jnp.pad(w, ((0, cin_p - cin), (0, cout_p - cout)))
    return w.astype(dtype)


def _pad_bias(b, cout_p):
    return jnp.pad(b.astype(jnp.float32), (0, cout_p - b.shape[0]))


def _pick_batch_tile(N, H, W):
    # Grow per-step matmul M (= B_TILE*H*W) toward ~1024+ rows, but keep at
    # least 2 grid steps when possible so both TensorCores get work (v7x).
    bt = max(1, min(N, -(-1024 // (H * W))))
    while bt > 1 and (N // bt) < 2:
        bt -= 1
    while N % bt:
        bt -= 1
    return bt


@functools.partial(jax.jit, static_argnames=("compute_dtype",))
def basic_block_forward(x_nchw, params, compute_dtype=jnp.bfloat16):
    """Pallas BasicBlock forward. x_nchw: (N, Cin, H, W) f32 -> (N, Cm, H, W) f32."""
    N, Cin, H, W = x_nchw.shape
    Cm = params["w1"].shape[0]
    LANE = 128
    cin_p = -(-Cin // LANE) * LANE
    cm_p = -(-Cm // LANE) * LANE

    # NCHW -> NHWC, channels zero-padded to a full lane width; bf16 operands.
    x = jnp.transpose(x_nchw, (0, 2, 3, 1)).astype(compute_dtype)
    x = jnp.pad(x, ((0, 0), (0, 0), (0, 0), (0, cin_p - Cin)))

    s1, b1 = _fold_bn(*params["bn1"])
    s2, b2 = _fold_bn(*params["bn2"])
    ss, bs = _fold_bn(*params["bns"])
    w1 = _prep_conv3x3(params["w1"], s1, cin_p, cm_p, compute_dtype)
    w2 = _prep_conv3x3(params["w2"], s2, cm_p, cm_p, compute_dtype)
    ws = _prep_conv1x1(params["ws"], ss, cin_p, cm_p, compute_dtype)
    biases = jnp.stack([_pad_bias(b1, cm_p), _pad_bias(b2, cm_p),
                        _pad_bias(bs, cm_p)], axis=0)          # (3, Cm_p) f32

    bt = _pick_batch_tile(N, H, W)
    steps = N // bt

    def const_spec(*shape):
        # Same block every grid step -> loaded once, stays VMEM-resident.
        return pl.BlockSpec(shape, lambda n: (0,) * len(shape))

    grid_spec = pltpu.PrefetchScalarGridSpec(
        num_scalar_prefetch=0,
        grid=(steps,),
        in_specs=[
            pl.BlockSpec((bt, H, W, cin_p), lambda n: (n, 0, 0, 0)),
            const_spec(9, cin_p, cm_p),
            const_spec(9, cm_p, cm_p),
            const_spec(cin_p, cm_p),
            const_spec(3, cm_p),
        ],
        out_specs=pl.BlockSpec((bt * H * W, cm_p), lambda n: (n, 0)),
        scratch_shapes=[
            pltpu.VMEM((bt, H + 2, W + 2, cin_p), compute_dtype),  # padded x
            pltpu.VMEM((bt, H + 2, W + 2, cm_p), compute_dtype),   # padded mid
        ],
    )

    y = pl.pallas_call(
        _basic_block_kernel,
        out_shape=jax.ShapeDtypeStruct((N * H * W, cm_p), jnp.float32),
        grid_spec=grid_spec,
        compiler_params=pltpu.CompilerParams(
            dimension_semantics=("parallel",),
            # Default scoped-VMEM limit is ample for these tiles; raise it
            # (<= ~48 MiB on v7x) only when enlarging B_TILE / spatial tiles.
        ),
    )(x, w1, w2, ws, biases)

    # Lane-dense (N*H*W, Cm_p) -> NCHW, dropping the channel padding.
    y = y.reshape(N, H, W, cm_p)[..., :Cm]
    return jnp.transpose(y, (0, 3, 1, 2))


# ------------------------------ pure-JAX references ------------------------- #

def _ref_matched(x_nchw, params, eps=1e-5):
    """Reference matching the kernel's precision choices: BN scale folded into
    bf16 weights, bf16 activations, f32 accumulation/epilogue."""
    x = jnp.transpose(x_nchw, (0, 2, 3, 1)).astype(jnp.bfloat16)

    def conv(v, w_oihw, scale):
        w = w_oihw.astype(jnp.float32) * scale[:, None, None, None]
        w = jnp.transpose(w, (2, 3, 1, 0)).astype(jnp.bfloat16)   # HWIO
        return lax.conv_general_dilated(
            v, w, (1, 1), "SAME",
            dimension_numbers=("NHWC", "HWIO", "NHWC"),
            preferred_element_type=jnp.float32)

    s1, b1 = _fold_bn(*params["bn1"], eps)
    s2, b2 = _fold_bn(*params["bn2"], eps)
    ss, bs = _fold_bn(*params["bns"], eps)
    mid = jax.nn.relu(conv(x, params["w1"], s1) + b1)
    out = conv(mid.astype(jnp.bfloat16), params["w2"], s2) + b2
    sc = conv(x, params["ws"], ss) + bs
    return jnp.transpose(jax.nn.relu(out + sc), (0, 3, 1, 2))


def _ref_f32(x_nchw, params, eps=1e-5):
    """Full-f32 unfused reference (loose sanity check)."""
    x = jnp.transpose(x_nchw, (0, 2, 3, 1)).astype(jnp.float32)

    def conv(v, w_oihw):
        w = jnp.transpose(w_oihw, (2, 3, 1, 0)).astype(jnp.float32)
        return lax.conv_general_dilated(
            v, w, (1, 1), "SAME",
            dimension_numbers=("NHWC", "HWIO", "NHWC"),
            preferred_element_type=jnp.float32)

    def bn(v, g, b, m, var):
        return (v - m) / jnp.sqrt(var + eps) * g + b

    mid = jax.nn.relu(bn(conv(x, params["w1"]), *params["bn1"]))
    out = bn(conv(mid, params["w2"]), *params["bn2"])
    sc = bn(conv(x, params["ws"]), *params["bns"])
    return jnp.transpose(jax.nn.relu(out + sc), (0, 3, 1, 2))


# ------------------------------------ main ---------------------------------- #

if __name__ == "__main__":
    key = jax.random.PRNGKey(0)
    ks = jax.random.split(key, 12)

    N, in_planes, planes, H, W = 2, 4, 8, 16, 16   # stride=1, shortcut conv active

    def bn_params(k):
        k1, k2, k3, k4 = jax.random.split(k, 4)
        gamma = 1.0 + 0.1 * jax.random.normal(k1, (planes,), jnp.float32)
        beta = 0.1 * jax.random.normal(k2, (planes,), jnp.float32)
        mean = 0.1 * jax.random.normal(k3, (planes,), jnp.float32)
        var = 0.5 + 0.1 * jnp.abs(jax.random.normal(k4, (planes,), jnp.float32))
        return (gamma, beta, mean, var)

    params = {
        "w1": 0.1 * jax.random.normal(ks[0], (planes, in_planes, 3, 3), jnp.float32),
        "w2": 0.1 * jax.random.normal(ks[1], (planes, planes, 3, 3), jnp.float32),
        "ws": 0.1 * jax.random.normal(ks[2], (planes, in_planes, 1, 1), jnp.float32),
        "bn1": bn_params(ks[3]),
        "bn2": bn_params(ks[4]),
        "bns": bn_params(ks[5]),
    }

    x = jax.random.normal(ks[11], (N, in_planes, H, W), jnp.float32)

    y = jax.block_until_ready(basic_block_forward(x, params))
    assert y.shape == (N, planes, H, W)

    # Precision-matched reference (folded bf16 weights, f32 accumulation).
    ref_m = jax.block_until_ready(_ref_matched(x, params))
    err_m = jnp.max(jnp.abs(y - ref_m))
    assert jnp.allclose(y, ref_m, atol=5e-3, rtol=5e-3), f"max abs err {err_m}"

    # Full-f32 reference: loose sanity check (covers bf16 quantization).
    ref_f = jax.block_until_ready(_ref_f32(x, params))
    err_f = jnp.max(jnp.abs(y - ref_f))
    assert jnp.allclose(y, ref_f, atol=1e-1, rtol=1e-1), f"max abs err vs f32 {err_f}"

    print("KERNEL_OK")
</pallas_src>

<mosaic_0001>
module attributes {stable_mosaic.version = 11 : i64} {
  func.func @_basic_block_kernel(%arg0: i32, %arg1: memref<1x16x16x128xbf16, #tpu.memory_space<vmem>>, %arg2: memref<9x128x128xbf16, #tpu.memory_space<vmem>>, %arg3: memref<9x128x128xbf16, #tpu.memory_space<vmem>>, %arg4: memref<128x128xbf16, #tpu.memory_space<vmem>>, %arg5: memref<3x128xf32, #tpu.memory_space<vmem>>, %arg6: memref<256x128xf32, #tpu.memory_space<vmem>>, %arg7: memref<1x18x18x128xbf16, #tpu.memory_space<vmem>>, %arg8: memref<1x18x18x128xbf16, #tpu.memory_space<vmem>>) attributes {dimension_semantics = [#tpu.dimension_semantics<parallel>], iteration_bounds = array<i64: 2>, scalar_prefetch = 0 : i64, scratch_operands = 2 : i64, tpu.core_type = #tpu.core_type<tc>, window_params = [{transform_indices = @transform_0, window_bounds = array<i64: 1, 16, 16, 128>}, {pipeline_mode = #tpu.pipeline_mode<synchronous>, transform_indices = @transform_1, window_bounds = array<i64: 9, 128, 128>}, {pipeline_mode = #tpu.pipeline_mode<synchronous>, transform_indices = @transform_2, window_bounds = array<i64: 9, 128, 128>}, {pipeline_mode = #tpu.pipeline_mode<synchronous>, transform_indices = @transform_3, window_bounds = array<i64: 128, 128>}, {pipeline_mode = #tpu.pipeline_mode<synchronous>, transform_indices = @transform_4, window_bounds = array<i64: 3, 128>}, {transform_indices = @transform_5, window_bounds = array<i64: 256, 128>}]} {
    %cst = arith.constant 0.000000e+00 : bf16
    %0 = vector.broadcast %cst : bf16 to vector<1x1x18x128xbf16>
    %c0 = arith.constant 0 : index
    %c0_0 = arith.constant 0 : index
    %c0_1 = arith.constant 0 : index
    %c0_2 = arith.constant 0 : index
    %1 = vector.load %arg7[%c0, %c0_0, %c0_1, %c0_2] : memref<1x18x18x128xbf16, #tpu.memory_space<vmem>>, vector<1x1x18x128xbf16>
    tpu.vector_store %arg7[%c0, %c0_0, %c0_1, %c0_2], %0 {strides = array<i32>} : memref<1x18x18x128xbf16, #tpu.memory_space<vmem>>, vector<1x1x18x128xbf16>,
    %cst_3 = arith.constant 0.000000e+00 : bf16
    %2 = vector.broadcast %cst_3 : bf16 to vector<1x1x18x128xbf16>
    %c0_4 = arith.constant 0 : index
    %c17 = arith.constant 17 : index
    %c0_5 = arith.constant 0 : index
    %c0_6 = arith.constant 0 : index
    %3 = vector.load %arg7[%c0_4, %c17, %c0_5, %c0_6] : memref<1x18x18x128xbf16, #tpu.memory_space<vmem>>, vector<1x1x18x128xbf16>
    tpu.vector_store %arg7[%c0_4, %c17, %c0_5, %c0_6], %2 {strides = array<i32>} : memref<1x18x18x128xbf16, #tpu.memory_space<vmem>>, vector<1x1x18x128xbf16>,
    %cst_7 = arith.constant 0.000000e+00 : bf16
    %4 = vector.broadcast %cst_7 : bf16 to vector<1x16x1x128xbf16>
    %c0_8 = arith.constant 0 : index
    %c1 = arith.constant 1 : index
    %c0_9 = arith.constant 0 : index
    %c0_10 = arith.constant 0 : index
    %5 = vector.load %arg7[%c0_8, %c1, %c0_9, %c0_10] : memref<1x18x18x128xbf16, #tpu.memory_space<vmem>>, vector<1x16x1x128xbf16>
    tpu.vector_store %arg7[%c0_8, %c1, %c0_9, %c0_10], %4 {strides = array<i32>} : memref<1x18x18x128xbf16, #tpu.memory_space<vmem>>, vector<1x16x1x128xbf16>,
    %cst_11 = arith.constant 0.000000e+00 : bf16
    %6 = vector.broadcast %cst_11 : bf16 to vector<1x16x1x128xbf16>
    %c0_12 = arith.constant 0 : index
    %c1_13 = arith.constant 1 : index
    %c17_14 = arith.constant 17 : index
    %c0_15 = arith.constant 0 : index
    %7 = vector.load %arg7[%c0_12, %c1_13, %c17_14, %c0_15] : memref<1x18x18x128xbf16, #tpu.memory_space<vmem>>, vector<1x16x1x128xbf16>
    tpu.vector_store %arg7[%c0_12, %c1_13, %c17_14, %c0_15], %6 {strides = array<i32>} : memref<1x18x18x128xbf16, #tpu.memory_space<vmem>>, vector<1x16x1x128xbf16>,
    %cst_16 = arith.constant 0.000000e+00 : bf16
    %8 = vector.broadcast %cst_16 : bf16 to vector<1x1x18x128xbf16>
    %c0_17 = arith.constant 0 : index
    %c0_18 = arith.constant 0 : index
    %c0_19 = arith.constant 0 : index
    %c0_20 = arith.constant 0 : index
    %9 = vector.load %arg8[%c0_17, %c0_18, %c0_19, %c0_20] : memref<1x18x18x128xbf16, #tpu.memory_space<vmem>>, vector<1x1x18x128xbf16>
    tpu.vector_store %arg8[%c0_17, %c0_18, %c0_19, %c0_20], %8 {strides = array<i32>} : memref<1x18x18x128xbf16, #tpu.memory_space<vmem>>, vector<1x1x18x128xbf16>,
    %cst_21 = arith.constant 0.000000e+00 : bf16
    %10 = vector.broadcast %cst_21 : bf16 to vector<1x1x18x128xbf16>
    %c0_22 = arith.constant 0 : index
    %c17_23 = arith.constant 17 : index
    %c0_24 = arith.constant 0 : index
    %c0_25 = arith.constant 0 : index
    %11 = vector.load %arg8[%c0_22, %c17_23, %c0_24, %c0_25] : memref<1x18x18x128xbf16, #tpu.memory_space<vmem>>, vector<1x1x18x128xbf16>
    tpu.vector_store %arg8[%c0_22, %c17_23, %c0_24, %c0_25], %10 {strides = array<i32>} : memref<1x18x18x128xbf16, #tpu.memory_space<vmem>>, vector<1x1x18x128xbf16>,
    %cst_26 = arith.constant 0.000000e+00 : bf16
    %12 = vector.broadcast %cst_26 : bf16 to vector<1x16x1x128xbf16>
    %c0_27 = arith.constant 0 : index
    %c1_28 = arith.constant 1 : index
    %c0_29 = arith.constant 0 : index
    %c0_30 = arith.constant 0 : index
    %13 = vector.load %arg8[%c0_27, %c1_28, %c0_29, %c0_30] : memref<1x18x18x128xbf16, #tpu.memory_space<vmem>>, vector<1x16x1x128xbf16>
    tpu.vector_store %arg8[%c0_27, %c1_28, %c0_29, %c0_30], %12 {strides = array<i32>} : memref<1x18x18x128xbf16, #tpu.memory_space<vmem>>, vector<1x16x1x128xbf16>,
    %cst_31 = arith.constant 0.000000e+00 : bf16
    %14 = vector.broadcast %cst_31 : bf16 to vector<1x16x1x128xbf16>
    %c0_32 = arith.constant 0 : index
    %c1_33 = arith.constant 1 : index
    %c17_34 = arith.constant 17 : index
    %c0_35 = arith.constant 0 : index
    %15 = vector.load %arg8[%c0_32, %c1_33, %c17_34, %c0_35] : memref<1x18x18x128xbf16, #tpu.memory_space<vmem>>, vector<1x16x1x128xbf16>
    tpu.vector_store %arg8[%c0_32, %c1_33, %c17_34, %c0_35], %14 {strides = array<i32>} : memref<1x18x18x128xbf16, #tpu.memory_space<vmem>>, vector<1x16x1x128xbf16>,
    %c0_36 = arith.constant 0 : index
    %c0_37 = arith.constant 0 : index
    %c0_38 = arith.constant 0 : index
    %c0_39 = arith.constant 0 : index
    %16 = vector.load %arg1[%c0_36, %c0_37, %c0_38, %c0_39] : memref<1x16x16x128xbf16, #tpu.memory_space<vmem>>, vector<1x16x16x128xbf16>
    %c0_40 = arith.constant 0 : index
    %c1_41 = arith.constant 1 : index
    %c1_42 = arith.constant 1 : index
    %c0_43 = arith.constant 0 : index
    %17 = vector.load %arg7[%c0_40, %c1_41, %c1_42, %c0_43] : memref<1x18x18x128xbf16, #tpu.memory_space<vmem>>, vector<1x16x16x128xbf16>
    tpu.vector_store %arg7[%c0_40, %c1_41, %c1_42, %c0_43], %16 {strides = array<i32>} : memref<1x18x18x128xbf16, #tpu.memory_space<vmem>>, vector<1x16x16x128xbf16>,
    %c0_44 = arith.constant 0 : index
    %c0_45 = arith.constant 0 : index
    %18 = vector.load %arg5[%c0_44, %c0_45] : memref<3x128xf32, #tpu.memory_space<vmem>>, vector<1x128xf32>
    %cst_46 = arith.constant 0.000000e+00 : f32
    %19 = vector.broadcast %cst_46 : f32 to vector<256x128xf32>
    %c0_47 = arith.constant 0 : index
    %c0_48 = arith.constant 0 : index
    %c0_49 = arith.constant 0 : index
    %c0_50 = arith.constant 0 : index
    %20 = vector.load %arg7[%c0_47, %c0_48, %c0_49, %c0_50] : memref<1x18x18x128xbf16, #tpu.memory_space<vmem>>, vector<1x16x16x128xbf16>
    %21 = vector.shape_cast %20 : vector<1x16x16x128xbf16> to vector<256x128xbf16>
    %c0_51 = arith.constant 0 : index
    %c0_52 = arith.constant 0 : index
    %c0_53 = arith.constant 0 : index
    %22 = vector.load %arg2[%c0_51, %c0_52, %c0_53] : memref<9x128x128xbf16, #tpu.memory_space<vmem>>, vector<1x128x128xbf16>
    %23 = vector.shape_cast %22 : vector<1x128x128xbf16> to vector<128x128xbf16>
    %cst_54 = arith.constant dense<0.000000e+00> : vector<256x128xf32>
    %24 = tpu.matmul %21, %23, %cst_54 {dimension_numbers = #tpu.dot_dimension_numbers<[1], [0], [0], [1], [0, 0, 1, 1], [], []>} : vector<256x128xbf16>, vector<128x128xbf16>, vector<256x128xf32> -> vector<256x128xf32>
    %25 = arith.addf %19, %24 : vector<256x128xf32>
    %c0_55 = arith.constant 0 : index
    %c0_56 = arith.constant 0 : index
    %c1_57 = arith.constant 1 : index
    %c0_58 = arith.constant 0 : index
    %26 = vector.load %arg7[%c0_55, %c0_56, %c1_57, %c0_58] : memref<1x18x18x128xbf16, #tpu.memory_space<vmem>>, vector<1x16x16x128xbf16>
    %27 = vector.shape_cast %26 : vector<1x16x16x128xbf16> to vector<256x128xbf16>
    %c1_59 = arith.constant 1 : index
    %c0_60 = arith.constant 0 : index
    %c0_61 = arith.constant 0 : index
    %28 = vector.load %arg2[%c1_59, %c0_60, %c0_61] : memref<9x128x128xbf16, #tpu.memory_space<vmem>>, vector<1x128x128xbf16>
    %29 = vector.shape_cast %28 : vector<1x128x128xbf16> to vector<128x128xbf16>
    %cst_62 = arith.constant dense<0.000000e+00> : vector<256x128xf32>
    %30 = tpu.matmul %27, %29, %cst_62 {dimension_numbers = #tpu.dot_dimension_numbers<[1], [0], [0], [1], [0, 0, 1, 1], [], []>} : vector<256x128xbf16>, vector<128x128xbf16>, vector<256x128xf32> -> vector<256x128xf32>
    %31 = arith.addf %25, %30 : vector<256x128xf32>
    %c0_63 = arith.constant 0 : index
    %c0_64 = arith.constant 0 : index
    %c2 = arith.constant 2 : index
    %c0_65 = arith.constant 0 : index
    %32 = vector.load %arg7[%c0_63, %c0_64, %c2, %c0_65] : memref<1x18x18x128xbf16, #tpu.memory_space<vmem>>, vector<1x16x16x128xbf16>
    %33 = vector.shape_cast %32 : vector<1x16x16x128xbf16> to vector<256x128xbf16>
    %c2_66 = arith.constant 2 : index
    %c0_67 = arith.constant 0 : index
    %c0_68 = arith.constant 0 : index
    %34 = vector.load %arg2[%c2_66, %c0_67, %c0_68] : memref<9x128x128xbf16, #tpu.memory_space<vmem>>, vector<1x128x128xbf16>
    %35 = vector.shape_cast %34 : vector<1x128x128xbf16> to vector<128x128xbf16>
    %cst_69 = arith.constant dense<0.000000e+00> : vector<256x128xf32>
    %36 = tpu.matmul %33, %35, %cst_69 {dimension_numbers = #tpu.dot_dimension_numbers<[1], [0], [0], [1], [0, 0, 1, 1], [], []>} : vector<256x128xbf16>, vector<128x128xbf16>, vector<256x128xf32> -> vector<256x128xf32>
    %37 = arith.addf %31, %36 : vector<256x128xf32>
    %c0_70 = arith.constant 0 : index
    %c1_71 = arith.constant 1 : index
    %c0_72 = arith.constant 0 : index
    %c0_73 = arith.constant 0 : index
    %38 = vector.load %arg7[%c0_70, %c1_71, %c0_72, %c0_73] : memref<1x18x18x128xbf16, #tpu.memory_space<vmem>>, vector<1x16x16x128xbf16>
    %39 = vector.shape_cast %38 : vector<1x16x16x128xbf16> to vector<256x128xbf16>
    %c3 = arith.constant 3 : index
    %c0_74 = arith.constant 0 : index
    %c0_75 = arith.constant 0 : index
    %40 = vector.load %arg2[%c3, %c0_74, %c0_75] : memref<9x128x128xbf16, #tpu.memory_space<vmem>>, vector<1x128x128xbf16>
    %41 = vector.shape_cast %40 : vector<1x128x128xbf16> to vector<128x128xbf16>
    %cst_76 = arith.constant dense<0.000000e+00> : vector<256x128xf32>
    %42 = tpu.matmul %39, %41, %cst_76 {dimension_numbers = #tpu.dot_dimension_numbers<[1], [0], [0], [1], [0, 0, 1, 1], [], []>} : vector<256x128xbf16>, vector<128x128xbf16>, vector<256x128xf32> -> vector<256x128xf32>
    %43 = arith.addf %37, %42 : vector<256x128xf32>
    %c0_77 = arith.constant 0 : index
    %c1_78 = arith.constant 1 : index
    %c1_79 = arith.constant 1 : index
    %c0_80 = arith.constant 0 : index
    %44 = vector.load %arg7[%c0_77, %c1_78, %c1_79, %c0_80] : memref<1x18x18x128xbf16, #tpu.memory_space<vmem>>, vector<1x16x16x128xbf16>
    %45 = vector.shape_cast %44 : vector<1x16x16x128xbf16> to vector<256x128xbf16>
    %c4 = arith.constant 4 : index
    %c0_81 = arith.constant 0 : index
    %c0_82 = arith.constant 0 : index
    %46 = vector.load %arg2[%c4, %c0_81, %c0_82] : memref<9x128x128xbf16, #tpu.memory_space<vmem>>, vector<1x128x128xbf16>
    %47 = vector.shape_cast %46 : vector<1x128x128xbf16> to vector<128x128xbf16>
    %cst_83 = arith.constant dense<0.000000e+00> : vector<256x128xf32>
    %48 = tpu.matmul %45, %47, %cst_83 {dimension_numbers = #tpu.dot_dimension_numbers<[1], [0], [0], [1], [0, 0, 1, 1], [], []>} : vector<256x128xbf16>, vector<128x128xbf16>, vector<256x128xf32> -> vector<256x128xf32>
    %49 = arith.addf %43, %48 : vector<256x128xf32>
    %c0_84 = arith.constant 0 : index
    %c1_85 = arith.constant 1 : index
    %c2_86 = arith.constant 2 : index
    %c0_87 = arith.constant 0 : index
    %50 = vector.load %arg7[%c0_84, %c1_85, %c2_86, %c0_87] : memref<1x18x18x128xbf16, #tpu.memory_space<vmem>>, vector<1x16x16x128xbf16>
    %51 = vector.shape_cast %50 : vector<1x16x16x128xbf16> to vector<256x128xbf16>
    %c5 = arith.constant 5 : index
    %c0_88 = arith.constant 0 : index
    %c0_89 = arith.constant 0 : index
    %52 = vector.load %arg2[%c5, %c0_88, %c0_89] : memref<9x128x128xbf16, #tpu.memory_space<vmem>>, vector<1x128x128xbf16>
    %53 = vector.shape_cast %52 : vector<1x128x128xbf16> to vector<128x128xbf16>
    %cst_90 = arith.constant dense<0.000000e+00> : vector<256x128xf32>
    %54 = tpu.matmul %51, %53, %cst_90 {dimension_numbers = #tpu.dot_dimension_numbers<[1], [0], [0], [1], [0, 0, 1, 1], [], []>} : vector<256x128xbf16>, vector<128x128xbf16>, vector<256x128xf32> -> vector<256x128xf32>
    %55 = arith.addf %49, %54 : vector<256x128xf32>
    %c0_91 = arith.constant 0 : index
    %c2_92 = arith.constant 2 : index
    %c0_93 = arith.constant 0 : index
    %c0_94 = arith.constant 0 : index
    %56 = vector.load %arg7[%c0_91, %c2_92, %c0_93, %c0_94] : memref<1x18x18x128xbf16, #tpu.memory_space<vmem>>, vector<1x16x16x128xbf16>
    %57 = vector.shape_cast %56 : vector<1x16x16x128xbf16> to vector<256x128xbf16>
    %c6 = arith.constant 6 : index
    %c0_95 = arith.constant 0 : index
    %c0_96 = arith.constant 0 : index
    %58 = vector.load %arg2[%c6, %c0_95, %c0_96] : memref<9x128x128xbf16, #tpu.memory_space<vmem>>, vector<1x128x128xbf16>
    %59 = vector.shape_cast %58 : vector<1x128x128xbf16> to vector<128x128xbf16>
    %cst_97 = arith.constant dense<0.000000e+00> : vector<256x128xf32>
    %60 = tpu.matmul %57, %59, %cst_97 {dimension_numbers = #tpu.dot_dimension_numbers<[1], [0], [0], [1], [0, 0, 1, 1], [], []>} : vector<256x128xbf16>, vector<128x128xbf16>, vector<256x128xf32> -> vector<256x128xf32>
    %61 = arith.addf %55, %60 : vector<256x128xf32>
    %c0_98 = arith.constant 0 : index
    %c2_99 = arith.constant 2 : index
    %c1_100 = arith.constant 1 : index
    %c0_101 = arith.constant 0 : index
    %62 = vector.load %arg7[%c0_98, %c2_99, %c1_100, %c0_101] : memref<1x18x18x128xbf16, #tpu.memory_space<vmem>>, vector<1x16x16x128xbf16>
    %63 = vector.shape_cast %62 : vector<1x16x16x128xbf16> to vector<256x128xbf16>
    %c7 = arith.constant 7 : index
    %c0_102 = arith.constant 0 : index
    %c0_103 = arith.constant 0 : index
    %64 = vector.load %arg2[%c7, %c0_102, %c0_103] : memref<9x128x128xbf16, #tpu.memory_space<vmem>>, vector<1x128x128xbf16>
    %65 = vector.shape_cast %64 : vector<1x128x128xbf16> to vector<128x128xbf16>
    %cst_104 = arith.constant dense<0.000000e+00> : vector<256x128xf32>
    %66 = tpu.matmul %63, %65, %cst_104 {dimension_numbers = #tpu.dot_dimension_numbers<[1], [0], [0], [1], [0, 0, 1, 1], [], []>} : vector<256x128xbf16>, vector<128x128xbf16>, vector<256x128xf32> -> vector<256x128xf32>
    %67 = arith.addf %61, %66 : vector<256x128xf32>
    %c0_105 = arith.constant 0 : index
    %c2_106 = arith.constant 2 : index
    %c2_107 = arith.constant 2 : index
    %c0_108 = arith.constant 0 : index
    %68 = vector.load %arg7[%c0_105, %c2_106, %c2_107, %c0_108] : memref<1x18x18x128xbf16, #tpu.memory_space<vmem>>, vector<1x16x16x128xbf16>
    %69 = vector.shape_cast %68 : vector<1x16x16x128xbf16> to vector<256x128xbf16>
    %c8 = arith.constant 8 : index
    %c0_109 = arith.constant 0 : index
    %c0_110 = arith.constant 0 : index
    %70 = vector.load %arg2[%c8, %c0_109, %c0_110] : memref<9x128x128xbf16, #tpu.memory_space<vmem>>, vector<1x128x128xbf16>
    %71 = vector.shape_cast %70 : vector<1x128x128xbf16> to vector<128x128xbf16>
    %cst_111 = arith.constant dense<0.000000e+00> : vector<256x128xf32>
    %72 = tpu.matmul %69, %71, %cst_111 {dimension_numbers = #tpu.dot_dimension_numbers<[1], [0], [0], [1], [0, 0, 1, 1], [], []>} : vector<256x128xbf16>, vector<128x128xbf16>, vector<256x128xf32> -> vector<256x128xf32>
    %73 = arith.addf %67, %72 : vector<256x128xf32>
    %74 = vector.broadcast %18 : vector<1x128xf32> to vector<256x128xf32>
    %75 = arith.addf %73, %74 : vector<256x128xf32>
    %cst_112 = arith.constant 0.000000e+00 : f32
    %76 = vector.broadcast %cst_112 : f32 to vector<256x128xf32>
    %77 = arith.maximumf %75, %76 : vector<256x128xf32>
    %78 = vector.shape_cast %77 : vector<256x128xf32> to vector<1x16x16x128xf32>
    %79 = arith.truncf %78 : vector<1x16x16x128xf32> to vector<1x16x16x128xbf16>
    %c0_113 = arith.constant 0 : index
    %c1_114 = arith.constant 1 : index
    %c1_115 = arith.constant 1 : index
    %c0_116 = arith.constant 0 : index
    %80 = vector.load %arg8[%c0_113, %c1_114, %c1_115, %c0_116] : memref<1x18x18x128xbf16, #tpu.memory_space<vmem>>, vector<1x16x16x128xbf16>
    tpu.vector_store %arg8[%c0_113, %c1_114, %c1_115, %c0_116], %79 {strides = array<i32>} : memref<1x18x18x128xbf16, #tpu.memory_space<vmem>>, vector<1x16x16x128xbf16>,
    %81 = vector.shape_cast %16 : vector<1x16x16x128xbf16> to vector<256x128xbf16>
    %c0_117 = arith.constant 0 : index
    %c0_118 = arith.constant 0 : index
    %82 = vector.load %arg4[%c0_117, %c0_118] : memref<128x128xbf16, #tpu.memory_space<vmem>>, vector<128x128xbf16>
    %cst_119 = arith.constant dense<0.000000e+00> : vector<256x128xf32>
    %83 = tpu.matmul %81, %82, %cst_119 {dimension_numbers = #tpu.dot_dimension_numbers<[1], [0], [0], [1], [0, 0, 1, 1], [], []>} : vector<256x128xbf16>, vector<128x128xbf16>, vector<256x128xf32> -> vector<256x128xf32>
    %c1_120 = arith.constant 1 : index
    %c0_121 = arith.constant 0 : index
    %84 = vector.load %arg5[%c1_120, %c0_121] : memref<3x128xf32, #tpu.memory_space<vmem>>, vector<1x128xf32>
    %c2_122 = arith.constant 2 : index
    %c0_123 = arith.constant 0 : index
    %85 = vector.load %arg5[%c2_122, %c0_123] : memref<3x128xf32, #tpu.memory_space<vmem>>, vector<1x128xf32>
    %86 = arith.addf %84, %85 : vector<1x128xf32>
    %87 = vector.broadcast %86 : vector<1x128xf32> to vector<256x128xf32>
    %88 = arith.addf %83, %87 : vector<256x128xf32>
    %c0_124 = arith.constant 0 : index
    %c0_125 = arith.constant 0 : index
    %c0_126 = arith.constant 0 : index
    %c0_127 = arith.constant 0 : index
    %89 = vector.load %arg8[%c0_124, %c0_125, %c0_126, %c0_127] : memref<1x18x18x128xbf16, #tpu.memory_space<vmem>>, vector<1x16x16x128xbf16>
    %90 = vector.shape_cast %89 : vector<1x16x16x128xbf16> to vector<256x128xbf16>
    %c0_128 = arith.constant 0 : index
    %c0_129 = arith.constant 0 : index
    %c0_130 = arith.constant 0 : index
    %91 = vector.load %arg3[%c0_128, %c0_129, %c0_130] : memref<9x128x128xbf16, #tpu.memory_space<vmem>>, vector<1x128x128xbf16>
    %92 = vector.shape_cast %91 : vector<1x128x128xbf16> to vector<128x128xbf16>
    %cst_131 = arith.constant dense<0.000000e+00> : vector<256x128xf32>
    %93 = tpu.matmul %90, %92, %cst_131 {dimension_numbers = #tpu.dot_dimension_numbers<[1], [0], [0], [1], [0, 0, 1, 1], [], []>} : vector<256x128xbf16>, vector<128x128xbf16>, vector<256x128xf32> -> vector<256x128xf32>
    %94 = arith.addf %88, %93 : vector<256x128xf32>
    %c0_132 = arith.constant 0 : index
    %c0_133 = arith.constant 0 : index
    %c1_134 = arith.constant 1 : index
    %c0_135 = arith.constant 0 : index
    %95 = vector.load %arg8[%c0_132, %c0_133, %c1_134, %c0_135] : memref<1x18x18x128xbf16, #tpu.memory_space<vmem>>, vector<1x16x16x128xbf16>
    %96 = vector.shape_cast %95 : vector<1x16x16x128xbf16> to vector<256x128xbf16>
    %c1_136 = arith.constant 1 : index
    %c0_137 = arith.constant 0 : index
    %c0_138 = arith.constant 0 : index
    %97 = vector.load %arg3[%c1_136, %c0_137, %c0_138] : memref<9x128x128xbf16, #tpu.memory_space<vmem>>, vector<1x128x128xbf16>
    %98 = vector.shape_cast %97 : vector<1x128x128xbf16> to vector<128x128xbf16>
    %cst_139 = arith.constant dense<0.000000e+00> : vector<256x128xf32>
    %99 = tpu.matmul %96, %98, %cst_139 {dimension_numbers = #tpu.dot_dimension_numbers<[1], [0], [0], [1], [0, 0, 1, 1], [], []>} : vector<256x128xbf16>, vector<128x128xbf16>, vector<256x128xf32> -> vector<256x128xf32>
    %100 = arith.addf %94, %99 : vector<256x128xf32>
    %c0_140 = arith.constant 0 : index
    %c0_141 = arith.constant 0 : index
    %c2_142 = arith.constant 2 : index
    %c0_143 = arith.constant 0 : index
    %101 = vector.load %arg8[%c0_140, %c0_141, %c2_142, %c0_143] : memref<1x18x18x128xbf16, #tpu.memory_space<vmem>>, vector<1x16x16x128xbf16>
    %102 = vector.shape_cast %101 : vector<1x16x16x128xbf16> to vector<256x128xbf16>
    %c2_144 = arith.constant 2 : index
    %c0_145 = arith.constant 0 : index
    %c0_146 = arith.constant 0 : index
    %103 = vector.load %arg3[%c2_144, %c0_145, %c0_146] : memref<9x128x128xbf16, #tpu.memory_space<vmem>>, vector<1x128x128xbf16>
    %104 = vector.shape_cast %103 : vector<1x128x128xbf16> to vector<128x128xbf16>
    %cst_147 = arith.constant dense<0.000000e+00> : vector<256x128xf32>
    %105 = tpu.matmul %102, %104, %cst_147 {dimension_numbers = #tpu.dot_dimension_numbers<[1], [0], [0], [1], [0, 0, 1, 1], [], []>} : vector<256x128xbf16>, vector<128x128xbf16>, vector<256x128xf32> -> vector<256x128xf32>
    %106 = arith.addf %100, %105 : vector<256x128xf32>
    %c0_148 = arith.constant 0 : index
    %c1_149 = arith.constant 1 : index
    %c0_150 = arith.constant 0 : index
    %c0_151 = arith.constant 0 : index
    %107 = vector.load %arg8[%c0_148, %c1_149, %c0_150, %c0_151] : memref<1x18x18x128xbf16, #tpu.memory_space<vmem>>, vector<1x16x16x128xbf16>
    %108 = vector.shape_cast %107 : vector<1x16x16x128xbf16> to vector<256x128xbf16>
    %c3_152 = arith.constant 3 : index
    %c0_153 = arith.constant 0 : index
    %c0_154 = arith.constant 0 : index
    %109 = vector.load %arg3[%c3_152, %c0_153, %c0_154] : memref<9x128x128xbf16, #tpu.memory_space<vmem>>, vector<1x128x128xbf16>
    %110 = vector.shape_cast %109 : vector<1x128x128xbf16> to vector<128x128xbf16>
    %cst_155 = arith.constant dense<0.000000e+00> : vector<256x128xf32>
    %111 = tpu.matmul %108, %110, %cst_155 {dimension_numbers = #tpu.dot_dimension_numbers<[1], [0], [0], [1], [0, 0, 1, 1], [], []>} : vector<256x128xbf16>, vector<128x128xbf16>, vector<256x128xf32> -> vector<256x128xf32>
    %112 = arith.addf %106, %111 : vector<256x128xf32>
    %c0_156 = arith.constant 0 : index
    %c1_157 = arith.constant 1 : index
    %c1_158 = arith.constant 1 : index
    %c0_159 = arith.constant 0 : index
    %113 = vector.load %arg8[%c0_156, %c1_157, %c1_158, %c0_159] : memref<1x18x18x128xbf16, #tpu.memory_space<vmem>>, vector<1x16x16x128xbf16>
    %114 = vector.shape_cast %113 : vector<1x16x16x128xbf16> to vector<256x128xbf16>
    %c4_160 = arith.constant 4 : index
    %c0_161 = arith.constant 0 : index
    %c0_162 = arith.constant 0 : index
    %115 = vector.load %arg3[%c4_160, %c0_161, %c0_162] : memref<9x128x128xbf16, #tpu.memory_space<vmem>>, vector<1x128x128xbf16>
    %116 = vector.shape_cast %115 : vector<1x128x128xbf16> to vector<128x128xbf16>
    %cst_163 = arith.constant dense<0.000000e+00> : vector<256x128xf32>
    %117 = tpu.matmul %114, %116, %cst_163 {dimension_numbers = #tpu.dot_dimension_numbers<[1], [0], [0], [1], [0, 0, 1, 1], [], []>} : vector<256x128xbf16>, vector<128x128xbf16>, vector<256x128xf32> -> vector<256x128xf32>
    %118 = arith.addf %112, %117 : vector<256x128xf32>
    %c0_164 = arith.constant 0 : index
    %c1_165 = arith.constant 1 : index
    %c2_166 = arith.constant 2 : index
    %c0_167 = arith.constant 0 : index
    %119 = vector.load %arg8[%c0_164, %c1_165, %c2_166, %c0_167] : memref<1x18x18x128xbf16, #tpu.memory_space<vmem>>, vector<1x16x16x128xbf16>
    %120 = vector.shape_cast %119 : vector<1x16x16x128xbf16> to vector<256x128xbf16>
    %c5_168 = arith.constant 5 : index
    %c0_169 = arith.constant 0 : index
    %c0_170 = arith.constant 0 : index
    %121 = vector.load %arg3[%c5_168, %c0_169, %c0_170] : memref<9x128x128xbf16, #tpu.memory_space<vmem>>, vector<1x128x128xbf16>
    %122 = vector.shape_cast %121 : vector<1x128x128xbf16> to vector<128x128xbf16>
    %cst_171 = arith.constant dense<0.000000e+00> : vector<256x128xf32>
    %123 = tpu.matmul %120, %122, %cst_171 {dimension_numbers = #tpu.dot_dimension_numbers<[1], [0], [0], [1], [0, 0, 1, 1], [], []>} : vector<256x128xbf16>, vector<128x128xbf16>, vector<256x128xf32> -> vector<256x128xf32>
    %124 = arith.addf %118, %123 : vector<256x128xf32>
    %c0_172 = arith.constant 0 : index
    %c2_173 = arith.constant 2 : index
    %c0_174 = arith.constant 0 : index
    %c0_175 = arith.constant 0 : index
    %125 = vector.load %arg8[%c0_172, %c2_173, %c0_174, %c0_175] : memref<1x18x18x128xbf16, #tpu.memory_space<vmem>>, vector<1x16x16x128xbf16>
    %126 = vector.shape_cast %125 : vector<1x16x16x128xbf16> to vector<256x128xbf16>
    %c6_176 = arith.constant 6 : index
    %c0_177 = arith.constant 0 : index
    %c0_178 = arith.constant 0 : index
    %127 = vector.load %arg3[%c6_176, %c0_177, %c0_178] : memref<9x128x128xbf16, #tpu.memory_space<vmem>>, vector<1x128x128xbf16>
    %128 = vector.shape_cast %127 : vector<1x128x128xbf16> to vector<128x128xbf16>
    %cst_179 = arith.constant dense<0.000000e+00> : vector<256x128xf32>
    %129 = tpu.matmul %126, %128, %cst_179 {dimension_numbers = #tpu.dot_dimension_numbers<[1], [0], [0], [1], [0, 0, 1, 1], [], []>} : vector<256x128xbf16>, vector<128x128xbf16>, vector<256x128xf32> -> vector<256x128xf32>
    %130 = arith.addf %124, %129 : vector<256x128xf32>
    %c0_180 = arith.constant 0 : index
    %c2_181 = arith.constant 2 : index
    %c1_182 = arith.constant 1 : index
    %c0_183 = arith.constant 0 : index
    %131 = vector.load %arg8[%c0_180, %c2_181, %c1_182, %c0_183] : memref<1x18x18x128xbf16, #tpu.memory_space<vmem>>, vector<1x16x16x128xbf16>
    %132 = vector.shape_cast %131 : vector<1x16x16x128xbf16> to vector<256x128xbf16>
    %c7_184 = arith.constant 7 : index
    %c0_185 = arith.constant 0 : index
    %c0_186 = arith.constant 0 : index
    %133 = vector.load %arg3[%c7_184, %c0_185, %c0_186] : memref<9x128x128xbf16, #tpu.memory_space<vmem>>, vector<1x128x128xbf16>
    %134 = vector.shape_cast %133 : vector<1x128x128xbf16> to vector<128x128xbf16>
    %cst_187 = arith.constant dense<0.000000e+00> : vector<256x128xf32>
    %135 = tpu.matmul %132, %134, %cst_187 {dimension_numbers = #tpu.dot_dimension_numbers<[1], [0], [0], [1], [0, 0, 1, 1], [], []>} : vector<256x128xbf16>, vector<128x128xbf16>, vector<256x128xf32> -> vector<256x128xf32>
    %136 = arith.addf %130, %135 : vector<256x128xf32>
    %c0_188 = arith.constant 0 : index
    %c2_189 = arith.constant 2 : index
    %c2_190 = arith.constant 2 : index
    %c0_191 = arith.constant 0 : index
    %137 = vector.load %arg8[%c0_188, %c2_189, %c2_190, %c0_191] : memref<1x18x18x128xbf16, #tpu.memory_space<vmem>>, vector<1x16x16x128xbf16>
    %138 = vector.shape_cast %137 : vector<1x16x16x128xbf16> to vector<256x128xbf16>
    %c8_192 = arith.constant 8 : index
    %c0_193 = arith.constant 0 : index
    %c0_194 = arith.constant 0 : index
    %139 = vector.load %arg3[%c8_192, %c0_193, %c0_194] : memref<9x128x128xbf16, #tpu.memory_space<vmem>>, vector<1x128x128xbf16>
    %140 = vector.shape_cast %139 : vector<1x128x128xbf16> to vector<128x128xbf16>
    %cst_195 = arith.constant dense<0.000000e+00> : vector<256x128xf32>
    %141 = tpu.matmul %138, %140, %cst_195 {dimension_numbers = #tpu.dot_dimension_numbers<[1], [0], [0], [1], [0, 0, 1, 1], [], []>} : vector<256x128xbf16>, vector<128x128xbf16>, vector<256x128xf32> -> vector<256x128xf32>
    %142 = arith.addf %136, %141 : vector<256x128xf32>
    %cst_196 = arith.constant 0.000000e+00 : f32
    %143 = vector.broadcast %cst_196 : f32 to vector<256x128xf32>
    %144 = arith.maximumf %142, %143 : vector<256x128xf32>
    %c0_197 = arith.constant 0 : index
    %c0_198 = arith.constant 0 : index
    %145 = vector.load %arg6[%c0_197, %c0_198] : memref<256x128xf32, #tpu.memory_space<vmem>>, vector<256x128xf32>
    tpu.vector_store %arg6[%c0_197, %c0_198], %144 {strides = array<i32>} : memref<256x128xf32, #tpu.memory_space<vmem>>, vector<256x128xf32>,
    return
  }
  func.func @transform_0(%arg0: i32) -> (i32, i32, i32, i32) {
    %c0_i32 = arith.constant 0 : i32
    %c0_i32_0 = arith.constant 0 : i32
    %c0_i32_1 = arith.constant 0 : i32
    %c0_i32_2 = arith.constant 0 : i32
    return %arg0, %c0_i32, %c0_i32_0, %c0_i32_1 : i32, i32, i32, i32
  }
  func.func @transform_1(%arg0: i32) -> (i32, i32, i32) {
    %c0_i32 = arith.constant 0 : i32
    %c0_i32_0 = arith.constant 0 : i32
    %c0_i32_1 = arith.constant 0 : i32
    %c0_i32_2 = arith.constant 0 : i32
    return %c0_i32, %c0_i32_0, %c0_i32_1 : i32, i32, i32
  }
  func.func @transform_2(%arg0: i32) -> (i32, i32, i32) {
    %c0_i32 = arith.constant 0 : i32
    %c0_i32_0 = arith.constant 0 : i32
    %c0_i32_1 = arith.constant 0 : i32
    %c0_i32_2 = arith.constant 0 : i32
    return %c0_i32, %c0_i32_0, %c0_i32_1 : i32, i32, i32
  }
  func.func @transform_3(%arg0: i32) -> (i32, i32) {
    %c0_i32 = arith.constant 0 : i32
    %c0_i32_0 = arith.constant 0 : i32
    %c0_i32_1 = arith.constant 0 : i32
    return %c0_i32, %c0_i32_0 : i32, i32
  }
  func.func @transform_4(%arg0: i32) -> (i32, i32) {
    %c0_i32 = arith.constant 0 : i32
    %c0_i32_0 = arith.constant 0 : i32
    %c0_i32_1 = arith.constant 0 : i32
    return %c0_i32, %c0_i32_0 : i32, i32
  }
  func.func @transform_5(%arg0: i32) -> (i32, i32) {
    %c0_i32 = arith.constant 0 : i32
    %c0_i32_0 = arith.constant 0 : i32
    return %arg0, %c0_i32 : i32, i32
  }
}

</mosaic_0001>

<bundles_post_ra>
// kernel: basic_block_forward.1
= control target key start
LH: loop header
LB: loop body
LE: loop exit
PB: predicated region body
PF: predicated region fallthrough
CT: control target
= control target key end

     0   :  { %s14322_s18 = smov 0   ;;  %s19800_s0 = inlined_call_operand.vmem [shape: bf16[2,16,16,128], index: 0, kind: input, shape index: {}]   ;;  %s19801_s1 = inlined_call_operand.vmem [shape: bf16[9,128,128], index: 1, kind: input, shape index: {}]   ;;  %s19802_s2 = inlined_call_operand.vmem [shape: bf16[9,128,128], index: 2, kind: input, shape index: {}]   ;;  %s19803_s3 = inlined_call_operand.vmem [shape: bf16[128,128], index: 3, kind: input, shape index: {}]   ;;  %s19804_s4 = inlined_call_operand.vmem [shape: f32[3,128], index: 4, kind: input, shape index: {}]   ;;  %s19805_s5 = inlined_call_operand.vmem [shape: f32[512,128], index: 5, kind: output, shape index: {}]  }
   0x1 LB: > { %s14328_s19 = sadd.s32 4294967295, %s14289_s18   ;;  %p11679_p0 = scmp.ge.s32.totalorder %s14289_s18, 1  ;;  %s14289_s18 = sphi %s14322_s18, %s15_s18  }
   0x2   : > { %p187_p1 = scmp.lt.s32.totalorder %s14289_s18, 3 }
   0x4   : > { %p188_p2 = pnand %p11679_p0, %p187_p1 }
   0x6   : > { %191 = sbr.rel (%p188_p2) target bundleno = 1211 (0x4bb), region = 40 }
   0xb   : > { %v13953_v0 = vld [vmem:[%s19801_s1 + $0x78] sm:$0xff]   ;;  %v13954_v1 = vld [vmem:[%s19801_s1 + $0x70] sm:$0xff]   ;;  %v14291_v2 = vmov 0   ;;  %p215_p3 = scmp.lt.s32.totalorder %s14328_s19, 1  ;;  %v13955_v3 = vld [vmem:[%s19801_s1 + $0x68] sm:$0xff]   ;;  %vm235_vm0 = vcmask 1040384  }
   0xc   : > { %227 = vst [vmem:[#allocation2] sm:$0xf] %v14291_v2  ;;  %228 = vst [vmem:[#allocation2 + $0x4] sm:$0xf] %v14291_v2  ;;  %13016 = vmatprep.subr.bf16.mxu0 %v13953_v0  ;;  %13928 = vmatprep.subr.bf16.mxu1 %v13953_v0  ;;  %v13956_v4 = vld [vmem:[%s19801_s1 + $0x60] sm:$0xff]   ;;  %v13957_v16 = vld [vmem:[%s19801_s1 + $0x58] sm:$0xff]  }
   0xd   : > { %229 = vst [vmem:[#allocation2 + $0x8] sm:$0x1] %v14291_v2  ;;  %231 = vst [vmem:[#allocation2 + $0xcc] sm:$0xf] %v14291_v2  ;;  %13017 = vmatpush3.bf16.msra.mxu0 %v13953_v0  ;;  %13936 = vmatpush3.bf16.msra.mxu1 %v13953_v0  ;;  %s216_s24 = scalar_select %p215_p3, %s14328_s19, 1  ;;  %v19873_v19 = vmov 0 }
   0xe   : > { %232 = vst [vmem:[#allocation2 + $0xd0] sm:$0xf] %v14291_v2  ;;  %233 = vst [vmem:[#allocation2 + $0xd4] sm:$0x1] %v14291_v2  ;;  %13018 = vmatprep.subr.bf16.mxu0 %v13954_v1  ;;  %13929 = vmatprep.subr.bf16.mxu1 %v13954_v1  ;;  %vm973_vm1 = vsmask.f32 3328 }
   0xf   : > { %336 = vst [vmem:[#allocation3] sm:$0xf] %v14291_v2  ;;  %337 = vst [vmem:[#allocation3 + $0x4] sm:$0xf] %v14291_v2  ;;  %s12527_s29 = sshll.u32 %s216_s24, 7  ;;  %vm794_vm6 = vcmask 1043456  }
  0x10   : > { %338 = vst [vmem:[#allocation3 + $0x8] sm:$0x1] %v14291_v2  ;;  %340 = vst [vmem:[#allocation3 + $0xcc] sm:$0xf] %v14291_v2  ;;  %vm974_vm2 = vsmask.f32 7440  ;;  %s14352_s7 = scalar_lea.vmem %s19800_s0, %s12527_s29 }
  0x11   : > { %341 = vst [vmem:[#allocation3 + $0xd0] sm:$0xf] %v14291_v2  ;;  %342 = vst [vmem:[#allocation3 + $0xd4] sm:$0x1] %v14291_v2  ;;  %13019 = vmatpush3.bf16.msra.mxu0 %v13954_v1  ;;  %13937 = vmatpush3.bf16.msra.mxu1 %v13954_v1  ;;  %v259_v13 = vld [vmem:[#allocation2 + $0x60] sm:$0x1] }
  0x12   : > { %13020 = vmatprep.subr.bf16.mxu0 %v13955_v3  ;;  %13930 = vmatprep.subr.bf16.mxu1 %v13955_v3  ;;  %vm236_vm3 = vsmask.f32 256  ;;  %vm286_vm4 = vsmask.f32 7938  ;;  %v309_v20 = vld [vmem:[#allocation2 + $0x68] sm:$0x1]  ;;  %vm14380_vm8 = vmor %vm973_vm1, %vm974_vm2 }
  0x13   : > { %v909_v5 = vld [vmem:[#allocation2] sm:$0xf]  ;;  %v910_v6 = vld [vmem:[#allocation2 + $0x4] sm:$0xf]  ;;  %vm14359_vm5 = vmand %vm235_vm0, %vm236_vm3  ;;  %v19876_v24 = vmov 0  ;;  %v19879_v28 = vmov 0 }
  0x14   : > { %v14346_v7 = vld [vmem:[#allocation2 + $0x8] sm:$0x1]  ;;  %v977_v8 = vshrl.u32 %v909_v5, 16  ;;  %v980_v9 = vshll.u32 %v909_v5, 16  ;;  %v986_v10 = vshll.u32 %v910_v6, 16  ;;  %v990_v11 = vshrl.u32 %v910_v6, 16  ;;  %vm14367_vm7 = vmand %vm235_vm0, %vm286_vm4 }
  0x15   : > { %v996_v12 = vshll.u32 %v14346_v7, 16  ;;  %13021 = vmatpush3.bf16.msra.mxu0 %v13955_v3  ;;  %13938 = vmatpush3.bf16.msra.mxu1 %v13955_v3  ;;  %v19874_v19 = vsel %vm14359_vm5, 4294967295, %v19873_v19  ;;  %v260_v23 = vsel %vm14359_vm5, 0, %v259_v13  ;;  %v19877_v24 = vsel %vm14367_vm7, 4294967295, %v19876_v24  ;;  %v454_v25 = vld [vmem:[%s14352_s7 + $0x38] sm:$0xf]  ;;  %vm14407_vm11 = vmand %vm794_vm6, %vm286_vm4 }
  0x16   : > { %v979_v14 = vrot.slane %v977_v8, 4  ;;  %v982_v15 = vrot.slane %v980_v9, 5  ;;  %13022 = vmatprep.subr.bf16.mxu0 %v13956_v4  ;;  %13931 = vmatprep.subr.bf16.mxu1 %v13956_v4  ;;  %v988_v17 = vrot.slane %v986_v10, 5  ;;  %v992_v18 = vrot.slane %v990_v11, 4  ;;  %19875 = vst [vmem:[#allocation4_spill] sm:$0xff] %v19874_v19  ;;  %19878 = vst [vmem:[#allocation5_spill] sm:$0xff] %v19877_v24 }
  0x17   : > { %v998_v22 = vrot.slane %v996_v12, 5  ;;  %v455_v26 = vld [vmem:[%s14352_s7 + $0x3c] sm:$0xf]  ;;  %v14376_v27 = vld [vmem:[%s19801_s1 + $0x50] sm:$0xff]   ;;  %v19880_v28 = vsel %vm14380_vm8, 4294967295, %v19879_v28  ;;  %v310_v30 = vsel %vm14367_vm7, 0, %v309_v20 }
  0x18   : > { %v983_v21 = vor.u32 %v982_v15, %v979_v14  ;;  %19881 = vst [vmem:[#allocation6_spill] sm:$0xff] %v19880_v28  ;;  %v993_v29 = vor.u32 %v992_v18, %v988_v17  ;;  %261 = vst [vmem:[#allocation2 + $0x60] sm:$0x1] %v260_v23  ;;  %vm472_vm9 = vsmask.f32 4368  ;;  %v594_v31 = vshrl.u32 %v454_v25, 16 }
  0x19   : > { %v238_v32 = vld [vmem:[#allocation2 + $0xc] sm:$0x1]  ;;  %13023 = vmatpush3.bf16.msra.mxu0 %v13956_v4  ;;  %13939 = vmatpush3.bf16.msra.mxu1 %v13956_v4  ;;  %311 = vst [vmem:[#allocation2 + $0x68] sm:$0x1] %v310_v30  ;;  %v597_v34 = vshll.u32 %v454_v25, 16  ;;  %v602_v35 = vshrl.u32 %v455_v26, 16  ;;  %vm14401_vm10 = vmor %vm236_vm3, %vm472_vm9 }
  0x1a   : > { %v984_v33 = vrot.slane %v983_v21, 4  ;;  %v605_v36 = vshll.u32 %v455_v26, 16  ;;  %v288_v37 = vld [vmem:[#allocation2 + $0x14] sm:$0x1]  ;;  %13024 = vmatprep.subr.bf16.mxu0 %v13957_v16  ;;  %13932 = vmatprep.subr.bf16.mxu1 %v13957_v16  ;;  %v994_v38 = vrot.slane %v993_v29, 4  ;;  %v596_v39 = vrot.slane %v594_v31, 7 }
  0x1b   : > { %v239_v40 = vsel %vm14359_vm5, 0, %v238_v32  ;;  %v289_v41 = vsel %vm14367_vm7, 0, %v288_v37  ;;  %v440_v42 = vld [vmem:[%s14352_s7] sm:$0xf]  ;;  %v604_v44 = vrot.slane %v602_v35, 7  ;;  %v13959_v48 = vld [vmem:[%s19801_s1 + $0x48] sm:$0xff]  }
  0x1c   : > { %v989_v43 = vsel %vm14380_vm8, %v984_v33, %v988_v17  ;;  %240 = vst [vmem:[#allocation2 + $0xc] sm:$0x1] %v239_v40  ;;  %290 = vst [vmem:[#allocation2 + $0x14] sm:$0x1] %v289_v41  ;;  %v441_v45 = vld [vmem:[%s14352_s7 + $0x4] sm:$0xf]  ;;  %v999_v49 = vsel %vm14380_vm8, %v994_v38, %v998_v22  ;;  %v599_v51 = vor.u32 %v597_v34, %v596_v39 }
  0x1d   : > { %v475_v46 = vshrl.u32 %v440_v42, 16  ;;  %v478_v47 = vshll.u32 %v440_v42, 16  ;;  %v19882_v50 = vmov 0  ;;  %v600_v52 = vrot.slane %v596_v39, 4  ;;  %v262_v54 = vld [vmem:[#allocation2 + $0x6c] sm:$0x1]  ;;  %13025 = vmatpush3.bf16.msra.mxu0 %v13957_v16  ;;  %13940 = vmatpush3.bf16.msra.mxu1 %v13957_v16 }
  0x1e   : > { %v19883_v50 = vsel %vm14401_vm10, 4294967295, %v19882_v50  ;;  %v483_v53 = vshrl.u32 %v441_v45, 16  ;;  %v312_v55 = vld [vmem:[#allocation2 + $0x74] sm:$0x1]  ;;  %v11700_v56 = vcombine.low %v989_v43, %v999_v49  ;;  %v607_v57 = vor.u32 %v605_v36, %v604_v44  ;;  %v456_v61 = vld [vmem:[%s14352_s7 + $0x40] sm:$0xf]  ;;  %13026 = vmatprep.subr.bf16.mxu0 %v14376_v27  ;;  %13933 = vmatprep.subr.bf16.mxu1 %v14376_v27 }
  0x1f   : > { %19884 = vst [vmem:[#allocation7_spill] sm:$0xff] %v19883_v50  ;;  %v609_v58 = vrot.slane %v604_v44, 4  ;;  %v19885_v59 = vmov 0  ;;  %v477_v60 = vrot.slane %v475_v46, 7  ;;  %v457_v62 = vld [vmem:[%s14352_s7 + $0x44] sm:$0xf] }
  0x20   : > { %v19886_v59 = vsel %vm14407_vm11, 4294967295, %v19885_v59  ;;  %v485_v63 = vrot.slane %v483_v53, 7  ;;  %v486_v0 = vshll.u32 %v441_v45, 16  ;;  %v263_v1 = vsel %vm14359_vm5, 0, %v262_v54  ;;  %13032 = vmatprep.mubr.bf16.mxu0 %v11700_v56  ;;  %v845_v4 = vld [vmem:[#allocation2 + $0x60] sm:$0xf] }
  0x21   : > { %19887 = vst [vmem:[#allocation8_spill] sm:$0xff] %v19886_v59  ;;  %v313_v2 = vsel %vm14367_vm7, 0, %v312_v55  ;;  %v608_v3 = vsel %vm14401_vm10, %v600_v52, %v607_v57  ;;  %v480_v5 = vor.u32 %v478_v47, %v477_v60  ;;  %v481_v6 = vrot.slane %v477_v60, 4  ;;  %264 = vst [vmem:[#allocation2 + $0x6c] sm:$0x1] %v263_v1  ;;  %13027 = vmatpush3.bf16.msra.mxu0 %v14376_v27  ;;  %v13960_v14 = vld [vmem:[%s19801_s1 + $0x40] sm:$0xff]  }
  0x22   : > { %314 = vst [vmem:[#allocation2 + $0x74] sm:$0x1] %v313_v2  ;;  %v611_v8 = vshrl.u32 %v456_v61, 16  ;;  %v846_v9 = vsel %vm14407_vm11, %v599_v51, %v845_v4  ;;  %848 = vst [vmem:[#allocation2 + $0x64] sm:$0xf] %v608_v3  ;;  %v488_v11 = vor.u32 %v486_v0, %v485_v63  ;;  %v490_v12 = vrot.slane %v485_v63, 4  ;;  %13941 = vmatpush3.bf16.msra.mxu1 %v14376_v27 }
  0x23   : > { %v849_v10 = vld [vmem:[#allocation2 + $0x68] sm:$0x1]  ;;  %v614_v13 = vshll.u32 %v456_v61, 16  ;;  %847 = vst [vmem:[#allocation2 + $0x60] sm:$0xf] %v846_v9  ;;  %v619_v17 = vshrl.u32 %v457_v62, 16  ;;  %13028 = vmatprep.subr.bf16.mxu0 %v13959_v48  ;;  %13934 = vmatprep.subr.bf16.mxu1 %v13959_v48 }
  0x24   : > { %v850_v15 = vsel %vm14359_vm5, %v609_v58, %v849_v10  ;;  %v613_v16 = vrot.slane %v611_v8, 7  ;;  %v622_v18 = vshll.u32 %v457_v62, 16  ;;  %v489_v20 = vsel %vm14401_vm10, %v481_v6, %v488_v11  ;;  %v796_v21 = vld [vmem:[#allocation2 + $0xc] sm:$0xf]  ;;  %v800_v22 = vld [vmem:[#allocation2 + $0x14] sm:$0x1] }
  0x25   : > { %851 = vst [vmem:[#allocation2 + $0x68] sm:$0x1] %v850_v15  ;;  %v797_v23 = vsel %vm14407_vm11, %v480_v5, %v796_v21  ;;  %799 = vst [vmem:[#allocation2 + $0x10] sm:$0xf] %v489_v20  ;;  %v801_v25 = vsel %vm14359_vm5, %v490_v12, %v800_v22  ;;  %v621_v29 = vrot.slane %v619_v17, 7  ;;  %v14439_v30 = vld [vmem:[%s19801_s1 + $0x38] sm:$0xff]   ;;  %13029 = vmatpush3.bf16.msra.mxu0 %v13959_v48 }
  0x26   : > { %v616_v26 = vor.u32 %v614_v13, %v613_v16  ;;  %798 = vst [vmem:[#allocation2 + $0xc] sm:$0xf] %v797_v23  ;;  %802 = vst [vmem:[#allocation2 + $0x14] sm:$0x1] %v801_v25  ;;  %v617_v27 = vrot.slane %v613_v16, 4  ;;  %13942 = vmatpush3.bf16.msra.mxu1 %v13959_v48  ;;  %v14444_v32 = vld [vmem:[%s19801_s1 + $0xb8] sm:$0xff]   ;;  %13030 = vmatprep.subr.bf16.mxu0 %v13960_v14 }
  0x27   : > { %v241_v31 = vld [vmem:[#allocation2 + $0x18] sm:$0x1]  ;;  %v291_v34 = vld [vmem:[#allocation2 + $0x20] sm:$0x1]  ;;  %v442_v35 = vld [vmem:[%s14352_s7 + $0x8] sm:$0xf]  ;;  %13935 = vmatprep.subr.bf16.mxu1 %v13960_v14  ;;  %v624_v36 = vor.u32 %v622_v18, %v621_v29 }
  0x28   : > { %v242_v33 = vsel %vm14359_vm5, 0, %v241_v31  ;;  %v626_v37 = vrot.slane %v621_v29, 4  ;;  %v852_v38 = vld [vmem:[#allocation2 + $0x6c] sm:$0xf]  ;;  %v292_v40 = vsel %vm14367_vm7, 0, %v291_v34  ;;  %v2011_v41 = vrot.slane %v14346_v7, 5 }
  0x29   : > { %v856_v39 = vld [vmem:[#allocation2 + $0x74] sm:$0x1]  ;;  %243 = vst [vmem:[#allocation2 + $0x18] sm:$0x1] %v242_v33  ;;  %v926_v42 = vld [vmem:[#allocation2 + $0x64] sm:$0xf]  ;;  %v853_v43 = vsel %vm14407_vm11, %v616_v26, %v852_v38  ;;  %v625_v49 = vsel %vm14401_vm10, %v617_v27, %v624_v36  ;;  %13031 = vmatpush3.bf16.msra.mxu0 %v13960_v14 }
  0x2a   : > { %293 = vst [vmem:[#allocation2 + $0x20] sm:$0x1] %v292_v40  ;;  %v14455_v44 = vld [vmem:[%s14352_s7 + $0xc] sm:$0xf]  ;;  %v492_v45 = vshrl.u32 %v442_v35, 16  ;;  %v1178_v47 = vshll.u32 %v926_v42, 16  ;;  %v857_v51 = vsel %vm14359_vm5, %v626_v37, %v856_v39  ;;  %13943 = vmatpush3.bf16.msra.mxu1 %v13960_v14  ;;  %13112 = vmatprep.subr.bf16.mxu0 %v14444_v32 }
  0x2b   : > { %v925_v46 = vld [vmem:[#allocation2 + $0x60] sm:$0xf]  ;;  %v1182_v48 = vshrl.u32 %v926_v42, 16  ;;  %854 = vst [vmem:[#allocation2 + $0x6c] sm:$0xf] %v853_v43  ;;  %v495_v56 = vshll.u32 %v442_v35, 16  ;;  %13064 = vmatprep.subr.bf16.mxu1 %v14439_v30 }
  0x2c   : > { %v965_v52 = vld [vmem:[#allocation2 + $0x68] sm:$0x1]  ;;  %v1169_v53 = vshrl.u32 %v925_v46, 16  ;;  %v1172_v54 = vshll.u32 %v925_v46, 16  ;;  %855 = vst [vmem:[#allocation2 + $0x70] sm:$0xf] %v625_v49 }
  0x2d   : > { %858 = vst [vmem:[#allocation2 + $0x74] sm:$0x1] %v857_v51  ;;  %v14461_v55 = vrot.slane %v492_v45, 7  ;;  %v1180_v57 = vrot.slane %v1178_v47, 5  ;;  %v1184_v58 = vrot.slane %v1182_v48, 4  ;;  %v1188_v60 = vshll.u32 %v965_v52, 16 }
  0x2e   : > { %v912_v61 = vld [vmem:[#allocation2 + $0x10] sm:$0xf]  ;;  %v500_v62 = vshrl.u32 %v14455_v44, 16  ;;  %v1171_v63 = vrot.slane %v1169_v53, 4  ;;  %v1174_v0 = vrot.slane %v1172_v54, 5  ;;  %vm2003_vm12 = vcmask 1042432  }
  0x2f   : > { %v911_v1 = vld [vmem:[#allocation2 + $0xc] sm:$0xf]  ;;  %v958_v2 = vld [vmem:[#allocation2 + $0x14] sm:$0x1]  ;;  %v1185_v3 = vor.u32 %v1184_v58, %v1180_v57  ;;  %v1190_v4 = vrot.slane %v1188_v60, 5  ;;  %v1010_v9 = vshll.u32 %v912_v61, 16  ;;  %v497_v15 = vor.u32 %v495_v56, %v14461_v55 }
  0x30   : > { %v1001_v5 = vshrl.u32 %v911_v1, 16  ;;  %v1004_v6 = vshll.u32 %v911_v1, 16  ;;  %v1175_v8 = vor.u32 %v1174_v0, %v1171_v63  ;;  %v1014_v10 = vshrl.u32 %v912_v61, 16  ;;  %v803_v40 = vld [vmem:[#allocation2 + $0x18] sm:$0xf]  ;;  %v13964_v53 = vld [vmem:[%s19801_s1 + $0xb0] sm:$0xff]  }
  0x31   : > { %v1020_v11 = vshll.u32 %v958_v2, 16  ;;  %v1186_v12 = vrot.slane %v1185_v3, 4  ;;  %v1012_v17 = vrot.slane %v1010_v9, 5  ;;  %v265_v42 = vld [vmem:[#allocation2 + $0x78] sm:$0x1]  ;;  %v498_v54 = vrot.slane %v14461_v55, 4 }
  0x32   : > { %v1003_v13 = vrot.slane %v1001_v5, 4  ;;  %v1006_v14 = vrot.slane %v1004_v6, 5  ;;  %v1176_v16 = vrot.slane %v1175_v8, 4  ;;  %v1016_v18 = vrot.slane %v1014_v10, 4  ;;  %v927_v21 = vld [vmem:[#allocation2 + $0x6c] sm:$0xf] }
  0x33   : > { %v1022_v20 = vrot.slane %v1020_v11, 5  ;;  %v1191_v22 = vsel %vm14380_vm8, %v1186_v12, %v1190_v4  ;;  %v928_v25 = vld [vmem:[#allocation2 + $0x70] sm:$0xf]  ;;  %v1193_v27 = vshrl.u32 %v927_v21, 16  ;;  %v1196_v29 = vshll.u32 %v927_v21, 16  ;;  %s11682_s26 = sshll.u32 %s14328_s19, 5 }
  0x34   : > { %v1007_v23 = vor.u32 %v1006_v14, %v1003_v13  ;;  %v966_v26 = vld [vmem:[#allocation2 + $0x74] sm:$0x1]  ;;  %v1181_v31 = vsel %vm14380_vm8, %v1176_v16, %v1180_v57  ;;  %v1017_v33 = vor.u32 %v1016_v18, %v1012_v17  ;;  %v1202_v34 = vshll.u32 %v928_v25, 16  ;;  %v315_v43 = vld [vmem:[#allocation2 + $0x80] sm:$0x1]  ;;  %p221_p4 = scmp.lt.s32.totalorder %s11682_s26, 63 }
  0x35   : > { %v1206_v35 = vshrl.u32 %v928_v25, 16  ;;  %v11708_v36 = vcombine.low %v1181_v31, %v1191_v22  ;;  %v1195_v38 = vrot.slane %v1193_v27, 4  ;;  %v1198_v39 = vrot.slane %v1196_v29, 5  ;;  %v807_v49 = vld [vmem:[#allocation2 + $0x20] sm:$0x1]  ;;  %v14499_v13 = vld [vmem:[%s19801_s1 + $0x30] sm:$0xff]  }
  0x36   : > { %v1008_v37 = vrot.slane %v1007_v23, 4  ;;  %v1018_v45 = vrot.slane %v1017_v33, 4  ;;  %v1204_v46 = vrot.slane %v1202_v34, 5  ;;  %v1212_v48 = vshll.u32 %v966_v26, 16  ;;  %v458_v57 = vld [vmem:[%s14352_s7 + $0x48] sm:$0xf] }
  0x37   : > { %v1208_v47 = vrot.slane %v1206_v35, 4  ;;  %13048 = vmatprep.mubr.bf16.mxu1 %v11708_v36  ;;  %v1199_v52 = vor.u32 %v1198_v39, %v1195_v38  ;;  %v502_v56 = vrot.slane %v500_v62, 7  ;;  %v459_v58 = vld [vmem:[%s14352_s7 + $0x4c] sm:$0xf]  ;;  %v503_v0 = vshll.u32 %v14455_v44, 16  ;;  %s20414_s26 = smov (!%p221_p4, %s11682_s26), 63 }
  0x38   : > { %v1013_v51 = vsel %vm14380_vm8, %v1008_v37, %v1012_v17  ;;  %v1023_v60 = vsel %vm14380_vm8, %v1018_v45, %v1022_v20  ;;  %v1214_v63 = vrot.slane %v1212_v48, 5  ;;  %v244_v1 = vld [vmem:[#allocation2 + $0x24] sm:$0x1]  ;;  %v294_v2 = vld [vmem:[#allocation2 + $0x2c] sm:$0x1]  ;;  %v804_v6 = vsel %vm14407_vm11, %v497_v15, %v803_v40  ;;  %s11683_s19 = sshll.u32 %s20414_s26, 3 }
  0x39   : > { %v1209_v61 = vor.u32 %v1208_v47, %v1204_v46  ;;  %v11701_v3 = vcombine.low %v1013_v51, %v1023_v60  ;;  %v1200_v4 = vrot.slane %v1199_v52, 4  ;;  %v507_v5 = vrot.slane %v502_v56, 4  ;;  %v14485_v8 = vld [vmem:[%s14352_s7 + $0x10] sm:$0xf]  ;;  %v14488_v55 = vld [vmem:[%s14352_s7 + $0x14] sm:$0xf]  ;;  %s19641_s29 = scalar_lea.vmem %s19805_s5, %s11683_s19 }
  0x3a   : > { %v505_v9 = vor.u32 %v503_v0, %v502_v56  ;;  %805 = vst [vmem:[#allocation2 + $0x18] sm:$0xf] %v804_v6  ;;  %v266_v10 = vsel %vm14359_vm5, 0, %v265_v42  ;;  %v316_v44 = vsel %vm14367_vm7, 0, %v315_v43  ;;  %v268_v11 = vld [vmem:[#allocation2 + $0x84] sm:$0x1] }
  0x3b   : > { %v1210_v62 = vrot.slane %v1209_v61, 4  ;;  %13033 = vmatmul.mubr.bf16.vlgmr.msra.gmra.mxu0 %v11701_v3  ;;  %v1205_v12 = vsel %vm14380_vm8, %v1200_v4, %v1204_v46  ;;  %v808_v14 = vsel %vm14359_vm5, %v507_v5, %v807_v49  ;;  %267 = vst [vmem:[#allocation2 + $0x78] sm:$0x1] %v266_v10  ;;  %317 = vst [vmem:[#allocation2 + $0x80] sm:$0x1] %v316_v44  ;;  %v628_v15 = vshrl.u32 %v458_v57, 16 }
  0x3c   : > { %v631_v16 = vshll.u32 %v458_v57, 16  ;;  %13113 = vmatpush3.bf16.msra.mxu0 %v14444_v32  ;;  %v506_v18 = vsel %vm14401_vm10, %v498_v54, %v505_v9  ;;  %809 = vst [vmem:[#allocation2 + $0x20] sm:$0x1] %v808_v14  ;;  %v636_v20 = vshrl.u32 %v459_v58, 16  ;;  %v639_v21 = vshll.u32 %v459_v58, 16  ;;  %v13966_v31 = vld [vmem:[%s19801_s1 + $0xa8] sm:$0xff]  }
  0x3d   : > { %v1215_v17 = vsel %vm14380_vm8, %v1210_v62, %v1214_v63  ;;  %v318_v22 = vld [vmem:[#allocation2 + $0x8c] sm:$0x1]  ;;  %v14509_v23 = vld [vmem:[%s14352_s7 + $0x50] sm:$0xf]  ;;  %v14512_v25 = vld [vmem:[%s14352_s7 + $0x54] sm:$0xf]  ;;  %13114 = vmatprep.subr.bf16.mxu0 %v13964_v53 }
  0x3e   : > { %v11709_v26 = vcombine.low %v1205_v12, %v1215_v17  ;;  %806 = vst [vmem:[#allocation2 + $0x1c] sm:$0xf] %v506_v18  ;;  %v630_v27 = vrot.slane %v628_v15, 7  ;;  %v245_v29 = vsel %vm14359_vm5, 0, %v244_v1  ;;  %v295_v32 = vsel %vm14367_vm7, 0, %v294_v2  ;;  %v13965_v47 = vld [vmem:[%s19801_s1 + $0x28] sm:$0xff]  }
  0x3f   : > { %v638_v33 = vrot.slane %v636_v20, 7  ;;  %246 = vst [vmem:[#allocation2 + $0x24] sm:$0x1] %v245_v29  ;;  %296 = vst [vmem:[#allocation2 + $0x2c] sm:$0x1] %v295_v32  ;;  %v509_v34 = vshrl.u32 %v14485_v8, 16 }
  0x40   : > { %v512_v35 = vshll.u32 %v14485_v8, 16  ;;  %v517_v36 = vshrl.u32 %v14488_v55, 16  ;;  %13049 = vmatmul.mubr.bf16.vlgmr.msra.gmra.mxu1 %v11709_v26  ;;  %v633_v37 = vor.u32 %v631_v16, %v630_v27  ;;  %v634_v38 = vrot.slane %v630_v27, 4  ;;  %13115 = vmatpush3.bf16.msra.mxu0 %v13964_v53  ;;  %v13968_v48 = vld [vmem:[%s19801_s1 + $0xa0] sm:$0xff]   ;;  %v247_v5 = vld [vmem:[#allocation2 + $0x30] sm:$0x1] }
  0x41   : > { %v520_v39 = vshll.u32 %v14488_v55, 16  ;;  %v269_v40 = vsel %vm14359_vm5, 0, %v268_v11  ;;  %13065 = vmatpush3.bf16.msra.mxu1 %v14439_v30  ;;  %v641_v42 = vor.u32 %v639_v21, %v638_v33  ;;  %v643_v43 = vrot.slane %v638_v33, 4  ;;  %v913_v49 = vld [vmem:[#allocation2 + $0x18] sm:$0xf]  ;;  %13116 = vmatprep.subr.bf16.mxu0 %v13966_v31  ;;  %v14549_v4 = vld [vmem:[%s19801_s1 + $0x20] sm:$0xff]  }
  0x42   : > { %v511_v45 = vrot.slane %v509_v34, 7  ;;  %v519_v46 = vrot.slane %v517_v36, 7  ;;  %270 = vst [vmem:[#allocation2 + $0x84] sm:$0x1] %v269_v40  ;;  %13066 = vmatprep.subr.bf16.mxu1 %v14499_v13  ;;  %v319_v30 = vsel %vm14367_vm7, 0, %v318_v22  ;;  %v645_v51 = vshrl.u32 %v14509_v23, 16 }
  0x43   : > { %v648_v52 = vshll.u32 %v14509_v23, 16  ;;  %v653_v53 = vshrl.u32 %v14512_v25, 16  ;;  %v1025_v54 = vshrl.u32 %v913_v49, 16  ;;  %v1028_v56 = vshll.u32 %v913_v49, 16  ;;  %v859_v58 = vld [vmem:[#allocation2 + $0x78] sm:$0xf] }
  0x44   : > { %v642_v57 = vsel %vm14401_vm10, %v634_v38, %v641_v42  ;;  %v863_v60 = vld [vmem:[#allocation2 + $0x80] sm:$0x1]  ;;  %v514_v61 = vor.u32 %v512_v35, %v511_v45  ;;  %320 = vst [vmem:[#allocation2 + $0x8c] sm:$0x1] %v319_v30  ;;  %v860_v0 = vsel %vm14407_vm11, %v633_v37, %v859_v58  ;;  %v515_v2 = vrot.slane %v511_v45, 4  ;;  %v14554_v8 = vld [vmem:[%s19801_s1 + $0x98] sm:$0xff]   ;;  %13117 = vmatpush3.bf16.msra.mxu0 %v13966_v31 }
  0x45   : > { %v959_v63 = vld [vmem:[#allocation2 + $0x20] sm:$0x1]  ;;  %862 = vst [vmem:[#allocation2 + $0x7c] sm:$0xf] %v642_v57  ;;  %v864_v1 = vsel %vm14359_vm5, %v643_v43, %v863_v60  ;;  %v522_v3 = vor.u32 %v520_v39, %v519_v46  ;;  %v297_v6 = vld [vmem:[#allocation2 + $0x38] sm:$0x1]  ;;  %13067 = vmatpush3.bf16.msra.mxu1 %v14499_v13  ;;  %13118 = vmatprep.subr.bf16.mxu0 %v13968_v48 }
  0x46   : > { %v914_v55 = vld [vmem:[#allocation2 + $0x1c] sm:$0xf]  ;;  %v1027_v62 = vrot.slane %v1025_v54, 4  ;;  %v1030_v9 = vrot.slane %v1028_v56, 5  ;;  %v1044_v10 = vshll.u32 %v959_v63, 16  ;;  %v524_v44 = vrot.slane %v519_v46, 4  ;;  %13068 = vmatprep.subr.bf16.mxu1 %v13965_v47 }
  0x47   : > { %861 = vst [vmem:[#allocation2 + $0x78] sm:$0xf] %v860_v0  ;;  %865 = vst [vmem:[#allocation2 + $0x80] sm:$0x1] %v864_v1  ;;  %v1034_v11 = vshll.u32 %v914_v55, 16  ;;  %v1038_v12 = vshrl.u32 %v914_v55, 16  ;;  %v523_v14 = vsel %vm14401_vm10, %v515_v2, %v522_v3 }
  0x48   : > { %v810_v15 = vld [vmem:[#allocation2 + $0x24] sm:$0xf]  ;;  %v814_v16 = vld [vmem:[#allocation2 + $0x2c] sm:$0x1]  ;;  %v1031_v17 = vor.u32 %v1030_v9, %v1027_v62  ;;  %v1046_v13 = vrot.slane %v1044_v10, 5  ;;  %v647_v23 = vrot.slane %v645_v51, 7  ;;  %13119 = vmatpush3.bf16.msra.mxu0 %v13968_v48 }
  0x49   : > { %v811_v18 = vsel %vm14407_vm11, %v514_v61, %v810_v15  ;;  %813 = vst [vmem:[#allocation2 + $0x28] sm:$0xf] %v523_v14  ;;  %v815_v20 = vsel %vm14359_vm5, %v524_v44, %v814_v16  ;;  %v1036_v21 = vrot.slane %v1034_v11, 5  ;;  %v1040_v22 = vrot.slane %v1038_v12, 4  ;;  %v14564_v27 = vld [vmem:[%s14352_s7 + $0x18] sm:$0xf]  ;;  %13069 = vmatpush3.bf16.msra.mxu1 %v13965_v47  ;;  %13120 = vmatprep.subr.bf16.mxu0 %v14554_v8 }
  0x4a   : > { %812 = vst [vmem:[#allocation2 + $0x24] sm:$0xf] %v811_v18  ;;  %816 = vst [vmem:[#allocation2 + $0x2c] sm:$0x1] %v815_v20  ;;  %v655_v26 = vrot.slane %v653_v53, 7  ;;  %v1032_v29 = vrot.slane %v1031_v17, 4  ;;  %v650_v36 = vor.u32 %v648_v52, %v647_v23  ;;  %13070 = vmatprep.subr.bf16.mxu1 %v14549_v4 }
  0x4b   : > { %v656_v32 = vshll.u32 %v14512_v25, 16  ;;  %v866_v31 = vld [vmem:[#allocation2 + $0x84] sm:$0xf]  ;;  %v248_v33 = vsel %vm14359_vm5, 0, %v247_v5  ;;  %v298_v34 = vsel %vm14367_vm7, 0, %v297_v6  ;;  %v1041_v35 = vor.u32 %v1040_v22, %v1036_v21  ;;  %v13969_v25 = vld [vmem:[%s19801_s1 + $0x18] sm:$0xff]  }
  0x4c   : > { %v651_v37 = vrot.slane %v647_v23, 4  ;;  %v660_v38 = vrot.slane %v655_v26, 4  ;;  %v870_v39 = vld [vmem:[#allocation2 + $0x8c] sm:$0x1]  ;;  %249 = vst [vmem:[#allocation2 + $0x30] sm:$0x1] %v248_v33  ;;  %v1037_v42 = vsel %vm14380_vm8, %v1032_v29, %v1036_v21  ;;  %v867_v52 = vsel %vm14407_vm11, %v650_v36, %v866_v31  ;;  %13121 = vmatpush3.bf16.msra.mxu0 %v14554_v8 }
  0x4d   : > { %299 = vst [vmem:[#allocation2 + $0x38] sm:$0x1] %v298_v34  ;;  %v13972_v40 = vld [vmem:[%s19801_s1 + $0x90] sm:$0xff]   ;;  %v930_v43 = vld [vmem:[#allocation2 + $0x7c] sm:$0xf]  ;;  %v658_v45 = vor.u32 %v656_v32, %v655_v26  ;;  %v526_v46 = vshrl.u32 %v14564_v27, 16  ;;  %13071 = vmatpush3.bf16.msra.mxu1 %v14549_v4 }
  0x4e   : > { %v529_v47 = vshll.u32 %v14564_v27, 16  ;;  %v1042_v48 = vrot.slane %v1041_v35, 4  ;;  %v929_v49 = vld [vmem:[#allocation2 + $0x78] sm:$0xf]  ;;  %v967_v30 = vld [vmem:[#allocation2 + $0x80] sm:$0x1]  ;;  %v871_v53 = vsel %vm14359_vm5, %v660_v38, %v870_v39  ;;  %13072 = vmatprep.subr.bf16.mxu1 %v13969_v25  ;;  %13122 = vmatprep.subr.bf16.mxu0 %v13972_v40 }
  0x4f   : > { %v1226_v51 = vshll.u32 %v930_v43, 16  ;;  %v1217_v54 = vshrl.u32 %v929_v49, 16  ;;  %v1220_v56 = vshll.u32 %v929_v49, 16  ;;  %v1230_v57 = vshrl.u32 %v930_v43, 16  ;;  %868 = vst [vmem:[#allocation2 + $0x84] sm:$0xf] %v867_v52 }
  0x50   : > { %v1236_v58 = vshll.u32 %v967_v30, 16  ;;  %872 = vst [vmem:[#allocation2 + $0x8c] sm:$0x1] %v871_v53  ;;  %v1047_v60 = vsel %vm14380_vm8, %v1042_v48, %v1046_v13  ;;  %v14591_v63 = vld [vmem:[#allocation2 + $0x28] sm:$0xf]  ;;  %v659_v0 = vsel %vm14401_vm10, %v651_v37, %v658_v45  ;;  %v14595_v1 = vrot.slane %v526_v46, 7  ;;  %13123 = vmatpush3.bf16.msra.mxu0 %v13972_v40 }
  0x51   : > { %v1228_v61 = vrot.slane %v1226_v51, 5  ;;  %v13971_v2 = vld [vmem:[%s19801_s1 + $0x10] sm:$0xff]   ;;  %v11702_v3 = vcombine.low %v1037_v42, %v1047_v60  ;;  %v1219_v4 = vrot.slane %v1217_v54, 4  ;;  %v1222_v5 = vrot.slane %v1220_v56, 5  ;;  %v915_v8 = vld [vmem:[#allocation2 + $0x24] sm:$0xf]  ;;  %13073 = vmatpush3.bf16.msra.mxu1 %v13969_v25 }
  0x52   : > { %v1232_v6 = vrot.slane %v1230_v57, 4  ;;  %869 = vst [vmem:[#allocation2 + $0x88] sm:$0xf] %v659_v0  ;;  %v13974_v55 = vld [vmem:[%s19801_s1 + $0x88] sm:$0xff]   ;;  %v1238_v62 = vrot.slane %v1236_v58, 5  ;;  %v1049_v10 = vshrl.u32 %v915_v8, 16  ;;  %v531_v22 = vor.u32 %v529_v47, %v14595_v1  ;;  %13074 = vmatprep.subr.bf16.mxu1 %v13971_v2 }
  0x53   : > { %v14603_v9 = vld [vmem:[#allocation2 + $0x2c] sm:$0x1]  ;;  %v1052_v44 = vshll.u32 %v915_v8, 16  ;;  %v1058_v11 = vshll.u32 %v14591_v63, 16  ;;  %13036 = vmatprep.mubr.bf16.mxu0 %v11702_v3  ;;  %v1223_v12 = vor.u32 %v1222_v5, %v1219_v4  ;;  %v1062_v15 = vshrl.u32 %v14591_v63, 16  ;;  %13124 = vmatprep.subr.bf16.mxu0 %v13974_v55  ;;  %v13976_v31 = vld [vmem:[%s19801_s1 + $0x80] sm:$0xff]  }
  0x54   : > { %v1233_v14 = vor.u32 %v1232_v6, %v1228_v61  ;;  %v1068_v16 = vshll.u32 %v14603_v9, 16  ;;  %v14609_v17 = vld [vmem:[%s14352_s7 + $0x1c] sm:$0xf]  ;;  %v817_v13 = vld [vmem:[#allocation2 + $0x30] sm:$0xf]  ;;  %v1051_v18 = vrot.slane %v1049_v10, 4  ;;  %13125 = vmatpush3.bf16.msra.mxu0 %v13974_v55 }
  0x55   : > { %v1054_v20 = vrot.slane %v1052_v44, 5  ;;  %v1060_v21 = vrot.slane %v1058_v11, 5  ;;  %v13973_v23 = vld [vmem:[%s19801_s1 + $0x8] sm:$0xff]   ;;  %v1224_v26 = vrot.slane %v1223_v12, 4  ;;  %v1064_v29 = vrot.slane %v1062_v15, 4  ;;  %13075 = vmatpush3.bf16.msra.mxu1 %v13971_v2  ;;  %v13975_v52 = vld [vmem:[%s19801_s1] sm:$0xff]   ;;  %13126 = vmatprep.subr.bf16.mxu0 %v13976_v31 }
  0x56   : > { %v1234_v27 = vrot.slane %v1233_v14, 4  ;;  %v1070_v32 = vrot.slane %v1068_v16, 5  ;;  %v931_v34 = vld [vmem:[#allocation2 + $0x84] sm:$0xf]  ;;  %v532_v36 = vrot.slane %v14595_v1, 4  ;;  %v534_v37 = vshrl.u32 %v14609_v17, 16  ;;  %13076 = vmatprep.subr.bf16.mxu1 %v13973_v23 }
  0x57   : > { %v1055_v33 = vor.u32 %v1054_v20, %v1051_v18  ;;  %v968_v35 = vld [vmem:[#allocation2 + $0x8c] sm:$0x1]  ;;  %v818_v38 = vsel %vm14407_vm11, %v531_v22, %v817_v13  ;;  %v1229_v39 = vsel %vm14380_vm8, %v1224_v26, %v1228_v61  ;;  %v1065_v40 = vor.u32 %v1064_v29, %v1060_v21  ;;  %v271_v43 = vld [vmem:[#allocation2 + $0x90] sm:$0x1]  ;;  %v321_v30 = vld [vmem:[#allocation2 + $0x98] sm:$0x1] }
  0x58   : > { %v1239_v25 = vsel %vm14380_vm8, %v1234_v27, %v1238_v62  ;;  %v1241_v42 = vshrl.u32 %v931_v34, 16  ;;  %819 = vst [vmem:[#allocation2 + $0x30] sm:$0xf] %v818_v38  ;;  %v1244_v48 = vshll.u32 %v931_v34, 16  ;;  %v1260_v49 = vshll.u32 %v968_v35, 16  ;;  %v14635_v58 = vld [vmem:[%s19801_s1 + $0x138] sm:$0xff]   ;;  %13127 = vmatpush3.bf16.msra.mxu0 %v13976_v31 }
  0x59   : > { %v11710_v45 = vcombine.low %v1229_v39, %v1239_v25  ;;  %v1056_v46 = vrot.slane %v1055_v33, 4  ;;  %v932_v47 = vld [vmem:[#allocation2 + $0x88] sm:$0xf]  ;;  %v14627_v51 = vld [vmem:[%s14352_s7 + $0x58] sm:$0xf]  ;;  %v1066_v53 = vrot.slane %v1065_v40, 4  ;;  %13077 = vmatpush3.bf16.msra.mxu1 %v13973_v23  ;;  %13208 = vmatprep.subr.bf16.mxu0 %v14635_v58 }
  0x5a   : > { %v1243_v54 = vrot.slane %v1241_v42, 4  ;;  %v1250_v56 = vshll.u32 %v932_v47, 16  ;;  %v1254_v57 = vshrl.u32 %v932_v47, 16  ;;  %v1246_v61 = vrot.slane %v1244_v48, 5  ;;  %v463_v3 = vld [vmem:[%s14352_s7 + $0x5c] sm:$0xf]  ;;  %13078 = vmatprep.subr.bf16.mxu1 %v13975_v52 }
  0x5b   : > { %13052 = vmatprep.mubr.bf16.mxu1 %v11710_v45  ;;  %v1061_v60 = vsel %vm14380_vm8, %v1056_v46, %v1060_v21  ;;  %v1262_v0 = vrot.slane %v1260_v49, 5  ;;  %v536_v2 = vrot.slane %v534_v37, 7  ;;  %v1071_v4 = vsel %vm14380_vm8, %v1066_v53, %v1070_v32  ;;  %v821_v55 = vld [vmem:[#allocation2 + $0x38] sm:$0x1]  ;;  %v250_v14 = vld [vmem:[#allocation2 + $0x3c] sm:$0x1] }
  0x5c   : > { %v1252_v5 = vrot.slane %v1250_v56, 5  ;;  %v1256_v6 = vrot.slane %v1254_v57, 4  ;;  %v537_v8 = vshll.u32 %v14609_v17, 16  ;;  %v13979_v62 = vld [vmem:[%s19801_s1 + $0xf8] sm:$0xff]   ;;  %v11703_v10 = vcombine.low %v1061_v60, %v1071_v4  ;;  %v300_v26 = vld [vmem:[#allocation2 + $0x44] sm:$0x1] }
  0x5d   : > { %v1247_v44 = vor.u32 %v1246_v61, %v1243_v54  ;;  %v541_v11 = vrot.slane %v536_v2, 4  ;;  %v272_v12 = vsel %vm14359_vm5, 0, %v271_v43  ;;  %v322_v17 = vsel %vm14367_vm7, 0, %v321_v30  ;;  %v448_v27 = vld [vmem:[%s14352_s7 + $0x20] sm:$0xf]  ;;  %13079 = vmatpush3.bf16.msra.mxu1 %v13975_v52 }
  0x5e   : > { %v1257_v15 = vor.u32 %v1256_v6, %v1252_v5  ;;  %v539_v16 = vor.u32 %v537_v8, %v536_v2  ;;  %273 = vst [vmem:[#allocation2 + $0x90] sm:$0x1] %v272_v12  ;;  %v662_v13 = vshrl.u32 %v14627_v51, 16  ;;  %13037 = vmatmul.mubr.bf16.gmra.mxu0 %v11703_v10  ;;  %323 = vst [vmem:[#allocation2 + $0x98] sm:$0x1] %v322_v17  ;;  %v665_v22 = vshll.u32 %v14627_v51, 16 }
  0x5f   : > { %v1248_v18 = vrot.slane %v1247_v44, 4  ;;  %v822_v20 = vsel %vm14359_vm5, %v541_v11, %v821_v55  ;;  %v14654_v21 = vld [vmem:[#allocation2 + $0x30] sm:$0xf]  ;;  %v670_v23 = vshrl.u32 %v463_v3, 16  ;;  %v449_v34 = vld [vmem:[%s14352_s7 + $0x24] sm:$0xf]  ;;  %13160 = vmatprep.subr.bf16.mxu1 %v13979_v62 }
  0x60   : > { %v1258_v29 = vrot.slane %v1257_v15, 4  ;;  %v540_v32 = vsel %vm14401_vm10, %v532_v36, %v539_v16  ;;  %823 = vst [vmem:[#allocation2 + $0x38] sm:$0x1] %v822_v20  ;;  %v1073_v31 = vshrl.u32 %v14654_v21, 16  ;;  %v1076_v33 = vshll.u32 %v14654_v21, 16 }
  0x61   : > { %v1253_v35 = vsel %vm14380_vm8, %v1248_v18, %v1252_v5  ;;  %820 = vst [vmem:[#allocation2 + $0x34] sm:$0xf] %v540_v32  ;;  %v664_v37 = vrot.slane %v662_v13, 7  ;;  %v672_v38 = vrot.slane %v670_v23, 7  ;;  %v673_v39 = vshll.u32 %v463_v3, 16 }
  0x62   : > { %v274_v25 = vld [vmem:[#allocation2 + $0x9c] sm:$0x1]  ;;  %v1263_v1 = vsel %vm14380_vm8, %v1258_v29, %v1262_v0  ;;  %v1075_v36 = vrot.slane %v1073_v31, 4  ;;  %v1078_v40 = vrot.slane %v1076_v33, 5  ;;  %v251_v42 = vsel %vm14359_vm5, 0, %v250_v14 }
  0x63   : > { %v11711_v43 = vcombine.low %v1253_v35, %v1263_v1  ;;  %v667_v45 = vor.u32 %v665_v22, %v664_v37  ;;  %v668_v46 = vrot.slane %v664_v37, 4  ;;  %v675_v47 = vor.u32 %v673_v39, %v672_v38  ;;  %252 = vst [vmem:[#allocation2 + $0x3c] sm:$0x1] %v251_v42  ;;  %v324_v48 = vld [vmem:[#allocation2 + $0xa4] sm:$0x1] }
  0x64   : > { %v1079_v49 = vor.u32 %v1078_v40, %v1075_v36  ;;  %v677_v30 = vrot.slane %v672_v38, 4  ;;  %v301_v51 = vsel %vm14367_vm7, 0, %v300_v26  ;;  %v543_v52 = vshrl.u32 %v448_v27, 16  ;;  %v464_v53 = vld [vmem:[%s14352_s7 + $0x60] sm:$0xf] }
  0x65   : > { %13053 = vmatmul.mubr.bf16.gmra.mxu1 %v11711_v43  ;;  %v676_v54 = vsel %vm14401_vm10, %v668_v46, %v675_v47  ;;  %v873_v56 = vld [vmem:[#allocation2 + $0x90] sm:$0xf]  ;;  %302 = vst [vmem:[#allocation2 + $0x44] sm:$0x1] %v301_v51  ;;  %v546_v57 = vshll.u32 %v448_v27, 16  ;;  %v551_v60 = vshrl.u32 %v449_v34, 16 }
  0x66   : > { %v554_v61 = vshll.u32 %v449_v34, 16  ;;  %v465_v0 = vld [vmem:[%s14352_s7 + $0x64] sm:$0xf]  ;;  %v14677_v2 = vrot.slane %v1079_v49, 4  ;;  %v874_v3 = vsel %vm14407_vm11, %v667_v45, %v873_v56  ;;  %876 = vst [vmem:[#allocation2 + $0x94] sm:$0xf] %v676_v54 }
  0x67   : > { %v877_v4 = vld [vmem:[#allocation2 + $0x98] sm:$0x1]  ;;  %v545_v5 = vrot.slane %v543_v52, 7  ;;  %v275_v6 = vsel %vm14359_vm5, 0, %v274_v25  ;;  %875 = vst [vmem:[#allocation2 + $0x90] sm:$0xf] %v874_v3 }
  0x68   : > { %v14683_v8 = vld [vmem:[#allocation2 + $0x38] sm:$0x1]  ;;  %v878_v55 = vsel %vm14359_vm5, %v677_v30, %v877_v4  ;;  %v553_v62 = vrot.slane %v551_v60, 7  ;;  %276 = vst [vmem:[#allocation2 + $0x9c] sm:$0x1] %v275_v6  ;;  %v325_v10 = vsel %vm14367_vm7, 0, %v324_v48 }
  0x69   : > { %v679_v44 = vshrl.u32 %v464_v53, 16  ;;  %v253_v11 = vld [vmem:[#allocation2 + $0x48] sm:$0x1]  ;;  %v14689_v12 = vld [vmem:[#allocation2 + $0x34] sm:$0xf]  ;;  %v1092_v14 = vshll.u32 %v14683_v8, 16  ;;  %v548_v15 = vor.u32 %v546_v57, %v545_v5 }
  0x6a   : > { %879 = vst [vmem:[#allocation2 + $0x98] sm:$0x1] %v878_v55  ;;  %v549_v16 = vrot.slane %v545_v5, 4  ;;  %326 = vst [vmem:[#allocation2 + $0xa4] sm:$0x1] %v325_v10  ;;  %v682_v17 = vshll.u32 %v464_v53, 16  ;;  %v556_v20 = vor.u32 %v554_v61, %v553_v62 }
  0x6b   : > { %v1082_v13 = vshll.u32 %v14689_v12, 16  ;;  %v1086_v18 = vshrl.u32 %v14689_v12, 16  ;;  %v558_v22 = vrot.slane %v553_v62, 4  ;;  %v303_v23 = vld [vmem:[#allocation2 + $0x50] sm:$0x1]  ;;  %v1094_v26 = vrot.slane %v1092_v14, 5 }
  0x6c   : > { %v824_v27 = vld [vmem:[#allocation2 + $0x3c] sm:$0xf]  ;;  %v681_v29 = vrot.slane %v679_v44, 7  ;;  %v687_v32 = vshrl.u32 %v465_v0, 16  ;;  %v690_v31 = vshll.u32 %v465_v0, 16  ;;  %v557_v35 = vsel %vm14401_vm10, %v549_v16, %v556_v20 }
  0x6d   : > { %v1084_v33 = vrot.slane %v1082_v13, 5  ;;  %v1088_v34 = vrot.slane %v1086_v18, 4  ;;  %v825_v37 = vsel %vm14407_vm11, %v548_v15, %v824_v27  ;;  %v450_v38 = vld [vmem:[%s14352_s7 + $0x28] sm:$0xf]  ;;  %827 = vst [vmem:[#allocation2 + $0x40] sm:$0xf] %v557_v35 }
  0x6e   : > { %826 = vst [vmem:[#allocation2 + $0x3c] sm:$0xf] %v825_v37  ;;  %v828_v39 = vld [vmem:[#allocation2 + $0x44] sm:$0x1]  ;;  %v684_v25 = vor.u32 %v682_v17, %v681_v29  ;;  %v685_v1 = vrot.slane %v681_v29, 4  ;;  %v689_v36 = vrot.slane %v687_v32, 7 }
  0x6f   : > { %v254_v40 = vsel %vm14359_vm5, 0, %v253_v11  ;;  %v1085_v42 = vsel %vm14380_vm8, %v14677_v2, %v1084_v33  ;;  %v1089_v43 = vor.u32 %v1088_v34, %v1084_v33  ;;  %v14704_v45 = vld [vmem:[#allocation2 + $0x94] sm:$0xf]  ;;  %v829_v46 = vsel %vm14359_vm5, %v558_v22, %v828_v39  ;;  %v933_v48 = vld [vmem:[#allocation2 + $0x90] sm:$0xf] }
  0x70   : > { %255 = vst [vmem:[#allocation2 + $0x48] sm:$0x1] %v254_v40  ;;  %v304_v47 = vsel %vm14367_vm7, 0, %v303_v23  ;;  %v1274_v49 = vshll.u32 %v14704_v45, 16  ;;  %v1278_v30 = vshrl.u32 %v14704_v45, 16  ;;  %v692_v51 = vor.u32 %v690_v31, %v689_v36 }
  0x71   : > { %830 = vst [vmem:[#allocation2 + $0x44] sm:$0x1] %v829_v46  ;;  %v694_v52 = vrot.slane %v689_v36, 4  ;;  %305 = vst [vmem:[#allocation2 + $0x50] sm:$0x1] %v304_v47  ;;  %v1090_v53 = vrot.slane %v1089_v43, 4 }
  0x72   : > { %v14712_v54 = vld [vmem:[#allocation2 + $0x98] sm:$0x1]  ;;  %v1265_v56 = vshrl.u32 %v933_v48, 16  ;;  %v1268_v57 = vshll.u32 %v933_v48, 16  ;;  %v560_v60 = vshrl.u32 %v450_v38, 16  ;;  %v1276_v61 = vrot.slane %v1274_v49, 5 }
  0x73   : > { %v1280_v0 = vrot.slane %v1278_v30, 4  ;;  %v1284_v2 = vshll.u32 %v14712_v54, 16  ;;  %v693_v3 = vsel %vm14401_vm10, %v685_v1, %v692_v51  ;;  %v880_v4 = vld [vmem:[#allocation2 + $0x9c] sm:$0xf]  ;;  %v1095_v5 = vsel %vm14380_vm8, %v1090_v53, %v1094_v26  ;;  %v884_v10 = vld [vmem:[#allocation2 + $0xa4] sm:$0x1] }
  0x74   : > { %v1267_v6 = vrot.slane %v1265_v56, 4  ;;  %v1270_v55 = vrot.slane %v1268_v57, 5  ;;  %v881_v62 = vsel %vm14407_vm11, %v684_v25, %v880_v4  ;;  %883 = vst [vmem:[#allocation2 + $0xa0] sm:$0xf] %v693_v3  ;;  %v11704_v44 = vcombine.low %v1085_v42, %v1095_v5  ;;  %v451_v16 = vld [vmem:[%s14352_s7 + $0x2c] sm:$0xf] }
  0x75   : > { %v1281_v11 = vor.u32 %v1280_v0, %v1276_v61  ;;  %v1286_v14 = vrot.slane %v1284_v2, 5  ;;  %882 = vst [vmem:[#allocation2 + $0x9c] sm:$0xf] %v881_v62  ;;  %v885_v15 = vsel %vm14359_vm5, %v694_v52, %v884_v10  ;;  %v14724_v13 = vld [vmem:[#allocation2 + $0x3c] sm:$0xf]  ;;  %v562_v20 = vrot.slane %v560_v60, 7 }
  0x76   : > { %v1271_v17 = vor.u32 %v1270_v55, %v1267_v6  ;;  %v14726_v18 = vld [vmem:[#allocation2 + $0x40] sm:$0xf]  ;;  %886 = vst [vmem:[#allocation2 + $0xa4] sm:$0x1] %v885_v15  ;;  %v563_v22 = vshll.u32 %v450_v38, 16  ;;  %13040 = vmatprep.mubr.bf16.mxu0 %v11704_v44  ;;  %v1097_v26 = vshrl.u32 %v14724_v13, 16 }
  0x77   : > { %v1282_v23 = vrot.slane %v1281_v11, 4  ;;  %v1100_v27 = vshll.u32 %v14724_v13, 16  ;;  %v1106_v29 = vshll.u32 %v14726_v18, 16  ;;  %v831_v32 = vld [vmem:[#allocation2 + $0x48] sm:$0xf]  ;;  %v1110_v34 = vshrl.u32 %v14726_v18, 16 }
  0x78   : > { %v1272_v31 = vrot.slane %v1271_v17, 4  ;;  %v14731_v33 = vld [vmem:[#allocation2 + $0x44] sm:$0x1]  ;;  %v565_v35 = vor.u32 %v563_v22, %v562_v20  ;;  %v566_v37 = vrot.slane %v562_v20, 4  ;;  %v1099_v38 = vrot.slane %v1097_v26, 4 }
  0x79   : > { %v1287_v39 = vsel %vm14380_vm8, %v1282_v23, %v1286_v14  ;;  %v1102_v25 = vrot.slane %v1100_v27, 5  ;;  %v1108_v1 = vrot.slane %v1106_v29, 5  ;;  %v1112_v40 = vrot.slane %v1110_v34, 4  ;;  %v277_v60 = vld [vmem:[#allocation2 + $0xa8] sm:$0x1] }
  0x7a   : > { %v1277_v36 = vsel %vm14380_vm8, %v1272_v31, %v1276_v61  ;;  %v1116_v42 = vshll.u32 %v14731_v33, 16  ;;  %v568_v43 = vshrl.u32 %v451_v16, 16  ;;  %v571_v49 = vshll.u32 %v451_v16, 16  ;;  %v327_v5 = vld [vmem:[#allocation2 + $0xb0] sm:$0x1] }
  0x7b   : > { %v11712_v46 = vcombine.low %v1277_v36, %v1287_v39  ;;  %v1103_v47 = vor.u32 %v1102_v25, %v1099_v38  ;;  %v14739_v48 = vld [vmem:[#allocation2 + $0xa0] sm:$0xf]  ;;  %v832_v30 = vsel %vm14407_vm11, %v565_v35, %v831_v32  ;;  %v1113_v51 = vor.u32 %v1112_v40, %v1108_v1  ;;  %v466_v44 = vld [vmem:[%s14352_s7 + $0x68] sm:$0xf]  ;;  %v835_v17 = vld [vmem:[#allocation2 + $0x50] sm:$0x1] }
  0x7c   : > { %v1118_v52 = vrot.slane %v1116_v42, 5  ;;  %v14743_v53 = vld [vmem:[#allocation2 + $0x9c] sm:$0xf]  ;;  %v1298_v56 = vshll.u32 %v14739_v48, 16  ;;  %v1302_v57 = vshrl.u32 %v14739_v48, 16  ;;  %v570_v4 = vrot.slane %v568_v43, 7 }
  0x7d   : > { %833 = vst [vmem:[#allocation2 + $0x48] sm:$0xf] %v832_v30  ;;  %13056 = vmatprep.mubr.bf16.mxu1 %v11712_v46  ;;  %v1104_v61 = vrot.slane %v1103_v47, 4  ;;  %v14747_v0 = vld [vmem:[#allocation2 + $0xa4] sm:$0x1]  ;;  %v1289_v2 = vshrl.u32 %v14743_v53, 16 }
  0x7e   : > { %v1292_v3 = vshll.u32 %v14743_v53, 16  ;;  %v1114_v6 = vrot.slane %v1113_v51, 4  ;;  %v1300_v55 = vrot.slane %v1298_v56, 5  ;;  %v1304_v62 = vrot.slane %v1302_v57, 4  ;;  %v467_v20 = vld [vmem:[%s14352_s7 + $0x6c] sm:$0xf] }
  0x7f   : > { %v1308_v10 = vshll.u32 %v14747_v0, 16  ;;  %v1109_v11 = vsel %vm14380_vm8, %v1104_v61, %v1108_v1  ;;  %v1291_v14 = vrot.slane %v1289_v2, 4  ;;  %v573_v16 = vor.u32 %v571_v49, %v570_v4  ;;  %v256_v29 = vld [vmem:[#allocation2 + $0x54] sm:$0x1]  ;;  %v306_v32 = vld [vmem:[#allocation2 + $0x5c] sm:$0x1] }
  0x80   : > { %v1294_v15 = vrot.slane %v1292_v3, 5  ;;  %v1119_v22 = vsel %vm14380_vm8, %v1114_v6, %v1118_v52  ;;  %v1305_v23 = vor.u32 %v1304_v62, %v1300_v55  ;;  %v575_v27 = vrot.slane %v570_v4, 4  ;;  %v452_v40 = vld [vmem:[%s14352_s7 + $0x30] sm:$0xf]  ;;  %v453_v49 = vld [vmem:[%s14352_s7 + $0x34] sm:$0xf] }
  0x81   : > { %v1310_v26 = vrot.slane %v1308_v10, 5  ;;  %v11705_v31 = vcombine.low %v1109_v11, %v1119_v22  ;;  %v574_v35 = vsel %vm14401_vm10, %v566_v37, %v573_v16  ;;  %v278_v39 = vsel %vm14359_vm5, 0, %v277_v60  ;;  %v280_v57 = vld [vmem:[#allocation2 + $0xb4] sm:$0x1]  ;;  %v15071_v24 = vld [vmem:[#allocation2 + $0x10] sm:$0xf] }
  0x82   : > { %v1295_v34 = vor.u32 %v1294_v15, %v1291_v14  ;;  %v1306_v38 = vrot.slane %v1305_v23, 4  ;;  %834 = vst [vmem:[#allocation2 + $0x4c] sm:$0xf] %v574_v35  ;;  %v836_v25 = vsel %vm14359_vm5, %v575_v27, %v835_v17  ;;  %279 = vst [vmem:[#allocation2 + $0xa8] sm:$0x1] %v278_v39  ;;  %v328_v1 = vsel %vm14367_vm7, 0, %v327_v5 }
  0x83   : > { %v696_v36 = vshrl.u32 %v466_v44, 16  ;;  %13041 = vmatmul.mubr.bf16.gmra.mxu0 %v11705_v31  ;;  %837 = vst [vmem:[#allocation2 + $0x50] sm:$0x1] %v836_v25  ;;  %329 = vst [vmem:[#allocation2 + $0xb0] sm:$0x1] %v328_v1  ;;  %v699_v37 = vshll.u32 %v466_v44, 16 }
  0x84   : > { %v1296_v42 = vrot.slane %v1295_v34, 4  ;;  %v14767_v43 = vld [vmem:[#allocation2 + $0x48] sm:$0xf]  ;;  %v704_v46 = vshrl.u32 %v467_v20, 16  ;;  %v707_v47 = vshll.u32 %v467_v20, 16  ;;  %v1311_v30 = vsel %vm14380_vm8, %v1306_v38, %v1310_v26  ;;  %19894 = vst [vmem:[#allocation11_spill] sm:$0xff] %v15071_v24 }
  0x85   : > { %v1121_v51 = vshrl.u32 %v14767_v43, 16  ;;  %v1124_v52 = vshll.u32 %v14767_v43, 16  ;;  %v698_v56 = vrot.slane %v696_v36, 7  ;;  %v257_v2 = vsel %vm14359_vm5, 0, %v256_v29  ;;  %v330_v20 = vld [vmem:[#allocation2 + $0xbc] sm:$0x1] }
  0x86   : > { %v1301_v60 = vsel %vm14380_vm8, %v1296_v42, %v1300_v55  ;;  %v706_v61 = vrot.slane %v704_v46, 7  ;;  %v307_v3 = vsel %vm14367_vm7, 0, %v306_v32  ;;  %258 = vst [vmem:[#allocation2 + $0x54] sm:$0x1] %v257_v2  ;;  %v577_v14 = vshrl.u32 %v452_v40, 16 }
  0x87   : > { %v11713_v4 = vcombine.low %v1301_v60, %v1311_v30  ;;  %v1123_v5 = vrot.slane %v1121_v51, 4  ;;  %v1126_v6 = vrot.slane %v1124_v52, 5  ;;  %v701_v62 = vor.u32 %v699_v37, %v698_v56  ;;  %308 = vst [vmem:[#allocation2 + $0x5c] sm:$0x1] %v307_v3  ;;  %v468_v32 = vld [vmem:[%s14352_s7 + $0x70] sm:$0xf] }
  0x88   : > { %v702_v10 = vrot.slane %v698_v56, 4  ;;  %v709_v44 = vor.u32 %v707_v47, %v706_v61  ;;  %v711_v11 = vrot.slane %v706_v61, 4  ;;  %v580_v15 = vshll.u32 %v452_v40, 16  ;;  %v469_v30 = vld [vmem:[%s14352_s7 + $0x74] sm:$0xf] }
  0x89   : > { %13057 = vmatmul.mubr.bf16.gmra.mxu1 %v11713_v4  ;;  %v1127_v55 = vor.u32 %v1126_v6, %v1123_v5  ;;  %v585_v16 = vshrl.u32 %v453_v49, 16  ;;  %v588_v17 = vshll.u32 %v453_v49, 16  ;;  %v14780_v22 = vld [vmem:[#allocation2 + $0x4c] sm:$0xf]  ;;  %v887_v26 = vld [vmem:[#allocation2 + $0xa8] sm:$0xf] }
  0x8a   : > { %v710_v23 = vsel %vm14401_vm10, %v702_v10, %v709_v44  ;;  %v579_v27 = vrot.slane %v577_v14, 7  ;;  %v281_v29 = vsel %vm14359_vm5, 0, %v280_v57  ;;  %v14787_v31 = vld [vmem:[#allocation2 + $0x50] sm:$0x1]  ;;  %v1130_v35 = vshll.u32 %v14780_v22, 16 }
  0x8b   : > { %v1128_v34 = vrot.slane %v1127_v55, 4  ;;  %v1134_v39 = vshrl.u32 %v14780_v22, 16  ;;  %v888_v38 = vsel %vm14407_vm11, %v701_v62, %v887_v26  ;;  %890 = vst [vmem:[#allocation2 + $0xac] sm:$0xf] %v710_v23  ;;  %282 = vst [vmem:[#allocation2 + $0xb4] sm:$0x1] %v281_v29 }
  0x8c   : > { %v1140_v25 = vshll.u32 %v14787_v31, 16  ;;  %889 = vst [vmem:[#allocation2 + $0xa8] sm:$0xf] %v888_v38  ;;  %v891_v1 = vld [vmem:[#allocation2 + $0xb0] sm:$0x1]  ;;  %v582_v36 = vor.u32 %v580_v15, %v579_v27  ;;  %v583_v40 = vrot.slane %v579_v27, 4 }
  0x8d   : > { %v587_v42 = vrot.slane %v585_v16, 7  ;;  %v1132_v37 = vrot.slane %v1130_v35, 5  ;;  %v1136_v46 = vrot.slane %v1134_v39, 4  ;;  %v892_v47 = vsel %vm14359_vm5, %v711_v11, %v891_v1  ;;  %v14799_v51 = vld [vmem:[#allocation2 + $0x14] sm:$0x1] }
  0x8e   : > { %v331_v49 = vsel %vm14367_vm7, 0, %v330_v20  ;;  %893 = vst [vmem:[#allocation2 + $0xb0] sm:$0x1] %v892_v47  ;;  %v838_v60 = vld [vmem:[#allocation2 + $0x54] sm:$0xf]  ;;  %v1142_v4 = vrot.slane %v1140_v25, 5 }
  0x8f   : > { %v590_v56 = vor.u32 %v588_v17, %v587_v42  ;;  %v592_v57 = vrot.slane %v587_v42, 4  ;;  %v842_v61 = vld [vmem:[#allocation2 + $0x5c] sm:$0x1]  ;;  %332 = vst [vmem:[#allocation2 + $0xbc] sm:$0x1] %v331_v49  ;;  %v1137_v3 = vor.u32 %v1136_v46, %v1132_v37  ;;  %v839_v5 = vsel %vm14407_vm11, %v582_v36, %v838_v60 }
  0x90   : > { %v713_v6 = vshrl.u32 %v468_v32, 16  ;;  %840 = vst [vmem:[#allocation2 + $0x54] sm:$0xf] %v839_v5  ;;  %v716_v44 = vshll.u32 %v468_v32, 16  ;;  %v721_v11 = vshrl.u32 %v469_v30, 16  ;;  %v1133_v14 = vsel %vm14380_vm8, %v1128_v34, %v1132_v37 }
  0x91   : > { %v591_v62 = vsel %vm14401_vm10, %v583_v40, %v590_v56  ;;  %v843_v10 = vsel %vm14359_vm5, %v592_v57, %v842_v61  ;;  %v1138_v55 = vrot.slane %v1137_v3, 4  ;;  %v724_v16 = vshll.u32 %v469_v30, 16  ;;  %v1955_v23 = vld [vmem:[#allocation2] sm:$0xe]  ;;  %v1959_v26 = vld [vmem:[#allocation2 + $0x30] sm:$0xe] }
  0x92   : > { %841 = vst [vmem:[#allocation2 + $0x58] sm:$0xf] %v591_v62  ;;  %844 = vst [vmem:[#allocation2 + $0x5c] sm:$0x1] %v843_v10  ;;  %v715_v15 = vrot.slane %v713_v6, 7  ;;  %v723_v20 = vrot.slane %v721_v11, 7 }
  0x93   : > { %v14812_v17 = vld [vmem:[#allocation2 + $0xac] sm:$0xf]  ;;  %vm2004_vm13 = vcmask 1046532   ;;  %v1143_v27 = vsel %vm14380_vm8, %v1138_v55, %v1142_v4  ;;  %v14818_v29 = vld [vmem:[#allocation2 + $0xa8] sm:$0xf]  ;;  %v11748_v6 = vrot.slane %v1955_v23, 9 }
  0x94   : > { %v1322_v32 = vshll.u32 %v14812_v17, 16  ;;  %v1326_v34 = vshrl.u32 %v14812_v17, 16  ;;  %v718_v35 = vor.u32 %v716_v44, %v715_v15  ;;  %v894_v39 = vld [vmem:[#allocation2 + $0xb4] sm:$0xf]  ;;  %v11706_v38 = vcombine.low %v1133_v14, %v1143_v27  ;;  %v1956_v55 = vld [vmem:[#allocation2 + $0xc] sm:$0xe]  ;;  %vm14845_vm14 = vmor %vm2003_vm12, %vm2004_vm13 }
  0x95   : > { %v1313_v25 = vshrl.u32 %v14818_v29, 16  ;;  %v1316_v1 = vshll.u32 %v14818_v29, 16  ;;  %v719_v36 = vrot.slane %v715_v15, 4  ;;  %v14824_v40 = vld [vmem:[#allocation2 + $0xb0] sm:$0x1]  ;;  %v726_v46 = vor.u32 %v724_v16, %v723_v20 }
  0x96   : > { %v1324_v42 = vrot.slane %v1322_v32, 5  ;;  %v1328_v37 = vrot.slane %v1326_v34, 4  ;;  %v728_v47 = vrot.slane %v723_v20, 4  ;;  %13044 = vmatprep.mubr.bf16.mxu0 %v11706_v38  ;;  %v1332_v56 = vshll.u32 %v14824_v40, 16  ;;  %v898_v60 = vld [vmem:[#allocation2 + $0xbc] sm:$0x1] }
  0x97   : > { %v1315_v49 = vrot.slane %v1313_v25, 4  ;;  %v1318_v30 = vrot.slane %v1316_v1, 5  ;;  %v895_v57 = vsel %vm14407_vm11, %v718_v35, %v894_v39  ;;  %v14829_v3 = vld [vmem:[#allocation2 + $0x54] sm:$0xf]  ;;  %v727_v4 = vsel %vm14401_vm10, %v719_v36, %v726_v46  ;;  %v14850_v39 = vld [vmem:[#allocation2 + $0x4] sm:$0xf] }
  0x98   : > { %v1329_v61 = vor.u32 %v1328_v37, %v1324_v42  ;;  %896 = vst [vmem:[#allocation2 + $0xb4] sm:$0xf] %v895_v57  ;;  %v899_v5 = vsel %vm14359_vm5, %v728_v47, %v898_v60  ;;  %v1334_v10 = vrot.slane %v1332_v56, 5  ;;  %v1145_v14 = vshrl.u32 %v14829_v3, 16  ;;  %897 = vst [vmem:[#allocation2 + $0xb8] sm:$0xf] %v727_v4 }
  0x99   : > { %v1319_v62 = vor.u32 %v1318_v30, %v1315_v49  ;;  %v14835_v44 = vld [vmem:[#allocation2 + $0x58] sm:$0xf]  ;;  %v14837_v11 = vld [vmem:[#allocation2 + $0x5c] sm:$0x1]  ;;  %900 = vst [vmem:[#allocation2 + $0xbc] sm:$0x1] %v899_v5 }
  0x9a   : > { %v1330_v15 = vrot.slane %v1329_v61, 4  ;;  %v1148_v16 = vshll.u32 %v14829_v3, 16  ;;  %v1154_v20 = vshll.u32 %v14835_v44, 16  ;;  %v1158_v27 = vshrl.u32 %v14835_v44, 16  ;;  %v1957_v46 = vld [vmem:[#allocation2 + $0x18] sm:$0xe] }
  0x9b   : > { %v19888_v23 = vmov 0  ;;  %v1320_v32 = vrot.slane %v1319_v62, 4  ;;  %v1147_v34 = vrot.slane %v1145_v14, 4  ;;  %v1164_v35 = vshll.u32 %v14837_v11, 16  ;;  %v15140_v19 = vld [vmem:[#allocation2 + $0x28] sm:$0xf] }
  0x9c   : > { %v19889_v23 = vsel %vm14845_vm14, 4294967295, %v19888_v23  ;;  %v2008_v38 = vrot.slane %v14850_v39, 5  ;;  %v1335_v25 = vsel %vm14380_vm8, %v1330_v15, %v1334_v10  ;;  %v1150_v1 = vrot.slane %v1148_v16, 5  ;;  %v14865_v10 = vld [vmem:[#allocation2 + $0x10] sm:$0xf]  ;;  %19898 = vst [vmem:[#allocation13_spill] sm:$0xff] %v15140_v19 }
  0x9d   : > { %19890 = vst [vmem:[#allocation9_spill] sm:$0xff] %v19889_v23  ;;  %v1156_v36 = vrot.slane %v1154_v20, 5  ;;  %v1160_v37 = vrot.slane %v1158_v27, 4  ;;  %v1325_v47 = vsel %vm14380_vm8, %v1320_v32, %v1324_v42  ;;  %v1166_v49 = vrot.slane %v1164_v35, 5  ;;  %v14868_v15 = vld [vmem:[#allocation2 + $0x1c] sm:$0xf] }
  0x9e   : > { %v2009_v30 = vsel %vm14845_vm14, %v11748_v6, %v2008_v38  ;;  %v2010_v56 = vrot.slane %v2008_v38, 4  ;;  %v11714_v57 = vcombine.low %v1325_v47, %v1335_v25  ;;  %v1151_v60 = vor.u32 %v1150_v1, %v1147_v34  ;;  %v15200_v23 = vld [vmem:[#allocation2 + $0x94] sm:$0xf] }
  0x9f   : > { %v1161_v61 = vor.u32 %v1160_v37, %v1156_v36  ;;  %v11749_v4 = vrot.slane %v1956_v55, 9  ;;  %v14859_v5 = vld [vmem:[#allocation2 + $0xb4] sm:$0xf]  ;;  %v2015_v42 = vrot.slane %v14865_v10, 5  ;;  %v11750_v14 = vrot.slane %v1957_v46, 9 }
  0xa0   : > { %v2012_v62 = vsel %vm14845_vm14, %v2010_v56, %v2011_v41  ;;  %v2022_v6 = vrot.slane %v14868_v15, 5  ;;  %13060 = vmatprep.mubr.bf16.mxu1 %v11714_v57  ;;  %v1152_v16 = vrot.slane %v1151_v60, 4  ;;  %v14871_v55 = vld [vmem:[#allocation2 + $0xb8] sm:$0xf]  ;;  %v14873_v27 = vld [vmem:[#allocation2 + $0xbc] sm:$0x1] }
  0xa1   : > { %v1162_v20 = vrot.slane %v1161_v61, 4  ;;  %19891 = vst [vmem:[#allocation10_spill] sm:$0xff] %v14871_v55  ;;  %v1337_v7 = vshrl.u32 %v14859_v5, 16  ;;  %v1340_v41 = vshll.u32 %v14859_v5, 16  ;;  %v1346_v32 = vshll.u32 %v14871_v55, 16 }
  0xa2   : > { %v1350_v34 = vshrl.u32 %v14871_v55, 16  ;;  %v1157_v35 = vsel %vm14380_vm8, %v1152_v16, %v1156_v36  ;;  %v1356_v25 = vshll.u32 %v14873_v27, 16  ;;  %v11780_v1 = vcombine.low %v2009_v30, %v2012_v62  ;;  %v1958_v37 = vld [vmem:[#allocation2 + $0x24] sm:$0xe]  ;;  %v14221_v16 = vld [vmem:[#allocation2 + $0x20] sm:$0x1] }
  0xa3   : > { %v1167_v38 = vsel %vm14380_vm8, %v1162_v20, %v1166_v49  ;;  %v1339_v47 = vrot.slane %v1337_v7, 4  ;;  %v1342_v56 = vrot.slane %v1340_v41, 5  ;;  %v1348_v57 = vrot.slane %v1346_v32, 5 }
  0xa4   : > { %v11707_v46 = vcombine.low %v1157_v35, %v1167_v38  ;;  %v1352_v60 = vrot.slane %v1350_v34, 4  ;;  %v2017_v61 = vrot.slane %v2015_v42, 4  ;;  %v2016_v52 = vsel %vm14845_vm14, %v11749_v4, %v2015_v42  ;;  %v1960_v4 = vld [vmem:[#allocation2 + $0x3c] sm:$0xe] }
  0xa5   : > { %v1343_v2 = vor.u32 %v1342_v56, %v1339_v47  ;;  %v2024_v36 = vrot.slane %v2022_v6, 4  ;;  %v2025_v59 = vrot.slane %v14221_v16, 5  ;;  %v1358_v20 = vrot.slane %v1356_v25, 5 }
  0xa6   : > { %13045 = vmatmul.mubr.bf16.gmra.mxu0 %v11707_v46  ;;  %v1353_v49 = vor.u32 %v1352_v60, %v1348_v57  ;;  %v19892_v30 = vrot.slane %v14799_v51, 5  ;;  %v2029_v7 = vrot.slane %v14591_v63, 5  ;;  %v2023_v32 = vsel %vm14845_vm14, %v11750_v14, %v2022_v6 }
  0xa7   : > { %13128 = vmatprep.mubr.bf16.mxu0 %v11780_v1  ;;  %v1344_v41 = vrot.slane %v1343_v2, 4  ;;  %v11751_v34 = vrot.slane %v1958_v37, 9  ;;  %v11752_v35 = vrot.slane %v1959_v26, 9  ;;  %v2026_v25 = vsel %vm14845_vm14, %v2024_v36, %v2025_v59  ;;  %v14222_v26 = vld [vmem:[#allocation2] sm:$0xf] }
  0xa8   : > { %v2019_v62 = vsel %vm14845_vm14, %v2017_v61, %v19892_v30  ;;  %v1354_v42 = vrot.slane %v1353_v49, 4  ;;  %v2032_v1 = vrot.slane %v14603_v9, 5  ;;  %v2031_v46 = vrot.slane %v2029_v7, 4  ;;  %v1961_v37 = vld [vmem:[#allocation2 + $0x48] sm:$0xe]  ;;  %v13984_v9 = vld [vmem:[%s19801_s1 + $0x130] sm:$0xff]  }
  0xa9   : > { %v11781_v38 = vcombine.low %v2016_v52, %v2019_v62  ;;  %v1349_v51 = vsel %vm14380_vm8, %v1344_v41, %v1348_v57  ;;  %v2036_v63 = vrot.slane %v14689_v12, 5  ;;  %v2039_v2 = vrot.slane %v14683_v8, 5  ;;  %v1962_v61 = vld [vmem:[#allocation2 + $0x54] sm:$0xe] }
  0xaa   : > { %v1359_v14 = vsel %vm14380_vm8, %v1354_v42, %v1358_v20  ;;  %v11724_v6 = vcombine.low %v14222_v26, %v14850_v39  ;;  %v2043_v52 = vrot.slane %v14726_v18, 5  ;;  %v11782_v47 = vcombine.low %v2023_v32, %v2026_v25  ;;  %v13983_v26 = vld [vmem:[%s19801_s1 + $0xf0] sm:$0xff]  }
  0xab   : > { %v11715_v59 = vcombine.low %v1349_v51, %v1359_v14  ;;  %v14909_v56 = vsel %vm14845_vm14, %v11752_v35, %v2036_v63  ;;  %v2038_v8 = vrot.slane %v2036_v63, 4  ;;  %v2030_v57 = vsel %vm14845_vm14, %v11751_v34, %v2029_v7  ;;  %v14928_v7 = vld [vmem:[%s19801_s1 + $0x128] sm:$0xff]   ;;  %v1963_v34 = vld [vmem:[#allocation2 + $0x60] sm:$0xe]  ;;  %v14936_v63 = vld [vmem:[#allocation2 + $0x64] sm:$0xf] }
  0xac   : > { %v11753_v60 = vrot.slane %v1960_v4, 9  ;;  %v2050_v39 = vrot.slane %v14780_v22, 5  ;;  %v2033_v36 = vsel %vm14845_vm14, %v2031_v46, %v2032_v1  ;;  %v2046_v49 = vrot.slane %v14731_v33, 5  ;;  %v1964_v35 = vld [vmem:[#allocation2 + $0x6c] sm:$0xe] }
  0xad   : > { %13061 = vmatmul.mubr.bf16.gmra.mxu1 %v11715_v59  ;;  %v14918_v16 = vsel %vm14845_vm14, %v2038_v8, %v2039_v2  ;;  %v2057_v20 = vrot.slane %v14835_v44, 5  ;;  %v2045_v62 = vrot.slane %v2043_v52, 4  ;;  %v11754_v41 = vrot.slane %v1961_v37, 9  ;;  %v14224_v1 = vld [vmem:[#allocation2 + $0xc] sm:$0xf] }
  0xae   : > { %13129 = vmatmul.mubr.bf16.vlgmr.msra.gmra.mxu0 %v11781_v38  ;;  %13080 = vmatprep.mubr.bf16.mxu1 %v11724_v6  ;;  %v11784_v30 = vcombine.low %v14909_v56, %v14918_v16  ;;  %v2053_v32 = vrot.slane %v14787_v31, 5  ;;  %v2052_v33 = vrot.slane %v2050_v39, 4  ;;  %v11755_v4 = vrot.slane %v1962_v61, 9  ;;  %v14932_v38 = vld [vmem:[#allocation2 + $0x68] sm:$0x1]  ;;  %v13992_v16 = vld [vmem:[%s19801_s1 + $0x120] sm:$0xff]  }
  0xaf   : > { %13209 = vmatpush3.bf16.msra.mxu0 %v14635_v58  ;;  %13132 = vmatprep.mubr.bf16.mxu0 %v11782_v47  ;;  %v2059_v42 = vrot.slane %v2057_v20, 4  ;;  %v2060_v58 = vrot.slane %v14837_v11, 5  ;;  %v2067_v25 = vrot.slane %v14932_v38, 5  ;;  %v11725_v51 = vcombine.low %v14224_v1, %v14865_v10  ;;  %v14226_v2 = vld [vmem:[#allocation2 + $0x18] sm:$0xf]  ;;  %v13987_v1 = vld [vmem:[%s19801_s1 + $0xe8] sm:$0xff]  }
  0xb0   : > { %13210 = vmatprep.subr.bf16.mxu0 %v13984_v9  ;;  %v11783_v46 = vcombine.low %v2030_v57, %v2033_v36  ;;  %v2064_v31 = vrot.slane %v14936_v63, 5  ;;  %v11726_v14 = vcombine.low %v14226_v2, %v14868_v15  ;;  %v14945_v11 = vsel %vm14845_vm14, %v11753_v60, %v2043_v52  ;;  %v14951_v6 = vld [vmem:[#allocation2 + $0x70] sm:$0xf]  ;;  %v14965_v56 = vld [vmem:[#allocation2 + $0x24] sm:$0xf] }
  0xb1   : > { %v14949_v10 = vsel %vm14845_vm14, %v2045_v62, %v2046_v49  ;;  %v2071_v37 = vrot.slane %v14951_v6, 5  ;;  %v14957_v15 = vsel %vm14845_vm14, %v11754_v41, %v2050_v39  ;;  %v14961_v59 = vsel %vm14845_vm14, %v2052_v33, %v2053_v32  ;;  %v14986_v49 = vld [vmem:[#allocation2 + $0x60] sm:$0xf]  ;;  %v1965_v41 = vld [vmem:[#allocation2 + $0x78] sm:$0xe] }
  0xb2   : > { %v11756_v52 = vrot.slane %v1963_v34, 9  ;;  %v11757_v47 = vrot.slane %v1964_v35, 9  ;;  %v14973_v60 = vsel %vm14845_vm14, %v11755_v4, %v2057_v20  ;;  %v14977_v39 = vsel %vm14845_vm14, %v2059_v42, %v2060_v58  ;;  %v14231_v32 = vld [vmem:[%s19801_s1 + $0xf8] sm:$0xff]   ;;  %v14995_v35 = vld [vmem:[#allocation2 + $0x6c] sm:$0xf] }
  0xb3   : > { %13211 = vmatpush3.bf16.msra.mxu0 %v13984_v9  ;;  %v14963_v9 = vld [vmem:[#allocation2 + $0x28] sm:$0xf]  ;;  %v11785_v61 = vcombine.low %v14945_v11, %v14949_v10  ;;  %v2066_v62 = vrot.slane %v2064_v31, 4  ;;  %v2073_v4 = vrot.slane %v2071_v37, 4  ;;  %v14233_v42 = vld [vmem:[#allocation2 + $0x74] sm:$0x1]  ;;  %v19895_v8 = vcombine.low %v14654_v21, %v14689_v12 }
  0xb4   : > { %13212 = vmatprep.subr.bf16.mxu0 %v14928_v7  ;;  %v2074_v58 = vrot.slane %v14233_v42, 5  ;;  %v1968_v38 = vld [vmem:[#allocation2 + $0x9c] sm:$0xe]  ;;  %v15010_v2 = vsel %vm14845_vm14, %v11757_v47, %v2071_v37  ;;  %v14235_v10 = vld [vmem:[#allocation2 + $0x80] sm:$0x1]  ;;  %v2106_v34 = vrot.slane %v14812_v17, 5  ;;  %v19896_v21 = vcombine.low %v14957_v15, %v14961_v59 }
  0xb5   : > { %13081 = vmatmul.mubr.bf16.vlgmr.msra.gmra.mxu1 %v11725_v51  ;;  %v15013_v11 = vld [vmem:[#allocation2 + $0x7c] sm:$0xf]  ;;  %v15016_v42 = vld [vmem:[#allocation2 + $0x84] sm:$0xe]  ;;  %v15038_v36 = vld [vmem:[#allocation2 + $0x88] sm:$0xf] }
  0xb6   : > { %13133 = vmatmul.mubr.bf16.gmra.mxu0 %v11783_v46  ;;  %13161 = vmatpush3.bf16.msra.mxu1 %v14231_v32  ;;  %v15006_v46 = vsel %vm14845_vm14, %v11756_v52, %v2064_v31  ;;  %v2081_v32 = vrot.slane %v14235_v10, 5  ;;  %v1969_v31 = vld [vmem:[#allocation2 + $0xa8] sm:$0xe]  ;;  %v13991_v37 = vld [vmem:[%s19801_s1 + $0xe0] sm:$0xff]   ;;  %v15027_v52 = vld [vmem:[#allocation2 + $0x78] sm:$0xf]  ;;  %v15034_v33 = vsel %vm14845_vm14, %v2073_v4, %v2074_v58 }
  0xb7   : > { %13084 = vmatprep.mubr.bf16.mxu1 %v11726_v14  ;;  %13162 = vmatprep.subr.bf16.mxu1 %v13983_v26  ;;  %v11758_v14 = vrot.slane %v1965_v41, 9  ;;  %v11761_v41 = vrot.slane %v1968_v38, 9  ;;  %v2099_v10 = vrot.slane %v14739_v48, 5  ;;  %v15036_v20 = vld [vmem:[#allocation2 + $0x84] sm:$0xf]  ;;  %v2102_v38 = vrot.slane %v14747_v0, 5 }
  0xb8   : > { %13136 = vmatprep.mubr.bf16.mxu0 %v11784_v30  ;;  %13213 = vmatpush3.bf16.msra.mxu0 %v14928_v7  ;;  %v2078_v30 = vrot.slane %v15013_v11, 5  ;;  %v15025_v7 = vsel %vm14845_vm14, %v2066_v62, %v2067_v25  ;;  %v2085_v62 = vrot.slane %v15038_v36, 5  ;;  %v15043_v57 = vld [vmem:[#allocation2 + $0x90] sm:$0xe]  ;;  %v11762_v47 = vrot.slane %v1969_v31, 9  ;;  %v13996_v25 = vld [vmem:[%s19801_s1 + $0x118] sm:$0xff]  }
  0xb9   : > { %13214 = vmatprep.subr.bf16.mxu0 %v13992_v16  ;;  %v2101_v4 = vrot.slane %v2099_v10, 4  ;;  %v2109_v0 = vrot.slane %v14824_v40, 5  ;;  %v11759_v31 = vrot.slane %v15016_v42, 9  ;;  %v14239_v58 = vld [vmem:[#allocation2 + $0x8c] sm:$0x1]  ;;  %v2108_v42 = vrot.slane %v2106_v34, 4 }
  0xba   : > { %13163 = vmatpush3.bf16.msra.mxu1 %v13983_v26  ;;  %v15048_v26 = vsel %vm14845_vm14, %v11761_v41, %v2099_v10  ;;  %v2080_v51 = vrot.slane %v2078_v30, 4  ;;  %v2826_v41 = vld [vmem:[#allocation2 + $0xc] sm:$0xf]  ;;  %v19893_v10 = vcombine.low %v14965_v56, %v14963_v9  ;;  %v2088_v50 = vrot.slane %v14239_v58, 5  ;;  %v13995_v9 = vld [vmem:[%s19801_s1 + $0xd8] sm:$0xff]  }
  0xbb   : > { %13164 = vmatprep.subr.bf16.mxu1 %v13987_v1  ;;  %v15069_v40 = vsel %vm14845_vm14, %v2101_v4, %v2102_v38  ;;  %v2087_v56 = vrot.slane %v2085_v62, 4  ;;  %v11760_v12 = vrot.slane %v15043_v57, 9  ;;  %v2875_v38 = vshrl.u32 %v2826_v41, 16  ;;  %v2829_v57 = vld [vmem:[#allocation2 + $0x18] sm:$0xf] }
  0xbc   : > { %13215 = vmatpush3.bf16.msra.mxu0 %v13992_v16  ;;  %v15064_v16 = vsel %vm14845_vm14, %v11758_v14, %v2078_v30  ;;  %v15086_v30 = vsel %vm14845_vm14, %v11762_v47, %v2106_v34  ;;  %v2878_v4 = vshll.u32 %v2826_v41, 16  ;;  %v15097_v58 = vsel %vm14845_vm14, %v2080_v51, %v2081_v32  ;;  %v15105_v47 = vld [vmem:[#allocation2 + $0x1c] sm:$0xf]  ;;  %v1970_v51 = vld [vmem:[#allocation2 + $0xb4] sm:$0xe] }
  0xbd   : > { %13085 = vmatmul.mubr.bf16.gmra.mxu1 %v19893_v10  ;;  %13216 = vmatprep.subr.bf16.mxu0 %v13996_v25  ;;  %v15101_v34 = vsel %vm14845_vm14, %v2108_v42, %v2109_v0  ;;  %v2884_v15 = vshll.u32 %v15071_v24, 16  ;;  %v2888_v59 = vshrl.u32 %v15071_v24, 16  ;;  %v2877_v32 = vrot.slane %v2875_v38, 4 }
  0xbe   : > { %13137 = vmatmul.mubr.bf16.gmra.mxu0 %v11785_v61  ;;  %13088 = vmatprep.mubr.bf16.mxu1 %v19895_v8  ;;  %v14000_v61 = vld [vmem:[%s19801_s1 + $0x110] sm:$0xff]   ;;  %v2092_v8 = vrot.slane %v14704_v45, 5  ;;  %v11788_v45 = vcombine.low %v15006_v46, %v15025_v7  ;;  %v2880_v10 = vrot.slane %v2878_v4, 5  ;;  %v15115_v42 = vsel %vm14845_vm14, %v11759_v31, %v2085_v62  ;;  %v14004_v7 = vld [vmem:[%s19801_s1 + $0x108] sm:$0xff]  }
  0xbf   : > { %13165 = vmatpush3.bf16.msra.mxu1 %v13987_v1  ;;  %13140 = vmatprep.mubr.bf16.mxu0 %v19896_v21  ;;  %v15093_v1 = vld [vmem:[#allocation2 + $0x14] sm:$0x1]  ;;  %v2095_v46 = vrot.slane %v14712_v54, 5  ;;  %v15131_v31 = vsel %vm14845_vm14, %v2087_v56, %v2088_v50  ;;  %v2832_v54 = vld [vmem:[#allocation2 + $0x24] sm:$0xf]  ;;  %v15138_v0 = vrot.slane %v2884_v15, 5  ;;  %v19899_v62 = vcombine.low %v14724_v13, %v14726_v18 }
  0xc0   : > { %13166 = vmatprep.subr.bf16.mxu1 %v13991_v37  ;;  %19897 = vst [vmem:[#allocation12_spill] sm:$0xff] %v15093_v1  ;;  %13217 = vmatpush3.bf16.msra.mxu0 %v13996_v25  ;;  %v13999_v21 = vld [vmem:[%s19801_s1 + $0xd0] sm:$0xff]   ;;  %v15125_v25 = vld [vmem:[#allocation2 + $0x20] sm:$0x1]  ;;  %v2094_v38 = vrot.slane %v2092_v8, 4  ;;  %v2894_v4 = vshll.u32 %v15093_v1, 16  ;;  %v15136_v41 = vsel %vm14845_vm14, %v11760_v12, %v2092_v8  ;;  %v2881_v14 = vor.u32 %v2880_v10, %v2877_v32 }
  0xc1   : > { %13218 = vmatprep.subr.bf16.mxu0 %v14000_v61  ;;  %v2890_v24 = vrot.slane %v2888_v59, 4  ;;  %v19900_v50 = vcombine.low %v14973_v60, %v14977_v39  ;;  %v2899_v56 = vshrl.u32 %v2829_v57, 16  ;;  %v2902_v1 = vshll.u32 %v2829_v57, 16  ;;  %v14003_v13 = vld [vmem:[%s19801_s1 + $0xc8] sm:$0xff]   ;;  %v14008_v39 = vld [vmem:[%s19801_s1 + $0x100] sm:$0xff]  }
  0xc2   : > { %v2912_v12 = vshrl.u32 %v15105_v47, 16  ;;  %v19901_v8 = vcombine.low %v14767_v43, %v14780_v22  ;;  %v11763_v18 = vrot.slane %v1970_v51, 9  ;;  %v2116_v60 = vrot.slane %v14873_v27, 5  ;;  %v2835_v32 = vld [vmem:[#allocation2 + $0x30] sm:$0xf] }
  0xc3   : > { %13167 = vmatpush3.bf16.msra.mxu1 %v13991_v37  ;;  %v2113_v37 = vrot.slane %v14871_v55, 5  ;;  %v2908_v55 = vshll.u32 %v15105_v47, 16  ;;  %v2923_v59 = vshrl.u32 %v2832_v54, 16  ;;  %v15160_v57 = vrot.slane %v2894_v4, 5 }
  0xc4   : > { %13168 = vmatprep.subr.bf16.mxu1 %v13995_v9  ;;  %13219 = vmatpush3.bf16.msra.mxu0 %v14000_v61  ;;  %v2918_v43 = vshll.u32 %v15125_v25, 16  ;;  %v2926_v22 = vshll.u32 %v2832_v54, 16  ;;  %v15166_v51 = vsel %vm14845_vm14, %v2094_v38, %v2095_v46  ;;  %v15168_v27 = vrot.slane %v2881_v14, 4 }
  0xc5   : > { %13089 = vmatmul.mubr.bf16.gmra.mxu1 %v19899_v62  ;;  %v2115_v15 = vrot.slane %v2113_v37, 4  ;;  %13220 = vmatprep.subr.bf16.mxu0 %v14004_v7  ;;  %v2891_v10 = vor.u32 %v2890_v24, %v15138_v0  ;;  %v2936_v61 = vshrl.u32 %v15140_v19, 16  ;;  %v2901_v62 = vrot.slane %v2899_v56, 4  ;;  %v14007_v24 = vld [vmem:[%s19801_s1 + $0xc0] sm:$0xff]   ;;  %v2838_v56 = vld [vmem:[#allocation2 + $0x3c] sm:$0xf] }
  0xc6   : > { %13141 = vmatmul.mubr.bf16.gmra.mxu0 %v19900_v50  ;;  %13092 = vmatprep.mubr.bf16.mxu1 %v19901_v8  ;;  %v2904_v25 = vrot.slane %v2902_v1, 5  ;;  %v15174_v4 = vrot.slane %v2908_v55, 5  ;;  %v2914_v54 = vrot.slane %v2912_v12, 4  ;;  %v15176_v50 = vld [vmem:[#allocation2 + $0x34] sm:$0xf]  ;;  %v15180_v46 = vsel %vm14845_vm14, %v11763_v18, %v2113_v37  ;;  %v15192_v55 = vld [vmem:[%s19801_s1 + $0x1b8] sm:$0xff]  }
  0xc7   : > { %13144 = vmatprep.mubr.bf16.mxu0 %v11788_v45  ;;  %13169 = vmatpush3.bf16.msra.mxu1 %v13995_v9  ;;  %v2932_v45 = vshll.u32 %v15140_v19, 16  ;;  %v15171_v9 = vld [vmem:[#allocation2 + $0x2c] sm:$0x1]  ;;  %19902 = vst [vmem:[#allocation14_spill] sm:$0xff] %v15176_v50  ;;  %v15184_v14 = vsel %vm14845_vm14, %v2115_v15, %v2116_v60  ;;  %v2925_v1 = vrot.slane %v2923_v59, 4  ;;  %v2947_v38 = vshrl.u32 %v2835_v32, 16 }
  0xc8   : > { %13170 = vmatprep.subr.bf16.mxu1 %v13999_v21  ;;  %v15194_v12 = vld [vmem:[#allocation2 + $0x40] sm:$0xf]  ;;  %13221 = vmatpush3.bf16.msra.mxu0 %v14004_v7  ;;  %v2928_v37 = vrot.slane %v2926_v22, 5  ;;  %v2938_v18 = vrot.slane %v2936_v61, 4  ;;  %v2950_v15 = vshll.u32 %v2835_v32, 16  ;;  %v11791_v60 = vcombine.low %v15115_v42, %v15131_v31 }
  0xc9   : > { %v15196_v8 = vrot.slane %v2932_v45, 5  ;;  %v15202_v19 = vld [vmem:[#allocation2 + $0x90] sm:$0xf]  ;;  %13222 = vmatprep.subr.bf16.mxu0 %v14008_v39  ;;  %v2960_v7 = vshrl.u32 %v15176_v50, 16  ;;  %v19903_v22 = vcombine.low %v14829_v3, %v14835_v44  ;;  %v19904_v42 = vcombine.low %v15010_v2, %v15034_v33  ;;  %v15218_v59 = vld [vmem:[#allocation2 + $0x38] sm:$0x1] }
  0xca   : > { %v15214_v31 = vrot.slane %v2891_v10, 4  ;;  %v2905_v45 = vor.u32 %v2904_v25, %v2901_v62  ;;  %v2915_v32 = vor.u32 %v2914_v54, %v15174_v4  ;;  %v2942_v61 = vshll.u32 %v15171_v9, 16  ;;  %v2841_v62 = vld [vmem:[#allocation2 + $0x48] sm:$0xf] }
  0xcb   : > { %13171 = vmatpush3.bf16.msra.mxu1 %v13999_v21  ;;  %v2956_v21 = vshll.u32 %v15176_v50, 16  ;;  %v19905_v50 = vcombine.low %v14986_v49, %v14936_v63  ;;  %v19906_v3 = vcombine.low %v15064_v16, %v15097_v58  ;;  %v11792_v44 = vcombine.low %v15136_v41, %v15166_v51  ;;  %v15236_v16 = vld [vmem:[%s19801_s1 + $0x178] sm:$0xff]   ;;  %v15331_v33 = vld [vmem:[#allocation2 + $0x68] sm:$0x1] }
  0xcc   : > { %13172 = vmatprep.subr.bf16.mxu1 %v14003_v13  ;;  %v2949_v2 = vrot.slane %v2947_v38, 4  ;;  %v2952_v10 = vrot.slane %v2950_v15, 5  ;;  %13223 = vmatpush3.bf16.msra.mxu0 %v14008_v39  ;;  %v15230_v25 = vrot.slane %v2918_v43, 5  ;;  %v2971_v54 = vshrl.u32 %v2838_v56, 16  ;;  %v15242_v39 = vld [vmem:[#allocation2 + $0x44] sm:$0x1] }
  0xcd   : > { %13093 = vmatmul.mubr.bf16.gmra.mxu1 %v19903_v22  ;;  %v2974_v63 = vshll.u32 %v2838_v56, 16  ;;  %v2980_v49 = vshll.u32 %v15194_v12, 16  ;;  %13304 = vmatprep.subr.bf16.mxu0 %v15192_v55  ;;  %v2929_v58 = vor.u32 %v2928_v37, %v2925_v1  ;;  %v2939_v41 = vor.u32 %v2938_v18, %v15196_v8 }
  0xce   : > { %13145 = vmatmul.mubr.bf16.gmra.mxu0 %v19904_v42  ;;  %13096 = vmatprep.mubr.bf16.mxu1 %v19905_v50  ;;  %v15240_v51 = vrot.slane %v2956_v21, 5  ;;  %v2887_v43 = vsel %vm14380_vm8, %v15168_v27, %v15138_v0  ;;  %v15248_v50 = vrot.slane %v2905_v45, 4  ;;  %v15250_v38 = vrot.slane %v2915_v32, 4  ;;  %v15258_v42 = vld [vmem:[#allocation2 + $0x4c] sm:$0xf] }
  0xcf   : > { %13148 = vmatprep.mubr.bf16.mxu0 %v19906_v3  ;;  %13173 = vmatpush3.bf16.msra.mxu1 %v14003_v13  ;;  %v2962_v13 = vrot.slane %v2960_v7, 4  ;;  %v2966_v56 = vshll.u32 %v15218_v59, 16  ;;  %v15253_v15 = vrot.slane %v2942_v61, 5  ;;  %v2953_v1 = vor.u32 %v2952_v10, %v2949_v2  ;;  %v2844_v10 = vld [vmem:[#allocation2 + $0x54] sm:$0xf] }
  0xd0   : > { %13174 = vmatprep.subr.bf16.mxu1 %v14007_v24  ;;  %v2984_v37 = vshrl.u32 %v15194_v12, 16  ;;  %v2995_v18 = vshrl.u32 %v2841_v62, 16  ;;  %v2973_v21 = vrot.slane %v2971_v54, 4  ;;  %v2976_v7 = vrot.slane %v2974_v63, 5 }
  0xd1   : > { %v15256_v22 = vrot.slane %v2980_v49, 5  ;;  %v2998_v3 = vshll.u32 %v2841_v62, 16  ;;  %v15261_v45 = vrot.slane %v2929_v58, 4  ;;  %v15263_v32 = vrot.slane %v2939_v41, 4  ;;  %v15280_v58 = vld [vmem:[#allocation2 + $0x50] sm:$0x1] }
  0xd2   : > { %v2963_v61 = vor.u32 %v2962_v13, %v15240_v51  ;;  %v2986_v2 = vrot.slane %v2984_v37, 4  ;;  %v2897_v62 = vsel %vm14380_vm8, %v15214_v31, %v15160_v57  ;;  %v2911_v54 = vsel %vm14380_vm8, %v15248_v50, %v15174_v4  ;;  %v15282_v41 = vld [vmem:[#allocation2 + $0x58] sm:$0xf] }
  0xd3   : > { %13175 = vmatpush3.bf16.msra.mxu1 %v14007_v24  ;;  %v19907_v24 = vcombine.low %v14995_v35, %v14951_v6  ;;  %v15277_v63 = vrot.slane %v2966_v56, 5  ;;  %v2990_v49 = vshll.u32 %v15242_v39, 16  ;;  %v19908_v6 = vcombine.low %v15027_v52, %v15013_v11 }
  0xd4   : > { %13256 = vmatprep.subr.bf16.mxu1 %v15236_v16  ;;  %v2997_v35 = vrot.slane %v2995_v18, 4  ;;  %v3000_v57 = vrot.slane %v2998_v3, 5  ;;  %v3008_v31 = vshrl.u32 %v15258_v42, 16  ;;  %v2954_v4 = vrot.slane %v2953_v1, 4  ;;  %v2847_v18 = vld [vmem:[#allocation2 + $0x60] sm:$0xf] }
  0xd5   : > { %13097 = vmatmul.mubr.bf16.gmra.mxu1 %v19907_v24  ;;  %v2977_v13 = vor.u32 %v2976_v7, %v2973_v21  ;;  %v2987_v50 = vor.u32 %v2986_v2, %v15256_v22  ;;  %v3019_v56 = vshrl.u32 %v2844_v10, 16  ;;  %v2921_v37 = vsel %vm14380_vm8, %v15250_v38, %v15230_v25  ;;  %v15304_v7 = vld [vmem:[#allocation2 + $0x5c] sm:$0x1] }
  0xd6   : > { %13149 = vmatmul.mubr.bf16.gmra.mxu0 %v11791_v60  ;;  %13100 = vmatprep.mubr.bf16.mxu1 %v19908_v6  ;;  %v3004_v60 = vshll.u32 %v15258_v42, 16  ;;  %v2935_v11 = vsel %vm14380_vm8, %v15261_v45, %v15196_v8  ;;  %v2964_v52 = vrot.slane %v2963_v61, 4  ;;  %v2945_v1 = vsel %vm14380_vm8, %v15263_v32, %v15253_v15  ;;  %v15311_v61 = vld [vmem:[#allocation2 + $0x64] sm:$0xf] }
  0xd7   : > { %13152 = vmatprep.mubr.bf16.mxu0 %v11792_v44  ;;  %v3022_v44 = vshll.u32 %v2844_v10, 16  ;;  %v15302_v21 = vrot.slane %v2990_v49, 5  ;;  %v3028_v3 = vshll.u32 %v15282_v41, 16  ;;  %v3032_v25 = vshrl.u32 %v15282_v41, 16 }
  0xd8   : > { %v3001_v38 = vor.u32 %v3000_v57, %v2997_v35  ;;  %v15308_v2 = vrot.slane %v3004_v60, 5  ;;  %v3010_v8 = vrot.slane %v3008_v31, 4  ;;  %v3014_v45 = vshll.u32 %v15280_v58, 16  ;;  %v2850_v60 = vld [vmem:[#allocation2 + $0x6c] sm:$0xf] }
  0xd9   : > { %v15313_v10 = vrot.slane %v2977_v13, 4  ;;  %v15315_v24 = vrot.slane %v2987_v50, 4  ;;  %v3021_v15 = vrot.slane %v3019_v56, 4  ;;  %v3043_v32 = vshrl.u32 %v2847_v18, 16 }
  0xda   : > { %v2959_v49 = vsel %vm14380_vm8, %v2954_v4, %v15240_v51  ;;  %v2969_v6 = vsel %vm14380_vm8, %v2964_v52, %v15277_v63  ;;  %v3024_v35 = vrot.slane %v3022_v44, 5  ;;  %v3046_v57 = vshll.u32 %v2847_v18, 16  ;;  %v15347_v44 = vld [vmem:[#allocation2 + $0x70] sm:$0xf] }
  0xdb   : > { %v19909_v31 = vcombine.low %v15036_v20, %v15038_v36  ;;  %v19910_v13 = vcombine.low %v15048_v26, %v15069_v40  ;;  %v15329_v50 = vrot.slane %v3028_v3, 5  ;;  %v3034_v56 = vrot.slane %v3032_v25, 4 }
  0xdc   : > { %v3052_v51 = vshll.u32 %v15311_v61, 16  ;;  %v3056_v63 = vshrl.u32 %v15311_v61, 16  ;;  %v19911_v4 = vcombine.low %v15202_v19, %v15200_v23  ;;  %v19912_v36 = vcombine.low %v15086_v30, %v15101_v34 }
  0xdd   : > { %13101 = vmatmul.mubr.bf16.gmra.mxu1 %v19909_v31  ;;  %v15341_v20 = vrot.slane %v3001_v38, 4  ;;  %v3011_v26 = vor.u32 %v3010_v8, %v15308_v2  ;;  %v15344_v40 = vrot.slane %v3014_v45, 5  ;;  %v3038_v52 = vshll.u32 %v15304_v7, 16  ;;  %v2853_v8 = vld [vmem:[#allocation2 + $0x78] sm:$0xf] }
  0xde   : > { %13153 = vmatmul.mubr.bf16.gmra.mxu0 %v19910_v13  ;;  %13104 = vmatprep.mubr.bf16.mxu1 %v19911_v4  ;;  %v3045_v18 = vrot.slane %v3043_v32, 4  ;;  %v3048_v3 = vrot.slane %v3046_v57, 5  ;;  %v15349_v25 = vrot.slane %v3052_v51, 5  ;;  %v3067_v19 = vshrl.u32 %v2850_v60, 16  ;;  %v15359_v57 = vld [vmem:[#allocation2 + $0x7c] sm:$0xf] }
  0xdf   : > { %13156 = vmatprep.mubr.bf16.mxu0 %v19912_v36  ;;  %v11860_v23 = vcombine.low %v2887_v43, %v2897_v62  ;;  %v3025_v30 = vor.u32 %v3024_v35, %v3021_v15  ;;  %v3058_v34 = vrot.slane %v3056_v63, 4  ;;  %v3062_v38 = vshll.u32 %v15331_v33, 16  ;;  %19913 = vst [vmem:[#allocation15_spill] sm:$0xff] %v15359_v57  ;;  %v15369_v62 = vld [vmem:[#allocation2 + $0x74] sm:$0x1] }
  0xe0   : > { %v11861_v45 = vcombine.low %v2911_v54, %v2921_v37  ;;  %v3035_v31 = vor.u32 %v3034_v56, %v15329_v50  ;;  %v3070_v13 = vshll.u32 %v2850_v60, 16  ;;  %v3076_v32 = vshll.u32 %v15347_v44, 16  ;;  %19914 = vst [vmem:[#allocation16_spill] sm:$0xff] %v15369_v62  ;;  %v15375_v60 = vld [vmem:[#allocation2 + $0x80] sm:$0x1] }
  0xe1   : > { %v15361_v51 = vcombine.low %v2935_v11, %v2945_v1  ;;  %v15363_v4 = vcombine.low %v2959_v49, %v2969_v6  ;;  %v15365_v36 = vrot.slane %v3011_v26, 4  ;;  %v3080_v0 = vshrl.u32 %v15347_v44, 16  ;;  %19915 = vst [vmem:[#allocation17_spill] sm:$0xff] %v15375_v60 }
  0xe2   : > { %v3049_v27 = vor.u32 %v3048_v3, %v3045_v18  ;;  %v3059_v43 = vor.u32 %v3058_v34, %v15349_v25  ;;  %v3069_v54 = vrot.slane %v3067_v19, 4  ;;  %v3072_v37 = vrot.slane %v3070_v13, 5  ;;  %v2856_v18 = vld [vmem:[#allocation2 + $0x84] sm:$0xf]  ;;  %v15402_v19 = vld [vmem:[#allocation2 + $0x88] sm:$0xf] }
  0xe3   : > { %v15371_v15 = vrot.slane %v3025_v30, 4  ;;  %v15373_v35 = vrot.slane %v3038_v52, 5  ;;  %v3091_v11 = vshrl.u32 %v2853_v8, 16  ;;  %v3094_v1 = vshll.u32 %v2853_v8, 16  ;;  %19919 = vst [vmem:[#allocation18_spill] sm:$0xff] %v15402_v19  ;;  %v14009_v34 = vld [vmem:[#allocation2 + $0xc] sm:$0xff]  }
  0xe4   : > { %v19916_v49 = vcombine.low %v14743_v53, %v14739_v48  ;;  %v19917_v6 = vcombine.low %v15180_v46, %v15184_v14  ;;  %v15383_v56 = vrot.slane %v3035_v31, 4  ;;  %v15385_v63 = vrot.slane %v3062_v38, 5 }
  0xe5   : > { %v15387_v26 = vrot.slane %v3076_v32, 5  ;;  %v3100_v52 = vshll.u32 %v15359_v57, 16  ;;  %v19918_v3 = vcombine.low %v14818_v29, %v14812_v17  ;;  %v2983_v48 = vsel %vm14380_vm8, %v15313_v10, %v15256_v22 }
  0xe6   : > { %13105 = vmatmul.mubr.bf16.gmra.mxu1 %v19916_v49  ;;  %13157 = vmatmul.mubr.bf16.gmra.mxu0 %v19917_v6  ;;  %v2993_v53 = vsel %vm14380_vm8, %v15315_v24, %v15302_v21  ;;  %v3082_v46 = vrot.slane %v3080_v0, 4  ;;  %v3104_v14 = vshrl.u32 %v15359_v57, 16  ;;  %v15404_v30 = vrot.slane %v3049_v27, 4  ;;  %v14016_v21 = vld [vmem:[%s19801_s1 + $0x1b0] sm:$0xff]  }
  0xe7   : > { %13108 = vmatprep.mubr.bf16.mxu1 %v19918_v3  ;;  %13224 = vmatprep.mubr.bf16.mxu0 %v11860_v23  ;;  %v15406_v17 = vrot.slane %v3059_v43, 4  ;;  %v3073_v29 = vor.u32 %v3072_v37, %v3069_v54  ;;  %v3086_v23 = vshll.u32 %v15369_v62, 16  ;;  %v3093_v38 = vrot.slane %v3091_v11, 4  ;;  %v2859_v0 = vld [vmem:[#allocation2 + $0x90] sm:$0xf]  ;;  %v19922_v43 = vld [vmem:[#allocation10_spill] sm:$0xff] }
  0xe8   : > { %v3096_v22 = vrot.slane %v3094_v1, 5  ;;  %v3110_v10 = vshll.u32 %v15375_v60, 16  ;;  %v3115_v8 = vshrl.u32 %v2856_v18, 16  ;;  %v15413_v24 = vrot.slane %v3100_v52, 5  ;;  %v15427_v11 = vld [vmem:[#allocation2 + $0x8c] sm:$0x1] }
  0xe9   : > { %v3106_v31 = vrot.slane %v3104_v14, 4  ;;  %v3118_v13 = vshll.u32 %v2856_v18, 16  ;;  %v3124_v32 = vshll.u32 %v15402_v19, 16  ;;  %v15416_v27 = vcombine.low %v2983_v48, %v2993_v53  ;;  %19920 = vst [vmem:[#allocation19_spill] sm:$0xff] %v15427_v11  ;;  %v15429_v1 = vld [vmem:[#allocation2 + $0x94] sm:$0xf] }
  0xea   : > { %v3083_v37 = vor.u32 %v3082_v46, %v15387_v26  ;;  %19921 = vst [vmem:[#allocation20_spill] sm:$0xff] %v15429_v1  ;;  %v3117_v49 = vrot.slane %v3115_v8, 4  ;;  %v3128_v18 = vshrl.u32 %v15402_v19, 16  ;;  %v15434_v3 = vrot.slane %v3073_v29, 4  ;;  %v15444_v46 = vld [vmem:[%s19801_s1 + $0x1a8] sm:$0xff]   ;;  %v14021_v62 = vld [vmem:[#allocation2 + $0x54] sm:$0xff]  }
  0xeb   : > { %v3120_v6 = vrot.slane %v3118_v13, 5  ;;  %v15431_v52 = vrot.slane %v3124_v32, 5  ;;  %v15436_v48 = vrot.slane %v3086_v23, 5  ;;  %v3139_v53 = vshrl.u32 %v2859_v0, 16  ;;  %v15447_v29 = vld [vmem:[#allocation2 + $0x98] sm:$0x1] }
  0xec   : > { %v3142_v14 = vshll.u32 %v2859_v0, 16  ;;  %v19923_v54 = vcombine.low %v14859_v5, %v19922_v43  ;;  %v3097_v8 = vor.u32 %v3096_v22, %v3093_v38  ;;  %v3107_v13 = vor.u32 %v3106_v31, %v15413_v24  ;;  %19924 = vst [vmem:[#allocation10_spill] sm:$0xff] %v15447_v29 }
  0xed   : > { %v3130_v32 = vrot.slane %v3128_v18, 4  ;;  %v3148_v23 = vshll.u32 %v15429_v1, 16  ;;  %v15451_v0 = vrot.slane %v3083_v37, 4  ;;  %v3141_v5 = vrot.slane %v3139_v53, 4  ;;  %v2862_v18 = vld [vmem:[#allocation2 + $0x9c] sm:$0xf] }
  0xee   : > { %13109 = vmatmul.mubr.bf16.gmra.mxu1 %v19923_v54  ;;  %13225 = vmatmul.mubr.bf16.vlgmr.msra.gmra.mxu0 %v11861_v45  ;;  %v3144_v45 = vrot.slane %v3142_v14, 5  ;;  %v3152_v43 = vshrl.u32 %v15429_v1, 16  ;;  %v15455_v38 = vrot.slane %v3110_v10, 5  ;;  %v3121_v22 = vor.u32 %v3120_v6, %v3117_v49  ;;  %v14013_v37 = vld [vmem:[#allocation2 + $0x24] sm:$0xff]  }
  0xef   : > { %13176 = vmatprep.mubr.bf16.mxu1 %v14009_v34  ;;  %13305 = vmatpush3.bf16.msra.mxu0 %v15192_v55  ;;  %v3131_v31 = vor.u32 %v3130_v32, %v15431_v52  ;;  %v3134_v54 = vshll.u32 %v15427_v11, 16  ;;  %v15459_v34 = vld [vmem:[#allocation2 + $0xa0] sm:$0xf]  ;;  %v14010_v55 = vld [vmem:[#allocation2 + $0x18] sm:$0xff]   ;;  %v15461_v53 = vrot.slane %v3148_v23, 5  ;;  %v3163_v1 = vshrl.u32 %v2862_v18, 16 }
  0xf0   : > { %13228 = vmatprep.mubr.bf16.mxu0 %v15361_v51  ;;  %13306 = vmatprep.subr.bf16.mxu0 %v14016_v21  ;;  %19925 = vst [vmem:[#allocation21_spill] sm:$0xff] %v15459_v34  ;;  %v3145_v19 = vor.u32 %v3144_v45, %v3141_v5  ;;  %v3154_v14 = vrot.slane %v3152_v43, 4  ;;  %v14015_v51 = vld [vmem:[%s19801_s1 + $0x170] sm:$0xff]   ;;  %v15466_v10 = vrot.slane %v3097_v8, 4  ;;  %v15468_v49 = vrot.slane %v3107_v13, 4 }
  0xf1   : > { %v3166_v6 = vshll.u32 %v2862_v18, 16  ;;  %v3172_v32 = vshll.u32 %v15459_v34, 16  ;;  %v3031_v23 = vsel %vm14380_vm8, %v15371_v15, %v15329_v50  ;;  %v3041_v5 = vsel %vm14380_vm8, %v15383_v56, %v15373_v35  ;;  %v15480_v8 = vld [vmem:[#allocation2 + $0xa4] sm:$0x1]  ;;  %v2865_v50 = vld [vmem:[#allocation2 + $0xa8] sm:$0xf] }
  0xf2   : > { %v3158_v45 = vshll.u32 %v15447_v29, 16  ;;  %19926 = vst [vmem:[#allocation22_spill] sm:$0xff] %v15480_v8  ;;  %v3165_v13 = vrot.slane %v3163_v1, 4  ;;  %v15483_v43 = vrot.slane %v3134_v54, 5  ;;  %v3176_v11 = vshrl.u32 %v15459_v34, 16  ;;  %v14024_v15 = vld [vmem:[%s19801_s1 + $0x1a0] sm:$0xff]  }
  0xf3   : > { %13307 = vmatpush3.bf16.msra.mxu0 %v14016_v21  ;;  %v3168_v21 = vrot.slane %v3166_v6, 5  ;;  %v15485_v18 = vrot.slane %v3172_v32, 5  ;;  %v15491_v35 = vrot.slane %v3121_v22, 4  ;;  %v15493_v56 = vrot.slane %v3131_v31, 4  ;;  %v15498_v54 = vld [vmem:[#allocation2 + $0xac] sm:$0xf] }
  0xf4   : > { %13308 = vmatprep.subr.bf16.mxu0 %v15444_v46  ;;  %v15495_v29 = vrot.slane %v3145_v19, 4  ;;  %v3155_v1 = vor.u32 %v3154_v14, %v15461_v53  ;;  %19927 = vst [vmem:[#allocation23_spill] sm:$0xff] %v15498_v54  ;;  %v3178_v6 = vrot.slane %v3176_v11, 4  ;;  %v3182_v32 = vshll.u32 %v15480_v8, 16  ;;  %v14019_v19 = vld [vmem:[%s19801_s1 + $0x168] sm:$0xff]  }
  0xf5   : > { %v3187_v34 = vshrl.u32 %v2865_v50, 16  ;;  %v3190_v60 = vshll.u32 %v2865_v50, 16  ;;  %v15506_v22 = vrot.slane %v3158_v45, 5  ;;  %v3169_v31 = vor.u32 %v3168_v21, %v3165_v13  ;;  %v15520_v45 = vld [vmem:[#allocation2 + $0xb0] sm:$0x1]  ;;  %v14017_v13 = vld [vmem:[#allocation2 + $0x3c] sm:$0xff]  }
  0xf6   : > { %13177 = vmatmul.mubr.bf16.vlgmr.msra.gmra.mxu1 %v14010_v55  ;;  %13229 = vmatmul.mubr.bf16.gmra.mxu0 %v15363_v4  ;;  %v3196_v14 = vshll.u32 %v15498_v54, 16  ;;  %v3200_v55 = vshrl.u32 %v15498_v54, 16  ;;  %v14014_v4 = vld [vmem:[#allocation2 + $0x30] sm:$0xff]   ;;  %v3065_v11 = vsel %vm14380_vm8, %v15406_v17, %v15385_v63  ;;  %19928 = vst [vmem:[#allocation24_spill] sm:$0xff] %v15520_v45  ;;  %v19930_v63 = vsel %vm14380_vm8, %v15341_v20, %v15308_v2  ;;  %v14023_v17 = vld [vmem:[%s19801_s1 + $0x160] sm:$0xff]  }
  0xf7   : > { %13257 = vmatpush3.bf16.msra.mxu1 %v15236_v16  ;;  %13180 = vmatprep.mubr.bf16.mxu1 %v14013_v37  ;;  %v3055_v16 = vsel %vm14380_vm8, %v15404_v30, %v15349_v25  ;;  %v3179_v37 = vor.u32 %v3178_v6, %v15485_v18  ;;  %v3189_v21 = vrot.slane %v3187_v34, 4  ;;  %v3192_v50 = vrot.slane %v3190_v60, 5  ;;  %v2868_v34 = vld [vmem:[#allocation2 + $0xb4] sm:$0xf]  ;;  %v15548_v2 = vld [vmem:[#allocation2 + $0xbc] sm:$0x1] }
  0xf8   : > { %13258 = vmatprep.subr.bf16.mxu1 %v14015_v51  ;;  %13232 = vmatprep.mubr.bf16.mxu0 %v15416_v27  ;;  %v15523_v27 = vrot.slane %v3196_v14, 5  ;;  %v3202_v54 = vrot.slane %v3200_v55, 4  ;;  %v19929_v25 = vsel %vm14380_vm8, %v15365_v36, %v15344_v40  ;;  %v15538_v60 = vrot.slane %v3155_v1, 4  ;;  %v15546_v36 = vld [vmem:[#allocation2 + $0xb8] sm:$0xf]  ;;  %19932 = vst [vmem:[#allocation26_spill] sm:$0xff] %v15548_v2 }
  0xf9   : > { %13309 = vmatpush3.bf16.msra.mxu0 %v15444_v46  ;;  %v11865_v30 = vcombine.low %v19930_v63, %v19929_v25  ;;  %v15540_v46 = vrot.slane %v3182_v32, 5  ;;  %v11866_v6 = vcombine.low %v3031_v23, %v3041_v5  ;;  %v15542_v14 = vcombine.low %v3055_v16, %v3065_v11  ;;  %19931 = vst [vmem:[#allocation25_spill] sm:$0xff] %v15546_v36  ;;  %v14028_v23 = vld [vmem:[%s19801_s1 + $0x198] sm:$0xff]   ;;  %v15559_v5 = vld [vmem:[%s19801_s1 + $0x190] sm:$0xff]  }
  0xfa   : > { %13310 = vmatprep.subr.bf16.mxu0 %v14024_v15  ;;  %v15544_v40 = vrot.slane %v3169_v31, 4  ;;  %v3211_v20 = vshrl.u32 %v2868_v34, 16  ;;  %v3206_v55 = vshll.u32 %v15520_v45, 16  ;;  %v3214_v1 = vshll.u32 %v2868_v34, 16  ;;  %v470_v34 = vld [vmem:[%s14352_s7 + $0x78] sm:$0xf] }
  0xfb   : > { %13259 = vmatpush3.bf16.msra.mxu1 %v14015_v51  ;;  %v3220_v32 = vshll.u32 %v15546_v36, 16  ;;  %v3224_v25 = vshrl.u32 %v15546_v36, 16  ;;  %v283_v51 = vld [vmem:[#allocation2 + $0xc0] sm:$0x1]  ;;  %v15561_v31 = vrot.slane %v3179_v37, 4  ;;  %v3193_v16 = vor.u32 %v3192_v50, %v3189_v21 }
  0xfc   : > { %13260 = vmatprep.subr.bf16.mxu1 %v14019_v19  ;;  %v3203_v11 = vor.u32 %v3202_v54, %v15523_v27  ;;  %v3213_v63 = vrot.slane %v3211_v20, 4  ;;  %v3216_v36 = vrot.slane %v3214_v1, 5  ;;  %v3230_v57 = vshll.u32 %v15548_v2, 16  ;;  %v471_v37 = vld [vmem:[%s14352_s7 + $0x7c] sm:$0xf] }
  0xfd   : > { %13311 = vmatpush3.bf16.msra.mxu0 %v14024_v15  ;;  %v15568_v15 = vld [vmem:[%s19801_s1 + $0x158] sm:$0xff]   ;;  %v15570_v45 = vrot.slane %v3220_v32, 5  ;;  %v3226_v8 = vrot.slane %v3224_v25, 4  ;;  %v3079_v54 = vsel %vm14380_vm8, %v15434_v3, %v15387_v26  ;;  %v284_v50 = vsel %vm14359_vm5, 0, %v283_v51  ;;  %v333_v20 = vld [vmem:[#allocation2 + $0xc8] sm:$0x1] }
  0xfe   : > { %13181 = vmatmul.mubr.bf16.gmra.mxu1 %v14014_v4  ;;  %13233 = vmatmul.mubr.bf16.gmra.mxu0 %v11865_v30  ;;  %v3089_v4 = vsel %vm14380_vm8, %v15451_v0, %v15436_v48  ;;  %v730_v30 = vshrl.u32 %v470_v34, 16  ;;  %v15584_v1 = vrot.slane %v3206_v55, 5  ;;  %285 = vst [vmem:[#allocation2 + $0xc0] sm:$0x1] %v284_v50  ;;  %v19934_v32 = vld [vmem:[#allocation11_spill] sm:$0xff]  ;;  %v733_v25 = vshll.u32 %v470_v34, 16 }
  0xff   : > { %13184 = vmatprep.mubr.bf16.mxu1 %v14017_v13  ;;  %13261 = vmatpush3.bf16.msra.mxu1 %v14019_v19  ;;  %v3217_v19 = vor.u32 %v3216_v36, %v3213_v63  ;;  %v3227_v13 = vor.u32 %v3226_v8, %v15570_v45  ;;  %v3646_v26 = vrot.slane %v19934_v32, 5  ;;  %v738_v2 = vshrl.u32 %v471_v37, 16  ;;  %v14018_v0 = vld [vmem:[#allocation2 + $0x48] sm:$0xff]   ;;  %v15975_v21 = vld [vmem:[#allocation2 + $0x40] sm:$0xf] }
 0x100   : > { %13236 = vmatprep.mubr.bf16.mxu0 %v11866_v6  ;;  %13262 = vmatprep.subr.bf16.mxu1 %v14023_v17  ;;  %v732_v3 = vrot.slane %v730_v30, 7  ;;  %v741_v48 = vshll.u32 %v471_v37, 16  ;;  %v15588_v51 = vrot.slane %v3193_v16, 4  ;;  %v15590_v6 = vrot.slane %v3203_v11, 4 }
 0x101   : > { %13312 = vmatprep.subr.bf16.mxu0 %v14028_v23  ;;  %v15592_v55 = vrot.slane %v3230_v57, 5  ;;  %v334_v8 = vsel %vm14367_vm7, 0, %v333_v20  ;;  %v11868_v63 = vcombine.low %v3079_v54, %v3089_v4  ;;  %v3103_v34 = vsel %vm14380_vm8, %v15466_v10, %v15413_v24  ;;  %v15604_v57 = vld [vmem:[#allocation2 + $0xc] sm:$0xe]  ;;  %v15630_v20 = vld [vmem:[#allocation2 + $0x18] sm:$0xe] }
 0x102   : > { %13313 = vmatpush3.bf16.msra.mxu0 %v14028_v23  ;;  %v14031_v23 = vld [vmem:[%s19801_s1 + $0x150] sm:$0xff]   ;;  %v736_v16 = vrot.slane %v732_v3, 4  ;;  %v740_v11 = vrot.slane %v738_v2, 7  ;;  %335 = vst [vmem:[#allocation2 + $0xc8] sm:$0x1] %v334_v8  ;;  %v15610_v37 = vrot.slane %v3217_v19, 4  ;;  %v735_v10 = vor.u32 %v733_v25, %v732_v3 }
 0x103   : > { %13263 = vmatpush3.bf16.msra.mxu1 %v14023_v17  ;;  %13314 = vmatprep.subr.bf16.mxu0 %v15559_v5  ;;  %v14036_v17 = vld [vmem:[%s19801_s1 + $0x188] sm:$0xff]   ;;  %v15612_v24 = vrot.slane %v3227_v13, 4  ;;  %v15616_v54 = vrot.slane %v3646_v26, 4  ;;  %v3113_v2 = vsel %vm14380_vm8, %v15468_v49, %v15455_v38  ;;  %v3127_v4 = vsel %vm14380_vm8, %v15491_v35, %v15431_v52  ;;  %v19936_v38 = vld [vmem:[#allocation12_spill] sm:$0xff]  ;;  %v14022_v25 = vld [vmem:[#allocation2 + $0x60] sm:$0xff]  }
 0x104   : > { %13264 = vmatprep.subr.bf16.mxu1 %v15568_v15  ;;  %v3137_v50 = vsel %vm14380_vm8, %v15493_v56, %v15483_v43  ;;  %v743_v30 = vor.u32 %v741_v48, %v740_v11  ;;  %v745_v19 = vrot.slane %v740_v11, 4  ;;  %v11884_v13 = vrot.slane %v15604_v57, 9  ;;  %v14035_v52 = vld [vmem:[%s19801_s1 + $0x148] sm:$0xff]   ;;  %v19939_v11 = vld [vmem:[#allocation13_spill] sm:$0xff] }
 0x105   : > { %v3653_v3 = vrot.slane %v15105_v47, 5  ;;  %v901_v56 = vld [vmem:[#allocation2 + $0xc0] sm:$0xf]  ;;  %v11869_v48 = vcombine.low %v3103_v34, %v3113_v2  ;;  %v11885_v8 = vrot.slane %v15630_v20, 9  ;;  %v11870_v49 = vcombine.low %v3127_v4, %v3137_v50  ;;  %v3593_v57 = vld [vmem:[#allocation2 + $0xa8] sm:$0xe] }
 0x106   : > { %13185 = vmatmul.mubr.bf16.gmra.mxu1 %v14018_v0  ;;  %13237 = vmatmul.mubr.bf16.gmra.mxu0 %v15542_v14  ;;  %v744_v35 = vsel %vm14401_vm10, %v736_v16, %v743_v30  ;;  %v14040_v14 = vld [vmem:[%s19801_s1 + $0x180] sm:$0xff]   ;;  %v902_v0 = vsel %vm14407_vm11, %v735_v10, %v901_v56  ;;  %v3660_v16 = vrot.slane %v19939_v11, 5  ;;  %v14025_v30 = vld [vmem:[#allocation2 + $0x6c] sm:$0xff]   ;;  %v3151_v34 = vsel %vm14380_vm8, %v15495_v29, %v15461_v53 }
 0x107   : > { %13188 = vmatprep.mubr.bf16.mxu1 %v14021_v62  ;;  %13240 = vmatprep.mubr.bf16.mxu0 %v11868_v63  ;;  %904 = vst [vmem:[#allocation2 + $0xc4] sm:$0xf] %v744_v35  ;;  %v3582_v63 = vld [vmem:[#allocation2 + $0x24] sm:$0xe]  ;;  %903 = vst [vmem:[#allocation2 + $0xc0] sm:$0xf] %v902_v0  ;;  %v3161_v10 = vsel %vm14380_vm8, %v15538_v60, %v15506_v22  ;;  %v3175_v2 = vsel %vm14380_vm8, %v15544_v40, %v15485_v18 }
 0x108   : > { %13265 = vmatpush3.bf16.msra.mxu1 %v15568_v15  ;;  %13315 = vmatpush3.bf16.msra.mxu0 %v15559_v5  ;;  %v11886_v5 = vrot.slane %v3582_v63, 9  ;;  %v3663_v15 = vrot.slane %v15171_v9, 5  ;;  %v3662_v50 = vrot.slane %v3660_v16, 4  ;;  %v3583_v35 = vld [vmem:[#allocation2 + $0x30] sm:$0xe]  ;;  %v19940_v29 = vld [vmem:[#allocation14_spill] sm:$0xff] }
 0x109   : > { %13266 = vmatprep.subr.bf16.mxu1 %v14031_v23  ;;  %13316 = vmatprep.subr.bf16.mxu0 %v14036_v17  ;;  %v905_v4 = vld [vmem:[#allocation2 + $0xc8] sm:$0x1]  ;;  %v3667_v53 = vrot.slane %v19940_v29, 5  ;;  %v14039_v9 = vld [vmem:[%s19801_s1 + $0x140] sm:$0xff]   ;;  %v15672_v22 = vld [vmem:[%s19801_s1 + $0x238] sm:$0xff]   ;;  %v11887_v40 = vrot.slane %v3583_v35, 9 }
 0x10a   : > { %v906_v56 = vsel %vm14359_vm5, %v745_v19, %v905_v4  ;;  %v15676_v18 = vsel %vm14845_vm14, %v11886_v5, %v3660_v16  ;;  %v3670_v0 = vrot.slane %v15218_v59, 5  ;;  %v3185_v19 = vsel %vm14380_vm8, %v15561_v31, %v15540_v46  ;;  %v3584_v16 = vld [vmem:[#allocation2 + $0x3c] sm:$0xe] }
 0x10b   : > { %907 = vst [vmem:[#allocation2 + $0xc8] sm:$0x1] %v906_v56  ;;  %v15685_v63 = vsel %vm14845_vm14, %v3662_v50, %v3663_v15  ;;  %v3669_v11 = vrot.slane %v3667_v53, 4  ;;  %v3674_v4 = vrot.slane %v15194_v12, 5  ;;  %v11888_v31 = vrot.slane %v3584_v16, 9  ;;  %v14026_v29 = vld [vmem:[#allocation2 + $0x78] sm:$0xff]  }
 0x10c   : > { %13267 = vmatpush3.bf16.msra.mxu1 %v14031_v23  ;;  %13317 = vmatpush3.bf16.msra.mxu0 %v14036_v17  ;;  %v11918_v59 = vcombine.low %v15676_v18, %v15685_v63  ;;  %v15692_v23 = vsel %vm14845_vm14, %v11887_v40, %v3667_v53  ;;  %v3677_v12 = vrot.slane %v15242_v39, 5  ;;  %v11871_v5 = vcombine.low %v3151_v34, %v3161_v10  ;;  %v3585_v56 = vld [vmem:[#allocation2 + $0x48] sm:$0xe]  ;;  %v4474_v62 = vld [vmem:[#allocation2 + $0x3c] sm:$0xf] }
 0x10d   : > { %13268 = vmatprep.subr.bf16.mxu1 %v14035_v52  ;;  %13318 = vmatprep.subr.bf16.mxu0 %v14040_v14  ;;  %v15696_v46 = vsel %vm14845_vm14, %v3669_v11, %v3670_v0  ;;  %v3676_v17 = vrot.slane %v3674_v4, 4  ;;  %v11872_v15 = vcombine.low %v3175_v2, %v3185_v19  ;;  %v15706_v53 = vrot.slane %v3653_v3, 4 }
 0x10e   : > { %13189 = vmatmul.mubr.bf16.gmra.mxu1 %v14022_v25  ;;  %13241 = vmatmul.mubr.bf16.gmra.mxu0 %v11869_v48  ;;  %v15699_v50 = vld [vmem:[#allocation2 + $0xc4] sm:$0xf]  ;;  %v2871_v25 = vld [vmem:[#allocation2 + $0xc0] sm:$0xf]  ;;  %v15710_v39 = vsel %vm14845_vm14, %v11888_v31, %v3674_v4  ;;  %v11889_v0 = vrot.slane %v3585_v56, 9  ;;  %v3681_v19 = vrot.slane %v15258_v42, 5 }
 0x10f   : > { %13192 = vmatprep.mubr.bf16.mxu1 %v14025_v30  ;;  %13244 = vmatprep.mubr.bf16.mxu0 %v11870_v49  ;;  %v3244_v48 = vshll.u32 %v15699_v50, 16  ;;  %v15714_v49 = vsel %vm14845_vm14, %v3676_v17, %v3677_v12  ;;  %v14029_v30 = vld [vmem:[#allocation2 + $0x84] sm:$0xff]   ;;  %v3235_v34 = vshrl.u32 %v2871_v25, 16  ;;  %v3238_v10 = vshll.u32 %v2871_v25, 16 }
 0x110   : > { %13269 = vmatpush3.bf16.msra.mxu1 %v14035_v52  ;;  %13319 = vmatpush3.bf16.msra.mxu0 %v14040_v14  ;;  %v3248_v52 = vshrl.u32 %v15699_v50, 16  ;;  %v15720_v14 = vld [vmem:[%s19801_s1 + $0x1f8] sm:$0xff]   ;;  %v3684_v11 = vrot.slane %v15280_v58, 5  ;;  %v3688_v12 = vrot.slane %v15282_v41, 5  ;;  %v3199_v25 = vsel %vm14380_vm8, %v15588_v51, %v15523_v27  ;;  %v15751_v51 = vld [vmem:[#allocation2 + $0x20] sm:$0x1] }
 0x111   : > { %13270 = vmatprep.subr.bf16.mxu1 %v14039_v9  ;;  %13400 = vmatprep.subr.bf16.mxu0 %v15672_v22  ;;  %v15725_v40 = vrot.slane %v3244_v48, 5  ;;  %v3237_v16 = vrot.slane %v3235_v34, 4  ;;  %v3240_v31 = vrot.slane %v3238_v10, 5  ;;  %v15739_v42 = vsel %vm14845_vm14, %v11889_v0, %v3681_v19  ;;  %v14030_v0 = vld [vmem:[#allocation2 + $0x90] sm:$0xff]  }
 0x112   : > { %v15729_v4 = vld [vmem:[#allocation2 + $0xc8] sm:$0x1]  ;;  %v3250_v17 = vrot.slane %v3248_v52, 4  ;;  %v3683_v58 = vrot.slane %v3681_v19, 4  ;;  %v3209_v34 = vsel %vm14380_vm8, %v15590_v6, %v15584_v1  ;;  %v3223_v41 = vsel %vm14380_vm8, %v15610_v37, %v15570_v45  ;;  %v3586_v1 = vld [vmem:[#allocation2 + $0x54] sm:$0xe] }
 0x113   : > { %v3254_v48 = vshll.u32 %v15729_v4, 16  ;;  %v3241_v10 = vor.u32 %v3240_v31, %v3237_v16  ;;  %v3690_v6 = vrot.slane %v3688_v12, 4  ;;  %v3691_v56 = vrot.slane %v15304_v7, 5  ;;  %v3587_v16 = vld [vmem:[#allocation2 + $0x60] sm:$0xe] }
 0x114   : > { %13271 = vmatpush3.bf16.msra.mxu1 %v14039_v9  ;;  %v3251_v27 = vor.u32 %v3250_v17, %v15725_v40  ;;  %v3656_v9 = vrot.slane %v15751_v51, 5  ;;  %v15756_v52 = vsel %vm14845_vm14, %v3683_v58, %v3684_v11  ;;  %v3233_v19 = vsel %vm14380_vm8, %v15612_v24, %v15592_v55  ;;  %v15911_v51 = vld [vmem:[#allocation2 + $0x1c] sm:$0xf] }
 0x115   : > { %13352 = vmatprep.subr.bf16.mxu1 %v15720_v14  ;;  %v3242_v45 = vrot.slane %v3241_v10, 4  ;;  %v3256_v37 = vrot.slane %v3254_v48, 5  ;;  %v15767_v11 = vsel %vm14845_vm14, %v3690_v6, %v3691_v56  ;;  %v3695_v7 = vrot.slane %v15311_v61, 5  ;;  %v19942_v56 = vld [vmem:[#allocation16_spill] sm:$0xff] }
 0x116   : > { %13193 = vmatmul.mubr.bf16.gmra.mxu1 %v14026_v29  ;;  %13245 = vmatmul.mubr.bf16.gmra.mxu0 %v11871_v5  ;;  %v11890_v5 = vrot.slane %v3586_v1, 9  ;;  %v3252_v31 = vrot.slane %v3251_v27, 4  ;;  %v11891_v48 = vrot.slane %v3587_v16, 9  ;;  %v11873_v58 = vcombine.low %v3199_v25, %v3209_v34  ;;  %v19944_v16 = vld [vmem:[#allocation17_spill] sm:$0xff] }
 0x117   : > { %13196 = vmatprep.mubr.bf16.mxu1 %v14029_v30  ;;  %13248 = vmatprep.mubr.bf16.mxu0 %v11872_v15  ;;  %v3698_v15 = vrot.slane %v15331_v33, 5  ;;  %v14033_v30 = vld [vmem:[#allocation2 + $0x9c] sm:$0xff]   ;;  %v3697_v24 = vrot.slane %v3695_v7, 4  ;;  %v3702_v10 = vrot.slane %v15347_v44, 5  ;;  %v11874_v1 = vcombine.low %v3223_v41, %v3233_v19  ;;  %v3588_v33 = vld [vmem:[#allocation2 + $0x6c] sm:$0xe] }
 0x118   : > { %v15773_v17 = vsel %vm14845_vm14, %v11890_v5, %v3688_v12  ;;  %v15780_v61 = vsel %vm14845_vm14, %v11891_v48, %v3695_v7  ;;  %v11892_v12 = vrot.slane %v3588_v33, 9  ;;  %v3705_v25 = vrot.slane %v19942_v56, 5  ;;  %v3589_v41 = vld [vmem:[#allocation2 + $0x78] sm:$0xe]  ;;  %v19943_v5 = vld [vmem:[#allocation15_spill] sm:$0xff]  ;;  %v19948_v44 = vld [vmem:[#allocation10_spill] sm:$0xff] }
 0x119   : > { %v15784_v27 = vsel %vm14845_vm14, %v3697_v24, %v3698_v15  ;;  %v3704_v6 = vrot.slane %v3702_v10, 4  ;;  %v3247_v34 = vsel %vm14380_vm8, %v3242_v45, %v15725_v40  ;;  %v3709_v19 = vrot.slane %v19943_v5, 5  ;;  %v19945_v40 = vld [vmem:[#allocation18_spill] sm:$0xff]  ;;  %v19946_v56 = vld [vmem:[#allocation19_spill] sm:$0xff] }
 0x11a   : > { %v3712_v7 = vrot.slane %v19944_v16, 5  ;;  %v15796_v15 = vsel %vm14845_vm14, %v11892_v12, %v3702_v10  ;;  %v11893_v24 = vrot.slane %v3589_v41, 9  ;;  %v3716_v45 = vrot.slane %v19945_v40, 5  ;;  %v14034_v10 = vld [vmem:[#allocation2 + $0xa8] sm:$0xff]   ;;  %v14041_v41 = vld [vmem:[#allocation2 + $0x18] sm:$0xff]   ;;  %v19950_v16 = vld [vmem:[#allocation22_spill] sm:$0xff] }
 0x11b   : > { %v15800_v48 = vsel %vm14845_vm14, %v3704_v6, %v3705_v25  ;;  %v3257_v33 = vsel %vm14380_vm8, %v3252_v31, %v3256_v37  ;;  %v3719_v5 = vrot.slane %v19946_v56, 5  ;;  %v3590_v6 = vld [vmem:[#allocation2 + $0x84] sm:$0xe]  ;;  %v14037_v25 = vld [vmem:[#allocation2 + $0xb4] sm:$0xff]   ;;  %v3591_v40 = vld [vmem:[#allocation2 + $0x90] sm:$0xe] }
 0x11c   : > { %v15810_v12 = vsel %vm14845_vm14, %v11893_v24, %v3709_v19  ;;  %v3718_v37 = vrot.slane %v3716_v45, 4  ;;  %v11875_v31 = vcombine.low %v3247_v34, %v3257_v33  ;;  %v19947_v56 = vld [vmem:[#allocation20_spill] sm:$0xff]  ;;  %v3726_v55 = vrot.slane %v19948_v44, 5 }
 0x11d   : > { %v3733_v29 = vrot.slane %v19950_v16, 5 }
 0x11e   : > { %13197 = vmatmul.mubr.bf16.gmra.mxu1 %v14030_v0  ;;  %13249 = vmatmul.mubr.bf16.gmra.mxu0 %v11873_v58  ;;  %v3711_v58 = vrot.slane %v3709_v19, 4  ;;  %v3723_v0 = vrot.slane %v19947_v56, 5  ;;  %v15826_v24 = vsel %vm14845_vm14, %v3718_v37, %v3719_v5  ;;  %v3592_v56 = vld [vmem:[#allocation2 + $0x9c] sm:$0xe]  ;;  %v3647_v5 = vsel %vm14845_vm14, %v11884_v13, %v3646_v26  ;;  %v14038_v13 = vld [vmem:[#allocation2 + $0xc0] sm:$0xff]  }
 0x11f   : > { %13200 = vmatprep.mubr.bf16.mxu1 %v14033_v30  ;;  %13252 = vmatprep.mubr.bf16.mxu0 %v11874_v1  ;;  %v11894_v1 = vrot.slane %v3590_v6, 9  ;;  %v11896_v16 = vrot.slane %v3592_v56, 9  ;;  %v19955_v56 = vld [vmem:[#allocation26_spill] sm:$0xff] }
 0x120   : > { %v15814_v30 = vsel %vm14845_vm14, %v3711_v58, %v3712_v7  ;;  %v11895_v7 = vrot.slane %v3591_v40, 9  ;;  %v19949_v58 = vld [vmem:[#allocation21_spill] sm:$0xff]  ;;  %v3725_v33 = vrot.slane %v3723_v0, 4 }
 0x121   : > { %v15822_v19 = vsel %vm14845_vm14, %v11894_v1, %v3716_v45  ;;  %v3730_v6 = vrot.slane %v19949_v58, 5  ;;  %v19951_v1 = vld [vmem:[#allocation23_spill] sm:$0xff] }
 0x122   : > { %v15834_v44 = vsel %vm14845_vm14, %v11895_v7, %v3723_v0  ;;  %v3737_v2 = vrot.slane %v19951_v1, 5  ;;  %v15845_v37 = vsel %vm14845_vm14, %v3725_v33, %v3726_v55  ;;  %v19952_v0 = vld [vmem:[#allocation24_spill] sm:$0xff]  ;;  %v19953_v7 = vld [vmem:[#allocation25_spill] sm:$0xff]  ;;  %v19954_v55 = vrot.slane %v19936_v38, 5 }
 0x123   : > { %v3732_v45 = vrot.slane %v3730_v6, 4  ;;  %v3740_v40 = vrot.slane %v19952_v0, 5  ;;  %v3744_v26 = vrot.slane %v19953_v7, 5  ;;  %v11897_v33 = vrot.slane %v3593_v57, 9  ;;  %v14045_v38 = vld [vmem:[#allocation2 + $0x30] sm:$0xff]  }
 0x124   : > { %v3650_v58 = vsel %vm14845_vm14, %v15616_v54, %v19954_v55  ;;  %v14048_v54 = vld [vmem:[%s19801_s1 + $0x230] sm:$0xff]   ;;  %v3751_v57 = vrot.slane %v15699_v50, 5  ;;  %v3654_v50 = vsel %vm14845_vm14, %v11885_v8, %v3653_v3  ;;  %v4465_v8 = vld [vmem:[#allocation2 + $0x18] sm:$0xf] }
 0x125   : > { %v15852_v32 = vsel %vm14845_vm14, %v3732_v45, %v3733_v29  ;;  %v3747_v29 = vrot.slane %v19955_v56, 5  ;;  %v15876_v0 = vsel %vm14845_vm14, %v11897_v33, %v3737_v2  ;;  %v11916_v7 = vcombine.low %v3647_v5, %v3650_v58 }
 0x126   : > { %13201 = vmatmul.mubr.bf16.gmra.mxu1 %v14034_v10  ;;  %13253 = vmatmul.mubr.bf16.gmra.mxu0 %v11875_v31  ;;  %v3739_v31 = vrot.slane %v3737_v2, 4  ;;  %v3753_v34 = vrot.slane %v3751_v57, 4  ;;  %v3657_v2 = vsel %vm14845_vm14, %v15706_v53, %v3656_v9  ;;  %v4514_v9 = vshrl.u32 %v4465_v8, 16  ;;  %v15941_v53 = vpop.f32.mrf.mxu0 }
 0x127   : > { %13204 = vmatprep.mubr.bf16.mxu1 %v14037_v25  ;;  %13320 = vmatprep.mubr.bf16.mxu0 %v14041_v41  ;;  %v14042_v25 = vld [vmem:[#allocation2 + $0x24] sm:$0xff]   ;;  %v15862_v41 = vsel %vm14845_vm14, %v11896_v16, %v3730_v6  ;;  %v3594_v6 = vld [vmem:[#allocation2 + $0xb4] sm:$0xe]  ;;  %v3746_v16 = vrot.slane %v3744_v26, 4  ;;  %v4517_v5 = vshll.u32 %v4465_v8, 16  ;;  %19956 = vst [vmem:[#allocation11_spill] sm:$0xff] %v15941_v53 }
 0x128   : > { %v15869_v1 = vsel %vm14845_vm14, %v3739_v31, %v3740_v40  ;;  %v11898_v56 = vrot.slane %v3594_v6, 9  ;;  %v3595_v40 = vld [vmem:[#allocation2 + $0xc0] sm:$0xe]  ;;  %v3754_v31 = vrot.slane %v15729_v4, 5  ;;  %v4516_v58 = vrot.slane %v4514_v9, 4 }
 0x129   : > { %v15884_v45 = vsel %vm14845_vm14, %v3746_v16, %v3747_v29  ;;  %v11899_v10 = vrot.slane %v3595_v40, 9  ;;  %v11917_v29 = vcombine.low %v3654_v50, %v3657_v2  ;;  %v15923_v6 = vld [vmem:[#allocation2 + $0x20] sm:$0x1]  ;;  %v14049_v40 = vld [vmem:[#allocation2 + $0x48] sm:$0xff]  }
 0x12a   : > { %v15899_v4 = vsel %vm14845_vm14, %v11898_v56, %v3744_v26  ;;  %v15909_v3 = vsel %vm14845_vm14, %v3753_v34, %v3754_v31  ;;  %v4523_v26 = vshll.u32 %v15911_v51, 16  ;;  %v14052_v34 = vld [vmem:[%s19801_s1 + $0x228] sm:$0xff]   ;;  %v14047_v56 = vld [vmem:[%s19801_s1 + $0x1f0] sm:$0xff]   ;;  %v5219_v31 = vld [vmem:[#allocation2 + $0x18] sm:$0xe] }
 0x12b   : > { %v15905_v20 = vsel %vm14845_vm14, %v11899_v10, %v3751_v57  ;;  %v4527_v10 = vshrl.u32 %v15911_v51, 16  ;;  %v15925_v57 = vld [vmem:[#allocation2 + $0x28] sm:$0xf] }
 0x12c   : > { %v15921_v33 = vrot.slane %v4523_v26, 5  ;;  %v4547_v8 = vshll.u32 %v15925_v57, 16  ;;  %v4551_v9 = vshrl.u32 %v15925_v57, 16  ;;  %v5285_v26 = vrot.slane %v15911_v51, 5 }
 0x12d   : > { %v4529_v16 = vrot.slane %v4527_v10, 4  ;;  %v14051_v10 = vld [vmem:[%s19801_s1 + $0x1e8] sm:$0xff]   ;;  %v12020_v51 = vrot.slane %v5219_v31, 9  ;;  %v15961_v31 = vpop.f32.mrf.mxu0 }
 0x12e   : > { %13205 = vmatmul.mubr.bf16.gmra.mxu1 %v14038_v13  ;;  %13321 = vmatmul.mubr.bf16.vlgmr.msra.gmra.mxu0 %v14042_v25  ;;  %v14046_v13 = vld [vmem:[#allocation2 + $0x3c] sm:$0xff]   ;;  %v4519_v25 = vrot.slane %v4517_v5, 5  ;;  %v4533_v5 = vshll.u32 %v15923_v6, 16  ;;  %v15952_v47 = vrot.slane %v4547_v8, 5  ;;  %v4553_v55 = vrot.slane %v4551_v9, 4  ;;  %19957 = vst [vmem:[#allocation12_spill] sm:$0xff] %v15961_v31 }
 0x12f   : > { %13272 = vmatprep.mubr.bf16.mxu1 %v11916_v7  ;;  %13401 = vmatpush3.bf16.msra.mxu0 %v15672_v22  ;;  %v4468_v22 = vld [vmem:[#allocation2 + $0x24] sm:$0xf]  ;;  %v4530_v2 = vor.u32 %v4529_v16, %v15921_v33  ;;  %v15950_v16 = vld [vmem:[#allocation2 + $0x34] sm:$0xf]  ;;  %v5306_v31 = vrot.slane %v15975_v21, 5 }
 0x130   : > { %13324 = vmatprep.mubr.bf16.mxu0 %v14045_v38  ;;  %13402 = vmatprep.subr.bf16.mxu0 %v14048_v54  ;;  %v4538_v38 = vshrl.u32 %v4468_v22, 16  ;;  %v4541_v7 = vshll.u32 %v4468_v22, 16  ;;  %v4520_v50 = vor.u32 %v4519_v25, %v4516_v58  ;;  %v14056_v22 = vld [vmem:[%s19801_s1 + $0x220] sm:$0xff]   ;;  %v15959_v63 = vrot.slane %v4533_v5, 5 }
 0x131   : > { %v15957_v18 = vrot.slane %v4530_v2, 4  ;;  %v4571_v43 = vshll.u32 %v15950_v16, 16  ;;  %v4575_v5 = vshrl.u32 %v15950_v16, 16 }
 0x132   : > { %v4540_v58 = vrot.slane %v4538_v38, 4  ;;  %v4543_v25 = vrot.slane %v4541_v7, 5  ;;  %v5220_v38 = vld [vmem:[#allocation2 + $0x24] sm:$0xe]  ;;  %v5292_v7 = vrot.slane %v15925_v57, 5  ;;  %v15955_v35 = vrot.slane %v4520_v50, 4 }
 0x133   : > { %13403 = vmatpush3.bf16.msra.mxu0 %v14048_v54  ;;  %v4471_v54 = vld [vmem:[#allocation2 + $0x30] sm:$0xf]  ;;  %v14053_v57 = vld [vmem:[#allocation2 + $0x60] sm:$0xff]   ;;  %v12021_v50 = vrot.slane %v5220_v38, 9 }
 0x134   : > { %13404 = vmatprep.subr.bf16.mxu0 %v14052_v34  ;;  %v4565_v9 = vshll.u32 %v4471_v54, 16 }
 0x136   : > { %13273 = vmatmul.mubr.bf16.vlgmr.msra.gmra.mxu1 %v11917_v29  ;;  %13325 = vmatmul.mubr.bf16.gmra.mxu0 %v14046_v13  ;;  %v5288_v13 = vrot.slane %v15923_v6, 5  ;;  %v15948_v29 = vld [vmem:[#allocation2 + $0x2c] sm:$0x1]  ;;  %v14050_v6 = vld [vmem:[#allocation2 + $0x54] sm:$0xff]   ;;  %v4567_v36 = vrot.slane %v4565_v9, 5  ;;  %v15995_v9 = vpop.f32.mrf.mxu0 }
 0x137   : > { %13353 = vmatpush3.bf16.msra.mxu1 %v15720_v14  ;;  %13276 = vmatprep.mubr.bf16.mxu1 %v11918_v59  ;;  %v4562_v14 = vshrl.u32 %v4471_v54, 16  ;;  %v5287_v59 = vrot.slane %v5285_v26, 4  ;;  %v4557_v8 = vshll.u32 %v15948_v29, 16  ;;  %v4554_v54 = vor.u32 %v4553_v55, %v15952_v47  ;;  %19960 = vst [vmem:[#allocation14_spill] sm:$0xff] %v15995_v9  ;;  %v16060_v9 = vld [vmem:[#allocation2 + $0x4c] sm:$0xf] }
 0x138   : > { %13354 = vmatprep.subr.bf16.mxu1 %v14047_v56  ;;  %13328 = vmatprep.mubr.bf16.mxu0 %v14049_v40  ;;  %v4544_v40 = vor.u32 %v4543_v25, %v4540_v58  ;;  %v14055_v58 = vld [vmem:[%s19801_s1 + $0x1e0] sm:$0xff]   ;;  %v5294_v25 = vrot.slane %v5292_v7, 4  ;;  %v15988_v55 = vrot.slane %v4571_v43, 5  ;;  %v16005_v43 = vld [vmem:[#allocation2 + $0x38] sm:$0x1] }
 0x139   : > { %13405 = vmatpush3.bf16.msra.mxu0 %v14052_v34  ;;  %v15967_v34 = vsel %vm14845_vm14, %v12020_v51, %v5285_v26  ;;  %v4564_v2 = vrot.slane %v4562_v14, 4  ;;  %v14060_v26 = vld [vmem:[%s19801_s1 + $0x218] sm:$0xff]   ;;  %v4526_v51 = vsel %vm14380_vm8, %v15955_v35, %v15921_v33  ;;  %v15986_v38 = vsel %vm14845_vm14, %v5287_v59, %v5288_v13 }
 0x13a   : > { %13406 = vmatprep.subr.bf16.mxu0 %v14056_v22  ;;  %v19958_v14 = vcombine.low %v15692_v23, %v15696_v46  ;;  %v4536_v35 = vsel %vm14380_vm8, %v15957_v18, %v15959_v63  ;;  %v16001_v33 = vrot.slane %v4544_v40, 4  ;;  %v16003_v13 = vrot.slane %v4557_v8, 5  ;;  %v14064_v46 = vld [vmem:[%s19801_s1 + $0x210] sm:$0xff]   ;;  %v14059_v40 = vld [vmem:[%s19801_s1 + $0x1d8] sm:$0xff]  }
 0x13b   : > { %13355 = vmatpush3.bf16.msra.mxu1 %v14047_v56  ;;  %v5295_v56 = vrot.slane %v15948_v29, 5  ;;  %v4577_v29 = vrot.slane %v4575_v5, 4  ;;  %v4586_v59 = vshrl.u32 %v4474_v62, 16  ;;  %v19961_v23 = vcombine.low %v15710_v39, %v15714_v49 }
 0x13c   : > { %13356 = vmatprep.subr.bf16.mxu1 %v14051_v10  ;;  %v4589_v5 = vshll.u32 %v4474_v62, 16  ;;  %v4595_v18 = vshll.u32 %v15975_v21, 16  ;;  %v4599_v63 = vshrl.u32 %v15975_v21, 16  ;;  %v4555_v8 = vrot.slane %v4554_v54, 4 }
 0x13d   : > { %13407 = vmatpush3.bf16.msra.mxu0 %v14056_v22  ;;  %v15993_v22 = vpop.f32.mrf.mxu1  ;;  %v16020_v39 = vsel %vm14845_vm14, %v12021_v50, %v5292_v7  ;;  %v16024_v49 = vsel %vm14845_vm14, %v5294_v25, %v5295_v56  ;;  %v5299_v62 = vrot.slane %v15950_v16, 5  ;;  %v16031_v7 = vpop.f32.mrf.mxu0  ;;  %v16035_v25 = vld [vmem:[#allocation2 + $0x44] sm:$0x1] }
 0x13e   : > { %13277 = vmatmul.mubr.bf16.gmra.mxu1 %v19958_v14  ;;  %13329 = vmatmul.mubr.bf16.gmra.mxu0 %v14050_v6  ;;  %19959 = vst [vmem:[#allocation13_spill] sm:$0xff] %v15993_v22  ;;  %v4568_v6 = vor.u32 %v4567_v36, %v4564_v2  ;;  %v5221_v36 = vld [vmem:[#allocation2 + $0x30] sm:$0xe]  ;;  %v4588_v2 = vrot.slane %v4586_v59, 4  ;;  %v4591_v14 = vrot.slane %v4589_v5, 5  ;;  %19963 = vst [vmem:[#allocation15_spill] sm:$0xff] %v16031_v7 }
 0x13f   : > { %13280 = vmatprep.mubr.bf16.mxu1 %v19961_v23  ;;  %13357 = vmatpush3.bf16.msra.mxu1 %v14051_v10  ;;  %v4578_v10 = vor.u32 %v4577_v29, %v15988_v55  ;;  %v14054_v23 = vld [vmem:[#allocation2 + $0x6c] sm:$0xff]   ;;  %v16029_v54 = vpop.f32.mrf.mxu1  ;;  %v16037_v56 = vrot.slane %v4595_v18, 5  ;;  %v4601_v16 = vrot.slane %v4599_v63, 4  ;;  %v14057_v29 = vld [vmem:[#allocation2 + $0x78] sm:$0xff]   ;;  %v16039_v22 = vcombine.low %v4526_v51, %v4536_v35 }
 0x140   : > { %13332 = vmatprep.mubr.bf16.mxu0 %v14053_v57  ;;  %13358 = vmatprep.subr.bf16.mxu1 %v14055_v58  ;;  %v4581_v57 = vshll.u32 %v16005_v43, 16  ;;  %19962 = vst [vmem:[#allocation16_spill] sm:$0xff] %v16029_v54  ;;  %v16045_v59 = vrot.slane %v4568_v6, 4  ;;  %v12022_v5 = vrot.slane %v5221_v36, 9  ;;  %v4477_v54 = vld [vmem:[#allocation2 + $0x48] sm:$0xf]  ;;  %v4592_v50 = vor.u32 %v4591_v14, %v4588_v2 }
 0x141   : > { %13408 = vmatprep.subr.bf16.mxu0 %v14060_v26  ;;  %v14063_v18 = vld [vmem:[%s19801_s1 + $0x1d0] sm:$0xff]   ;;  %v5301_v35 = vrot.slane %v5299_v62, 4  ;;  %v5302_v63 = vrot.slane %v16005_v43, 5  ;;  %v4579_v6 = vrot.slane %v4578_v10, 4  ;;  %v4605_v7 = vshll.u32 %v16035_v25, 16  ;;  %v16067_v43 = vpop.f32.mrf.mxu0 }
 0x142   : > { %13409 = vmatpush3.bf16.msra.mxu0 %v14060_v26  ;;  %v4550_v26 = vsel %vm14380_vm8, %v16001_v33, %v15952_v47  ;;  %v5222_v47 = vld [vmem:[#allocation2 + $0x3c] sm:$0xe]  ;;  %v14068_v33 = vld [vmem:[%s19801_s1 + $0x208] sm:$0xff]   ;;  %v4583_v36 = vrot.slane %v4581_v57, 5  ;;  %19966 = vst [vmem:[#allocation18_spill] sm:$0xff] %v16067_v43  ;;  %v4602_v51 = vor.u32 %v4601_v16, %v16037_v56  ;;  %v4610_v10 = vshrl.u32 %v4477_v54, 16 }
 0x143   : > { %13359 = vmatpush3.bf16.msra.mxu1 %v14055_v58  ;;  %13410 = vmatprep.subr.bf16.mxu0 %v14064_v46  ;;  %v4560_v58 = vsel %vm14380_vm8, %v4555_v8, %v16003_v13  ;;  %v19964_v13 = vcombine.low %v15739_v42, %v15756_v52  ;;  %v16065_v8 = vpop.f32.mrf.mxu1  ;;  %v4613_v57 = vshll.u32 %v4477_v54, 16  ;;  %v19967_v2 = vcombine.low %v15773_v17, %v15767_v11  ;;  %v16090_v16 = vld [vmem:[#allocation2 + $0x58] sm:$0xf] }
 0x144   : > { %13360 = vmatprep.subr.bf16.mxu1 %v14059_v40  ;;  %19965 = vst [vmem:[#allocation17_spill] sm:$0xff] %v16065_v8  ;;  %v16074_v14 = vcombine.low %v4550_v26, %v4560_v58  ;;  %v4574_v42 = vsel %vm14380_vm8, %v16045_v59, %v15988_v55  ;;  %v16082_v52 = vsel %vm14845_vm14, %v12022_v5, %v5299_v62  ;;  %v12023_v11 = vrot.slane %v5222_v47, 9  ;;  %v14067_v55 = vld [vmem:[%s19801_s1 + $0x1c8] sm:$0xff]   ;;  %v16103_v58 = vpop.f32.mrf.mxu0  ;;  %v16105_v47 = vld [vmem:[#allocation2 + $0x50] sm:$0x1] }
 0x145   : > { %v16086_v21 = vsel %vm14845_vm14, %v5301_v35, %v5302_v63  ;;  %v4619_v17 = vshll.u32 %v16060_v9, 16  ;;  %v4623_v54 = vshrl.u32 %v16060_v9, 16  ;;  %v4593_v62 = vrot.slane %v4592_v50, 4  ;;  %v16101_v5 = vpop.f32.mrf.mxu1  ;;  %v14061_v8 = vld [vmem:[#allocation2 + $0x90] sm:$0xff]  }
 0x146   : > { %13281 = vmatmul.mubr.bf16.gmra.mxu1 %v19964_v13  ;;  %13333 = vmatmul.mubr.bf16.gmra.mxu0 %v14054_v23  ;;  %19968 = vst [vmem:[#allocation19_spill] sm:$0xff] %v16074_v14  ;;  %v4480_v23 = vld [vmem:[#allocation2 + $0x54] sm:$0xf]  ;;  %v4607_v26 = vrot.slane %v4605_v7, 5  ;;  %v5309_v59 = vrot.slane %v16035_v25, 5  ;;  %19969 = vst [vmem:[#allocation20_spill] sm:$0xff] %v16101_v5 }
 0x147   : > { %13284 = vmatprep.mubr.bf16.mxu1 %v19967_v2  ;;  %13336 = vmatprep.mubr.bf16.mxu0 %v14057_v29  ;;  %v14058_v29 = vld [vmem:[#allocation2 + $0x84] sm:$0xff]   ;;  %v4603_v35 = vrot.slane %v4602_v51, 4  ;;  %v5308_v63 = vrot.slane %v5306_v31, 4  ;;  %v4612_v13 = vrot.slane %v4610_v10, 4  ;;  %v4615_v2 = vrot.slane %v4613_v57, 5 }
 0x148   : > { %13361 = vmatpush3.bf16.msra.mxu1 %v14059_v40  ;;  %13411 = vmatpush3.bf16.msra.mxu0 %v14064_v46  ;;  %v14072_v46 = vld [vmem:[%s19801_s1 + $0x200] sm:$0xff]   ;;  %v4584_v40 = vsel %vm14380_vm8, %v4579_v6, %v4583_v36  ;;  %v4634_v43 = vshrl.u32 %v4480_v23, 16  ;;  %v4637_v53 = vshll.u32 %v4480_v23, 16  ;;  %v4643_v14 = vshll.u32 %v16090_v16, 16  ;;  %v5223_v23 = vld [vmem:[#allocation2 + $0x48] sm:$0xe] }
 0x149   : > { %13362 = vmatprep.subr.bf16.mxu1 %v14063_v18  ;;  %13412 = vmatprep.subr.bf16.mxu0 %v14068_v33  ;;  %v4647_v50 = vshrl.u32 %v16090_v16, 16  ;;  %v16111_v25 = vrot.slane %v4619_v17, 5  ;;  %v4625_v51 = vrot.slane %v4623_v54, 4  ;;  %v5313_v6 = vrot.slane %v16060_v9, 5  ;;  %v14071_v36 = vld [vmem:[%s19801_s1 + $0x1c0] sm:$0xff]   ;;  %v16130_v17 = vpop.f32.mrf.mxu1 }
 0x14a   : > { %v16117_v10 = vcombine.low %v4574_v42, %v4584_v40  ;;  %v4629_v57 = vshll.u32 %v16105_v47, 16  ;;  %v19970_v9 = vcombine.low %v15780_v61, %v15784_v27  ;;  %19971 = vst [vmem:[#allocation10_spill] sm:$0xff] %v16130_v17  ;;  %v16132_v42 = vpop.f32.mrf.mxu0  ;;  %v4608_v54 = vsel %vm14380_vm8, %v4603_v35, %v4607_v26  ;;  %v4483_v40 = vld [vmem:[#allocation2 + $0x60] sm:$0xf]  ;;  %v16147_v7 = vld [vmem:[#allocation2 + $0x64] sm:$0xf] }
 0x14b   : > { %19972 = vst [vmem:[#allocation21_spill] sm:$0xff] %v16132_v42  ;;  %v19973_v61 = vcombine.low %v15796_v15, %v15800_v48  ;;  %v4636_v27 = vrot.slane %v4634_v43, 4  ;;  %v4626_v26 = vor.u32 %v4625_v51, %v16111_v25  ;;  %v5315_v35 = vrot.slane %v5313_v6, 4  ;;  %v14062_v43 = vld [vmem:[#allocation2 + $0x9c] sm:$0xff]   ;;  %v4486_v15 = vld [vmem:[#allocation2 + $0x6c] sm:$0xf] }
 0x14c   : > { %13363 = vmatpush3.bf16.msra.mxu1 %v14063_v18  ;;  %13413 = vmatpush3.bf16.msra.mxu0 %v14068_v33  ;;  %v4598_v18 = vsel %vm14380_vm8, %v4593_v62, %v16037_v56  ;;  %v16124_v33 = vsel %vm14845_vm14, %v12023_v11, %v5306_v31  ;;  %v16138_v56 = vsel %vm14845_vm14, %v5308_v63, %v5309_v59  ;;  %v16140_v11 = vld [vmem:[#allocation2 + $0x5c] sm:$0x1]  ;;  %v16145_v62 = vrot.slane %v4643_v14, 5  ;;  %v16159_v14 = vpop.f32.mrf.mxu1  ;;  %v16183_v17 = vld [vmem:[#allocation2 + $0x70] sm:$0xf] }
 0x14d   : > { %13364 = vmatprep.subr.bf16.mxu1 %v14067_v55  ;;  %13414 = vmatprep.subr.bf16.mxu0 %v14072_v46  ;;  %v4616_v31 = vor.u32 %v4615_v2, %v4612_v13  ;;  %v12024_v59 = vrot.slane %v5223_v23, 9  ;;  %v5316_v63 = vrot.slane %v16105_v47, 5  ;;  %v16151_v13 = vcombine.low %v4598_v18, %v4608_v54  ;;  %19974 = vst [vmem:[#allocation22_spill] sm:$0xff] %v16159_v14  ;;  %v16216_v42 = vld [vmem:[#allocation2 + $0x7c] sm:$0xf] }
 0x14e   : > { %13285 = vmatmul.mubr.bf16.gmra.mxu1 %v19970_v9  ;;  %13337 = vmatmul.mubr.bf16.gmra.mxu0 %v14058_v29  ;;  %v4639_v29 = vrot.slane %v4637_v53, 5  ;;  %v4649_v9 = vrot.slane %v4647_v50, 4  ;;  %v16155_v48 = vrot.slane %v4629_v57, 5  ;;  %v16157_v53 = vld [vmem:[#allocation2 + $0x54] sm:$0xe]  ;;  %v4653_v2 = vshll.u32 %v16140_v11, 16 }
 0x14f   : > { %13288 = vmatprep.mubr.bf16.mxu1 %v19973_v61  ;;  %13340 = vmatprep.mubr.bf16.mxu0 %v14061_v8  ;;  %v4658_v8 = vshrl.u32 %v4483_v40, 16  ;;  %v4661_v47 = vshll.u32 %v4483_v40, 16  ;;  %v4667_v50 = vshll.u32 %v16147_v7, 16  ;;  %v4671_v51 = vshrl.u32 %v16147_v7, 16  ;;  %v16170_v61 = vld [vmem:[#allocation2 + $0x68] sm:$0x1] }
 0x150   : > { %13365 = vmatpush3.bf16.msra.mxu1 %v14067_v55  ;;  %13415 = vmatpush3.bf16.msra.mxu0 %v14072_v46  ;;  %v16161_v55 = vpop.f32.mrf.mxu0  ;;  %v14065_v46 = vld [vmem:[#allocation2 + $0xa8] sm:$0xff]   ;;  %v16166_v18 = vrot.slane %v4616_v31, 4  ;;  %v4640_v57 = vor.u32 %v4639_v29, %v4636_v27  ;;  %v4650_v23 = vor.u32 %v4649_v9, %v16145_v62  ;;  %v5320_v54 = vrot.slane %v16090_v16, 5 }
 0x151   : > { %13366 = vmatprep.subr.bf16.mxu1 %v14071_v36  ;;  %19975 = vst [vmem:[#allocation23_spill] sm:$0xff] %v16161_v55  ;;  %v4627_v5 = vrot.slane %v4626_v26, 4  ;;  %v16174_v14 = vsel %vm14845_vm14, %v12024_v59, %v5313_v6  ;;  %v16178_v40 = vsel %vm14845_vm14, %v5315_v35, %v5316_v63  ;;  %v12025_v31 = vrot.slane %v16157_v53, 9  ;;  %v16188_v6 = vpop.f32.mrf.mxu1 }
 0x152   : > { %v4660_v27 = vrot.slane %v4658_v8, 4  ;;  %v4663_v29 = vrot.slane %v4661_v47, 5  ;;  %v16181_v9 = vrot.slane %v4667_v50, 5  ;;  %v4673_v16 = vrot.slane %v4671_v51, 4  ;;  %19977 = vst [vmem:[#allocation24_spill] sm:$0xff] %v16188_v6  ;;  %v16190_v26 = vpop.f32.mrf.mxu0  ;;  %v14066_v6 = vld [vmem:[#allocation2 + $0xb4] sm:$0xff]  }
 0x153   : > { %19978 = vst [vmem:[#allocation25_spill] sm:$0xff] %v16190_v26  ;;  %v4655_v59 = vrot.slane %v4653_v2, 5  ;;  %v5323_v35 = vrot.slane %v16140_v11, 5  ;;  %v4677_v63 = vshll.u32 %v16170_v61, 16  ;;  %v4682_v53 = vshrl.u32 %v4486_v15, 16 }
 0x154   : > { %13367 = vmatpush3.bf16.msra.mxu1 %v14071_v36  ;;  %v19976_v36 = vcombine.low %v15810_v12, %v15814_v30  ;;  %v19979_v8 = vcombine.low %v15822_v19, %v15826_v24  ;;  %v4641_v47 = vrot.slane %v4640_v57, 4  ;;  %v4651_v50 = vrot.slane %v4650_v23, 4  ;;  %v5225_v30 = vld [vmem:[#allocation2 + $0x60] sm:$0xe]  ;;  %v4489_v23 = vld [vmem:[#allocation2 + $0x78] sm:$0xf] }
 0x155   : > { %v5322_v12 = vrot.slane %v5320_v54, 4  ;;  %v4622_v2 = vsel %vm14380_vm8, %v16166_v18, %v16111_v25  ;;  %v5327_v11 = vrot.slane %v16147_v7, 5  ;;  %v4691_v51 = vshll.u32 %v16183_v17, 16  ;;  %v14069_v19 = vld [vmem:[#allocation2 + $0xc0] sm:$0xff]   ;;  %v16210_v25 = vpop.f32.mrf.mxu1  ;;  %v16212_v7 = vpop.f32.mrf.mxu0 }
 0x156   : > { %13289 = vmatmul.mubr.bf16.gmra.mxu1 %v19976_v36  ;;  %13341 = vmatmul.mubr.bf16.gmra.mxu0 %v14062_v43  ;;  %v4685_v43 = vshll.u32 %v4486_v15, 16  ;;  %v4695_v36 = vshrl.u32 %v16183_v17, 16  ;;  %v4632_v24 = vsel %vm14380_vm8, %v4627_v5, %v16155_v48  ;;  %v4674_v57 = vor.u32 %v4673_v16, %v16181_v9  ;;  %19980 = vst [vmem:[#allocation26_spill] sm:$0xff] %v16210_v25  ;;  %v16231_v16 = vld [vmem:[#allocation2 + $0x74] sm:$0x1] }
 0x157   : > { %13292 = vmatprep.mubr.bf16.mxu1 %v19979_v8  ;;  %13344 = vmatprep.mubr.bf16.mxu0 %v14065_v46  ;;  %v4664_v46 = vor.u32 %v4663_v29, %v4660_v27  ;;  %19981 = vst [vmem:[#allocation27_spill] sm:$0xff] %v16212_v7  ;;  %v16214_v18 = vrot.slane %v4677_v63, 5  ;;  %v12026_v8 = vrot.slane %v5225_v30, 9  ;;  %v4684_v26 = vrot.slane %v4682_v53, 4  ;;  %v5226_v63 = vld [vmem:[#allocation2 + $0x6c] sm:$0xe] }
 0x158   : > { %v4687_v55 = vrot.slane %v4685_v43, 5  ;;  %v4646_v5 = vsel %vm14380_vm8, %v4641_v47, %v16145_v62  ;;  %v4656_v48 = vsel %vm14380_vm8, %v4651_v50, %v4655_v59  ;;  %v16225_v27 = vsel %vm14845_vm14, %v12025_v31, %v5320_v54 }
 0x159   : > { %v16229_v29 = vsel %vm14845_vm14, %v5322_v12, %v5323_v35  ;;  %v5329_v53 = vrot.slane %v5327_v11, 4  ;;  %v5330_v30 = vrot.slane %v16170_v61, 5  ;;  %v16234_v43 = vrot.slane %v4691_v51, 5  ;;  %v16243_v35 = vpop.f32.mrf.mxu1  ;;  %v16245_v12 = vpop.f32.mrf.mxu0 }
 0x15a   : > { %v4697_v62 = vrot.slane %v4695_v36, 4  ;;  %v16236_v47 = vrot.slane %v4664_v46, 4  ;;  %v16238_v59 = vrot.slane %v4674_v57, 4  ;;  %v4706_v50 = vshrl.u32 %v4489_v23, 16  ;;  %19983 = vst [vmem:[#allocation28_spill] sm:$0xff] %v16243_v35  ;;  %19984 = vst [vmem:[#allocation29_spill] sm:$0xff] %v16245_v12 }
 0x15b   : > { %v4709_v54 = vshll.u32 %v4489_v23, 16  ;;  %v19982_v31 = vcombine.low %v15834_v44, %v15845_v37  ;;  %v16247_v15 = vcombine.low %v4622_v2, %v4632_v24  ;;  %v4715_v51 = vshll.u32 %v16216_v42, 16  ;;  %v4492_v46 = vld [vmem:[#allocation2 + $0x84] sm:$0xf]  ;;  %v16262_v2 = vld [vmem:[#allocation2 + $0x88] sm:$0xf] }
 0x15c   : > { %v4719_v36 = vshrl.u32 %v16216_v42, 16  ;;  %v19985_v57 = vcombine.low %v15862_v41, %v15852_v32  ;;  %v16256_v44 = vcombine.low %v4646_v5, %v4656_v48  ;;  %v16260_v37 = vsel %vm14845_vm14, %v12026_v8, %v5327_v11  ;;  %v14070_v24 = vld [vmem:[#allocation2 + $0xcc] sm:$0xff]   ;;  %v16280_v5 = vpop.f32.mrf.mxu1  ;;  %v16282_v48 = vpop.f32.mrf.mxu0 }
 0x15d   : > { %v16266_v23 = vsel %vm14845_vm14, %v5329_v53, %v5330_v30  ;;  %v4701_v32 = vshll.u32 %v16231_v16, 16  ;;  %v12027_v41 = vrot.slane %v5226_v63, 9  ;;  %v4708_v11 = vrot.slane %v4706_v50, 4  ;;  %19987 = vst [vmem:[#allocation31_spill] sm:$0xff] %v16280_v5  ;;  %19988 = vst [vmem:[#allocation32_spill] sm:$0xff] %v16282_v48 }
 0x15e   : > { %13293 = vmatmul.mubr.bf16.gmra.mxu1 %v19982_v31  ;;  %13345 = vmatmul.mubr.bf16.gmra.mxu0 %v14066_v6  ;;  %19986 = vst [vmem:[#allocation30_spill] sm:$0xff] %v16256_v44  ;;  %v4688_v6 = vor.u32 %v4687_v55, %v4684_v26  ;;  %v4698_v31 = vor.u32 %v4697_v62, %v16234_v43  ;;  %v16278_v26 = vld [vmem:[#allocation2 + $0x80] sm:$0x1]  ;;  %v4711_v8 = vrot.slane %v4709_v54, 5  ;;  %v5334_v63 = vrot.slane %v16183_v17, 5 }
 0x15f   : > { %13296 = vmatprep.mubr.bf16.mxu1 %v19985_v57  ;;  %13348 = vmatprep.mubr.bf16.mxu0 %v14069_v19  ;;  %v16285_v53 = vrot.slane %v4715_v51, 5  ;;  %v4721_v30 = vrot.slane %v4719_v36, 4  ;;  %v4730_v62 = vshrl.u32 %v4492_v46, 16  ;;  %v16291_v19 = vld [vmem:[#allocation2 + $0x8c] sm:$0x1]  ;;  %v4733_v55 = vshll.u32 %v4492_v46, 16 }
 0x160   : > { %v16289_v61 = vrot.slane %v4688_v6, 4  ;;  %v4739_v50 = vshll.u32 %v16262_v2, 16  ;;  %v4495_v54 = vld [vmem:[#allocation2 + $0x90] sm:$0xf]  ;;  %v16294_v25 = vrot.slane %v4698_v31, 4  ;;  %v16296_v5 = vrot.slane %v4701_v32, 5  ;;  %v16307_v31 = vpop.f32.mrf.mxu1 }
 0x161   : > { %v5337_v17 = vrot.slane %v16231_v16, 5  ;;  %v5227_v51 = vld [vmem:[#allocation2 + $0x78] sm:$0xe]  ;;  %v4732_v36 = vrot.slane %v4730_v62, 4  ;;  %v4712_v35 = vor.u32 %v4711_v8, %v4708_v11  ;;  %v4735_v48 = vrot.slane %v4733_v55, 5  ;;  %19990 = vst [vmem:[#allocation33_spill] sm:$0xff] %v16307_v31 }
 0x162   : > { %v16299_v12 = vrot.slane %v4739_v50, 5  ;;  %v4743_v6 = vshrl.u32 %v16262_v2, 16  ;;  %v16302_v57 = vld [vmem:[#allocation2 + $0x94] sm:$0xf]  ;;  %v19989_v46 = vcombine.low %v15876_v0, %v15869_v1  ;;  %v16313_v16 = vsel %vm14845_vm14, %v12027_v41, %v5334_v63  ;;  %v5228_v62 = vld [vmem:[#allocation2 + $0x84] sm:$0xe] }
 0x163   : > { %v5336_v55 = vrot.slane %v5334_v63, 4  ;;  %v4722_v11 = vor.u32 %v4721_v30, %v16285_v53  ;;  %v4725_v8 = vshll.u32 %v16278_v26, 16  ;;  %v19992_v50 = vcombine.low %v15899_v4, %v15884_v45 }
 0x164   : > { %v19993_v1 = vcombine.low %v15967_v34, %v15986_v38  ;;  %v4736_v41 = vor.u32 %v4735_v48, %v4732_v36  ;;  %v4745_v63 = vrot.slane %v4743_v6, 4  ;;  %v4704_v45 = vsel %vm14380_vm8, %v16294_v25, %v16296_v5 }
 0x165   : > { %v4749_v4 = vshll.u32 %v16291_v19, 16  ;;  %v5348_v34 = vrot.slane %v16262_v2, 5  ;;  %v4754_v38 = vshrl.u32 %v4495_v54, 16  ;;  %v4757_v0 = vshll.u32 %v4495_v54, 16 }
 0x166   : > { %13297 = vmatmul.mubr.bf16.gmra.mxu1 %v19989_v46  ;;  %v16309_v32 = vpop.f32.mrf.mxu0  ;;  %13349 = vmatmul.mubr.bf16.gmra.mxu0 %v14070_v24  ;;  %v5341_v24 = vrot.slane %v16216_v42, 5  ;;  %v4713_v46 = vrot.slane %v4712_v35, 4  ;;  %v16337_v42 = vpop.f32.mrf.mxu1  ;;  %v4723_v36 = vrot.slane %v4722_v11, 4  ;;  %v4727_v6 = vrot.slane %v4725_v8, 5  ;;  %v16344_v35 = vld [vmem:[#allocation2 + $0x98] sm:$0x1] }
 0x167   : > { %19991 = vst [vmem:[#allocation34_spill] sm:$0xff] %v16309_v32  ;;  %13300 = vmatprep.mubr.bf16.mxu1 %v19992_v50  ;;  %13416 = vmatprep.mubr.bf16.mxu0 %v19993_v1  ;;  %v12028_v50 = vrot.slane %v5227_v51, 9  ;;  %v4746_v1 = vor.u32 %v4745_v63, %v16299_v12  ;;  %19995 = vst [vmem:[#allocation36_spill] sm:$0xff] %v16337_v42  ;;  %v4763_v31 = vshll.u32 %v16302_v57, 16  ;;  %v4767_v25 = vshrl.u32 %v16302_v57, 16 }
 0x168   : > { %v16328_v30 = vpop.f32.mrf.mxu0  ;;  %v5343_v5 = vrot.slane %v5341_v24, 4  ;;  %v4737_v2 = vrot.slane %v4736_v41, 4  ;;  %v12029_v32 = vrot.slane %v5228_v62, 9  ;;  %v4498_v51 = vld [vmem:[#allocation2 + $0x9c] sm:$0xf]  ;;  %v4751_v54 = vrot.slane %v4749_v4, 5 }
 0x169   : > { %19994 = vst [vmem:[#allocation35_spill] sm:$0xff] %v16328_v30  ;;  %v5344_v30 = vrot.slane %v16278_v26, 5  ;;  %v5350_v42 = vrot.slane %v5348_v34, 4  ;;  %v4756_v11 = vrot.slane %v4754_v38, 4  ;;  %v16349_v8 = vld [vmem:[#allocation2 + $0xa0] sm:$0xf]  ;;  %v16353_v7 = vsel %vm14845_vm14, %v5336_v55, %v5337_v17 }
 0x16a   : > { %v16339_v48 = vpop.f32.mrf.mxu0  ;;  %v16357_v26 = vsel %vm14845_vm14, %v12028_v50, %v5341_v24  ;;  %v4747_v62 = vrot.slane %v4746_v1, 4  ;;  %v4759_v41 = vrot.slane %v4757_v0, 5  ;;  %v19997_v4 = vcombine.low %v15905_v20, %v15909_v3  ;;  %v16402_v1 = vld [vmem:[#allocation2 + $0xa4] sm:$0x1] }
 0x16b   : > { %19996 = vst [vmem:[#allocation37_spill] sm:$0xff] %v16339_v48  ;;  %v5351_v48 = vrot.slane %v16291_v19, 5  ;;  %v19998_v38 = vcombine.low %v16020_v39, %v16024_v49  ;;  %v4718_v17 = vsel %vm14380_vm8, %v4713_v46, %v16285_v53  ;;  %v4728_v55 = vsel %vm14380_vm8, %v4723_v36, %v4727_v6  ;;  %v5229_v53 = vld [vmem:[#allocation2 + $0x90] sm:$0xe] }
 0x16c   : > { %v16346_v63 = vpop.f32.mrf.mxu0  ;;  %v16374_v0 = vrot.slane %v4763_v31, 5  ;;  %v4769_v24 = vrot.slane %v4767_v25, 4  ;;  %v19999_v20 = vcombine.low %v16082_v52, %v16086_v21  ;;  %v16382_v3 = vsel %vm14845_vm14, %v5343_v5, %v5344_v30 }
 0x16d   : > { %v16359_v44 = vpop.f32.mrf.mxu1  ;;  %v4742_v39 = vsel %vm14380_vm8, %v4737_v2, %v16299_v12  ;;  %v16389_v49 = vsel %vm14845_vm14, %v12029_v32, %v5348_v34  ;;  %v16397_v52 = vsel %vm14845_vm14, %v5350_v42, %v5351_v48  ;;  %v4773_v21 = vshll.u32 %v16344_v35, 16 }
 0x16e   : > { %13301 = vmatmul.mubr.bf16.gmra.mxu1 %v19997_v4  ;;  %v16364_v19 = vpop.f32.mrf.mxu0  ;;  %13417 = vmatmul.mubr.bf16.vlgmr.msra.gmra.mxu0 %v19998_v38  ;;  %v4778_v30 = vshrl.u32 %v4498_v51, 16  ;;  %v4781_v46 = vshll.u32 %v4498_v51, 16  ;;  %v4752_v12 = vsel %vm14380_vm8, %v4747_v62, %v4751_v54  ;;  %v4760_v50 = vor.u32 %v4759_v41, %v4756_v11  ;;  %v4501_v11 = vld [vmem:[#allocation2 + $0xa8] sm:$0xf]  ;;  %v16445_v4 = vld [vmem:[#allocation2 + $0xac] sm:$0xf] }
 0x16f   : > { %13368 = vmatprep.mubr.bf16.mxu1 %v16039_v22  ;;  %13420 = vmatprep.mubr.bf16.mxu0 %v19999_v20  ;;  %v16391_v31 = vpop.f32.mrf.mxu1  ;;  %v4787_v32 = vshll.u32 %v16349_v8, 16  ;;  %v4791_v34 = vshrl.u32 %v16349_v8, 16  ;;  %v20000_v42 = vsel %vm14380_vm8, %v16238_v59, %v16214_v18  ;;  %v20001_v48 = vsel %vm14380_vm8, %v16236_v47, %v16181_v9  ;;  %v5230_v20 = vld [vmem:[#allocation2 + $0x9c] sm:$0xe] }
 0x170   : > { %v16393_v22 = vpop.f32.mrf.mxu0  ;;  %v16420_v25 = vcombine.low %v20001_v48, %v20000_v42  ;;  %v20002_v5 = vsel %vm14380_vm8, %v16289_v61, %v16234_v43  ;;  %v4770_v51 = vor.u32 %v4769_v24, %v16374_v0  ;;  %v5355_v54 = vrot.slane %v16302_v57, 5  ;;  %v20003_v42 = vld [vmem:[#allocation19_spill] sm:$0xff] }
 0x171   : > { %v16406_v36 = vpop.f32.mrf.mxu1  ;;  %v16427_v2 = vcombine.low %v20002_v5, %v4704_v45  ;;  %v16433_v59 = vcombine.low %v4718_v17, %v4728_v55  ;;  %v12030_v47 = vrot.slane %v5229_v53, 9  ;;  %v16441_v43 = vcombine.low %v4742_v39, %v4752_v12 }
 0x172   : > { %v16408_v6 = vpop.f32.mrf.mxu0  ;;  %v4780_v57 = vrot.slane %v4778_v30, 4  ;;  %v4783_v45 = vrot.slane %v4781_v46, 5  ;;  %v4761_v38 = vrot.slane %v4760_v50, 4  ;;  %v4775_v17 = vrot.slane %v4773_v21, 5  ;;  %v20005_v21 = vld [vmem:[#allocation11_spill] sm:$0xff] }
 0x173   : > { %v16437_v62 = vpop.f32.mrf.mxu1  ;;  %v16447_v55 = vrot.slane %v4787_v32, 5  ;;  %v4793_v24 = vrot.slane %v4791_v34, 4  ;;  %v20004_v39 = vcombine.low %v16124_v33, %v16138_v56  ;;  %v4771_v12 = vrot.slane %v4770_v51, 4 }
 0x174   : > { %v16439_v41 = vpop.f32.mrf.mxu0  ;;  %v5357_v30 = vrot.slane %v5355_v54, 4  ;;  %v5358_v46 = vrot.slane %v16344_v35, 5  ;;  %v4797_v50 = vshll.u32 %v16402_v1, 16  ;;  %v20006_v34 = vcombine.low %v16174_v14, %v16178_v40  ;;  %v20008_v14 = vld [vmem:[#allocation12_spill] sm:$0xff] }
 0x175   : > { %v13082_v53 = vpop.f32.mrf.mxu1  ;;  %v5362_v5 = vrot.slane %v16349_v8, 5  ;;  %v4805_v61 = vshll.u32 %v4501_v11, 16  ;;  %v16467_v35 = vsel %vm14845_vm14, %v12030_v47, %v5355_v54  ;;  %v4784_v51 = vor.u32 %v4783_v45, %v4780_v57 }
 0x176   : > { %13369 = vmatmul.mubr.bf16.vlgmr.msra.gmra.mxu1 %v20003_v42  ;;  %v16450_v48 = vpop.f32.mrf.mxu0  ;;  %13421 = vmatmul.mubr.bf16.gmra.mxu0 %v20004_v39  ;;  %v1837_v32 = vadd.f32 %v13082_v53, %v20005_v21  ;;  %v4802_v42 = vshrl.u32 %v4501_v11, 16  ;;  %v4811_v53 = vshll.u32 %v16445_v4, 16  ;;  %v4766_v8 = vsel %vm14380_vm8, %v4761_v38, %v16374_v0  ;;  %v16479_v21 = vld [vmem:[#allocation2 + $0xb0] sm:$0x1]  ;;  %v20010_v0 = vld [vmem:[#allocation14_spill] sm:$0xff] }
 0x177   : > { %13372 = vmatprep.mubr.bf16.mxu1 %v16117_v10  ;;  %13424 = vmatprep.mubr.bf16.mxu0 %v20006_v34  ;;  %v1828_v33 = vpop.f32.mrf.mxu1  ;;  %v4815_v10 = vshrl.u32 %v16445_v4, 16  ;;  %v4794_v11 = vor.u32 %v4793_v24, %v16447_v55  ;;  %v4776_v57 = vsel %vm14380_vm8, %v4771_v12, %v4775_v17  ;;  %v16489_v45 = vrot.slane %v4797_v50, 5 }
 0x178   : > { %v16463_v56 = vpop.f32.mrf.mxu0  ;;  %v16472_v39 = vadd.f32 %v16364_v19, %v1837_v32  ;;  %v1829_v40 = vadd.f32 %v1828_v33, %v20008_v14  ;;  %v16487_v19 = vsel %vm14845_vm14, %v5357_v30, %v5358_v46  ;;  %v12031_v32 = vrot.slane %v5230_v20, 9  ;;  %v4504_v14 = vld [vmem:[#allocation2 + $0xb4] sm:$0xf] }
 0x179   : > { %v13083_v54 = vpop.f32.mrf.mxu1  ;;  %v4804_v24 = vrot.slane %v4802_v42, 4  ;;  %v4807_v33 = vrot.slane %v4805_v61, 5  ;;  %v5365_v17 = vrot.slane %v16402_v1, 5  ;;  %v16500_v12 = vrot.slane %v4811_v53, 5  ;;  %v16508_v61 = vld [vmem:[#allocation2 + $0xb8] sm:$0xf] }
 0x17a   : > { %20007 = vst [vmem:[#allocation19_spill] sm:$0xff] %v16472_v39  ;;  %v16481_v47 = vpop.f32.mrf.mxu0  ;;  %v16492_v34 = vadd.f32 %v16393_v22, %v1829_v40  ;;  %v1840_v38 = vadd.f32 %v13083_v54, %v20010_v0  ;;  %v16497_v39 = vrot.slane %v4784_v51, 4  ;;  %v4817_v30 = vrot.slane %v4815_v10, 4  ;;  %v20012_v22 = vld [vmem:[#allocation15_spill] sm:$0xff] }
 0x17b   : > { %v1831_v9 = vpop.f32.mrf.mxu1  ;;  %v16506_v50 = vrot.slane %v4794_v11, 4  ;;  %v5364_v42 = vrot.slane %v5362_v5, 4  ;;  %v20013_v1 = vcombine.low %v16225_v27, %v16229_v29  ;;  %v16516_v53 = vcombine.low %v4766_v8, %v4776_v57  ;;  %v14073_v8 = vld [vmem:[%s19803_s3 + $0x38] sm:$0xff]  }
 0x17c   : > { %20009 = vst [vmem:[#allocation11_spill] sm:$0xff] %v16492_v34  ;;  %v16495_v18 = vpop.f32.mrf.mxu0  ;;  %v16503_v20 = vadd.f32 %v16408_v6, %v1840_v38  ;;  %v1832_v46 = vadd.f32 %v1831_v9, %v20012_v22  ;;  %v16522_v9 = vsel %vm14845_vm14, %v12031_v32, %v5362_v5  ;;  %v4821_v10 = vshll.u32 %v16479_v21, 16  ;;  %v16555_v22 = vld [vmem:[#allocation2 + $0xbc] sm:$0x1]  ;;  %13448 = vmatprep.subr.bf16.mxu1 %v14073_v8 }
 0x17d   : > { %v13086_v40 = vpop.f32.mrf.mxu1  ;;  %v20016_v27 = vcombine.low %v16260_v37, %v16266_v23  ;;  %v4808_v29 = vor.u32 %v4807_v33, %v4804_v24  ;;  %v4818_v32 = vor.u32 %v4817_v30, %v16500_v12  ;;  %v4826_v0 = vshrl.u32 %v4504_v14, 16  ;;  %v4507_v30 = vld [vmem:[#allocation2 + $0xc0] sm:$0xf]  ;;  %13449 = vmatpush3.bf16.msra.mxu1 %v14073_v8 }
 0x17e   : > { %20011 = vst [vmem:[#allocation12_spill] sm:$0xff] %v16503_v20  ;;  %13373 = vmatmul.mubr.bf16.gmra.mxu1 %v16151_v13  ;;  %v16511_v51 = vpop.f32.mrf.mxu0  ;;  %13425 = vmatmul.mubr.bf16.gmra.mxu0 %v20013_v1  ;;  %v16526_v11 = vadd.f32 %v16439_v41, %v1832_v46  ;;  %v20015_v13 = vld [vmem:[#allocation18_spill] sm:$0xff]  ;;  %v4829_v38 = vshll.u32 %v4504_v14, 16  ;;  %v16553_v33 = vsel %vm14845_vm14, %v5364_v42, %v5365_v17  ;;  %v4839_v1 = vshrl.u32 %v16508_v61, 16  ;;  %v20019_v42 = vld [vmem:[#allocation21_spill] sm:$0xff] }
 0x17f   : > { %v1853_v54 = vadd.f32 %v13086_v40, %v20015_v13  ;;  %13376 = vmatprep.mubr.bf16.mxu1 %v16247_v15  ;;  %13428 = vmatprep.mubr.bf16.mxu0 %v20016_v27  ;;  %v1844_v5 = vpop.f32.mrf.mxu1  ;;  %v5231_v15 = vld [vmem:[#allocation2 + $0xa8] sm:$0xe]  ;;  %v4835_v40 = vshll.u32 %v16508_v61, 16  ;;  %v16564_v13 = vld [vmem:[#allocation2 + $0xc4] sm:$0xf]  ;;  %v16570_v27 = vrot.slane %v4808_v29, 4 }
 0x180   : > { %20014 = vst [vmem:[#allocation14_spill] sm:$0xff] %v16526_v11  ;;  %v16536_v57 = vpop.f32.mrf.mxu0  ;;  %v1845_v23 = vadd.f32 %v1844_v5, %v16103_v58  ;;  %v5369_v58 = vrot.slane %v16445_v4, 5  ;;  %v12032_v5 = vrot.slane %v5231_v15, 9  ;;  %v16577_v24 = vrot.slane %v4818_v32, 4  ;;  %v20022_v11 = vld [vmem:[#allocation30_spill] sm:$0xff] }
 0x181   : > { %v16544_v37 = vadd.f32 %v16450_v48, %v1853_v54  ;;  %v13087_v46 = vpop.f32.mrf.mxu1  ;;  %v16559_v48 = vrot.slane %v4821_v10, 5  ;;  %v14074_v10 = vld [vmem:[%s19803_s3 + $0x30] sm:$0xff]   ;;  %v5372_v6 = vrot.slane %v16479_v21, 5  ;;  %v4828_v8 = vrot.slane %v4826_v0, 4 }
 0x182   : > { %v16557_v14 = vpop.f32.mrf.mxu0  ;;  %v16567_v17 = vadd.f32 %v16463_v56, %v1845_v23  ;;  %v1856_v54 = vadd.f32 %v13087_v46, %v20019_v42  ;;  %v20021_v23 = vld [vmem:[#allocation23_spill] sm:$0xff]  ;;  %v16584_v46 = vld [vmem:[#allocation2 + $0xb4] sm:$0xe]  ;;  %v4850_v15 = vshrl.u32 %v4507_v30, 16  ;;  %v4853_v42 = vshll.u32 %v4507_v30, 16  ;;  %13450 = vmatprep.subr.bf16.mxu1 %v14074_v10  ;;  %v20025_v30 = vld [vmem:[#allocation25_spill] sm:$0xff] }
 0x183   : > { %20017 = vst [vmem:[#allocation15_spill] sm:$0xff] %v16544_v37  ;;  %v1847_v4 = vpop.f32.mrf.mxu1  ;;  %v4831_v37 = vrot.slane %v4829_v38, 5  ;;  %v20023_v21 = vcombine.low %v16313_v16, %v16353_v7  ;;  %v5371_v32 = vrot.slane %v5369_v58, 4  ;;  %v16592_v0 = vrot.slane %v4835_v40, 5  ;;  %v4510_v40 = vld [vmem:[#allocation2 + $0xcc] sm:$0xf]  ;;  %13451 = vmatpush3.bf16.msra.mxu1 %v14074_v10 }
 0x184   : > { %20018 = vst [vmem:[#allocation18_spill] sm:$0xff] %v16567_v17  ;;  %v16575_v41 = vpop.f32.mrf.mxu0  ;;  %v16581_v56 = vadd.f32 %v16481_v47, %v1856_v54  ;;  %v1848_v29 = vadd.f32 %v1847_v4, %v20021_v23  ;;  %v16594_v47 = vrot.slane %v4839_v1, 4  ;;  %v4845_v38 = vshll.u32 %v16555_v22, 16  ;;  %v14075_v1 = vld [vmem:[%s19803_s3 + $0x28] sm:$0xff]   ;;  %v16635_v10 = vld [vmem:[#allocation2 + $0xd0] sm:$0xf] }
 0x185   : > { %v13090_v17 = vpop.f32.mrf.mxu1  ;;  %v4859_v16 = vshll.u32 %v16564_v13, 16  ;;  %v4852_v7 = vrot.slane %v4850_v15, 4  ;;  %13452 = vmatprep.subr.bf16.mxu1 %v14075_v1  ;;  %v20030_v15 = vld [vmem:[#allocation29_spill] sm:$0xff] }
 0x186   : > { %20020 = vst [vmem:[#allocation21_spill] sm:$0xff] %v16581_v56  ;;  %13377 = vmatmul.mubr.bf16.gmra.mxu1 %v20022_v11  ;;  %v16587_v20 = vpop.f32.mrf.mxu0  ;;  %13429 = vmatmul.mubr.bf16.gmra.mxu0 %v20023_v21  ;;  %v16598_v54 = vadd.f32 %v16495_v18, %v1848_v29  ;;  %v1869_v4 = vadd.f32 %v13090_v17, %v20025_v30  ;;  %v20028_v21 = vld [vmem:[#allocation27_spill] sm:$0xff] }
 0x187   : > { %13380 = vmatprep.mubr.bf16.mxu1 %v16420_v25  ;;  %v20026_v11 = vcombine.low %v16357_v26, %v16382_v3  ;;  %v1860_v18 = vpop.f32.mrf.mxu1  ;;  %v16615_v25 = vsel %vm14845_vm14, %v12032_v5, %v5369_v58  ;;  %v4832_v17 = vor.u32 %v4831_v37, %v4828_v8  ;;  %v19837_v26 = vrot.slane %v16508_v61, 5  ;;  %13453 = vmatpush3.bf16.msra.mxu1 %v14075_v1 }
 0x188   : > { %20024 = vst [vmem:[#allocation23_spill] sm:$0xff] %v16598_v54  ;;  %v16611_v23 = vpop.f32.mrf.mxu0  ;;  %v4863_v3 = vshrl.u32 %v16564_v13, 16  ;;  %v16620_v29 = vadd.f32 %v16511_v51, %v1869_v4  ;;  %v1861_v30 = vadd.f32 %v1860_v18, %v20028_v21  ;;  %v4855_v54 = vrot.slane %v4853_v42, 5  ;;  %v14076_v21 = vld [vmem:[%s19803_s3 + $0x20] sm:$0xff]  }
 0x189   : > { %13432 = vmatprep.mubr.bf16.mxu0 %v20026_v11  ;;  %v16623_v11 = vld [vmem:[#allocation2 + $0xc8] sm:$0x1]  ;;  %v13091_v56 = vpop.f32.mrf.mxu1  ;;  %v16631_v58 = vrot.slane %v4845_v38, 5  ;;  %v16641_v4 = vrot.slane %v4859_v16, 5  ;;  %v16650_v5 = vsel %vm14845_vm14, %v5371_v32, %v5372_v6  ;;  %v16652_v51 = vrot.slane %v4832_v17, 4  ;;  %13454 = vmatprep.subr.bf16.mxu1 %v14076_v21 }
 0x18a   : > { %20027 = vst [vmem:[#allocation30_spill] sm:$0xff] %v16620_v29  ;;  %v16625_v34 = vpop.f32.mrf.mxu0  ;;  %v16638_v8 = vadd.f32 %v16536_v57, %v1861_v30  ;;  %v1872_v42 = vadd.f32 %v13091_v56, %v20030_v15  ;;  %v4865_v18 = vrot.slane %v4863_v3, 4  ;;  %v4842_v57 = vor.u32 %v16594_v47, %v16592_v0  ;;  %v20031_v3 = vld [vmem:[#allocation32_spill] sm:$0xff]  ;;  %v5233_v29 = vld [vmem:[#allocation2 + $0xc0] sm:$0xe] }
 0x18b   : > { %v1863_v38 = vpop.f32.mrf.mxu1  ;;  %v4874_v56 = vshrl.u32 %v4510_v40, 16  ;;  %v5378_v15 = vrot.slane %v19837_v26, 4  ;;  %v20032_v47 = vcombine.low %v16389_v49, %v16397_v52  ;;  %v5383_v1 = vrot.slane %v16564_v13, 5  ;;  %v16679_v52 = vld [vmem:[#allocation2 + $0xd4] sm:$0x1]  ;;  %13455 = vmatpush3.bf16.msra.mxu1 %v14076_v21 }
 0x18c   : > { %20029 = vst [vmem:[#allocation25_spill] sm:$0xff] %v16638_v8  ;;  %v16646_v37 = vpop.f32.mrf.mxu0  ;;  %v16657_v16 = vadd.f32 %v16557_v14, %v1872_v42  ;;  %v1864_v30 = vadd.f32 %v1863_v38, %v20031_v3  ;;  %v4856_v8 = vor.u32 %v4855_v54, %v4852_v7  ;;  %v4869_v14 = vshll.u32 %v16623_v11, 16  ;;  %v20034_v54 = vld [vmem:[#allocation34_spill] sm:$0xff]  ;;  %v16682_v13 = vld [vmem:[#allocation2 + $0xcc] sm:$0xe] }
 0x18d   : > { %v13094_v6 = vpop.f32.mrf.mxu1  ;;  %v4876_v17 = vrot.slane %v4874_v56, 4  ;;  %v4877_v42 = vshll.u32 %v4510_v40, 16  ;;  %v4866_v49 = vor.u32 %v4865_v18, %v16641_v4  ;;  %v4883_v3 = vshll.u32 %v16635_v10, 16 }
 0x18e   : > { %13381 = vmatmul.mubr.bf16.gmra.mxu1 %v16427_v2  ;;  %v16663_v32 = vpop.f32.mrf.mxu0  ;;  %13433 = vmatmul.mubr.bf16.gmra.mxu0 %v20032_v47  ;;  %v16671_v38 = vadd.f32 %v16575_v41, %v1864_v30  ;;  %v1885_v7 = vadd.f32 %v13094_v6, %v20034_v54  ;;  %v20035_v2 = vcombine.low %v16467_v35, %v16487_v19  ;;  %v14077_v41 = vld [vmem:[%s19803_s3 + $0x18] sm:$0xff]   ;;  %v4887_v18 = vshrl.u32 %v16635_v10, 16  ;;  %v20036_v6 = vld [vmem:[#allocation35_spill] sm:$0xff] }
 0x18f   : > { %13384 = vmatprep.mubr.bf16.mxu1 %v16433_v59  ;;  %v1876_v40 = vpop.f32.mrf.mxu1  ;;  %v4824_v59 = vsel %vm14380_vm8, %v16577_v24, %v16559_v48  ;;  %v12064_v35 = vcombine.low %v16615_v25, %v16650_v5  ;;  %v4879_v19 = vrot.slane %v4877_v42, 5  ;;  %v16698_v54 = vrot.slane %v4842_v57, 4  ;;  %13456 = vmatprep.subr.bf16.mxu1 %v14077_v41 }
 0x190   : > { %20033 = vst [vmem:[#allocation27_spill] sm:$0xff] %v16671_v38  ;;  %13436 = vmatprep.mubr.bf16.mxu0 %v20035_v2  ;;  %v2345_v56 = vpop.f32.mrf.mxu0  ;;  %v16695_v30 = vadd.f32 %v16587_v20, %v1885_v7  ;;  %v1877_v47 = vadd.f32 %v1876_v40, %v20036_v6  ;;  %v16700_v2 = vrot.slane %v4856_v8, 4  ;;  %v16702_v24 = vrot.slane %v4869_v14, 5  ;;  %v20037_v20 = vld [vmem:[#allocation37_spill] sm:$0xff]  ;;  %v14078_v8 = vld [vmem:[%s19803_s3 + $0x10] sm:$0xff]   ;;  %13457 = vmatpush3.bf16.msra.mxu1 %v14077_v41 }
 0x191   : > { %v13095_v26 = vpop.f32.mrf.mxu1  ;;  %v12034_v48 = vrot.slane %v5233_v29, 9  ;;  %v5385_v25 = vrot.slane %v5383_v1, 4  ;;  %v5386_v5 = vrot.slane %v16623_v11, 5  ;;  %v16709_v7 = vrot.slane %v4866_v49, 4  ;;  %13458 = vmatprep.subr.bf16.mxu1 %v14078_v8 }
 0x192   : > { %v13147_v38 = vpop.f32.mrf.mxu0  ;;  %v16706_v21 = vadd.f32 %v16611_v23, %v1877_v47  ;;  %v1888_v42 = vadd.f32 %v13095_v26, %v20037_v20  ;;  %v4880_v57 = vor.u32 %v4879_v19, %v4876_v17  ;;  %v16716_v14 = vrot.slane %v4883_v3, 5 }
 0x193   : > { %v1879_v40 = vpop.f32.mrf.mxu1  ;;  %v16718_v29 = vrot.slane %v4887_v18, 4  ;;  %v4893_v11 = vshll.u32 %v16679_v52, 16  ;;  %v12035_v23 = vrot.slane %v16682_v13, 9  ;;  %v5390_v49 = vrot.slane %v16635_v10, 5 }
 0x194   : > { %v16714_v6 = vpop.f32.mrf.mxu0  ;;  %v16723_v26 = vadd.f32 %v16625_v34, %v1888_v42  ;;  %v1880_v17 = vadd.f32 %v1879_v40, %v16346_v63  ;;  %v5393_v19 = vrot.slane %v16679_v52, 5  ;;  %v20038_v18 = vcombine.low %v16522_v9, %v16553_v33  ;;  %v20042_v9 = vld [vmem:[#allocation13_spill] sm:$0xff]  ;;  %13459 = vmatpush3.bf16.msra.mxu1 %v14078_v8 }
 0x195   : > { %v13098_v47 = vpop.f32.mrf.mxu1  ;;  %v20039_v13 = vrot.slane %v16508_v61, 5  ;;  %v20040_v34 = vrot.slane %v16584_v46, 9  ;;  %v20041_v10 = vrot.slane %v16555_v22, 5  ;;  %v5387_v61 = vsel %vm14845_vm14, %v5385_v25, %v5386_v5  ;;  %v14080_v22 = vld [vmem:[%s19803_s3 + $0x8] sm:$0xff]  }
 0x196   : > { %13385 = vmatmul.mubr.bf16.gmra.mxu1 %v16441_v43  ;;  %v13150_v3 = vpop.f32.mrf.mxu0  ;;  %13437 = vmatmul.mubr.bf16.gmra.mxu0 %v20038_v18  ;;  %v5384_v43 = vsel %vm14845_vm14, %v12034_v48, %v5383_v1  ;;  %v16745_v41 = vadd.f32 %v16646_v37, %v1880_v17  ;;  %v1901_v33 = vadd.f32 %v13098_v47, %v20042_v9  ;;  %v16751_v46 = vrot.slane %v4880_v57, 4  ;;  %v20043_v1 = vld [vmem:[#allocation16_spill] sm:$0xff]  ;;  %v20047_v47 = vld [vmem:[#allocation17_spill] sm:$0xff] }
 0x197   : > { %v5377_v63 = vsel %vm14845_vm14, %v20040_v34, %v20039_v13  ;;  %v5380_v52 = vsel %vm14845_vm14, %v5378_v15, %v20041_v10  ;;  %13388 = vmatprep.mubr.bf16.mxu1 %v16516_v53  ;;  %13440 = vmatprep.mubr.bf16.mxu0 %v12064_v35  ;;  %v1892_v15 = vpop.f32.mrf.mxu1  ;;  %v20044_v35 = vsel %vm14380_vm8, %v16506_v50, %v16489_v45  ;;  %v4895_v45 = vrot.slane %v4893_v11, 5 }
 0x198   : > { %v2361_v20 = vpop.f32.mrf.mxu0  ;;  %v16757_v37 = vadd.f32 %v16663_v32, %v1901_v33  ;;  %v1893_v48 = vadd.f32 %v1892_v15, %v20043_v1  ;;  %13460 = vmatprep.subr.bf16.mxu1 %v14080_v22  ;;  %v20045_v25 = vsel %vm14380_vm8, %v16497_v39, %v16447_v55  ;;  %v20046_v32 = vsel %vm14380_vm8, %v16570_v27, %v16500_v12  ;;  %v14079_v55 = vld [vmem:[%s19802_s2 + $0x38] sm:$0xff]   ;;  %v14081_v39 = vld [vmem:[%s19803_s3] sm:$0xff]   ;;  %v20050_v15 = vld [vmem:[#allocation24_spill] sm:$0xff] }
 0x199   : > { %v13099_v53 = vpop.f32.mrf.mxu1  ;;  %v12007_v5 = vcombine.low %v20045_v25, %v20044_v35  ;;  %v12008_v57 = vcombine.low %v20046_v32, %v4824_v59  ;;  %v12065_v8 = vcombine.low %v5377_v63, %v5380_v52  ;;  %v12066_v40 = vcombine.low %v5384_v43, %v5387_v61  ;;  %13461 = vmatpush3.bf16.msra.mxu1 %v14080_v22  ;;  %v20048_v63 = vld [vmem:[#allocation10_spill] sm:$0xff] }
 0x19a   : > { %v13151_v42 = vpop.f32.mrf.mxu0  ;;  %v16775_v17 = vadd.f32 %v2345_v56, %v1893_v48  ;;  %v1904_v18 = vadd.f32 %v13099_v53, %v20047_v47  ;;  %v5392_v50 = vrot.slane %v5390_v49, 4  ;;  %13496 = vmatprep.subr.bf16.mxu0 %v14079_v55  ;;  %13462 = vmatprep.subr.bf16.mxu1 %v14081_v39  ;;  %v4838_v11 = vsel %vm14380_vm8, %v16652_v51, %v16592_v0 }
 0x19b   : > { %v16784_v13 = vpop.f32.mrf.mxu1  ;;  %v4848_v34 = vsel %vm14380_vm8, %v16698_v54, %v16631_v58  ;;  %v5391_v52 = vsel %vm14845_vm14, %v12035_v23, %v5390_v49  ;;  %v4862_v58 = vsel %vm14380_vm8, %v16700_v2, %v16641_v4  ;;  %v4872_v54 = vsel %vm14380_vm8, %v16709_v7, %v16702_v24  ;;  %13497 = vmatpush3.bf16.msra.mxu0 %v14079_v55  ;;  %v20049_v23 = vld [vmem:[#allocation22_spill] sm:$0xff]  ;;  %v14083_v24 = vld [vmem:[%s19802_s2 + $0x30] sm:$0xff]  }
 0x19c   : > { %v16786_v12 = vpop.f32.mrf.mxu0  ;;  %v16788_v27 = vadd.f32 %v13147_v38, %v1904_v18  ;;  %v4890_v38 = vor.u32 %v16718_v29, %v16716_v14  ;;  %v5394_v43 = vsel %vm14845_vm14, %v5392_v50, %v5393_v19  ;;  %v12009_v19 = vcombine.low %v4838_v11, %v4848_v34  ;;  %13498 = vmatprep.subr.bf16.mxu0 %v14083_v24  ;;  %v14243_v34 = vld [vmem:[%s14352_s7] sm:$0xf] }
 0x19d   : > { %v13102_v56 = vpop.f32.mrf.mxu1  ;;  %13463 = vmatpush3.bf16.msra.mxu1 %v14081_v39  ;;  %v12067_v61 = vcombine.low %v5391_v52, %v5394_v43  ;;  %v12010_v4 = vcombine.low %v4862_v58, %v4872_v54 }
 0x19e   : > { %13389 = vmatmul.mubr.bf16.gmra.mxu1 %v12007_v5  ;;  %v13154_v59 = vpop.f32.mrf.mxu0  ;;  %13441 = vmatmul.mubr.bf16.gmra.mxu0 %v12065_v8  ;;  %v1917_v10 = vadd.f32 %v13102_v56, %v20048_v63  ;;  %v4891_v2 = vrot.slane %v4890_v38, 4  ;;  %v4886_v5 = vsel %vm14380_vm8, %v16751_v46, %v16716_v14  ;;  %v20053_v56 = vld [vmem:[#allocation33_spill] sm:$0xff]  ;;  %v14244_v38 = vld [vmem:[%s14352_s7 + $0x4] sm:$0xf]  ;;  %v14086_v46 = vld [vmem:[%s19802_s2 + $0x28] sm:$0xff]  }
 0x19f   : > { %13392 = vmatprep.mubr.bf16.mxu1 %v12008_v57  ;;  %13444 = vmatprep.mubr.bf16.mxu0 %v12066_v40  ;;  %v1908_v0 = vpop.f32.mrf.mxu1  ;;  %v20052_v40 = vld [vmem:[#allocation31_spill] sm:$0xff]  ;;  %v12109_v14 = vcombine.low %v14243_v34, %v14244_v38  ;;  %v14249_v38 = vld [vmem:[%s14352_s7 + $0x18] sm:$0xf] }
 0x1a0   : > { %v2377_v51 = vpop.f32.mrf.mxu0  ;;  %v16813_v29 = vadd.f32 %v13150_v3, %v1917_v10  ;;  %v1909_v49 = vadd.f32 %v1908_v0, %v20049_v23  ;;  %v4896_v32 = vsel %vm14380_vm8, %v4891_v2, %v4895_v45  ;;  %13499 = vmatpush3.bf16.msra.mxu0 %v14083_v24  ;;  %v20054_v10 = vld [vmem:[#allocation36_spill] sm:$0xff] }
 0x1a1   : > { %v13103_v9 = vpop.f32.mrf.mxu1  ;;  %v12011_v50 = vcombine.low %v4886_v5, %v4896_v32  ;;  %13500 = vmatprep.subr.bf16.mxu0 %v14086_v46  ;;  %v14247_v2 = vld [vmem:[%s14352_s7 + $0x10] sm:$0xf]  ;;  %v14248_v24 = vld [vmem:[%s14352_s7 + $0x14] sm:$0xf]  ;;  %v20055_v32 = vld [vmem:[#allocation19_spill] sm:$0xff] }
 0x1a2   : > { %v13155_v33 = vpop.f32.mrf.mxu0  ;;  %v16816_v22 = vadd.f32 %v2361_v20, %v1909_v49  ;;  %v1920_v1 = vadd.f32 %v13103_v9, %v20050_v15  ;;  %v20051_v20 = vld [vmem:[#allocation28_spill] sm:$0xff] }
 0x1a3   : > { %v16822_v7 = vpop.f32.mrf.mxu1 }
 0x1a4   : > { %v16824_v3 = vpop.f32.mrf.mxu0  ;;  %v16826_v48 = vadd.f32 %v13151_v42, %v1920_v1  ;;  %13501 = vmatpush3.bf16.msra.mxu0 %v14086_v46 }
 0x1a6   : > { %v13106_v53 = vpop.f32.mrf.mxu1  ;;  %13393 = vmatmul.mubr.bf16.gmra.mxu1 %v12009_v19  ;;  %v13158_v35 = vpop.f32.mrf.mxu0  ;;  %13445 = vmatmul.mubr.bf16.gmra.mxu0 %v12067_v61  ;;  %v14246_v61 = vld [vmem:[%s14352_s7 + $0xc] sm:$0xf] }
 0x1a7   : > { %v1933_v25 = vadd.f32 %v13106_v53, %v20051_v20  ;;  %13396 = vmatprep.mubr.bf16.mxu1 %v12010_v4  ;;  %v12111_v53 = vcombine.low %v14247_v2, %v14248_v24 }
 0x1a8   : > { %v1924_v42 = vpop.f32.mrf.mxu1  ;;  %v2393_v57 = vpop.f32.mrf.mxu0 }
 0x1a9   : > { %v16835_v8 = vadd.f32 %v13154_v59, %v1933_v25  ;;  %v1925_v47 = vadd.f32 %v1924_v42, %v20052_v40 }
 0x1aa   : > { %v13107_v18 = vpop.f32.mrf.mxu1  ;;  %v13159_v55 = vpop.f32.mrf.mxu0 }
 0x1ab   : > { %v16838_v39 = vadd.f32 %v2377_v51, %v1925_v47  ;;  %v1936_v11 = vadd.f32 %v13107_v18, %v20053_v56 }
 0x1ac   : > { %v1927_v45 = vpop.f32.mrf.mxu1  ;;  %v16846_v63 = vpop.f32.mrf.mxu0 }
 0x1ad   : > { %v16848_v59 = vadd.f32 %v13155_v33, %v1936_v11  ;;  %v16851_v52 = vadd.f32 %v1927_v45, %v20054_v10  ;;  %v14245_v33 = vld [vmem:[%s14352_s7 + $0x8] sm:$0xf]  ;;  %v20058_v10 = vld [vmem:[#allocation12_spill] sm:$0xff] }
 0x1ae   : > { %v13110_v43 = vpop.f32.mrf.mxu1  ;;  %13397 = vmatmul.mubr.bf16.gmra.mxu1 %v12011_v50  ;;  %v13226_v0 = vpop.f32.mrf.mxu0  ;;  %v12110_v15 = vcombine.low %v14245_v33, %v14246_v61  ;;  %v20060_v61 = vld [vmem:[#allocation14_spill] sm:$0xff] }
 0x1af   : > { %v1949_v51 = vadd.f32 %v13110_v43, %v16359_v44  ;;  %13464 = vmatprep.mubr.bf16.mxu1 %v12109_v14  ;;  %v14089_v44 = vld [vmem:[%s19802_s2 + $0x20] sm:$0xff]   ;;  %v14250_v14 = vld [vmem:[%s14352_s7 + $0x1c] sm:$0xf] }
 0x1b0   : > { %v1940_v58 = vpop.f32.mrf.mxu1  ;;  %v3421_v54 = vpop.f32.mrf.mxu0  ;;  %13502 = vmatprep.subr.bf16.mxu0 %v14089_v44  ;;  %v12112_v46 = vcombine.low %v14249_v38, %v14250_v14  ;;  %v17263_v14 = vld [vmem:[%s19804_s4] ss:$0 sm:$0xff] }
 0x1b1   : > { %v16854_v23 = vadd.f32 %v13158_v35, %v1949_v51  ;;  %v1941_v49 = vadd.f32 %v1940_v58, %v16391_v31  ;;  %13503 = vmatpush3.bf16.msra.mxu0 %v14089_v44  ;;  %v14251_v51 = vld [vmem:[%s14352_s7 + $0x20] sm:$0xf]  ;;  %v14252_v58 = vld [vmem:[%s14352_s7 + $0x24] sm:$0xf] }
 0x1b2   : > { %v13111_v9 = vpop.f32.mrf.mxu1  ;;  %v13227_v19 = vpop.f32.mrf.mxu0 }
 0x1b3   : > { %v16859_v1 = vadd.f32 %v2393_v57, %v1941_v49  ;;  %v1952_v4 = vadd.f32 %v13111_v9, %v16406_v36  ;;  %v347_v57 = vld [vmem:[#allocation3 + $0x18] sm:$0x1]  ;;  %v12113_v49 = vcombine.low %v14251_v51, %v14252_v58  ;;  %v14256_v58 = vld [vmem:[%s14352_s7 + $0x34] sm:$0xf] }
 0x1b4   : > { %v1943_v35 = vpop.f32.mrf.mxu1  ;;  %v16867_v20 = vpop.f32.mrf.mxu0  ;;  %v348_v50 = vsel %vm14359_vm5, 0, %v347_v57  ;;  %v395_v57 = vld [vmem:[#allocation3 + $0x20] sm:$0x1]  ;;  %v14255_v51 = vld [vmem:[%s14352_s7 + $0x30] sm:$0xf] }
 0x1b5   : > { %v16869_v31 = vadd.f32 %v13159_v55, %v1952_v4  ;;  %v16872_v25 = vadd.f32 %v1943_v35, %v16437_v62  ;;  %v20057_v55 = vld [vmem:[#allocation11_spill] sm:$0xff]  ;;  %349 = vst [vmem:[#allocation3 + $0x18] sm:$0x1] %v348_v50 }
 0x1b6   : > { %v13178_v5 = vpop.f32.mrf.mxu1  ;;  %v13230_v36 = vpop.f32.mrf.mxu0  ;;  %13465 = vmatmul.mubr.bf16.vlgmr.msra.gmra.mxu1 %v12110_v15 }
 0x1b7   : > { %v2796_v42 = vadd.f32 %v13178_v5, %v20055_v32  ;;  %13468 = vmatprep.mubr.bf16.mxu1 %v12111_v53  ;;  %v344_v53 = vld [vmem:[#allocation3 + $0xc] sm:$0x1] }
 0x1b8   : > { %v2667_v40 = vpop.f32.mrf.mxu1  ;;  %v3437_v47 = vpop.f32.mrf.mxu0  ;;  %v20063_v32 = vld [vmem:[#allocation18_spill] sm:$0xff] }
 0x1b9   : > { %v16877_v62 = vadd.f32 %v13226_v0, %v2796_v42  ;;  %v2794_v56 = vadd.f32 %v2667_v40, %v20057_v55  ;;  %v14097_v40 = vld [vmem:[%s19802_s2 + $0x78] sm:$0xff]  }
 0x1ba   : > { %v13179_v11 = vpop.f32.mrf.mxu1  ;;  %v13231_v34 = vpop.f32.mrf.mxu0  ;;  %13544 = vmatprep.subr.bf16.mxu1 %v14097_v40 }
 0x1bb   : > { %v16882_v45 = vadd.f32 %v3421_v54, %v2794_v56  ;;  %v2797_v43 = vadd.f32 %v13179_v11, %v20058_v10  ;;  %v20061_v54 = vld [vmem:[#allocation15_spill] sm:$0xff]  ;;  %13545 = vmatpush3.bf16.msra.mxu1 %v14097_v40 }
 0x1bc   : > { %v2670_v9 = vpop.f32.mrf.mxu1  ;;  %v16887_v33 = vpop.f32.mrf.mxu0  ;;  %v14253_v56 = vld [vmem:[%s14352_s7 + $0x28] sm:$0xf]  ;;  %v14254_v11 = vld [vmem:[%s14352_s7 + $0x2c] sm:$0xf] }
 0x1bd   : > { %20059 = vst [vmem:[#allocation29_spill] sm:$0xff] %v16887_v33  ;;  %v16889_v0 = vadd.f32 %v13227_v19, %v2797_v43  ;;  %v16892_v15 = vadd.f32 %v2670_v9, %v20060_v61  ;;  %v345_v19 = vsel %vm14359_vm5, 0, %v344_v53  ;;  %v12114_v38 = vcombine.low %v14253_v56, %v14254_v11  ;;  %v350_v11 = vld [vmem:[#allocation3 + $0x24] sm:$0x1] }
 0x1be   : > { %v13182_v4 = vpop.f32.mrf.mxu1  ;;  %v13234_v2 = vpop.f32.mrf.mxu0  ;;  %13469 = vmatmul.mubr.bf16.gmra.mxu1 %v12112_v46  ;;  %346 = vst [vmem:[#allocation3 + $0xc] sm:$0x1] %v345_v19  ;;  %v396_v46 = vsel %vm14367_vm7, 0, %v395_v57  ;;  %v20069_v57 = vld [vmem:[#allocation30_spill] sm:$0xff] }
 0x1bf   : > { %v2800_v24 = vadd.f32 %v13182_v4, %v20061_v54  ;;  %13472 = vmatprep.mubr.bf16.mxu1 %v12113_v49  ;;  %v12115_v49 = vcombine.low %v14255_v51, %v14256_v58  ;;  %397 = vst [vmem:[#allocation3 + $0x20] sm:$0x1] %v396_v46  ;;  %v392_v4 = vld [vmem:[#allocation3 + $0x14] sm:$0x1] }
 0x1c0   : > { %v2683_v44 = vpop.f32.mrf.mxu1  ;;  %v3453_v35 = vpop.f32.mrf.mxu0 }
 0x1c1   : > { %v16897_v5 = vadd.f32 %v13230_v36, %v2800_v24  ;;  %v2798_v42 = vadd.f32 %v2683_v44, %v20063_v32  ;;  %v20066_v36 = vld [vmem:[#allocation21_spill] sm:$0xff]  ;;  %v20068_v24 = vld [vmem:[#allocation23_spill] sm:$0xff]  ;;  %v393_v44 = vsel %vm14367_vm7, 0, %v392_v4 }
 0x1c2   : > { %v13183_v50 = vpop.f32.mrf.mxu1  ;;  %v13235_v55 = vpop.f32.mrf.mxu0  ;;  %394 = vst [vmem:[#allocation3 + $0x14] sm:$0x1] %v393_v44  ;;  %v14259_v44 = vld [vmem:[%s14352_s7 + $0x40] sm:$0xf] }
 0x1c3   : > { %20062 = vst [vmem:[#allocation32_spill] sm:$0xff] %v16897_v5  ;;  %v16907_v10 = vadd.f32 %v3437_v47, %v2798_v42  ;;  %v2801_v43 = vadd.f32 %v13183_v50, %v20066_v36  ;;  %v14092_v47 = vld [vmem:[%s19802_s2 + $0x18] sm:$0xff]   ;;  %v353_v42 = vld [vmem:[#allocation3 + $0x30] sm:$0x1] }
 0x1c4   : > { %v2686_v9 = vpop.f32.mrf.mxu1  ;;  %v16912_v61 = vpop.f32.mrf.mxu0  ;;  %13504 = vmatprep.subr.bf16.mxu0 %v14092_v47  ;;  %v354_v40 = vsel %vm14359_vm5, 0, %v353_v42  ;;  %v14273_v5 = vld [vmem:[%s14352_s7 + $0x78] sm:$0xf] }
 0x1c5   : > { %20065 = vst [vmem:[#allocation34_spill] sm:$0xff] %v16907_v10  ;;  %20067 = vst [vmem:[#allocation35_spill] sm:$0xff] %v16912_v61  ;;  %v16914_v54 = vadd.f32 %v13231_v34, %v2801_v43  ;;  %v16917_v53 = vadd.f32 %v2686_v9, %v20068_v24  ;;  %13505 = vmatpush3.bf16.msra.mxu0 %v14092_v47  ;;  %v351_v43 = vsel %vm14359_vm5, 0, %v350_v11  ;;  %v14258_v9 = vld [vmem:[%s14352_s7 + $0x3c] sm:$0xf]  ;;  %v14098_v24 = vld [vmem:[%s19802_s2 + $0x70] sm:$0xff]  }
 0x1c6   : > { %v13186_v19 = vpop.f32.mrf.mxu1  ;;  %v13238_v32 = vpop.f32.mrf.mxu0  ;;  %13473 = vmatmul.mubr.bf16.gmra.mxu1 %v12114_v38  ;;  %355 = vst [vmem:[#allocation3 + $0x30] sm:$0x1] %v354_v40  ;;  %v20070_v38 = vld [vmem:[#allocation25_spill] sm:$0xff]  ;;  %352 = vst [vmem:[#allocation3 + $0x24] sm:$0x1] %v351_v43  ;;  %13546 = vmatprep.subr.bf16.mxu1 %v14098_v24 }
 0x1c7   : > { %v2804_v34 = vadd.f32 %v13186_v19, %v20069_v57  ;;  %13476 = vmatprep.mubr.bf16.mxu1 %v12115_v49  ;;  %v14257_v49 = vld [vmem:[%s14352_s7 + $0x38] sm:$0xf]  ;;  %v14260_v19 = vld [vmem:[%s14352_s7 + $0x44] sm:$0xf]  ;;  %v14095_v57 = vld [vmem:[%s19802_s2 + $0x10] sm:$0xff]   ;;  %13547 = vmatpush3.bf16.msra.mxu1 %v14098_v24 }
 0x1c8   : > { %v2699_v50 = vpop.f32.mrf.mxu1  ;;  %v3469_v56 = vpop.f32.mrf.mxu0  ;;  %v12116_v4 = vcombine.low %v14257_v49, %v14258_v9  ;;  %v12117_v42 = vcombine.low %v14259_v44, %v14260_v19  ;;  %13506 = vmatprep.subr.bf16.mxu0 %v14095_v57  ;;  %v398_v44 = vld [vmem:[#allocation3 + $0x2c] sm:$0x1]  ;;  %v371_v61 = vld [vmem:[#allocation3 + $0x78] sm:$0x1] }
 0x1c9   : > { %v16927_v46 = vadd.f32 %v13234_v2, %v2804_v34  ;;  %v2802_v36 = vadd.f32 %v2699_v50, %v20070_v38  ;;  %v401_v34 = vld [vmem:[#allocation3 + $0x38] sm:$0x1]  ;;  %13507 = vmatpush3.bf16.msra.mxu0 %v14095_v57  ;;  %v14261_v57 = vld [vmem:[%s14352_s7 + $0x48] sm:$0xf] }
 0x1ca   : > { %v13187_v51 = vpop.f32.mrf.mxu1  ;;  %v13239_v58 = vpop.f32.mrf.mxu0  ;;  %v402_v11 = vsel %vm14367_vm7, 0, %v401_v34  ;;  %v14262_v34 = vld [vmem:[%s14352_s7 + $0x4c] sm:$0xf] }
 0x1cb   : > { %v16937_v47 = vadd.f32 %v3453_v35, %v2802_v36  ;;  %v2805_v2 = vadd.f32 %v13187_v51, %v16657_v16  ;;  %v20072_v35 = vld [vmem:[#allocation27_spill] sm:$0xff]  ;;  %403 = vst [vmem:[#allocation3 + $0x38] sm:$0x1] %v402_v11 }
 0x1cc   : > { %v2702_v40 = vpop.f32.mrf.mxu1  ;;  %v16945_v50 = vpop.f32.mrf.mxu0 }
 0x1cd   : > { %20071 = vst [vmem:[#allocation37_spill] sm:$0xff] %v16945_v50  ;;  %v16949_v38 = vadd.f32 %v13235_v55, %v2805_v2  ;;  %v16952_v36 = vadd.f32 %v2702_v40, %v20072_v35  ;;  %v14102_v55 = vld [vmem:[%s19802_s2 + $0x68] sm:$0xff]   ;;  %v14264_v35 = vld [vmem:[%s14352_s7 + $0x54] sm:$0xf]  ;;  %v14274_v50 = vld [vmem:[%s14352_s7 + $0x7c] sm:$0xf] }
 0x1ce   : > { %v13190_v16 = vpop.f32.mrf.mxu1  ;;  %v13242_v43 = vpop.f32.mrf.mxu0  ;;  %13477 = vmatmul.mubr.bf16.gmra.mxu1 %v12116_v4  ;;  %13548 = vmatprep.subr.bf16.mxu1 %v14102_v55 }
 0x1cf   : > { %20073 = vst [vmem:[#allocation13_spill] sm:$0xff] %v16952_v36  ;;  %v2808_v51 = vadd.f32 %v13190_v16, %v16695_v30  ;;  %13480 = vmatprep.mubr.bf16.mxu1 %v12117_v42  ;;  %v12118_v30 = vcombine.low %v14261_v57, %v14262_v34  ;;  %v399_v42 = vsel %vm14367_vm7, 0, %v398_v44  ;;  %13549 = vmatpush3.bf16.msra.mxu1 %v14102_v55  ;;  %v359_v57 = vld [vmem:[#allocation3 + $0x48] sm:$0x1] }
 0x1d0   : > { %v2715_v49 = vpop.f32.mrf.mxu1  ;;  %v3485_v9 = vpop.f32.mrf.mxu0  ;;  %400 = vst [vmem:[#allocation3 + $0x2c] sm:$0x1] %v399_v42 }
 0x1d1   : > { %v16958_v2 = vadd.f32 %v13238_v32, %v2808_v51  ;;  %v2806_v24 = vadd.f32 %v2715_v49, %v16706_v21  ;;  %v14263_v32 = vld [vmem:[%s14352_s7 + $0x50] sm:$0xf]  ;;  %v14103_v21 = vld [vmem:[%s19802_s2 + $0x60] sm:$0xff]  }
 0x1d2   : > { %v13191_v19 = vpop.f32.mrf.mxu1  ;;  %v13243_v4 = vpop.f32.mrf.mxu0  ;;  %v12119_v16 = vcombine.low %v14263_v32, %v14264_v35  ;;  %13550 = vmatprep.subr.bf16.mxu1 %v14103_v21  ;;  %v407_v35 = vld [vmem:[#allocation3 + $0x50] sm:$0x1] }
 0x1d3   : > { %v16965_v40 = vadd.f32 %v3469_v56, %v2806_v24  ;;  %v2809_v11 = vadd.f32 %v13191_v19, %v16723_v26  ;;  %v360_v26 = vsel %vm14359_vm5, 0, %v359_v57  ;;  %v14100_v56 = vld [vmem:[%s19802_s2 + $0x8] sm:$0xff]   ;;  %v356_v19 = vld [vmem:[#allocation3 + $0x3c] sm:$0x1]  ;;  %13551 = vmatpush3.bf16.msra.mxu1 %v14103_v21  ;;  %v14267_v21 = vld [vmem:[%s14352_s7 + $0x60] sm:$0xf] }
 0x1d4   : > { %v2718_v51 = vpop.f32.mrf.mxu1  ;;  %v16973_v49 = vpop.f32.mrf.mxu0  ;;  %361 = vst [vmem:[#allocation3 + $0x48] sm:$0x1] %v360_v26  ;;  %13508 = vmatprep.subr.bf16.mxu0 %v14100_v56  ;;  %v14266_v26 = vld [vmem:[%s14352_s7 + $0x5c] sm:$0xf] }
 0x1d5   : > { %20074 = vst [vmem:[#allocation16_spill] sm:$0xff] %v16973_v49  ;;  %v16975_v34 = vadd.f32 %v13239_v58, %v2809_v11  ;;  %v16978_v55 = vadd.f32 %v2718_v51, %v16745_v41  ;;  %v357_v41 = vsel %vm14359_vm5, 0, %v356_v19  ;;  %13509 = vmatpush3.bf16.msra.mxu0 %v14100_v56  ;;  %v404_v56 = vld [vmem:[#allocation3 + $0x44] sm:$0x1]  ;;  %v410_v49 = vld [vmem:[#allocation3 + $0x5c] sm:$0x1] }
 0x1d6   : > { %v13194_v24 = vpop.f32.mrf.mxu1  ;;  %v13246_v44 = vpop.f32.mrf.mxu0  ;;  %13481 = vmatmul.mubr.bf16.gmra.mxu1 %v12118_v30  ;;  %358 = vst [vmem:[#allocation3 + $0x3c] sm:$0x1] %v357_v41 }
 0x1d7   : > { %20075 = vst [vmem:[#allocation17_spill] sm:$0xff] %v16978_v55  ;;  %v2812_v58 = vadd.f32 %v13194_v24, %v16757_v37  ;;  %13484 = vmatprep.mubr.bf16.mxu1 %v12119_v16  ;;  %v14265_v37 = vld [vmem:[%s14352_s7 + $0x58] sm:$0xf]  ;;  %v408_v16 = vsel %vm14367_vm7, 0, %v407_v35  ;;  %v405_v35 = vsel %vm14367_vm7, 0, %v404_v56 }
 0x1d8   : > { %v2731_v42 = vpop.f32.mrf.mxu1  ;;  %v3501_v11 = vpop.f32.mrf.mxu0  ;;  %v12120_v24 = vcombine.low %v14265_v37, %v14266_v26  ;;  %409 = vst [vmem:[#allocation3 + $0x50] sm:$0x1] %v408_v16  ;;  %406 = vst [vmem:[#allocation3 + $0x44] sm:$0x1] %v405_v35  ;;  %v362_v56 = vld [vmem:[#allocation3 + $0x54] sm:$0x1] }
 0x1d9   : > { %v16988_v32 = vadd.f32 %v13242_v43, %v2812_v58  ;;  %v2810_v30 = vadd.f32 %v2731_v42, %v16775_v17  ;;  %v14268_v43 = vld [vmem:[%s14352_s7 + $0x64] sm:$0xf]  ;;  %v14107_v17 = vld [vmem:[%s19802_s2 + $0x58] sm:$0xff]  }
 0x1da   : > { %v13195_v51 = vpop.f32.mrf.mxu1  ;;  %v13247_v57 = vpop.f32.mrf.mxu0  ;;  %v12121_v58 = vcombine.low %v14267_v21, %v14268_v43  ;;  %13552 = vmatprep.subr.bf16.mxu1 %v14107_v17 }
 0x1db   : > { %v16995_v19 = vadd.f32 %v3485_v9, %v2810_v30  ;;  %v2813_v41 = vadd.f32 %v13195_v51, %v16788_v27  ;;  %v365_v27 = vld [vmem:[#allocation3 + $0x60] sm:$0x1]  ;;  %v14105_v30 = vld [vmem:[%s19802_s2] sm:$0xff]   ;;  %13553 = vmatpush3.bf16.msra.mxu1 %v14107_v17 }
 0x1dc   : > { %v17003_v42 = vpop.f32.mrf.mxu1  ;;  %v17005_v60 = vpop.f32.mrf.mxu0  ;;  %v366_v26 = vsel %vm14359_vm5, 0, %v365_v27  ;;  %13510 = vmatprep.subr.bf16.mxu0 %v14105_v30 }
 0x1dd   : > { %20076 = vst [vmem:[#allocation10_spill] sm:$0xff] %v17005_v60  ;;  %v17009_v9 = vadd.f32 %v13243_v4, %v2813_v41  ;;  %367 = vst [vmem:[#allocation3 + $0x60] sm:$0x1] %v366_v26  ;;  %13511 = vmatpush3.bf16.msra.mxu0 %v14105_v30  ;;  %v14108_v30 = vld [vmem:[%s19802_s2 + $0x50] sm:$0xff]  }
 0x1de   : > { %v13198_v51 = vpop.f32.mrf.mxu1  ;;  %v13250_v37 = vpop.f32.mrf.mxu0  ;;  %13485 = vmatmul.mubr.bf16.gmra.mxu1 %v12120_v24  ;;  %v363_v24 = vsel %vm14359_vm5, 0, %v362_v56  ;;  %13554 = vmatprep.subr.bf16.mxu1 %v14108_v30  ;;  %v413_v56 = vld [vmem:[#allocation3 + $0x68] sm:$0x1] }
 0x1df   : > { %v2816_v16 = vadd.f32 %v13198_v51, %v16813_v29  ;;  %13488 = vmatprep.mubr.bf16.mxu1 %v12121_v58  ;;  %364 = vst [vmem:[#allocation3 + $0x54] sm:$0x1] %v363_v24  ;;  %v14269_v29 = vld [vmem:[%s14352_s7 + $0x68] sm:$0xf]  ;;  %v14270_v58 = vld [vmem:[%s14352_s7 + $0x6c] sm:$0xf]  ;;  %13555 = vmatpush3.bf16.msra.mxu1 %v14108_v30 }
 0x1e0   : > { %v2747_v4 = vpop.f32.mrf.mxu1  ;;  %v3517_v41 = vpop.f32.mrf.mxu0  ;;  %v12122_v51 = vcombine.low %v14269_v29, %v14270_v58  ;;  %v14271_v24 = vld [vmem:[%s14352_s7 + $0x70] sm:$0xf]  ;;  %v14272_v29 = vld [vmem:[%s14352_s7 + $0x74] sm:$0xf] }
 0x1e1   : > { %v17017_v21 = vadd.f32 %v13246_v44, %v2816_v16  ;;  %v2814_v43 = vadd.f32 %v2747_v4, %v16816_v22  ;;  %v14109_v22 = vld [vmem:[#allocation3] sm:$0xff]   ;;  %v12123_v58 = vcombine.low %v14271_v24, %v14272_v29 }
 0x1e2   : > { %v13199_v35 = vpop.f32.mrf.mxu1  ;;  %v13251_v27 = vpop.f32.mrf.mxu0  ;;  %13512 = vmatprep.mubr.bf16.mxu0 %v14109_v22 }
 0x1e3   : > { %v17027_v17 = vadd.f32 %v3501_v11, %v2814_v43  ;;  %v2817_v44 = vadd.f32 %v13199_v35, %v16826_v48  ;;  %v414_v48 = vsel %vm14367_vm7, 0, %v413_v56  ;;  %v14115_v11 = vld [vmem:[%s19802_s2 + $0x48] sm:$0xff]   ;;  %v7026_v43 = vld [vmem:[#allocation3] sm:$0xf]  ;;  %v7027_v35 = vld [vmem:[#allocation3 + $0x4] sm:$0xf] }
 0x1e4   : > { %v17030_v26 = vpop.f32.mrf.mxu1  ;;  %v17032_v16 = vpop.f32.mrf.mxu0  ;;  %415 = vst [vmem:[#allocation3 + $0x68] sm:$0x1] %v414_v48  ;;  %13556 = vmatprep.subr.bf16.mxu1 %v14115_v11  ;;  %v7075_v22 = vshrl.u32 %v7026_v43, 16  ;;  %v7084_v24 = vshll.u32 %v7027_v35, 16  ;;  %v7088_v29 = vshrl.u32 %v7027_v35, 16  ;;  %v411_v48 = vsel %vm14367_vm7, 0, %v410_v49 }
 0x1e5   : > { %20077 = vst [vmem:[#allocation22_spill] sm:$0xff] %v17032_v16  ;;  %v17034_v4 = vadd.f32 %v13247_v57, %v2817_v44  ;;  %13557 = vmatpush3.bf16.msra.mxu1 %v14115_v11  ;;  %412 = vst [vmem:[#allocation3 + $0x5c] sm:$0x1] %v411_v48 }
 0x1e6   : > { %v13202_v10 = vpop.f32.mrf.mxu1  ;;  %v13254_v60 = vpop.f32.mrf.mxu0  ;;  %13489 = vmatmul.mubr.bf16.gmra.mxu1 %v12122_v51  ;;  %v7078_v51 = vshll.u32 %v7026_v43, 16  ;;  %v14116_v43 = vld [vmem:[%s19802_s2 + $0x40] sm:$0xff]   ;;  %v7077_v55 = vrot.slane %v7075_v22, 4  ;;  %v372_v22 = vsel %vm14359_vm5, 0, %v371_v61  ;;  %v419_v61 = vld [vmem:[#allocation3 + $0x80] sm:$0x1] }
 0x1e7   : > { %v2820_v57 = vadd.f32 %v13202_v10, %v16835_v8  ;;  %13492 = vmatprep.mubr.bf16.mxu1 %v12123_v58  ;;  %v12124_v8 = vcombine.low %v14273_v5, %v14274_v50  ;;  %v7090_v5 = vrot.slane %v7088_v29, 4  ;;  %13558 = vmatprep.subr.bf16.mxu1 %v14116_v43  ;;  %373 = vst [vmem:[#allocation3 + $0x78] sm:$0x1] %v372_v22 }
 0x1e8   : > { %v2763_v30 = vpop.f32.mrf.mxu1  ;;  %v3533_v44 = vpop.f32.mrf.mxu0  ;;  %v7080_v35 = vrot.slane %v7078_v51, 5  ;;  %v368_v51 = vld [vmem:[#allocation3 + $0x6c] sm:$0x1] }
 0x1e9   : > { %v17044_v56 = vadd.f32 %v13250_v37, %v2820_v57  ;;  %v2818_v16 = vadd.f32 %v2763_v30, %v16838_v39  ;;  %v7086_v37 = vrot.slane %v7084_v24, 5  ;;  %v7028_v30 = vld [vmem:[#allocation3 + $0x8] sm:$0x1]  ;;  %13559 = vmatpush3.bf16.msra.mxu1 %v14116_v43 }
 0x1ea   : > { %v13203_v10 = vpop.f32.mrf.mxu1  ;;  %v13255_v58 = vpop.f32.mrf.mxu0  ;;  %v7081_v49 = vor.u32 %v7080_v35, %v7077_v55  ;;  %v7094_v36 = vshll.u32 %v7028_v30, 16  ;;  %v369_v55 = vsel %vm14359_vm5, 0, %v368_v51 }
 0x1eb   : > { %v17054_v57 = vadd.f32 %v3517_v41, %v2818_v16  ;;  %v2821_v39 = vadd.f32 %v13203_v10, %v16848_v59  ;;  %v7091_v41 = vor.u32 %v7090_v5, %v7086_v37  ;;  %370 = vst [vmem:[#allocation3 + $0x6c] sm:$0x1] %v369_v55 }
 0x1ec   : > { %v17057_v50 = vpop.f32.mrf.mxu1  ;;  %v17059_v11 = vpop.f32.mrf.mxu0  ;;  %v7082_v24 = vrot.slane %v7081_v49, 4  ;;  %v7096_v29 = vrot.slane %v7094_v36, 5  ;;  %v420_v36 = vsel %vm14367_vm7, 0, %v419_v61  ;;  %v416_v49 = vld [vmem:[#allocation3 + $0x74] sm:$0x1] }
 0x1ed   : > { %20078 = vst [vmem:[#allocation24_spill] sm:$0xff] %v17059_v11  ;;  %v17061_v33 = vadd.f32 %v13251_v27, %v2821_v39  ;;  %v7092_v27 = vrot.slane %v7091_v41, 4  ;;  %421 = vst [vmem:[#allocation3 + $0x80] sm:$0x1] %v420_v36  ;;  %v374_v61 = vld [vmem:[#allocation3 + $0x84] sm:$0x1] }
 0x1ee   : > { %v13206_v16 = vpop.f32.mrf.mxu1  ;;  %v17065_v59 = vpop.f32.mrf.mxu0  ;;  %13493 = vmatmul.mubr.bf16.gmra.mxu1 %v12124_v8  ;;  %v7087_v43 = vsel %vm14380_vm8, %v7082_v24, %v7086_v37  ;;  %v17097_v24 = vld [vmem:[%s19802_s2 + $0xb8] sm:$0xff]  }
 0x1ef   : > { %v2824_v10 = vadd.f32 %v13206_v16, %v16854_v23  ;;  %v7097_v23 = vsel %vm14380_vm8, %v7092_v27, %v7096_v29  ;;  %20081 = vst [vmem:[#allocation33_spill] sm:$0xff] %v17097_v24  ;;  %13592 = vmatprep.subr.bf16.mxu0 %v17097_v24  ;;  %v425_v24 = vld [vmem:[#allocation3 + $0x98] sm:$0x1] }
 0x1f0   : > { %v2779_v48 = vpop.f32.mrf.mxu1  ;;  %v17070_v35 = vpop.f32.mrf.mxu0  ;;  %v12173_v22 = vcombine.low %v7087_v43, %v7097_v23  ;;  %v375_v43 = vsel %vm14359_vm5, 0, %v374_v61 }
 0x1f1   : > { %v17074_v39 = vadd.f32 %v13254_v60, %v2824_v10  ;;  %v2822_v8 = vadd.f32 %v2779_v48, %v16859_v1  ;;  %v417_v60 = vsel %vm14367_vm7, 0, %v416_v49  ;;  %376 = vst [vmem:[#allocation3 + $0x84] sm:$0x1] %v375_v43  ;;  %v426_v43 = vsel %vm14367_vm7, 0, %v425_v24  ;;  %v422_v24 = vld [vmem:[#allocation3 + $0x8c] sm:$0x1] }
 0x1f2   : > { %v13207_v30 = vpop.f32.mrf.mxu1  ;;  %v17081_v5 = vpop.f32.mrf.mxu0  ;;  %418 = vst [vmem:[#allocation3 + $0x74] sm:$0x1] %v417_v60  ;;  %13560 = vmatprep.mubr.bf16.mxu1 %v12173_v22  ;;  %427 = vst [vmem:[#allocation3 + $0x98] sm:$0x1] %v426_v43 }
 0x1f3   : > { %20079 = vst [vmem:[#allocation28_spill] sm:$0xff] %v17081_v5  ;;  %v17083_v41 = vadd.f32 %v3533_v44, %v2822_v8  ;;  %v2825_v37 = vadd.f32 %v13207_v30, %v16869_v31  ;;  %v377_v31 = vld [vmem:[#allocation3 + $0x90] sm:$0x1] }
 0x1f4   : > { %v17088_v1 = vpop.f32.mrf.mxu1  ;;  %v17090_v16 = vpop.f32.mrf.mxu0 }
 0x1f5   : > { %20080 = vst [vmem:[#allocation31_spill] sm:$0xff] %v17090_v16  ;;  %v17092_v51 = vadd.f32 %v13255_v58, %v2825_v37  ;;  %v378_v58 = vsel %vm14359_vm5, 0, %v377_v31 }
 0x1f6   : > { %v17099_v44 = vpop.f32.mrf.mxu1  ;;  %v17101_v29 = vpop.f32.mrf.mxu0  ;;  %379 = vst [vmem:[#allocation3 + $0x90] sm:$0x1] %v378_v58 }
 0x1f7   : > { %20082 = vst [vmem:[#allocation36_spill] sm:$0xff] %v17101_v29 }
 0x1f8   : > { %v17104_v10 = vpop.f32.mrf.mxu1  ;;  %v17106_v55 = vpop.f32.mrf.mxu0 }
 0x1f9   : > { %20083 = vst [vmem:[#allocation19_spill] sm:$0xff] %v17106_v55 }
 0x1fa   : > { %v17110_v27 = vpop.f32.mrf.mxu1  ;;  %v13327_v48 = vpop.f32.mrf.mxu0 }
 0x1fc   : > { %v17114_v8 = vpop.f32.mrf.mxu1  ;;  %v17116_v36 = vpop.f32.mrf.mxu0 }
 0x1fd   : > { %20084 = vst [vmem:[#allocation4_spill] sm:$0xff] %v17116_v36 }
 0x1fe   : > { %v17118_v23 = vpop.f32.mrf.mxu1  ;;  %v13330_v30 = vpop.f32.mrf.mxu0 }
 0x200   : > { %v17120_v49 = vpop.f32.mrf.mxu1  ;;  %v4338_v22 = vpop.f32.mrf.mxu0 }
 0x201   : > { %20085 = vst [vmem:[#allocation11_spill] sm:$0xff] %v17120_v49 }
 0x202   : > { %v13279_v37 = vpop.f32.mrf.mxu1  ;;  %v13331_v60 = vpop.f32.mrf.mxu0 }
 0x203   : > { %v4053_v31 = vadd.f32 %v13279_v37, %v16914_v54 }
 0x204   : > { %v17123_v58 = vpop.f32.mrf.mxu1  ;;  %v17125_v28 = vpop.f32.mrf.mxu0 }
 0x205   : > { %20086 = vst [vmem:[#allocation12_spill] sm:$0xff] %v17123_v58  ;;  %20087 = vst [vmem:[#allocation14_spill] sm:$0xff] %v17125_v28  ;;  %v17127_v61 = vadd.f32 %v13327_v48, %v4053_v31 }
 0x206   : > { %v13282_v55 = vpop.f32.mrf.mxu1  ;;  %v13334_v36 = vpop.f32.mrf.mxu0 }
 0x207   : > { %20088 = vst [vmem:[#allocation15_spill] sm:$0xff] %v17127_v61  ;;  %v4056_v29 = vadd.f32 %v13282_v55, %v16927_v46  ;;  %v423_v46 = vsel %vm14367_vm7, 0, %v422_v24 }
 0x208   : > { %v3951_v49 = vpop.f32.mrf.mxu1  ;;  %v4354_v16 = vpop.f32.mrf.mxu0  ;;  %424 = vst [vmem:[#allocation3 + $0x8c] sm:$0x1] %v423_v46  ;;  %v383_v46 = vld [vmem:[#allocation3 + $0xa8] sm:$0x1] }
 0x209   : > { %v17132_v5 = vadd.f32 %v13330_v30, %v4056_v29  ;;  %v4054_v54 = vadd.f32 %v3951_v49, %v16937_v47 }
 0x20a   : > { %v13283_v37 = vpop.f32.mrf.mxu1  ;;  %v13335_v58 = vpop.f32.mrf.mxu0 }
 0x20b   : > { %v17135_v28 = vadd.f32 %v4338_v22, %v4054_v54  ;;  %v4057_v48 = vadd.f32 %v13283_v37, %v16949_v38 }
 0x20c   : > { %v17138_v31 = vpop.f32.mrf.mxu1  ;;  %v17140_v61 = vpop.f32.mrf.mxu0 }
 0x20d   : > { %20089 = vst [vmem:[#allocation18_spill] sm:$0xff] %v17135_v28  ;;  %v17142_v11 = vadd.f32 %v13331_v60, %v4057_v48 }
 0x20e   : > { %v13286_v29 = vpop.f32.mrf.mxu1  ;;  %v13338_v55 = vpop.f32.mrf.mxu0 }
 0x20f   : > { %20090 = vst [vmem:[#allocation5_spill] sm:$0xff] %v17142_v11  ;;  %v4060_v47 = vadd.f32 %v13286_v29, %v16958_v2  ;;  %v380_v2 = vld [vmem:[#allocation3 + $0x9c] sm:$0x1] }
 0x210   : > { %v3967_v30 = vpop.f32.mrf.mxu1  ;;  %v4370_v49 = vpop.f32.mrf.mxu0 }
 0x211   : > { %v17147_v22 = vadd.f32 %v13334_v36, %v4060_v47  ;;  %v4058_v38 = vadd.f32 %v3967_v30, %v16965_v40  ;;  %v384_v36 = vsel %vm14359_vm5, 0, %v383_v46  ;;  %v381_v40 = vsel %vm14359_vm5, 0, %v380_v2  ;;  %v431_v30 = vld [vmem:[#allocation3 + $0xb0] sm:$0x1] }
 0x212   : > { %v13287_v43 = vpop.f32.mrf.mxu1  ;;  %v13339_v54 = vpop.f32.mrf.mxu0  ;;  %385 = vst [vmem:[#allocation3 + $0xa8] sm:$0x1] %v384_v36  ;;  %382 = vst [vmem:[#allocation3 + $0x9c] sm:$0x1] %v381_v40 }
 0x213   : > { %v17150_v37 = vadd.f32 %v4354_v16, %v4058_v38  ;;  %v4061_v60 = vadd.f32 %v13287_v43, %v16975_v34  ;;  %v432_v43 = vsel %vm14367_vm7, 0, %v431_v30 }
 0x214   : > { %v17153_v48 = vpop.f32.mrf.mxu1  ;;  %v17155_v24 = vpop.f32.mrf.mxu0  ;;  %433 = vst [vmem:[#allocation3 + $0xb0] sm:$0x1] %v432_v43 }
 0x215   : > { %v17157_v11 = vadd.f32 %v13335_v58, %v4061_v60 }
 0x216   : > { %v13290_v29 = vpop.f32.mrf.mxu1  ;;  %v13342_v28 = vpop.f32.mrf.mxu0 }
 0x217   : > { %20091 = vst [vmem:[#allocation21_spill] sm:$0xff] %v17157_v11  ;;  %v4064_v16 = vadd.f32 %v13290_v29, %v16988_v32 }
 0x218   : > { %v3983_v34 = vpop.f32.mrf.mxu1  ;;  %v4386_v47 = vpop.f32.mrf.mxu0 }
 0x219   : > { %v17164_v38 = vadd.f32 %v13338_v55, %v4064_v16  ;;  %v4062_v58 = vadd.f32 %v3983_v34, %v16995_v19 }
 0x21a   : > { %v13291_v60 = vpop.f32.mrf.mxu1  ;;  %v13343_v11 = vpop.f32.mrf.mxu0 }
 0x21b   : > { %20092 = vst [vmem:[#allocation23_spill] sm:$0xff] %v17164_v38  ;;  %v17169_v46 = vadd.f32 %v4370_v49, %v4062_v58  ;;  %v4065_v2 = vadd.f32 %v13291_v60, %v17009_v9  ;;  %v428_v49 = vld [vmem:[#allocation3 + $0xa4] sm:$0x1] }
 0x21c   : > { %v17172_v32 = vpop.f32.mrf.mxu1  ;;  %v17174_v29 = vpop.f32.mrf.mxu0  ;;  %v429_v9 = vsel %vm14367_vm7, 0, %v428_v49 }
 0x21d   : > { %20093 = vst [vmem:[#allocation30_spill] sm:$0xff] %v17169_v46  ;;  %v17176_v36 = vadd.f32 %v13339_v54, %v4065_v2  ;;  %430 = vst [vmem:[#allocation3 + $0xa4] sm:$0x1] %v429_v9 }
 0x21e   : > { %v13294_v55 = vpop.f32.mrf.mxu1  ;;  %v13346_v40 = vpop.f32.mrf.mxu0 }
 0x21f   : > { %20094 = vst [vmem:[#allocation25_spill] sm:$0xff] %v17176_v36  ;;  %v4068_v19 = vadd.f32 %v13294_v55, %v17017_v21  ;;  %v389_v36 = vld [vmem:[#allocation3 + $0xc0] sm:$0x1] }
 0x220   : > { %v3999_v16 = vpop.f32.mrf.mxu1  ;;  %v4402_v34 = vpop.f32.mrf.mxu0 }
 0x221   : > { %v17179_v30 = vadd.f32 %v13342_v28, %v4068_v19  ;;  %v4066_v43 = vadd.f32 %v3999_v16, %v17027_v17 }
 0x222   : > { %v13295_v58 = vpop.f32.mrf.mxu1  ;;  %v13347_v46 = vpop.f32.mrf.mxu0 }
 0x223   : > { %20095 = vst [vmem:[#allocation27_spill] sm:$0xff] %v17179_v30  ;;  %v17184_v60 = vadd.f32 %v4386_v47, %v4066_v43  ;;  %v4069_v54 = vadd.f32 %v13295_v58, %v17034_v4  ;;  %v390_v4 = vsel %vm14359_vm5, 0, %v389_v36  ;;  %v386_v43 = vld [vmem:[#allocation3 + $0xb4] sm:$0x1] }
 0x224   : > { %v17187_v2 = vpop.f32.mrf.mxu1  ;;  %v17189_v21 = vpop.f32.mrf.mxu0  ;;  %391 = vst [vmem:[#allocation3 + $0xc0] sm:$0x1] %v390_v4  ;;  %v20098_v4 = vld [vmem:[#allocation26_spill] sm:$0xff] }
 0x225   : > { %v17191_v55 = vadd.f32 %v13343_v11, %v4069_v54  ;;  %v387_v11 = vsel %vm14359_vm5, 0, %v386_v43 }
 0x226   : > { %v13298_v28 = vpop.f32.mrf.mxu1  ;;  %v13350_v19 = vpop.f32.mrf.mxu0  ;;  %388 = vst [vmem:[#allocation3 + $0xb4] sm:$0x1] %v387_v11 }
 0x227   : > { %v4072_v17 = vadd.f32 %v13298_v28, %v17044_v56 }
 0x228   : > { %v4015_v16 = vpop.f32.mrf.mxu1  ;;  %v4418_v30 = vpop.f32.mrf.mxu0 }
 0x229   : > { %v17194_v38 = vadd.f32 %v13346_v40, %v4072_v17  ;;  %v4070_v47 = vadd.f32 %v4015_v16, %v17054_v57  ;;  %v437_v57 = vld [vmem:[#allocation3 + $0xc8] sm:$0x1]  ;;  %v20097_v17 = vld [vmem:[#allocation20_spill] sm:$0xff] }
 0x22a   : > { %v13299_v49 = vpop.f32.mrf.mxu1  ;;  %v13351_v58 = vpop.f32.mrf.mxu0  ;;  %v438_v36 = vsel %vm14367_vm7, 0, %v437_v57  ;;  %v1896_v16 = vadd.f32 %v16784_v13, %v20097_v17 }
 0x22b   : > { %v17201_v9 = vadd.f32 %v4402_v34, %v4070_v47  ;;  %v4073_v56 = vadd.f32 %v13299_v49, %v17061_v33  ;;  %v1912_v34 = vadd.f32 %v16822_v7, %v20098_v4  ;;  %439 = vst [vmem:[#allocation3 + $0xc8] sm:$0x1] %v438_v36  ;;  %v2433_v7 = vadd.f32 %v16824_v3, %v16851_v52 }
 0x22c   : > { %v17204_v54 = vpop.f32.mrf.mxu1  ;;  %v17206_v40 = vpop.f32.mrf.mxu0  ;;  %v2437_v36 = vadd.f32 %v16846_v63, %v16872_v25  ;;  %v3549_v4 = vadd.f32 %v16867_v20, %v16892_v15  ;;  %v4049_v20 = vadd.f32 %v17110_v27, %v16889_v0  ;;  %v20104_v27 = vld [vmem:[#allocation32_spill] sm:$0xff] }
 0x22d   : > { %v17208_v28 = vadd.f32 %v13347_v46, %v4073_v56  ;;  %v4048_v46 = vadd.f32 %v17099_v44, %v16877_v62  ;;  %v2429_v13 = vadd.f32 %v16786_v12, %v1912_v34  ;;  %v4046_v62 = vadd.f32 %v17104_v10, %v16882_v45  ;;  %v20103_v34 = vld [vmem:[#allocation37_spill] sm:$0xff] }
 0x22e   : > { %v13302_v47 = vpop.f32.mrf.mxu1  ;;  %v13418_v43 = vpop.f32.mrf.mxu0  ;;  %v2819_v3 = vadd.f32 %v17057_v50, %v2433_v7  ;;  %v2823_v63 = vadd.f32 %v17088_v1, %v2437_v36  ;;  %v4047_v45 = vadd.f32 %v17114_v8, %v3549_v4  ;;  %v4052_v8 = vadd.f32 %v17118_v23, %v20104_v27  ;;  %v20108_v7 = vld [vmem:[#allocation24_spill] sm:$0xff]  ;;  %v20110_v23 = vld [vmem:[#allocation31_spill] sm:$0xff] }
 0x22f   : > { %20096 = vst [vmem:[#allocation38_spill] sm:$0xff] %v17208_v28  ;;  %v4076_v33 = vadd.f32 %v13302_v47, %v17074_v39  ;;  %v2425_v28 = vadd.f32 %v16714_v6, %v1896_v16  ;;  %v4433_v0 = vadd.f32 %v17070_v35, %v4046_v62  ;;  %v20109_v4 = vld [vmem:[#allocation28_spill] sm:$0xff] }
 0x230   : > { %v4031_v49 = vpop.f32.mrf.mxu1  ;;  %v5558_v11 = vpop.f32.mrf.mxu0  ;;  %v3577_v36 = vadd.f32 %v20108_v7, %v2823_v63  ;;  %v4436_v62 = vadd.f32 %v20109_v4, %v4049_v20  ;;  %v20116_v7 = vld [vmem:[#allocation4_spill] sm:$0xff] }
 0x231   : > { %v17219_v56 = vadd.f32 %v13350_v19, %v4076_v33  ;;  %v4074_v57 = vadd.f32 %v4031_v49, %v17083_v41  ;;  %v2811_v12 = vadd.f32 %v17003_v42, %v2425_v28  ;;  %v2815_v41 = vadd.f32 %v17030_v26, %v2429_v13  ;;  %v20099_v42 = vld [vmem:[#allocation29_spill] sm:$0xff]  ;;  %v20105_v33 = vld [vmem:[#allocation16_spill] sm:$0xff]  ;;  %v20106_v49 = vld [vmem:[#allocation10_spill] sm:$0xff] }
 0x232   : > { %v13303_v39 = vpop.f32.mrf.mxu1  ;;  %v13419_v17 = vpop.f32.mrf.mxu0  ;;  %v4435_v19 = vadd.f32 %v17065_v59, %v4048_v46  ;;  %v3553_v10 = vadd.f32 %v20099_v42, %v16917_v53  ;;  %v20100_v26 = vld [vmem:[#allocation13_spill] sm:$0xff]  ;;  %v20112_v42 = vld [vmem:[#allocation11_spill] sm:$0xff] }
 0x233   : > { %v17232_v44 = vadd.f32 %v4418_v30, %v4074_v57  ;;  %v4077_v6 = vadd.f32 %v13303_v39, %v17092_v51  ;;  %v434_v51 = vld [vmem:[#allocation3 + $0xbc] sm:$0x1]  ;;  %v20101_v30 = vld [vmem:[#allocation35_spill] sm:$0xff]  ;;  %v20102_v59 = vld [vmem:[#allocation17_spill] sm:$0xff]  ;;  %v3565_v53 = vadd.f32 %v20105_v33, %v2811_v12  ;;  %v3569_v46 = vadd.f32 %v20106_v49, %v2815_v41 }
 0x234   : > { %v4034_v52 = vpop.f32.mrf.mxu1  ;;  %v5561_v25 = vpop.f32.mrf.mxu0  ;;  %v3557_v50 = vadd.f32 %v20101_v30, %v20100_v26  ;;  %v435_v16 = vsel %vm14367_vm7, 0, %v434_v51  ;;  %v3561_v47 = vadd.f32 %v20103_v34, %v20102_v59  ;;  %v20107_v57 = vld [vmem:[#allocation22_spill] sm:$0xff]  ;;  %v20113_v26 = vld [vmem:[#allocation12_spill] sm:$0xff] }
 0x235   : > { %v17243_v15 = vadd.f32 %v13351_v58, %v4077_v6  ;;  %436 = vst [vmem:[#allocation3 + $0xbc] sm:$0x1] %v435_v16  ;;  %v3573_v13 = vadd.f32 %v20107_v57, %v2819_v3  ;;  %v4434_v6 = vadd.f32 %v20110_v23, %v4047_v45  ;;  %v20111_v12 = vld [vmem:[#allocation34_spill] sm:$0xff]  ;;  %v4051_v3 = vadd.f32 %v20113_v26, %v3553_v10  ;;  %v20114_v59 = vld [vmem:[#allocation36_spill] sm:$0xff] }
 0x236   : > { %v13370_v28 = vpop.f32.mrf.mxu1  ;;  %v13422_v1 = vpop.f32.mrf.mxu0  ;;  %v4050_v41 = vadd.f32 %v20112_v42, %v20111_v12  ;;  %v4055_v63 = vadd.f32 %v17138_v31, %v3557_v50  ;;  %v4059_v30 = vadd.f32 %v17153_v48, %v3561_v47  ;;  %v4439_v34 = vadd.f32 %v20114_v59, %v4052_v8  ;;  %v20115_v8 = vld [vmem:[#allocation19_spill] sm:$0xff] }
 0x237   : > { %v5189_v58 = vadd.f32 %v13370_v28, %v4435_v19  ;;  %v4075_v10 = vadd.f32 %v4034_v52, %v3577_v36 }
 0x238   : > { %v5060_v39 = vpop.f32.mrf.mxu1  ;;  %v5574_v35 = vpop.f32.mrf.mxu0  ;;  %v4437_v57 = vadd.f32 %v20115_v8, %v4050_v41 }
 0x239   : > { %v5687_v19 = vadd.f32 %v13418_v43, %v5189_v58  ;;  %v5187_v51 = vadd.f32 %v5060_v39, %v4433_v0  ;;  %v4063_v43 = vadd.f32 %v17172_v32, %v3565_v53  ;;  %v4067_v0 = vadd.f32 %v17187_v2, %v3569_v46  ;;  %v20117_v39 = vld [vmem:[#allocation14_spill] sm:$0xff] }
 0x23a   : > { %v13371_v28 = vpop.f32.mrf.mxu1  ;;  %v17272_v16 = vpop.f32.mrf.mxu0  ;;  %v4071_v58 = vadd.f32 %v17204_v54, %v3573_v13  ;;  %v17287_v32 = vadd.f32 %v20117_v39, %v4055_v63  ;;  %v17290_v2 = vadd.f32 %v17140_v61, %v4059_v30 }
 0x23b   : > { %v5723_v20 = vadd.f32 %v17263_v14, %v5687_v19  ;;  %v5685_v27 = vadd.f32 %v5558_v11, %v5187_v51  ;;  %v5190_v45 = vadd.f32 %v13371_v28, %v4436_v62  ;;  %v17284_v11 = vadd.f32 %v20116_v7, %v4051_v3  ;;  %v6208_v28 = vld [vmem:[#allocation3 + $0x18] sm:$0xf] }
 0x23c   : > { %v5063_v33 = vpop.f32.mrf.mxu1  ;;  %v17279_v31 = vpop.f32.mrf.mxu0  ;;  %v17296_v36 = vadd.f32 %v17155_v24, %v4063_v43  ;;  %v17299_v4 = vadd.f32 %v17174_v29, %v4067_v0  ;;  %v17302_v62 = vadd.f32 %v17189_v21, %v4071_v58 }
 0x23d   : > { %v5755_v48 = vmax.f32 %v5723_v20, 0.0  ;;  %v5721_v50 = vadd.f32 %v17263_v14, %v5685_v27  ;;  %v5688_v47 = vadd.f32 %v13419_v17, %v5190_v45  ;;  %v5188_v49 = vadd.f32 %v5063_v33, %v4434_v6  ;;  %v20118_v20 = vld [vmem:[#allocation15_spill] sm:$0xff] }
 0x23e   : > { %v13374_v54 = vpop.f32.mrf.mxu1  ;;  %v17292_v52 = vpop.f32.mrf.mxu0  ;;  %v17305_v6 = vadd.f32 %v17206_v40, %v4075_v10 }
 0x23f   : > { %v12530_v53 = vpack.c.bf16 %v5755_v48, %v5755_v48  ;;  %v5753_v46 = vmax.f32 %v5721_v50, 0.0  ;;  %v5724_v13 = vadd.f32 %v17263_v14, %v5688_v47  ;;  %v5686_v17 = vadd.f32 %v5561_v25, %v5188_v49 }
 0x240   : > { %v5193_v23 = vadd.f32 %v13374_v54, %v4439_v34  ;;  %v5076_v61 = vpop.f32.mrf.mxu1  ;;  %v17307_v42 = vpop.f32.mrf.mxu0 }
 0x241   : > { %v5899_v19 = vshrl.u32 %v12530_v53, 16  ;;  %v12528_v51 = vpack.c.bf16 %v5753_v46, %v5753_v46  ;;  %v5756_v12 = vmax.f32 %v5724_v13, 0.0  ;;  %v5902_v25 = vshll.u32 %v12530_v53, 16  ;;  %v6212_v46 = vld [vmem:[#allocation3 + $0x20] sm:$0x1] }
 0x242   : > { %v5722_v24 = vadd.f32 %v17263_v14, %v5686_v17  ;;  %v5691_v41 = vadd.f32 %v13422_v1, %v5193_v23  ;;  %v5191_v26 = vadd.f32 %v5076_v61, %v4437_v57  ;;  %v13375_v29 = vpop.f32.mrf.mxu1  ;;  %v17312_v33 = vpop.f32.mrf.mxu0  ;;  %v6201_v1 = vld [vmem:[#allocation3 + $0xc] sm:$0xf] }
 0x243   : > { %v5901_v3 = vrot.slane %v5899_v19, 7  ;;  %v5882_v63 = vshrl.u32 %v12528_v51, 16  ;;  %v5885_v21 = vshll.u32 %v12528_v51, 16  ;;  %v12531_v30 = vpack.c.bf16 %v5756_v12, %v5756_v12 }
 0x244   : > { %v5754_v59 = vmax.f32 %v5722_v24, 0.0  ;;  %v5727_v40 = vadd.f32 %v17263_v14, %v5691_v41  ;;  %v5689_v34 = vadd.f32 %v5574_v35, %v5191_v26  ;;  %v5194_v27 = vadd.f32 %v13375_v29, %v20118_v20  ;;  %v5079_v45 = vpop.f32.mrf.mxu1  ;;  %v17318_v35 = vld [vmem:[%s19802_s2 + $0xf8] sm:$0xff]   ;;  %v5593_v41 = vpop.f32.mrf.mxu0 }
 0x245   : > { %v5904_v43 = vor.u32 %v5902_v25, %v5901_v3  ;;  %v5905_v0 = vrot.slane %v5901_v3, 4  ;;  %v5884_v58 = vrot.slane %v5882_v63, 7  ;;  %v5907_v10 = vshrl.u32 %v12531_v30, 16  ;;  %13640 = vmatprep.subr.bf16.mxu1 %v17318_v35 }
 0x246   : > { %v5910_v48 = vshll.u32 %v12531_v30, 16  ;;  %v12529_v50 = vpack.c.bf16 %v5754_v59, %v5754_v59  ;;  %v5759_v47 = vmax.f32 %v5727_v40, 0.0  ;;  %v5725_v49 = vadd.f32 %v17263_v14, %v5689_v34  ;;  %v13378_v8 = vpop.f32.mrf.mxu1  ;;  %v6205_v40 = vld [vmem:[#allocation3 + $0x14] sm:$0x1] }
 0x247   : > { %v6209_v7 = vsel %vm14407_vm11, %v5904_v43, %v6208_v28  ;;  %v5887_v39 = vor.u32 %v5885_v21, %v5884_v58  ;;  %v5888_v54 = vrot.slane %v5884_v58, 4  ;;  %v5909_v53 = vrot.slane %v5907_v10, 7 }
 0x248   : > { %6210 = vst [vmem:[#allocation3 + $0x18] sm:$0xf] %v6209_v7  ;;  %v5890_v13 = vshrl.u32 %v12529_v50, 16  ;;  %v5893_v17 = vshll.u32 %v12529_v50, 16  ;;  %v12534_v23 = vpack.c.bf16 %v5759_v47, %v5759_v47  ;;  %v5757_v61 = vmax.f32 %v5725_v49, 0.0  ;;  %v5092_v19 = vpop.f32.mrf.mxu1  ;;  %v13430_v49 = vpop.f32.mrf.mxu0 }
 0x249   : > { %v6202_v51 = vsel %vm14407_vm11, %v5887_v39, %v6201_v1  ;;  %v5912_v12 = vor.u32 %v5910_v48, %v5909_v53  ;;  %v5914_v25 = vrot.slane %v5909_v53, 4  ;;  %v5692_v24 = vadd.f32 %v17272_v16, %v5194_v27  ;;  %v6222_v1 = vld [vmem:[#allocation3 + $0x30] sm:$0xf] }
 0x24a   : > { %6203 = vst [vmem:[#allocation3 + $0xc] sm:$0xf] %v6202_v51  ;;  %v5892_v26 = vrot.slane %v5890_v13, 7  ;;  %v5933_v29 = vshrl.u32 %v12534_v23, 16  ;;  %v5936_v3 = vshll.u32 %v12534_v23, 16  ;;  %v12532_v63 = vpack.c.bf16 %v5757_v61, %v5757_v61  ;;  %v13379_v21 = vpop.f32.mrf.mxu1  ;;  %v20122_v61 = vld [vmem:[#allocation5_spill] sm:$0xff] }
 0x24b   : > { %v5913_v28 = vsel %vm14401_vm10, %v5905_v0, %v5912_v12  ;;  %v6213_v59 = vsel %vm14359_vm5, %v5914_v25, %v6212_v46  ;;  %v5728_v34 = vadd.f32 %v17263_v14, %v5692_v24  ;;  %v5192_v20 = vadd.f32 %v5079_v45, %v17284_v11 }
 0x24c   : > { %6211 = vst [vmem:[#allocation3 + $0x1c] sm:$0xf] %v5913_v28  ;;  %6214 = vst [vmem:[#allocation3 + $0x20] sm:$0x1] %v6213_v59  ;;  %v5895_v16 = vor.u32 %v5893_v17, %v5892_v26  ;;  %v5897_v27 = vrot.slane %v5892_v26, 4  ;;  %v5935_v43 = vrot.slane %v5933_v29, 7  ;;  %v5095_v10 = vpop.f32.mrf.mxu1  ;;  %v5197_v47 = vadd.f32 %v13378_v8, %v17132_v5 }
 0x24d   : > { %v5916_v58 = vshrl.u32 %v12532_v63, 16  ;;  %v5919_v48 = vshll.u32 %v12532_v63, 16  ;;  %v5760_v50 = vmax.f32 %v5728_v34, 0.0  ;;  %v5690_v0 = vadd.f32 %v17279_v31, %v5192_v20  ;;  %v6215_v8 = vld [vmem:[#allocation3 + $0x24] sm:$0xf]  ;;  %v17349_v63 = vpop.f32.mrf.mxu0 }
 0x24e   : > { %v5896_v7 = vsel %vm14401_vm10, %v5888_v54, %v5895_v16  ;;  %v6206_v11 = vsel %vm14359_vm5, %v5897_v27, %v6205_v40  ;;  %v5938_v45 = vor.u32 %v5936_v3, %v5935_v43  ;;  %v5939_v39 = vrot.slane %v5935_v43, 4  ;;  %v13382_v53 = vpop.f32.mrf.mxu1  ;;  %v20121_v54 = vld [vmem:[#allocation18_spill] sm:$0xff]  ;;  %v6226_v16 = vld [vmem:[#allocation3 + $0x38] sm:$0x1] }
 0x24f   : > { %6204 = vst [vmem:[#allocation3 + $0x10] sm:$0xf] %v5896_v7  ;;  %6207 = vst [vmem:[#allocation3 + $0x14] sm:$0x1] %v6206_v11  ;;  %v17338_v46 = vrot.slane %v5916_v58, 7  ;;  %v12535_v13 = vpack.c.bf16 %v5760_v50, %v5760_v50  ;;  %v5726_v17 = vadd.f32 %v17263_v14, %v5690_v0  ;;  %v5695_v31 = vadd.f32 %v17292_v52, %v5197_v47  ;;  %v17364_v0 = vpop.f32.mrf.mxu0 }
 0x250   : > { %v6223_v5 = vsel %vm14407_vm11, %v5938_v45, %v6222_v1  ;;  %v5195_v23 = vadd.f32 %v5092_v19, %v20121_v54  ;;  %v5198_v51 = vadd.f32 %v13379_v21, %v20122_v61  ;;  %v5196_v12 = vadd.f32 %v5095_v10, %v17287_v32  ;;  %v5108_v25 = vpop.f32.mrf.mxu1 }
 0x251   : > { %6224 = vst [vmem:[#allocation3 + $0x30] sm:$0xf] %v6223_v5  ;;  %v5921_v24 = vor.u32 %v5919_v48, %v17338_v46  ;;  %v5922_v26 = vrot.slane %v17338_v46, 4  ;;  %v5941_v29 = vshrl.u32 %v12535_v13, 16  ;;  %v5944_v3 = vshll.u32 %v12535_v13, 16 }
 0x252   : > { %v5758_v52 = vmax.f32 %v5726_v17, 0.0  ;;  %v5731_v28 = vadd.f32 %v17263_v14, %v5695_v31  ;;  %v5693_v59 = vadd.f32 %v17307_v42, %v5195_v23  ;;  %v5696_v19 = vadd.f32 %v17312_v33, %v5198_v51  ;;  %v17354_v21 = vpop.f32.mrf.mxu1  ;;  %v6219_v51 = vld [vmem:[#allocation3 + $0x2c] sm:$0x1] }
 0x253   : > { %v6216_v32 = vsel %vm14407_vm11, %v5921_v24, %v6215_v8  ;;  %v5943_v40 = vrot.slane %v5941_v29, 7  ;;  %v5694_v34 = vadd.f32 %v5593_v41, %v5196_v12  ;;  %v5201_v20 = vadd.f32 %v13382_v53, %v17147_v22  ;;  %v14114_v5 = vld [vmem:[#allocation3 + $0x18] sm:$0xff]  }
 0x254   : > { %6217 = vst [vmem:[#allocation3 + $0x24] sm:$0xf] %v6216_v32  ;;  %v12533_v27 = vpack.c.bf16 %v5758_v52, %v5758_v52  ;;  %v5763_v43 = vmax.f32 %v5731_v28, 0.0  ;;  %v5729_v58 = vadd.f32 %v17263_v14, %v5693_v59  ;;  %v5732_v10 = vadd.f32 %v17263_v14, %v5696_v19  ;;  %v17361_v42 = vpop.f32.mrf.mxu1  ;;  %v6236_v32 = vld [vmem:[#allocation3 + $0x48] sm:$0xf] }
 0x255   : > { %v5946_v33 = vor.u32 %v5944_v3, %v5943_v40  ;;  %v5948_v1 = vrot.slane %v5943_v40, 4  ;;  %v5730_v48 = vadd.f32 %v17263_v14, %v5694_v34  ;;  %v5699_v50 = vadd.f32 %v13430_v49, %v5201_v20  ;;  %v14118_v49 = vld [vmem:[%s19802_s2 + $0xb0] sm:$0xff]   ;;  %v17377_v3 = vpop.f32.mrf.mxu0  ;;  %v20123_v34 = vld [vmem:[#allocation33_spill] sm:$0xff]  ;;  %v14121_v20 = vld [vmem:[%s19802_s2 + $0xa8] sm:$0xff]  }
 0x256   : > { %v5924_v41 = vshrl.u32 %v12533_v27, 16  ;;  %v5927_v47 = vshll.u32 %v12533_v27, 16  ;;  %v12538_v22 = vpack.c.bf16 %v5763_v43, %v5763_v43  ;;  %v5761_v7 = vmax.f32 %v5729_v58, 0.0  ;;  %v17366_v11 = vpop.f32.mrf.mxu1  ;;  %v14111_v45 = vld [vmem:[#allocation3 + $0xc] sm:$0xff]  }
 0x257   : > { %v5947_v53 = vsel %vm14401_vm10, %v5939_v39, %v5946_v33  ;;  %v6227_v13 = vsel %vm14359_vm5, %v5948_v1, %v6226_v16  ;;  %v5764_v17 = vmax.f32 %v5732_v10, 0.0  ;;  %v5762_v31 = vmax.f32 %v5730_v48, 0.0  ;;  %13513 = vmatmul.mubr.bf16.vlgmr.msra.gmra.mxu0 %v14111_v45  ;;  %v6229_v1 = vld [vmem:[#allocation3 + $0x3c] sm:$0xf] }
 0x258   : > { %6225 = vst [vmem:[#allocation3 + $0x34] sm:$0xf] %v5947_v53  ;;  %6228 = vst [vmem:[#allocation3 + $0x38] sm:$0x1] %v6227_v13  ;;  %v5926_v8 = vrot.slane %v5924_v41, 7  ;;  %v5967_v54 = vshrl.u32 %v12538_v22, 16  ;;  %v12536_v61 = vpack.c.bf16 %v5761_v7, %v5761_v7  ;;  %v5735_v24 = vadd.f32 %v17263_v14, %v5699_v50  ;;  %v17379_v52 = vpop.f32.mrf.mxu1  ;;  %13516 = vmatprep.mubr.bf16.mxu0 %v14114_v5  ;;  %v13434_v7 = vpop.f32.mrf.mxu0 }
 0x259   : > { %v5970_v23 = vshll.u32 %v12538_v22, 16  ;;  %v12539_v12 = vpack.c.bf16 %v5764_v17, %v5764_v17  ;;  %v12537_v39 = vpack.c.bf16 %v5762_v31, %v5762_v31  ;;  %v5199_v29 = vadd.f32 %v5108_v25, %v17150_v37  ;;  %13593 = vmatpush3.bf16.msra.mxu0 %v20123_v34  ;;  %v6240_v41 = vld [vmem:[#allocation3 + $0x50] sm:$0x1]  ;;  %v6233_v53 = vld [vmem:[#allocation3 + $0x44] sm:$0x1] }
 0x25a   : > { %v5929_v28 = vor.u32 %v5927_v47, %v5926_v8  ;;  %v5931_v59 = vrot.slane %v5926_v8, 4  ;;  %v5969_v19 = vrot.slane %v5967_v54, 7  ;;  %v5950_v40 = vshrl.u32 %v12536_v61, 16  ;;  %13594 = vmatprep.subr.bf16.mxu0 %v14118_v49  ;;  %v13387_v45 = vpop.f32.mrf.mxu1  ;;  %v20124_v17 = vld [vmem:[#allocation21_spill] sm:$0xff] }
 0x25b   : > { %v5953_v16 = vshll.u32 %v12536_v61, 16  ;;  %v5975_v27 = vshrl.u32 %v12539_v12, 16  ;;  %v5978_v43 = vshll.u32 %v12539_v12, 16  ;;  %v5958_v37 = vshrl.u32 %v12537_v39, 16  ;;  %v14124_v61 = vld [vmem:[%s19802_s2 + $0xa0] sm:$0xff]  }
 0x25c   : > { %v5930_v25 = vsel %vm14401_vm10, %v5922_v26, %v5929_v28  ;;  %v6220_v58 = vsel %vm14359_vm5, %v5931_v59, %v6219_v51  ;;  %v5972_v10 = vor.u32 %v5970_v23, %v5969_v19  ;;  %v5973_v33 = vrot.slane %v5969_v19, 4  ;;  %v5622_v28 = vpop.f32.mrf.mxu0  ;;  %v5127_v59 = vpop.f32.mrf.mxu1 }
 0x25d   : > { %6218 = vst [vmem:[#allocation3 + $0x28] sm:$0xf] %v5930_v25  ;;  %6221 = vst [vmem:[#allocation3 + $0x2c] sm:$0x1] %v6220_v58  ;;  %v5952_v48 = vrot.slane %v5950_v40, 7  ;;  %v5977_v50 = vrot.slane %v5975_v27, 7  ;;  %v5697_v13 = vadd.f32 %v17349_v63, %v5199_v29  ;;  %v5202_v31 = vadd.f32 %v17354_v21, %v20124_v17  ;;  %13595 = vmatpush3.bf16.msra.mxu0 %v14118_v49 }
 0x25e   : > { %v5960_v47 = vrot.slane %v5958_v37, 7  ;;  %v5961_v22 = vshll.u32 %v12537_v39, 16  ;;  %v6237_v46 = vsel %vm14407_vm11, %v5972_v10, %v6236_v32  ;;  %v5767_v26 = vmax.f32 %v5735_v24, 0.0  ;;  %13596 = vmatprep.subr.bf16.mxu0 %v14121_v20  ;;  %v20126_v58 = vld [vmem:[#allocation30_spill] sm:$0xff] }
 0x25f   : > { %6238 = vst [vmem:[#allocation3 + $0x48] sm:$0xf] %v6237_v46  ;;  %v5955_v5 = vor.u32 %v5953_v16, %v5952_v48  ;;  %v5956_v8 = vrot.slane %v5952_v48, 4  ;;  %v5980_v54 = vor.u32 %v5978_v43, %v5977_v50  ;;  %v5982_v23 = vrot.slane %v5977_v50, 4  ;;  %v20125_v43 = vld [vmem:[#allocation23_spill] sm:$0xff]  ;;  %v14127_v50 = vld [vmem:[%s19802_s2 + $0x98] sm:$0xff]  }
 0x260   : > { %v5963_v51 = vor.u32 %v5961_v22, %v5960_v47  ;;  %v5965_v12 = vrot.slane %v5960_v47, 4  ;;  %v12542_v39 = vpack.c.bf16 %v5767_v26, %v5767_v26  ;;  %v5733_v24 = vadd.f32 %v17263_v14, %v5697_v13  ;;  %v13435_v22 = vpop.f32.mrf.mxu0  ;;  %v14119_v46 = vld [vmem:[#allocation3 + $0x30] sm:$0xff]  }
 0x261   : > { %v6230_v63 = vsel %vm14407_vm11, %v5955_v5, %v6229_v1  ;;  %v5981_v21 = vsel %vm14401_vm10, %v5973_v33, %v5980_v54  ;;  %v6241_v49 = vsel %vm14359_vm5, %v5982_v23, %v6240_v41  ;;  %v5700_v29 = vadd.f32 %v17364_v0, %v5202_v31  ;;  %13597 = vmatpush3.bf16.msra.mxu0 %v14121_v20  ;;  %v20127_v33 = vld [vmem:[#allocation25_spill] sm:$0xff]  ;;  %v14130_v23 = vld [vmem:[%s19802_s2 + $0x90] sm:$0xff]  }
 0x262   : > { %6231 = vst [vmem:[#allocation3 + $0x3c] sm:$0xf] %v6230_v63  ;;  %6239 = vst [vmem:[#allocation3 + $0x4c] sm:$0xf] %v5981_v21  ;;  %v5964_v19 = vsel %vm14401_vm10, %v5956_v8, %v5963_v51  ;;  %v6234_v32 = vsel %vm14359_vm5, %v5965_v12, %v6233_v53  ;;  %v6001_v40 = vshrl.u32 %v12542_v39, 16  ;;  %v6004_v34 = vshll.u32 %v12542_v39, 16  ;;  %13598 = vmatprep.subr.bf16.mxu0 %v14124_v61 }
 0x263   : > { %6242 = vst [vmem:[#allocation3 + $0x50] sm:$0x1] %v6241_v49  ;;  %6232 = vst [vmem:[#allocation3 + $0x40] sm:$0xf] %v5964_v19  ;;  %v5765_v16 = vmax.f32 %v5733_v24, 0.0  ;;  %v5736_v27 = vadd.f32 %v17263_v14, %v5700_v29  ;;  %v5200_v0 = vadd.f32 %v17361_v42, %v17290_v2  ;;  %v5205_v37 = vadd.f32 %v17366_v11, %v20125_v43  ;;  %v5625_v24 = vpop.f32.mrf.mxu0 }
 0x264   : > { %6235 = vst [vmem:[#allocation3 + $0x44] sm:$0x1] %v6234_v32  ;;  %v17416_v25 = vrot.slane %v6001_v40, 7  ;;  %v5203_v10 = vadd.f32 %v17379_v52, %v20126_v58  ;;  %v5206_v1 = vadd.f32 %v13387_v45, %v20127_v33  ;;  %v5204_v20 = vadd.f32 %v5127_v59, %v17296_v36  ;;  %v14117_v48 = vld [vmem:[#allocation3 + $0x24] sm:$0xff]   ;;  %v6250_v41 = vld [vmem:[#allocation3 + $0x60] sm:$0xf] }
 0x265   : > { %v12540_v2 = vpack.c.bf16 %v5765_v16, %v5765_v16  ;;  %v5768_v42 = vmax.f32 %v5736_v27, 0.0  ;;  %v5698_v11 = vadd.f32 %v17377_v3, %v5200_v0  ;;  %v5703_v47 = vadd.f32 %v13434_v7, %v5205_v37  ;;  %13517 = vmatmul.mubr.bf16.gmra.mxu0 %v14117_v48  ;;  %v6243_v7 = vld [vmem:[#allocation3 + $0x54] sm:$0xf] }
 0x266   : > { %v6006_v53 = vor.u32 %v6004_v34, %v17416_v25  ;;  %v6007_v52 = vrot.slane %v17416_v25, 4  ;;  %v5701_v45 = vadd.f32 %v5622_v28, %v5203_v10  ;;  %v5704_v26 = vadd.f32 %v13435_v22, %v5206_v1  ;;  %13520 = vmatprep.mubr.bf16.mxu0 %v14119_v46  ;;  %13599 = vmatpush3.bf16.msra.mxu0 %v14124_v61  ;;  %v6254_v34 = vld [vmem:[#allocation3 + $0x68] sm:$0x1]  ;;  %v14135_v37 = vld [vmem:[%s19802_s2 + $0x88] sm:$0xff]   ;;  %v13390_v1 = vpop.f32.mrf.mxu1  ;;  %v6264_v46 = vld [vmem:[#allocation3 + $0x78] sm:$0xf] }
 0x267   : > { %v5984_v36 = vshrl.u32 %v12540_v2, 16  ;;  %v5987_v13 = vshll.u32 %v12540_v2, 16  ;;  %v12543_v17 = vpack.c.bf16 %v5768_v42, %v5768_v42  ;;  %v5734_v31 = vadd.f32 %v17263_v14, %v5698_v11  ;;  %13600 = vmatprep.subr.bf16.mxu0 %v14127_v50 }
 0x268   : > { %v6251_v3 = vsel %vm14407_vm11, %v6006_v53, %v6250_v41  ;;  %v5739_v5 = vadd.f32 %v17263_v14, %v5703_v47  ;;  %v5737_v8 = vadd.f32 %v17263_v14, %v5701_v45  ;;  %v5740_v54 = vadd.f32 %v17263_v14, %v5704_v26  ;;  %v14140_v45 = vld [vmem:[%s19802_s2 + $0x80] sm:$0xff]  }
 0x269   : > { %6252 = vst [vmem:[#allocation3 + $0x60] sm:$0xf] %v6251_v3  ;;  %v17437_v51 = vrot.slane %v5984_v36, 7  ;;  %v6009_v12 = vshrl.u32 %v12543_v17, 16  ;;  %v6012_v61 = vshll.u32 %v12543_v17, 16  ;;  %v5766_v39 = vmax.f32 %v5734_v31, 0.0 }
 0x26a   : > { %v5771_v63 = vmax.f32 %v5739_v5, 0.0  ;;  %v5769_v21 = vmax.f32 %v5737_v8, 0.0  ;;  %v5772_v49 = vmax.f32 %v5740_v54, 0.0  ;;  %v5702_v29 = vadd.f32 %v5625_v24, %v5204_v20  ;;  %v14120_v28 = vld [vmem:[#allocation3 + $0x3c] sm:$0xff]   ;;  %13601 = vmatpush3.bf16.msra.mxu0 %v14127_v50  ;;  %v14122_v20 = vld [vmem:[#allocation3 + $0x48] sm:$0xff]   ;;  %v20128_v5 = vld [vmem:[#allocation27_spill] sm:$0xff]  ;;  %v13438_v54 = vpop.f32.mrf.mxu0 }
 0x26b   : > { %v5989_v59 = vor.u32 %v5987_v13, %v17437_v51  ;;  %v5990_v19 = vrot.slane %v17437_v51, 4  ;;  %v6011_v32 = vrot.slane %v6009_v12, 7  ;;  %v12541_v40 = vpack.c.bf16 %v5766_v39, %v5766_v39  ;;  %13602 = vmatprep.subr.bf16.mxu0 %v14130_v23  ;;  %v6247_v50 = vld [vmem:[#allocation3 + $0x5c] sm:$0x1]  ;;  %v6257_v3 = vld [vmem:[#allocation3 + $0x6c] sm:$0xf] }
 0x26c   : > { %v12546_v16 = vpack.c.bf16 %v5771_v63, %v5771_v63  ;;  %v12544_v27 = vpack.c.bf16 %v5769_v21, %v5769_v21  ;;  %v12547_v0 = vpack.c.bf16 %v5772_v49, %v5772_v49  ;;  %v5738_v43 = vadd.f32 %v17263_v14, %v5702_v29  ;;  %v6268_v24 = vld [vmem:[#allocation3 + $0x80] sm:$0x1] }
 0x26d   : > { %v6244_v25 = vsel %vm14407_vm11, %v5989_v59, %v6243_v7  ;;  %v6014_v58 = vor.u32 %v6012_v61, %v6011_v32  ;;  %v6016_v10 = vrot.slane %v6011_v32, 4  ;;  %v5992_v33 = vshrl.u32 %v12541_v40, 16  ;;  %13521 = vmatmul.mubr.bf16.gmra.mxu0 %v14120_v28  ;;  %v7029_v28 = vld [vmem:[#allocation3 + $0xc] sm:$0xf] }
 0x26e   : > { %6245 = vst [vmem:[#allocation3 + $0x54] sm:$0xf] %v6244_v25  ;;  %v5995_v48 = vshll.u32 %v12541_v40, 16  ;;  %v6035_v41 = vshrl.u32 %v12546_v16, 16  ;;  %v6038_v2 = vshll.u32 %v12546_v16, 16  ;;  %v6018_v42 = vshrl.u32 %v12544_v27, 16  ;;  %13524 = vmatprep.mubr.bf16.mxu0 %v14122_v20  ;;  %13603 = vmatpush3.bf16.msra.mxu0 %v14130_v23  ;;  %v5140_v23 = vpop.f32.mrf.mxu1  ;;  %v5638_v25 = vpop.f32.mrf.mxu0 }
 0x26f   : > { %v6015_v11 = vsel %vm14401_vm10, %v6007_v52, %v6014_v58  ;;  %v6255_v47 = vsel %vm14359_vm5, %v6016_v10, %v6254_v34  ;;  %v5994_v22 = vrot.slane %v5992_v33, 7  ;;  %v6021_v53 = vshll.u32 %v12544_v27, 16  ;;  %13604 = vmatprep.subr.bf16.mxu0 %v14135_v37  ;;  %v7030_v16 = vld [vmem:[#allocation3 + $0x10] sm:$0xf] }
 0x270   : > { %6253 = vst [vmem:[#allocation3 + $0x64] sm:$0xf] %v6015_v11  ;;  %6256 = vst [vmem:[#allocation3 + $0x68] sm:$0x1] %v6255_v47  ;;  %v6037_v26 = vrot.slane %v6035_v41, 7  ;;  %v17454_v36 = vrot.slane %v6018_v42, 7  ;;  %v5209_v8 = vadd.f32 %v13390_v1, %v20128_v5  ;;  %v5207_v34 = vadd.f32 %v5140_v23, %v17184_v60  ;;  %v13439_v23 = vpop.f32.mrf.mxu0 }
 0x271   : > { %v6043_v13 = vshrl.u32 %v12547_v0, 16  ;;  %v6046_v17 = vshll.u32 %v12547_v0, 16  ;;  %v5997_v52 = vor.u32 %v5995_v48, %v5994_v22  ;;  %v5999_v31 = vrot.slane %v5994_v22, 4  ;;  %v6261_v42 = vld [vmem:[#allocation3 + $0x74] sm:$0x1] }
 0x272   : > { %v5770_v7 = vmax.f32 %v5738_v43, 0.0  ;;  %v6040_v51 = vor.u32 %v6038_v2, %v6037_v26  ;;  %v6041_v12 = vrot.slane %v6037_v26, 4  ;;  %v6023_v61 = vor.u32 %v6021_v53, %v17454_v36  ;;  %13605 = vmatpush3.bf16.msra.mxu0 %v14135_v37  ;;  %v13391_v2 = vpop.f32.mrf.mxu1 }
 0x273   : > { %v6024_v39 = vrot.slane %v17454_v36, 4  ;;  %v5998_v63 = vsel %vm14401_vm10, %v5990_v19, %v5997_v52  ;;  %v6248_v21 = vsel %vm14359_vm5, %v5999_v31, %v6247_v50  ;;  %v6045_v49 = vrot.slane %v6043_v13, 7  ;;  %13606 = vmatprep.subr.bf16.mxu0 %v14140_v45  ;;  %v14143_v19 = vld [vmem:[%s19802_s2 + $0x138] sm:$0xff]   ;;  %v7031_v50 = vld [vmem:[#allocation3 + $0x14] sm:$0x1] }
 0x274   : > { %v12545_v29 = vpack.c.bf16 %v5770_v7, %v5770_v7  ;;  %6246 = vst [vmem:[#allocation3 + $0x58] sm:$0xf] %v5998_v63  ;;  %6249 = vst [vmem:[#allocation3 + $0x5c] sm:$0x1] %v6248_v21  ;;  %v6265_v59 = vsel %vm14407_vm11, %v6040_v51, %v6264_v46  ;;  %v6258_v32 = vsel %vm14407_vm11, %v6023_v61, %v6257_v3  ;;  %v7099_v33 = vshrl.u32 %v7029_v28, 16  ;;  %v5143_v51 = vpop.f32.mrf.mxu1 }
 0x275   : > { %v5707_v40 = vadd.f32 %v13438_v54, %v5209_v8  ;;  %6266 = vst [vmem:[#allocation3 + $0x78] sm:$0xf] %v6265_v59  ;;  %6259 = vst [vmem:[#allocation3 + $0x6c] sm:$0xf] %v6258_v32  ;;  %v6048_v27 = vor.u32 %v6046_v17, %v6045_v49  ;;  %v6050_v0 = vrot.slane %v6045_v49, 4  ;;  %v5705_v10 = vadd.f32 %v5638_v25, %v5207_v34 }
 0x276   : > { %v6026_v43 = vshrl.u32 %v12545_v29, 16  ;;  %v6029_v37 = vshll.u32 %v12545_v29, 16  ;;  %v7102_v1 = vshll.u32 %v7029_v28, 16  ;;  %v7108_v41 = vshll.u32 %v7030_v16, 16  ;;  %13607 = vmatpush3.bf16.msra.mxu0 %v14140_v45  ;;  %v7032_v17 = vld [vmem:[#allocation3 + $0x18] sm:$0xf] }
 0x277   : > { %v5743_v58 = vadd.f32 %v17263_v14, %v5707_v40  ;;  %v6049_v60 = vsel %vm14401_vm10, %v6041_v12, %v6048_v27  ;;  %v6269_v20 = vsel %vm14359_vm5, %v6050_v0, %v6268_v24  ;;  %v5741_v47 = vadd.f32 %v17263_v14, %v5705_v10  ;;  %13688 = vmatprep.subr.bf16.mxu0 %v14143_v19  ;;  %v14125_v49 = vld [vmem:[#allocation3 + $0x60] sm:$0xff]   ;;  %v6278_v34 = vld [vmem:[#allocation3 + $0x90] sm:$0xf]  ;;  %v13394_v10 = vpop.f32.mrf.mxu1 }
 0x278   : > { %v6028_v48 = vrot.slane %v6026_v43, 7  ;;  %6267 = vst [vmem:[#allocation3 + $0x7c] sm:$0xf] %v6049_v60  ;;  %6270 = vst [vmem:[#allocation3 + $0x80] sm:$0x1] %v6269_v20  ;;  %v7101_v22 = vrot.slane %v7099_v33, 4  ;;  %v5210_v54 = vadd.f32 %v13391_v2, %v17191_v55 }
 0x279   : > { %v5775_v11 = vmax.f32 %v5743_v58, 0.0  ;;  %v7104_v46 = vrot.slane %v7102_v1, 5  ;;  %v7110_v36 = vrot.slane %v7108_v41, 5  ;;  %v7112_v13 = vshrl.u32 %v7030_v16, 16  ;;  %v5641_v58 = vpop.f32.mrf.mxu0  ;;  %v6271_v20 = vld [vmem:[#allocation3 + $0x84] sm:$0xf] }
 0x27a   : > { %v6031_v53 = vor.u32 %v6029_v37, %v6028_v48  ;;  %v6033_v26 = vrot.slane %v6028_v48, 4  ;;  %v5773_v31 = vmax.f32 %v5741_v47, 0.0  ;;  %v7118_v7 = vshll.u32 %v7031_v50, 16  ;;  %v7034_v2 = vld [vmem:[#allocation3 + $0x20] sm:$0x1] }
 0x27b   : > { %v12550_v52 = vpack.c.bf16 %v5775_v11, %v5775_v11  ;;  %v7105_v3 = vor.u32 %v7104_v46, %v7101_v22  ;;  %v7114_v8 = vrot.slane %v7112_v13, 4  ;;  %v14123_v12 = vld [vmem:[#allocation3 + $0x54] sm:$0xff]   ;;  %v5708_v59 = vadd.f32 %v13439_v23, %v5210_v54  ;;  %v7035_v54 = vld [vmem:[#allocation3 + $0x24] sm:$0xf] }
 0x27c   : > { %v6032_v45 = vsel %vm14401_vm10, %v6024_v39, %v6031_v53  ;;  %v6262_v5 = vsel %vm14359_vm5, %v6033_v26, %v6261_v42  ;;  %v12548_v63 = vpack.c.bf16 %v5773_v31, %v5773_v31  ;;  %v7120_v28 = vrot.slane %v7118_v7, 5  ;;  %v7033_v39 = vld [vmem:[#allocation3 + $0x1c] sm:$0xf]  ;;  %13525 = vmatmul.mubr.bf16.gmra.mxu0 %v14123_v12  ;;  %v5156_v31 = vpop.f32.mrf.mxu1 }
 0x27d   : > { %6260 = vst [vmem:[#allocation3 + $0x70] sm:$0xf] %v6032_v45  ;;  %6263 = vst [vmem:[#allocation3 + $0x74] sm:$0x1] %v6262_v5  ;;  %v6069_v61 = vshrl.u32 %v12550_v52, 16  ;;  %v6072_v24 = vshll.u32 %v12550_v52, 16  ;;  %v7115_v29 = vor.u32 %v7114_v8, %v7110_v36  ;;  %13528 = vmatprep.mubr.bf16.mxu0 %v14125_v49  ;;  %v5744_v43 = vadd.f32 %v17263_v14, %v5708_v59  ;;  %v13442_v52 = vpop.f32.mrf.mxu0 }
 0x27e   : > { %v7106_v21 = vrot.slane %v7105_v3, 4  ;;  %v7123_v32 = vshrl.u32 %v7032_v17, 16  ;;  %v6052_v55 = vshrl.u32 %v12548_v63, 16  ;;  %v6055_v16 = vshll.u32 %v12548_v63, 16  ;;  %v14133_v53 = vld [vmem:[%s19802_s2 + $0xf0] sm:$0xff]  }
 0x27f   : > { %v17482_v40 = vrot.slane %v6069_v61, 7  ;;  %v7116_v0 = vrot.slane %v7115_v29, 4  ;;  %v7126_v25 = vshll.u32 %v7032_v17, 16  ;;  %v7132_v48 = vshll.u32 %v7033_v39, 16  ;;  %v14128_v23 = vld [vmem:[#allocation3 + $0x78] sm:$0xff]  }
 0x280   : > { %v7111_v27 = vsel %vm14380_vm8, %v7106_v21, %v7110_v36  ;;  %v7125_v37 = vrot.slane %v7123_v32, 4  ;;  %v17489_v60 = vrot.slane %v6052_v55, 7  ;;  %v5776_v41 = vmax.f32 %v5744_v43, 0.0  ;;  %v6282_v21 = vld [vmem:[#allocation3 + $0x98] sm:$0x1] }
 0x281   : > { %v6074_v33 = vor.u32 %v6072_v24, %v17482_v40  ;;  %v6075_v1 = vrot.slane %v17482_v40, 4  ;;  %v7121_v50 = vsel %vm14380_vm8, %v7116_v0, %v7120_v28  ;;  %v7128_v42 = vrot.slane %v7126_v25, 5  ;;  %v17516_v55 = vld [vmem:[%s19804_s4] ss:$0 sm:$0xff] }
 0x282   : > { %v7136_v11 = vshrl.u32 %v7033_v39, 16  ;;  %v6057_v47 = vor.u32 %v6055_v16, %v17489_v60  ;;  %v6058_v22 = vrot.slane %v17489_v60, 4  ;;  %v12174_v46 = vcombine.low %v7111_v27, %v7121_v50  ;;  %v17506_v39 = vld [vmem:[#allocation3 + $0x28] sm:$0xf] }
 0x283   : > { %v6279_v14 = vsel %vm14407_vm11, %v6074_v33, %v6278_v34  ;;  %v12551_v26 = vpack.c.bf16 %v5776_v41, %v5776_v41  ;;  %v7129_v36 = vor.u32 %v7128_v42, %v7125_v37  ;;  %v7134_v13 = vrot.slane %v7132_v48, 5  ;;  %v17526_v41 = vld [vmem:[#allocation3 + $0x2c] sm:$0x1] }
 0x284   : > { %6280 = vst [vmem:[#allocation3 + $0x90] sm:$0xf] %v6279_v14  ;;  %v7138_v17 = vrot.slane %v7136_v11, 4  ;;  %v14126_v3 = vld [vmem:[#allocation3 + $0x6c] sm:$0xff]   ;;  %v6272_v7 = vsel %vm14407_vm11, %v6057_v47, %v6271_v20  ;;  %13561 = vmatmul.mubr.bf16.vlgmr.msra.gmra.mxu1 %v12174_v46  ;;  %v7142_v45 = vshll.u32 %v7034_v2, 16  ;;  %v5208_v5 = vadd.f32 %v5143_v51, %v17299_v4  ;;  %v13395_v2 = vpop.f32.mrf.mxu1 }
 0x285   : > { %v5213_v8 = vadd.f32 %v13394_v10, %v17194_v38  ;;  %6273 = vst [vmem:[#allocation3 + $0x84] sm:$0xf] %v6272_v7  ;;  %v6077_v12 = vshrl.u32 %v12551_v26, 16  ;;  %v6080_v61 = vshll.u32 %v12551_v26, 16  ;;  %v7130_v24 = vrot.slane %v7129_v36, 4  ;;  %13529 = vmatmul.mubr.bf16.gmra.mxu0 %v14126_v3  ;;  %13641 = vmatpush3.bf16.msra.mxu1 %v17318_v35  ;;  %v14137_v38 = vld [vmem:[%s19802_s2 + $0xe8] sm:$0xff]   ;;  %v5654_v35 = vpop.f32.mrf.mxu0 }
 0x286   : > { %v7139_v63 = vor.u32 %v7138_v17, %v7134_v13  ;;  %v7144_v49 = vrot.slane %v7142_v45, 5  ;;  %v5706_v29 = vadd.f32 %v5641_v58, %v5208_v5  ;;  %v5211_v59 = vadd.f32 %v5156_v31, %v17201_v9  ;;  %13532 = vmatprep.mubr.bf16.mxu0 %v14128_v23  ;;  %13642 = vmatprep.subr.bf16.mxu1 %v14133_v53  ;;  %v14138_v10 = vld [vmem:[%s19802_s2 + $0xe0] sm:$0xff]   ;;  %v7038_v31 = vld [vmem:[#allocation3 + $0x30] sm:$0xf]  ;;  %v14141_v3 = vld [vmem:[%s19802_s2 + $0xd8] sm:$0xff]  }
 0x287   : > { %v5711_v28 = vadd.f32 %v13442_v52, %v5213_v8  ;;  %v6079_v4 = vrot.slane %v6077_v12, 7  ;;  %v7135_v51 = vsel %vm14380_vm8, %v7130_v24, %v7134_v13  ;;  %v7147_v34 = vshrl.u32 %v7035_v54, 16  ;;  %v20130_v52 = vld [vmem:[#allocation38_spill] sm:$0xff]  ;;  %v13443_v24 = vpop.f32.mrf.mxu0 }
 0x288   : > { %v7140_v32 = vrot.slane %v7139_v63, 4  ;;  %v5742_v9 = vadd.f32 %v17516_v55, %v5706_v29  ;;  %v5709_v27 = vadd.f32 %v5654_v35, %v5211_v59  ;;  %v7150_v0 = vshll.u32 %v7035_v54, 16  ;;  %v5159_v63 = vpop.f32.mrf.mxu1  ;;  %v6275_v59 = vld [vmem:[#allocation3 + $0x8c] sm:$0x1] }
 0x289   : > { %v5747_v16 = vadd.f32 %v17516_v55, %v5711_v28  ;;  %v6082_v43 = vor.u32 %v6080_v61, %v6079_v4  ;;  %v6084_v37 = vrot.slane %v6079_v4, 4  ;;  %v7149_v58 = vrot.slane %v7147_v34, 4  ;;  %13643 = vmatpush3.bf16.msra.mxu1 %v14133_v53 }
 0x28a   : > { %v7145_v25 = vsel %vm14380_vm8, %v7140_v32, %v7144_v49  ;;  %v5774_v20 = vmax.f32 %v5742_v9, 0.0  ;;  %v5745_v50 = vadd.f32 %v17516_v55, %v5709_v27  ;;  %13644 = vmatprep.subr.bf16.mxu1 %v14137_v38  ;;  %v7152_v14 = vrot.slane %v7150_v0, 5  ;;  %v17547_v0 = vld [vmem:[#allocation3 + $0x34] sm:$0xf] }
 0x28b   : > { %v12175_v33 = vcombine.low %v7135_v51, %v7145_v25  ;;  %v5779_v48 = vmax.f32 %v5747_v16, 0.0  ;;  %v6083_v42 = vsel %vm14401_vm10, %v6075_v1, %v6082_v43  ;;  %v6283_v11 = vsel %vm14359_vm5, %v6084_v37, %v6282_v21  ;;  %v14142_v43 = vld [vmem:[%s19802_s2 + $0xd0] sm:$0xff]  }
 0x28c   : > { %v7156_v47 = vshll.u32 %v17506_v39, 16  ;;  %6281 = vst [vmem:[#allocation3 + $0x94] sm:$0xf] %v6083_v42  ;;  %6284 = vst [vmem:[#allocation3 + $0x98] sm:$0x1] %v6283_v11  ;;  %v12549_v46 = vpack.c.bf16 %v5774_v20, %v5774_v20  ;;  %v5777_v26 = vmax.f32 %v5745_v50, 0.0  ;;  %v7153_v13 = vor.u32 %v7152_v14, %v7149_v58  ;;  %v13398_v20 = vpop.f32.mrf.mxu1 }
 0x28d   : > { %13564 = vmatprep.mubr.bf16.mxu1 %v12175_v33  ;;  %v12554_v53 = vpack.c.bf16 %v5779_v48, %v5779_v48  ;;  %v7160_v36 = vshrl.u32 %v17506_v39, 16  ;;  %v7166_v40 = vshll.u32 %v17526_v41, 16  ;;  %v5214_v1 = vadd.f32 %v13395_v2, %v20130_v52  ;;  %13645 = vmatpush3.bf16.msra.mxu1 %v14137_v38  ;;  %v6292_v38 = vld [vmem:[#allocation3 + $0xa8] sm:$0xf]  ;;  %v6285_v42 = vld [vmem:[#allocation3 + $0x9c] sm:$0xf] }
 0x28e   : > { %v7158_v17 = vrot.slane %v7156_v47, 5  ;;  %v6060_v7 = vshrl.u32 %v12549_v46, 16  ;;  %v6063_v45 = vshll.u32 %v12549_v46, 16  ;;  %13646 = vmatprep.subr.bf16.mxu1 %v14138_v10  ;;  %v12552_v54 = vpack.c.bf16 %v5777_v26, %v5777_v26  ;;  %v17563_v11 = vld [vmem:[#allocation3 + $0x38] sm:$0x1] }
 0x28f   : > { %v6103_v5 = vshrl.u32 %v12554_v53, 16  ;;  %v6106_v8 = vshll.u32 %v12554_v53, 16  ;;  %v7154_v23 = vrot.slane %v7153_v13, 4  ;;  %v7162_v12 = vrot.slane %v7160_v36, 4 }
 0x290   : > { %v7168_v61 = vrot.slane %v7166_v40, 5  ;;  %v6062_v21 = vrot.slane %v6060_v7, 7  ;;  %v5712_v29 = vadd.f32 %v13443_v24, %v5214_v1  ;;  %v7171_v28 = vshrl.u32 %v7038_v31, 16  ;;  %v5172_v7 = vpop.f32.mrf.mxu1 }
 0x291   : > { %v17541_v49 = vrot.slane %v6103_v5, 7  ;;  %v6086_v4 = vshrl.u32 %v12552_v54, 16  ;;  %v6089_v51 = vshll.u32 %v12552_v54, 16  ;;  %v7159_v32 = vsel %vm14380_vm8, %v7154_v23, %v7158_v17  ;;  %13647 = vmatpush3.bf16.msra.mxu1 %v14138_v10  ;;  %v5657_v10 = vpop.f32.mrf.mxu0  ;;  %v7041_v23 = vld [vmem:[#allocation3 + $0x3c] sm:$0xf] }
 0x292   : > { %v7163_v35 = vor.u32 %v7162_v12, %v7158_v17  ;;  %v6065_v34 = vor.u32 %v6063_v45, %v6062_v21  ;;  %v6067_v9 = vrot.slane %v6062_v21, 4  ;;  %13648 = vmatprep.subr.bf16.mxu1 %v14141_v3  ;;  %v5748_v58 = vadd.f32 %v17516_v55, %v5712_v29  ;;  %v14144_v17 = vld [vmem:[%s19802_s2 + $0xc8] sm:$0xff]  }
 0x293   : > { %v6108_v16 = vor.u32 %v6106_v8, %v17541_v49  ;;  %v6109_v27 = vrot.slane %v17541_v49, 4  ;;  %v17552_v37 = vrot.slane %v6086_v4, 7  ;;  %v7173_v33 = vrot.slane %v7171_v28, 4  ;;  %v6296_v29 = vld [vmem:[#allocation3 + $0xb0] sm:$0x1] }
 0x294   : > { %v7164_v25 = vrot.slane %v7163_v35, 4  ;;  %v6066_v48 = vsel %vm14401_vm10, %v6058_v22, %v6065_v34  ;;  %v6276_v50 = vsel %vm14359_vm5, %v6067_v9, %v6275_v59  ;;  %v7174_v14 = vshll.u32 %v7038_v31, 16 }
 0x295   : > { %v6293_v2 = vsel %vm14407_vm11, %v6108_v16, %v6292_v38  ;;  %6274 = vst [vmem:[#allocation3 + $0x88] sm:$0xf] %v6066_v48  ;;  %6277 = vst [vmem:[#allocation3 + $0x8c] sm:$0x1] %v6276_v50  ;;  %v6091_v47 = vor.u32 %v6089_v51, %v17552_v37  ;;  %v6092_v60 = vrot.slane %v17552_v37, 4  ;;  %v5780_v46 = vmax.f32 %v5748_v58, 0.0  ;;  %13649 = vmatpush3.bf16.msra.mxu1 %v14141_v3  ;;  %v13446_v3 = vpop.f32.mrf.mxu0 }
 0x296   : > { %6294 = vst [vmem:[#allocation3 + $0xa8] sm:$0xf] %v6293_v2  ;;  %v7169_v22 = vsel %vm14380_vm8, %v7164_v25, %v7168_v61  ;;  %v7176_v26 = vrot.slane %v7174_v14, 5  ;;  %v7180_v36 = vshll.u32 %v17547_v0, 16  ;;  %v7184_v13 = vshrl.u32 %v17547_v0, 16  ;;  %13650 = vmatprep.subr.bf16.mxu1 %v14142_v43  ;;  %v14131_v48 = vld [vmem:[#allocation3 + $0x90] sm:$0xff]  }
 0x297   : > { %v12176_v53 = vcombine.low %v7159_v32, %v7169_v22  ;;  %v6286_v40 = vsel %vm14407_vm11, %v6091_v47, %v6285_v42  ;;  %v12555_v52 = vpack.c.bf16 %v5780_v46, %v5780_v46  ;;  %v7190_v1 = vshll.u32 %v17563_v11, 16  ;;  %v5670_v51 = vpop.f32.mrf.mxu0  ;;  %v17592_v14 = vld [vmem:[#allocation3 + $0x44] sm:$0x1] }
 0x298   : > { %v5212_v31 = vadd.f32 %v5159_v63, %v17302_v62  ;;  %6287 = vst [vmem:[#allocation3 + $0x9c] sm:$0xf] %v6286_v40  ;;  %v7177_v45 = vor.u32 %v7176_v26, %v7173_v33  ;;  %v7182_v5 = vrot.slane %v7180_v36, 5  ;;  %v7186_v8 = vrot.slane %v7184_v13, 4  ;;  %v14146_v63 = vld [vmem:[%s19802_s2 + $0xc0] sm:$0xff]   ;;  %v17597_v22 = vld [vmem:[%s19802_s2 + $0x178] sm:$0xff]  }
 0x299   : > { %13565 = vmatmul.mubr.bf16.gmra.mxu1 %v12176_v53  ;;  %v5217_v54 = vadd.f32 %v13398_v20, %v17219_v56  ;;  %v6111_v12 = vshrl.u32 %v12555_v52, 16  ;;  %v6114_v61 = vshll.u32 %v12555_v52, 16  ;;  %v7192_v24 = vrot.slane %v7190_v1, 5 }
 0x29a   : > { %v5710_v21 = vadd.f32 %v5657_v10, %v5212_v31  ;;  %13651 = vmatpush3.bf16.msra.mxu1 %v14142_v43  ;;  %v7178_v28 = vrot.slane %v7177_v45, 4  ;;  %v7187_v59 = vor.u32 %v7186_v8, %v7182_v5  ;;  %v5215_v62 = vadd.f32 %v5172_v7, %v17232_v44  ;;  %v17587_v10 = vld [vmem:[#allocation3 + $0x40] sm:$0xf] }
 0x29b   : > { %v5715_v38 = vadd.f32 %v13446_v3, %v5217_v54  ;;  %13652 = vmatprep.subr.bf16.mxu1 %v14144_v17  ;;  %v6113_v4 = vrot.slane %v6111_v12, 7  ;;  %v7195_v32 = vshrl.u32 %v7041_v23, 16  ;;  %v7198_v35 = vshll.u32 %v7041_v23, 16  ;;  %v13399_v3 = vpop.f32.mrf.mxu1  ;;  %v6289_v23 = vld [vmem:[#allocation3 + $0xa4] sm:$0x1] }
 0x29c   : > { %v5746_v56 = vadd.f32 %v17516_v55, %v5710_v21  ;;  %v7183_v34 = vsel %vm14380_vm8, %v7178_v28, %v7182_v5  ;;  %v7188_v9 = vrot.slane %v7187_v59, 4  ;;  %v5713_v43 = vadd.f32 %v5670_v51, %v5215_v62  ;;  %v14129_v25 = vld [vmem:[#allocation3 + $0x84] sm:$0xff]  }
 0x29d   : > { %v5751_v16 = vadd.f32 %v17516_v55, %v5715_v38  ;;  %v6116_v44 = vor.u32 %v6114_v61, %v6113_v4  ;;  %v6118_v58 = vrot.slane %v6113_v4, 4  ;;  %v7197_v20 = vrot.slane %v7195_v32, 4  ;;  %13533 = vmatmul.mubr.bf16.gmra.mxu0 %v14129_v25  ;;  %v7044_v38 = vld [vmem:[#allocation3 + $0x48] sm:$0xf]  ;;  %v6306_v4 = vld [vmem:[#allocation3 + $0xc0] sm:$0xf]  ;;  %v13447_v32 = vpop.f32.mrf.mxu0 }
 0x29e   : > { %v5778_v33 = vmax.f32 %v5746_v56, 0.0  ;;  %13653 = vmatpush3.bf16.msra.mxu1 %v14144_v17  ;;  %v7193_v50 = vsel %vm14380_vm8, %v7188_v9, %v7192_v24  ;;  %v5749_v42 = vadd.f32 %v17516_v55, %v5713_v43  ;;  %v7200_v47 = vrot.slane %v7198_v35, 5  ;;  %13536 = vmatprep.mubr.bf16.mxu0 %v14131_v48  ;;  %v17618_v43 = vld [vmem:[#allocation3 + $0x4c] sm:$0xf] }
 0x29f   : > { %v5783_v2 = vmax.f32 %v5751_v16, 0.0  ;;  %13654 = vmatprep.subr.bf16.mxu1 %v14146_v63  ;;  %v6117_v46 = vsel %vm14401_vm10, %v6109_v27, %v6116_v44  ;;  %v6297_v53 = vsel %vm14359_vm5, %v6118_v58, %v6296_v29  ;;  %v12177_v26 = vcombine.low %v7183_v34, %v7193_v50  ;;  %v6299_v44 = vld [vmem:[#allocation3 + $0xb4] sm:$0xf] }
 0x2a0   : > { %v12553_v36 = vpack.c.bf16 %v5778_v33, %v5778_v33  ;;  %6295 = vst [vmem:[#allocation3 + $0xac] sm:$0xf] %v6117_v46  ;;  %6298 = vst [vmem:[#allocation3 + $0xb0] sm:$0x1] %v6297_v53  ;;  %v5781_v17 = vmax.f32 %v5749_v42, 0.0  ;;  %v7201_v40 = vor.u32 %v7200_v47, %v7197_v20  ;;  %v7204_v52 = vshll.u32 %v17587_v10, 16 }
 0x2a1   : > { %v12558_v13 = vpack.c.bf16 %v5783_v2, %v5783_v2  ;;  %13568 = vmatprep.mubr.bf16.mxu1 %v12177_v26  ;;  %v7208_v49 = vshrl.u32 %v17587_v10, 16  ;;  %v7214_v27 = vshll.u32 %v17592_v14, 16  ;;  %v5218_v59 = vadd.f32 %v13399_v3, %v17243_v15  ;;  %v17631_v2 = vld [vmem:[#allocation3 + $0x50] sm:$0x1]  ;;  %v7047_v42 = vld [vmem:[#allocation3 + $0x54] sm:$0xf] }
 0x2a2   : > { %v6094_v1 = vshrl.u32 %v12553_v36, 16  ;;  %v6097_v31 = vshll.u32 %v12553_v36, 16  ;;  %13655 = vmatpush3.bf16.msra.mxu1 %v14146_v63  ;;  %v12556_v5 = vpack.c.bf16 %v5781_v17, %v5781_v17  ;;  %v7202_v8 = vrot.slane %v7201_v40, 4 }
 0x2a3   : > { %v6137_v7 = vshrl.u32 %v12558_v13, 16  ;;  %v6140_v45 = vshll.u32 %v12558_v13, 16  ;;  %13736 = vmatprep.subr.bf16.mxu1 %v17597_v22  ;;  %v7206_v12 = vrot.slane %v7204_v52, 5  ;;  %v7210_v61 = vrot.slane %v7208_v49, 4  ;;  %v17639_v52 = vld [vmem:[#allocation3 + $0x58] sm:$0xf] }
 0x2a4   : > { %v6096_v54 = vrot.slane %v6094_v1, 7  ;;  %v7216_v24 = vrot.slane %v7214_v27, 5  ;;  %v6120_v29 = vshrl.u32 %v12556_v5, 16  ;;  %v6123_v28 = vshll.u32 %v12556_v5, 16 }
 0x2a5   : > { %v17609_v21 = vrot.slane %v6137_v7, 7  ;;  %v7207_v56 = vsel %vm14380_vm8, %v7202_v8, %v7206_v12  ;;  %v7211_v51 = vor.u32 %v7210_v61, %v7206_v12  ;;  %v5716_v16 = vadd.f32 %v13447_v32, %v5218_v59  ;;  %v17643_v12 = vld [vmem:[#allocation3 + $0x5c] sm:$0x1] }
 0x2a6   : > { %v6099_v62 = vor.u32 %v6097_v31, %v6096_v54  ;;  %v6101_v63 = vrot.slane %v6096_v54, 4  ;;  %v17616_v9 = vrot.slane %v6120_v29, 7  ;;  %v7219_v33 = vshrl.u32 %v7044_v38, 16 }
 0x2a7   : > { %v6142_v35 = vor.u32 %v6140_v45, %v17609_v21  ;;  %v6143_v34 = vrot.slane %v17609_v21, 4  ;;  %v7212_v58 = vrot.slane %v7211_v51, 4  ;;  %v5752_v37 = vadd.f32 %v17516_v55, %v5716_v16  ;;  %v5673_v45 = vpop.f32.mrf.mxu0 }
 0x2a8   : > { %v6100_v15 = vsel %vm14401_vm10, %v6092_v60, %v6099_v62  ;;  %v6290_v25 = vsel %vm14359_vm5, %v6101_v63, %v6289_v23  ;;  %v6125_v48 = vor.u32 %v6123_v28, %v17616_v9  ;;  %v6126_v50 = vrot.slane %v17616_v9, 4  ;;  %v5175_v60 = vpop.f32.mrf.mxu1 }
 0x2a9   : > { %6288 = vst [vmem:[#allocation3 + $0xa0] sm:$0xf] %v6100_v15  ;;  %6291 = vst [vmem:[#allocation3 + $0xa4] sm:$0x1] %v6290_v25  ;;  %v6307_v20 = vsel %vm14407_vm11, %v6142_v35, %v6306_v4  ;;  %v7217_v47 = vsel %vm14380_vm8, %v7212_v58, %v7216_v24  ;;  %v7221_v46 = vrot.slane %v7219_v33, 4  ;;  %v7222_v53 = vshll.u32 %v7044_v38, 16 }
 0x2aa   : > { %6308 = vst [vmem:[#allocation3 + $0xc0] sm:$0xf] %v6307_v20  ;;  %v7228_v26 = vshll.u32 %v17618_v43, 16  ;;  %v6300_v36 = vsel %vm14407_vm11, %v6125_v48, %v6299_v44  ;;  %v12178_v13 = vcombine.low %v7207_v56, %v7217_v47  ;;  %v5784_v17 = vmax.f32 %v5752_v37, 0.0  ;;  %v7050_v38 = vld [vmem:[#allocation3 + $0x60] sm:$0xf] }
 0x2ab   : > { %v7232_v40 = vshrl.u32 %v17618_v43, 16  ;;  %6301 = vst [vmem:[#allocation3 + $0xb4] sm:$0xf] %v6300_v36  ;;  %v7224_v1 = vrot.slane %v7222_v53, 5  ;;  %v7238_v49 = vshll.u32 %v17631_v2, 16  ;;  %v5216_v27 = vadd.f32 %v5175_v60, %v17305_v6  ;;  %v14136_v15 = vld [vmem:[#allocation3 + $0xa8] sm:$0xff]  }
 0x2ac   : > { %v7230_v31 = vrot.slane %v7228_v26, 5  ;;  %13569 = vmatmul.mubr.bf16.gmra.mxu1 %v12178_v13  ;;  %v12559_v3 = vpack.c.bf16 %v5784_v17, %v5784_v17  ;;  %v7243_v5 = vshrl.u32 %v7047_v42, 16  ;;  %v7246_v57 = vshll.u32 %v7047_v42, 16  ;;  %v6310_v25 = vld [vmem:[#allocation3 + $0xc8] sm:$0x1] }
 0x2ad   : > { %v7234_v7 = vrot.slane %v7232_v40, 4  ;;  %v7225_v8 = vor.u32 %v7224_v1, %v7221_v46  ;;  %v7240_v54 = vrot.slane %v7238_v49, 5  ;;  %v5714_v23 = vadd.f32 %v5673_v45, %v5216_v27  ;;  %v17653_v42 = vld [vmem:[#allocation3 + $0x64] sm:$0xf]  ;;  %v17655_v36 = vld [vmem:[#allocation3 + $0x68] sm:$0x1] }
 0x2ae   : > { %v7252_v61 = vshll.u32 %v17639_v52, 16  ;;  %v6145_v24 = vshrl.u32 %v12559_v3, 16  ;;  %v6148_v29 = vshll.u32 %v12559_v3, 16  ;;  %v7245_v59 = vrot.slane %v7243_v5, 4  ;;  %v7053_v13 = vld [vmem:[#allocation3 + $0x6c] sm:$0xf] }
 0x2af   : > { %v7235_v28 = vor.u32 %v7234_v7, %v7230_v31  ;;  %v7226_v62 = vrot.slane %v7225_v8, 4  ;;  %v5750_v6 = vadd.f32 %v17516_v55, %v5714_v23  ;;  %v7248_v63 = vrot.slane %v7246_v57, 5 }
 0x2b0   : > { %v7254_v4 = vrot.slane %v7252_v61, 5  ;;  %v14134_v56 = vld [vmem:[#allocation3 + $0x9c] sm:$0xff]   ;;  %v6147_v51 = vrot.slane %v6145_v24, 7  ;;  %v7256_v35 = vshrl.u32 %v17639_v52, 16  ;;  %v7262_v16 = vshll.u32 %v17643_v12, 16 }
 0x2b1   : > { %v7236_v32 = vrot.slane %v7235_v28, 4  ;;  %v7231_v44 = vsel %vm14380_vm8, %v7226_v62, %v7230_v31  ;;  %v5782_v58 = vmax.f32 %v5750_v6, 0.0  ;;  %v7249_v33 = vor.u32 %v7248_v63, %v7245_v59  ;;  %13537 = vmatmul.mubr.bf16.gmra.mxu0 %v14134_v56  ;;  %v6303_v24 = vld [vmem:[#allocation3 + $0xbc] sm:$0x1]  ;;  %v17672_v56 = vld [vmem:[#allocation3 + $0x74] sm:$0x1] }
 0x2b2   : > { %v7267_v20 = vshrl.u32 %v7050_v38, 16  ;;  %v6150_v48 = vor.u32 %v6148_v29, %v6147_v51  ;;  %v6152_v55 = vrot.slane %v6147_v51, 4  ;;  %v7258_v60 = vrot.slane %v7256_v35, 4  ;;  %13540 = vmatprep.mubr.bf16.mxu0 %v14136_v15  ;;  %v7056_v15 = vld [vmem:[#allocation3 + $0x78] sm:$0xf] }
 0x2b3   : > { %v7241_v37 = vsel %vm14380_vm8, %v7236_v32, %v7240_v54  ;;  %v12557_v46 = vpack.c.bf16 %v5782_v58, %v5782_v58  ;;  %v7250_v53 = vrot.slane %v7249_v33, 4  ;;  %v7264_v26 = vrot.slane %v7262_v16, 5  ;;  %v17668_v54 = vld [vmem:[#allocation3 + $0x70] sm:$0xf] }
 0x2b4   : > { %v12179_v47 = vcombine.low %v7231_v44, %v7241_v37  ;;  %v6151_v17 = vsel %vm14401_vm10, %v6143_v34, %v6150_v48  ;;  %v6311_v40 = vsel %vm14359_vm5, %v6152_v55, %v6310_v25  ;;  %v7259_v1 = vor.u32 %v7258_v60, %v7254_v4 }
 0x2b5   : > { %v7269_v31 = vrot.slane %v7267_v20, 4  ;;  %6309 = vst [vmem:[#allocation3 + $0xc4] sm:$0xf] %v6151_v17  ;;  %6312 = vst [vmem:[#allocation3 + $0xc8] sm:$0x1] %v6311_v40  ;;  %v6128_v49 = vshrl.u32 %v12557_v46, 16  ;;  %v7255_v3 = vsel %vm14380_vm8, %v7250_v53, %v7254_v4 }
 0x2b6   : > { %13572 = vmatprep.mubr.bf16.mxu1 %v12179_v47  ;;  %v6131_v27 = vshll.u32 %v12557_v46, 16  ;;  %v7270_v7 = vshll.u32 %v7050_v38, 16  ;;  %v7260_v45 = vrot.slane %v7259_v1, 4  ;;  %v7276_v21 = vshll.u32 %v17653_v42, 16  ;;  %v17682_v20 = vld [vmem:[#allocation3 + $0x7c] sm:$0xf] }
 0x2b7   : > { %v7280_v5 = vshrl.u32 %v17653_v42, 16  ;;  %v7286_v34 = vshll.u32 %v17655_v36, 16  ;;  %v6130_v57 = vrot.slane %v6128_v49, 7  ;;  %v7291_v23 = vshrl.u32 %v7053_v13, 16  ;;  %v7059_v17 = vld [vmem:[#allocation3 + $0x84] sm:$0xf] }
 0x2b8   : > { %v7272_v8 = vrot.slane %v7270_v7, 5  ;;  %v7294_v61 = vshll.u32 %v7053_v13, 16  ;;  %v7265_v29 = vsel %vm14380_vm8, %v7260_v45, %v7264_v26  ;;  %v7278_v28 = vrot.slane %v7276_v21, 5 }
 0x2b9   : > { %v7282_v59 = vrot.slane %v7280_v5, 4  ;;  %v7288_v38 = vrot.slane %v7286_v34, 5  ;;  %v6133_v62 = vor.u32 %v6131_v27, %v6130_v57  ;;  %v6135_v6 = vrot.slane %v6130_v57, 4  ;;  %v17692_v27 = vld [vmem:[#allocation3 + $0x88] sm:$0xf] }
 0x2ba   : > { %v12180_v63 = vcombine.low %v7255_v3, %v7265_v29  ;;  %v7273_v4 = vor.u32 %v7272_v8, %v7269_v31  ;;  %v7293_v32 = vrot.slane %v7291_v23, 4  ;;  %v7296_v35 = vrot.slane %v7294_v61, 5  ;;  %v7062_v5 = vld [vmem:[#allocation3 + $0x90] sm:$0xf]  ;;  %v17698_v61 = vld [vmem:[#allocation3 + $0x94] sm:$0xf] }
 0x2bb   : > { %v7283_v51 = vor.u32 %v7282_v59, %v7278_v28  ;;  %v7300_v16 = vshll.u32 %v17668_v54, 16  ;;  %v6134_v25 = vsel %vm14401_vm10, %v6126_v50, %v6133_v62  ;;  %v6304_v44 = vsel %vm14359_vm5, %v6135_v6, %v6303_v24  ;;  %v17687_v50 = vld [vmem:[#allocation3 + $0x80] sm:$0x1] }
 0x2bc   : > { %13573 = vmatmul.mubr.bf16.gmra.mxu1 %v12180_v63  ;;  %v7274_v58 = vrot.slane %v7273_v4, 4  ;;  %v7304_v33 = vshrl.u32 %v17668_v54, 16  ;;  %6302 = vst [vmem:[#allocation3 + $0xb8] sm:$0xf] %v6134_v25  ;;  %6305 = vst [vmem:[#allocation3 + $0xbc] sm:$0x1] %v6304_v44  ;;  %v7297_v55 = vor.u32 %v7296_v35, %v7293_v32 }
 0x2bd   : > { %v7284_v48 = vrot.slane %v7283_v51, 4  ;;  %v7302_v37 = vrot.slane %v7300_v16, 5  ;;  %v7310_v60 = vshll.u32 %v17672_v56, 16  ;;  %v7315_v18 = vshrl.u32 %v7056_v15, 16 }
 0x2be   : > { %v7279_v30 = vsel %vm14380_vm8, %v7274_v58, %v7278_v28  ;;  %v7306_v9 = vrot.slane %v7304_v33, 4  ;;  %v7318_v47 = vshll.u32 %v7056_v15, 16  ;;  %v7298_v53 = vrot.slane %v7297_v55, 4  ;;  %v17700_v28 = vld [vmem:[#allocation3 + $0x8c] sm:$0x1] }
 0x2bf   : > { %v7289_v46 = vsel %vm14380_vm8, %v7284_v48, %v7288_v38  ;;  %v7312_v26 = vrot.slane %v7310_v60, 5  ;;  %v7324_v13 = vshll.u32 %v17682_v20, 16  ;;  %v7317_v31 = vrot.slane %v7315_v18, 4 }
 0x2c0   : > { %v12181_v40 = vcombine.low %v7279_v30, %v7289_v46  ;;  %v7307_v1 = vor.u32 %v7306_v9, %v7302_v37  ;;  %v7320_v49 = vrot.slane %v7318_v47, 5  ;;  %v7303_v3 = vsel %vm14380_vm8, %v7298_v53, %v7302_v37  ;;  %v17709_v37 = vld [vmem:[#allocation3 + $0x98] sm:$0x1]  ;;  %v7065_v53 = vld [vmem:[#allocation3 + $0x9c] sm:$0xf] }
 0x2c1   : > { %v7326_v7 = vrot.slane %v7324_v13, 5  ;;  %v7328_v45 = vshrl.u32 %v17682_v20, 16  ;;  %v7334_v21 = vshll.u32 %v17687_v50, 16  ;;  %v7339_v8 = vshrl.u32 %v7059_v17, 16 }
 0x2c2   : > { %13576 = vmatprep.mubr.bf16.mxu1 %v12181_v40  ;;  %v7308_v34 = vrot.slane %v7307_v1, 4  ;;  %v7321_v57 = vor.u32 %v7320_v49, %v7317_v31  ;;  %v7342_v23 = vshll.u32 %v7059_v17, 16  ;;  %v7348_v59 = vshll.u32 %v17692_v27, 16  ;;  %v17715_v1 = vld [vmem:[#allocation3 + $0xa0] sm:$0xf] }
 0x2c3   : > { %v7330_v24 = vrot.slane %v7328_v45, 4  ;;  %v7336_v29 = vrot.slane %v7334_v21, 5  ;;  %v7352_v38 = vshrl.u32 %v17692_v27, 16  ;;  %v7341_v63 = vrot.slane %v7339_v8, 4  ;;  %v14139_v51 = vld [vmem:[#allocation3 + $0xb4] sm:$0xff]  }
 0x2c4   : > { %v7313_v62 = vsel %vm14380_vm8, %v7308_v34, %v7312_v26  ;;  %v7322_v6 = vrot.slane %v7321_v57, 4  ;;  %v7344_v4 = vrot.slane %v7342_v23, 5  ;;  %v7350_v16 = vrot.slane %v7348_v59, 5  ;;  %13541 = vmatmul.mubr.bf16.gmra.mxu0 %v14139_v51  ;;  %v7068_v57 = vld [vmem:[#allocation3 + $0xa8] sm:$0xf] }
 0x2c5   : > { %v12182_v32 = vcombine.low %v7303_v3, %v7313_v62  ;;  %v7331_v35 = vor.u32 %v7330_v24, %v7326_v7  ;;  %v7354_v15 = vrot.slane %v7352_v38, 4  ;;  %v7358_v58 = vshll.u32 %v17700_v28, 16  ;;  %v17722_v24 = vld [vmem:[#allocation3 + $0xa4] sm:$0x1] }
 0x2c6   : > { %v7327_v25 = vsel %vm14380_vm8, %v7322_v6, %v7326_v7  ;;  %v7345_v44 = vor.u32 %v7344_v4, %v7341_v63  ;;  %v7363_v33 = vshrl.u32 %v7062_v5, 16  ;;  %v7366_v60 = vshll.u32 %v7062_v5, 16  ;;  %v17726_v63 = vld [vmem:[#allocation3 + $0xac] sm:$0xf]  ;;  %v17728_v4 = vpop.f32.mrf.mxu1 }
 0x2c7   : > { %13577 = vmatmul.mubr.bf16.gmra.mxu1 %v12182_v32  ;;  %v7332_v48 = vrot.slane %v7331_v35, 4  ;;  %v7355_v55 = vor.u32 %v7354_v15, %v7350_v16  ;;  %v7372_v30 = vshll.u32 %v17698_v61, 16  ;;  %v7360_v18 = vrot.slane %v7358_v58, 5  ;;  %v7780_v15 = vld [vmem:[#allocation3] sm:$0xe] }
 0x2c8   : > { %v7346_v9 = vrot.slane %v7345_v44, 4  ;;  %v7365_v47 = vrot.slane %v7363_v33, 4  ;;  %v7376_v46 = vshrl.u32 %v17698_v61, 16  ;;  %v7368_v17 = vrot.slane %v7366_v60, 5  ;;  %v17731_v33 = vld [vmem:[#allocation3 + $0xb0] sm:$0x1] }
 0x2c9   : > { %v7337_v26 = vsel %vm14380_vm8, %v7332_v48, %v7336_v29  ;;  %v7356_v13 = vrot.slane %v7355_v55, 4  ;;  %v7374_v40 = vrot.slane %v7372_v30, 5  ;;  %v7382_v7 = vshll.u32 %v17709_v37, 16 }
 0x2ca   : > { %v12183_v31 = vcombine.low %v7327_v25, %v7337_v26  ;;  %v7351_v49 = vsel %vm14380_vm8, %v7346_v9, %v7350_v16  ;;  %v7378_v3 = vrot.slane %v7376_v46, 4  ;;  %v7369_v21 = vor.u32 %v7368_v17, %v7365_v47  ;;  %v17738_v26 = vpop.f32.mrf.mxu1 }
 0x2cb   : > { %v7361_v45 = vsel %vm14380_vm8, %v7356_v13, %v7360_v18  ;;  %v7387_v5 = vshrl.u32 %v7065_v53, 16  ;;  %v7390_v34 = vshll.u32 %v7065_v53, 16  ;;  %v7396_v29 = vshll.u32 %v17715_v1, 16 }
 0x2cc   : > { %13580 = vmatprep.mubr.bf16.mxu1 %v12183_v31  ;;  %v12184_v8 = vcombine.low %v7351_v49, %v7361_v45  ;;  %v7379_v23 = vor.u32 %v7378_v3, %v7374_v40  ;;  %v7370_v59 = vrot.slane %v7369_v21, 4  ;;  %v7400_v6 = vshrl.u32 %v17715_v1, 16  ;;  %v14276_v45 = vld [vmem:[#allocation3 + $0x4] sm:$0xf] }
 0x2cd   : > { %v7389_v38 = vrot.slane %v7387_v5, 4  ;;  %v7392_v62 = vrot.slane %v7390_v34, 5  ;;  %v7384_v32 = vrot.slane %v7382_v7, 5  ;;  %v7398_v35 = vrot.slane %v7396_v29, 5  ;;  %v7781_v5 = vld [vmem:[#allocation3 + $0xc] sm:$0xe] }
 0x2ce   : > { %v7380_v51 = vrot.slane %v7379_v23, 4  ;;  %v7411_v16 = vshrl.u32 %v7068_v57, 16  ;;  %v7402_v44 = vrot.slane %v7400_v6, 4  ;;  %v7406_v58 = vshll.u32 %v17722_v24, 16  ;;  %v14277_v23 = vld [vmem:[#allocation3 + $0x8] sm:$0x1] }
 0x2cf   : > { %13581 = vmatmul.mubr.bf16.gmra.mxu1 %v12184_v8  ;;  %v7393_v25 = vor.u32 %v7392_v62, %v7389_v38  ;;  %v7414_v48 = vshll.u32 %v7068_v57, 16  ;;  %v7375_v55 = vsel %vm14380_vm8, %v7370_v59, %v7374_v40  ;;  %v7420_v9 = vshll.u32 %v17726_v63, 16  ;;  %v7071_v59 = vld [vmem:[#allocation3 + $0xb4] sm:$0xf] }
 0x2d0   : > { %v7385_v60 = vsel %vm14380_vm8, %v7380_v51, %v7384_v32  ;;  %v7413_v30 = vrot.slane %v7411_v16, 4  ;;  %v7403_v46 = vor.u32 %v7402_v44, %v7398_v35  ;;  %v7424_v17 = vshrl.u32 %v17726_v63, 16  ;;  %v17748_v16 = vpop.f32.mrf.mxu1 }
 0x2d1   : > { %v12185_v18 = vcombine.low %v7375_v55, %v7385_v60  ;;  %v7394_v47 = vrot.slane %v7393_v25, 4  ;;  %v7416_v53 = vrot.slane %v7414_v48, 5  ;;  %v7422_v13 = vrot.slane %v7420_v9, 5  ;;  %v17750_v48 = vld [vmem:[#allocation3 + $0xb8] sm:$0xf] }
 0x2d2   : > { %v7430_v31 = vshll.u32 %v17731_v33, 16  ;;  %v12197_v49 = vrot.slane %v7780_v15, 9  ;;  %v7404_v40 = vrot.slane %v7403_v46, 4  ;;  %v7408_v3 = vrot.slane %v7406_v58, 5  ;;  %v14278_v58 = vld [vmem:[#allocation3 + $0x10] sm:$0xf] }
 0x2d3   : > { %13584 = vmatprep.mubr.bf16.mxu1 %v12185_v18  ;;  %v7417_v7 = vor.u32 %v7416_v53, %v7413_v30  ;;  %v7846_v21 = vrot.slane %v14276_v45, 5  ;;  %v7399_v34 = vsel %vm14380_vm8, %v7394_v47, %v7398_v35  ;;  %v7426_v57 = vrot.slane %v7424_v17, 4  ;;  %v14279_v60 = vld [vmem:[#allocation3 + $0x14] sm:$0x1]  ;;  %v17754_v9 = vld [vmem:[#allocation3 + $0xbc] sm:$0x1] }
 0x2d4   : > { %v7432_v8 = vrot.slane %v7430_v31, 5  ;;  %v7849_v29 = vrot.slane %v14277_v23, 5  ;;  %v7409_v38 = vsel %vm14380_vm8, %v7404_v40, %v7408_v3  ;;  %v12198_v44 = vrot.slane %v7781_v5, 9  ;;  %v17760_v5 = vpop.f32.mrf.mxu1 }
 0x2d5   : > { %v7418_v62 = vrot.slane %v7417_v7, 4  ;;  %v7847_v51 = vsel %vm14845_vm14, %v12197_v49, %v7846_v21  ;;  %v7848_v32 = vrot.slane %v7846_v21, 4  ;;  %v12186_v15 = vcombine.low %v7399_v34, %v7409_v38  ;;  %v7782_v49 = vld [vmem:[#allocation3 + $0x18] sm:$0xe]  ;;  %v7783_v21 = vld [vmem:[#allocation3 + $0x24] sm:$0xe] }
 0x2d6   : > { %v7427_v25 = vor.u32 %v7426_v57, %v7422_v13  ;;  %v7853_v35 = vrot.slane %v14278_v58, 5  ;;  %v7856_v30 = vrot.slane %v14279_v60, 5  ;;  %v7435_v18 = vshrl.u32 %v7071_v59, 16  ;;  %v17773_v60 = vpop.f32.mrf.mxu1 }
 0x2d7   : > { %v7850_v55 = vsel %vm14845_vm14, %v7848_v32, %v7849_v29  ;;  %v7438_v47 = vshll.u32 %v7071_v59, 16  ;;  %13585 = vmatmul.mubr.bf16.gmra.mxu1 %v12186_v15  ;;  %v7423_v46 = vsel %vm14380_vm8, %v7418_v62, %v7422_v13  ;;  %v7444_v7 = vshll.u32 %v17750_v48, 16  ;;  %v14280_v15 = vld [vmem:[#allocation3 + $0x1c] sm:$0xf] }
 0x2d8   : > { %v7428_v53 = vrot.slane %v7427_v25, 4  ;;  %v12229_v17 = vcombine.low %v7847_v51, %v7850_v55  ;;  %v7855_v31 = vrot.slane %v7853_v35, 4  ;;  %v7437_v40 = vrot.slane %v7435_v18, 4  ;;  %v14147_v51 = vld [vmem:[%s19802_s2 + $0x130] sm:$0xff]   ;;  %v7784_v25 = vld [vmem:[#allocation3 + $0x30] sm:$0xe] }
 0x2d9   : > { %v7440_v3 = vrot.slane %v7438_v47, 5  ;;  %v7448_v45 = vshrl.u32 %v17750_v48, 16  ;;  %v7854_v13 = vsel %vm14845_vm14, %v12198_v44, %v7853_v35  ;;  %v7454_v23 = vshll.u32 %v17754_v9, 16  ;;  %v14281_v47 = vld [vmem:[#allocation3 + $0x20] sm:$0x1] }
 0x2da   : > { %v7433_v34 = vsel %vm14380_vm8, %v7428_v53, %v7432_v8  ;;  %13608 = vmatprep.mubr.bf16.mxu0 %v12229_v17  ;;  %v7857_v57 = vsel %vm14845_vm14, %v7855_v31, %v7856_v30  ;;  %v7446_v62 = vrot.slane %v7444_v7, 5  ;;  %v7860_v8 = vrot.slane %v14280_v15, 5  ;;  %v14282_v53 = vld [vmem:[%s19802_s2 + $0x138] sm:$0xff]   ;;  %v7786_v15 = vld [vmem:[#allocation3 + $0x48] sm:$0xe] }
 0x2db   : > { %v12187_v29 = vcombine.low %v7423_v46, %v7433_v34  ;;  %v12230_v59 = vcombine.low %v7854_v13, %v7857_v57  ;;  %v7441_v38 = vor.u32 %v7440_v3, %v7437_v40  ;;  %v7450_v32 = vrot.slane %v7448_v45, 4  ;;  %v14150_v3 = vld [vmem:[%s19802_s2 + $0x128] sm:$0xff]   ;;  %v7785_v13 = vld [vmem:[#allocation3 + $0x3c] sm:$0xe] }
 0x2dc   : > { %v7456_v58 = vrot.slane %v7454_v23, 5  ;;  %v12199_v35 = vrot.slane %v7782_v49, 9  ;;  %v7867_v55 = vrot.slane %v17506_v39, 5  ;;  %v7862_v18 = vrot.slane %v7860_v8, 4 }
 0x2dd   : > { %13588 = vmatprep.mubr.bf16.mxu1 %v12187_v29  ;;  %13609 = vmatmul.mubr.bf16.vlgmr.msra.gmra.mxu0 %v12230_v59  ;;  %v7442_v44 = vrot.slane %v7441_v38, 4  ;;  %v7451_v30 = vor.u32 %v7450_v32, %v7446_v62  ;;  %v7863_v46 = vrot.slane %v14281_v47, 5  ;;  %v12200_v17 = vrot.slane %v7783_v21, 9  ;;  %v17792_v29 = vpop.f32.mrf.mxu1  ;;  %v7787_v47 = vld [vmem:[#allocation3 + $0x54] sm:$0xe] }
 0x2de   : > { %13689 = vmatpush3.bf16.msra.mxu0 %v14282_v53  ;;  %v7861_v31 = vsel %vm14845_vm14, %v12199_v35, %v7860_v8  ;;  %v7869_v40 = vrot.slane %v7867_v55, 4  ;;  %v7870_v49 = vrot.slane %v17526_v41, 5  ;;  %v7874_v39 = vrot.slane %v17547_v0, 5 }
 0x2df   : > { %13690 = vmatprep.subr.bf16.mxu0 %v14147_v51  ;;  %v7447_v7 = vsel %vm14380_vm8, %v7442_v44, %v7446_v62  ;;  %v7452_v45 = vrot.slane %v7451_v30, 4  ;;  %v7864_v21 = vsel %vm14845_vm14, %v7862_v18, %v7863_v46  ;;  %v12201_v34 = vrot.slane %v7784_v25, 9  ;;  %v14145_v25 = vld [vmem:[#allocation3 + $0xc] sm:$0xff]   ;;  %v17809_v53 = vpop.f32.mrf.mxu1 }
 0x2e0   : > { %v12231_v57 = vcombine.low %v7861_v31, %v7864_v21  ;;  %v7871_v41 = vsel %vm14845_vm14, %v7869_v40, %v7870_v49  ;;  %v7876_v23 = vrot.slane %v7874_v39, 4  ;;  %v7877_v0 = vrot.slane %v17563_v11, 5 }
 0x2e1   : > { %v7457_v59 = vsel %vm14380_vm8, %v7452_v45, %v7456_v58  ;;  %v7868_v38 = vsel %vm14845_vm14, %v12200_v17, %v7867_v55  ;;  %v7875_v62 = vsel %vm14845_vm14, %v12201_v34, %v7874_v39  ;;  %v7881_v32 = vrot.slane %v17587_v10, 5  ;;  %v14153_v55 = vld [vmem:[%s19802_s2 + $0x120] sm:$0xff]   ;;  %v7788_v17 = vld [vmem:[#allocation3 + $0x60] sm:$0xe] }
 0x2e2   : > { %13691 = vmatpush3.bf16.msra.mxu0 %v14147_v51  ;;  %v12188_v8 = vcombine.low %v7447_v7, %v7457_v59  ;;  %13612 = vmatprep.mubr.bf16.mxu0 %v12231_v57  ;;  %v12232_v44 = vcombine.low %v7868_v38, %v7871_v41  ;;  %v7878_v11 = vsel %vm14845_vm14, %v7876_v23, %v7877_v0  ;;  %v7888_v58 = vrot.slane %v17618_v43, 5  ;;  %v17827_v41 = vpop.f32.mrf.mxu1  ;;  %v7790_v59 = vld [vmem:[#allocation3 + $0x78] sm:$0xe] }
 0x2e3   : > { %13692 = vmatprep.subr.bf16.mxu0 %v14150_v3  ;;  %v12233_v35 = vcombine.low %v7875_v62, %v7878_v11  ;;  %v7883_v30 = vrot.slane %v7881_v32, 4  ;;  %v12202_v10 = vrot.slane %v7785_v13, 9  ;;  %v7884_v51 = vrot.slane %v17592_v14, 5  ;;  %v14148_v62 = vld [vmem:[#allocation3 + $0x18] sm:$0xff]  }
 0x2e4   : > { %13589 = vmatmul.mubr.bf16.gmra.mxu1 %v12188_v8  ;;  %v7890_v18 = vrot.slane %v7888_v58, 4  ;;  %v7895_v46 = vrot.slane %v17639_v52, 5  ;;  %v7891_v43 = vrot.slane %v17631_v2, 5  ;;  %v7902_v31 = vrot.slane %v17653_v42, 5  ;;  %v14156_v42 = vld [vmem:[%s19802_s2 + $0x118] sm:$0xff]  }
 0x2e5   : > { %13613 = vmatmul.mubr.bf16.gmra.mxu0 %v12232_v44  ;;  %13656 = vmatprep.mubr.bf16.mxu1 %v14145_v25  ;;  %v7882_v40 = vsel %vm14845_vm14, %v12202_v10, %v7881_v32  ;;  %v7885_v49 = vsel %vm14845_vm14, %v7883_v30, %v7884_v51  ;;  %v12203_v14 = vrot.slane %v7786_v15, 9  ;;  %v12204_v7 = vrot.slane %v7787_v47, 9  ;;  %v14149_v32 = vld [vmem:[#allocation3 + $0x24] sm:$0xff]   ;;  %v7792_v25 = vld [vmem:[#allocation3 + $0x90] sm:$0xe]  ;;  %v14163_v30 = vld [vmem:[%s19802_s2 + $0x170] sm:$0xff]  }
 0x2e6   : > { %13616 = vmatprep.mubr.bf16.mxu0 %v12233_v35  ;;  %13693 = vmatpush3.bf16.msra.mxu0 %v14150_v3  ;;  %v7897_v39 = vrot.slane %v7895_v46, 4  ;;  %v7892_v52 = vsel %vm14845_vm14, %v7890_v18, %v7891_v43  ;;  %v7898_v45 = vrot.slane %v17643_v12, 5  ;;  %v7904_v2 = vrot.slane %v7902_v31, 4  ;;  %v7789_v3 = vld [vmem:[#allocation3 + $0x6c] sm:$0xe]  ;;  %v14159_v35 = vld [vmem:[%s19802_s2 + $0x110] sm:$0xff]  }
 0x2e7   : > { %13694 = vmatprep.subr.bf16.mxu0 %v14153_v55  ;;  %v7889_v21 = vsel %vm14845_vm14, %v12203_v14, %v7888_v58  ;;  %v12205_v34 = vrot.slane %v7788_v17, 9  ;;  %v7905_v13 = vrot.slane %v17655_v36, 5  ;;  %v7909_v57 = vrot.slane %v17668_v54, 5  ;;  %v7791_v51 = vld [vmem:[#allocation3 + $0x84] sm:$0xe]  ;;  %v14164_v14 = vld [vmem:[%s19802_s2 + $0x108] sm:$0xff]  }
 0x2e8   : > { %v12234_v23 = vcombine.low %v7882_v40, %v7885_v49  ;;  %v17831_v12 = vsel %vm14845_vm14, %v12204_v7, %v7895_v46  ;;  %v17835_v0 = vsel %vm14845_vm14, %v7897_v39, %v7898_v45  ;;  %v7916_v38 = vrot.slane %v17682_v20, 5  ;;  %v7793_v49 = vld [vmem:[#allocation3 + $0x9c] sm:$0xe]  ;;  %v7794_v45 = vld [vmem:[#allocation3 + $0xa8] sm:$0xe] }
 0x2e9   : > { %v12235_v36 = vcombine.low %v7889_v21, %v7892_v52  ;;  %v17840_v54 = vsel %vm14845_vm14, %v12205_v34, %v7902_v31  ;;  %v17844_v15 = vsel %vm14845_vm14, %v7904_v2, %v7905_v13  ;;  %v7911_v8 = vrot.slane %v7909_v57, 4  ;;  %v8664_v34 = vld [vmem:[#allocation3 + $0xc] sm:$0xf]  ;;  %v14151_v13 = vld [vmem:[#allocation3 + $0x30] sm:$0xff]  }
 0x2ea   : > { %13695 = vmatpush3.bf16.msra.mxu0 %v14153_v55  ;;  %v12206_v44 = vrot.slane %v7789_v3, 9  ;;  %v7912_v11 = vrot.slane %v17672_v56, 5  ;;  %v7918_v58 = vrot.slane %v7916_v38, 4  ;;  %v7923_v20 = vrot.slane %v17692_v27, 5  ;;  %v17858_v27 = vpop.f32.mrf.mxu1  ;;  %v14152_v3 = vld [vmem:[#allocation3 + $0x3c] sm:$0xff]  }
 0x2eb   : > { %13696 = vmatprep.subr.bf16.mxu0 %v14156_v42  ;;  %v12236_v55 = vcombine.low %v17831_v12, %v17835_v0  ;;  %v12207_v10 = vrot.slane %v7790_v59, 9  ;;  %v7919_v56 = vrot.slane %v17687_v50, 5  ;;  %v7930_v18 = vrot.slane %v17698_v61, 5  ;;  %v17911_v59 = vld [vmem:[#allocation3 + $0x10] sm:$0xf] }
 0x2ec   : > { %13657 = vmatmul.mubr.bf16.vlgmr.msra.gmra.mxu1 %v14148_v62  ;;  %v12237_v47 = vcombine.low %v17840_v54, %v17844_v15  ;;  %v17864_v46 = vsel %vm14845_vm14, %v7911_v8, %v7912_v11  ;;  %v7925_v43 = vrot.slane %v7923_v20, 4  ;;  %v7926_v17 = vrot.slane %v17700_v28, 5  ;;  %v8667_v54 = vld [vmem:[#allocation3 + $0x18] sm:$0xf]  ;;  %v17921_v8 = vld [vmem:[#allocation3 + $0xb4] sm:$0xe] }
 0x2ed   : > { %13617 = vmatmul.mubr.bf16.gmra.mxu0 %v12234_v23  ;;  %13660 = vmatprep.mubr.bf16.mxu1 %v14149_v32  ;;  %v17869_v50 = vsel %vm14845_vm14, %v12206_v44, %v7909_v57  ;;  %v17873_v61 = vsel %vm14845_vm14, %v7918_v58, %v7919_v56  ;;  %v7932_v31 = vrot.slane %v7930_v18, 4  ;;  %v7933_v40 = vrot.slane %v17709_v37, 5  ;;  %v14169_v44 = vld [vmem:[%s19802_s2 + $0x100] sm:$0xff]  }
 0x2ee   : > { %13620 = vmatprep.mubr.bf16.mxu0 %v12235_v36  ;;  %13697 = vmatpush3.bf16.msra.mxu0 %v14156_v42  ;;  %v12208_v28 = vrot.slane %v7791_v51, 9  ;;  %v17882_v39 = vsel %vm14845_vm14, %v7925_v43, %v7926_v17  ;;  %v12209_v52 = vrot.slane %v7792_v25, 9  ;;  %v7937_v7 = vrot.slane %v17715_v1, 5  ;;  %v17899_v1 = vpop.f32.mrf.mxu1  ;;  %v14168_v36 = vld [vmem:[%s19802_s2 + $0x160] sm:$0xff]   ;;  %v17945_v17 = vld [vmem:[#allocation3 + $0x1c] sm:$0xf] }
 0x2ef   : > { %13737 = vmatpush3.bf16.msra.mxu1 %v17597_v22  ;;  %13698 = vmatprep.subr.bf16.mxu0 %v14159_v35  ;;  %v14166_v22 = vld [vmem:[%s19802_s2 + $0x168] sm:$0xff]   ;;  %v12238_v37 = vcombine.low %v17869_v50, %v17864_v46  ;;  %v17892_v2 = vsel %vm14845_vm14, %v12207_v10, %v7916_v38  ;;  %v17896_v42 = vsel %vm14845_vm14, %v7932_v31, %v7933_v40  ;;  %v7944_v21 = vrot.slane %v17726_v63, 5 }
 0x2f0   : > { %13738 = vmatprep.subr.bf16.mxu1 %v14163_v30  ;;  %v12239_v57 = vcombine.low %v17892_v2, %v17873_v61  ;;  %v17905_v23 = vsel %vm14845_vm14, %v12208_v28, %v7923_v20  ;;  %v17909_v12 = vsel %vm14845_vm14, %v12209_v52, %v7930_v18  ;;  %v7939_v0 = vrot.slane %v7937_v7, 4  ;;  %v17936_v10 = vld [vmem:[#allocation3 + $0x14] sm:$0x1]  ;;  %v17938_v56 = vpop.f32.mrf.mxu1 }
 0x2f1   : > { %v12240_v63 = vcombine.low %v17905_v23, %v17882_v39  ;;  %v12210_v38 = vrot.slane %v7793_v49, 9  ;;  %v7940_v62 = vrot.slane %v17722_v24, 5  ;;  %v12211_v32 = vrot.slane %v7794_v45, 9 }
 0x2f2   : > { %13699 = vmatpush3.bf16.msra.mxu0 %v14159_v35  ;;  %v12241_v15 = vcombine.low %v17909_v12, %v17896_v42  ;;  %v7951_v25 = vrot.slane %v17750_v48, 5  ;;  %v8713_v24 = vshrl.u32 %v8664_v34, 16  ;;  %v8716_v11 = vshll.u32 %v8664_v34, 16  ;;  %v17968_v34 = vld [vmem:[#allocation3 + $0x20] sm:$0x1] }
 0x2f3   : > { %13739 = vmatpush3.bf16.msra.mxu1 %v14163_v30  ;;  %13700 = vmatprep.subr.bf16.mxu0 %v14164_v14  ;;  %v17929_v58 = vsel %vm14845_vm14, %v12210_v38, %v7937_v7  ;;  %v17933_v20 = vsel %vm14845_vm14, %v7939_v0, %v7940_v62  ;;  %v7946_v35 = vrot.slane %v7944_v21, 4  ;;  %v7947_v30 = vrot.slane %v17731_v33, 5  ;;  %v17971_v0 = vpop.f32.mrf.mxu1  ;;  %v18038_v48 = vld [vmem:[#allocation3 + $0x38] sm:$0x1] }
 0x2f4   : > { %13740 = vmatprep.subr.bf16.mxu1 %v14166_v22  ;;  %13661 = vmatmul.mubr.bf16.gmra.mxu1 %v14151_v13  ;;  %v8715_v51 = vrot.slane %v8713_v24, 4  ;;  %v8718_v18 = vrot.slane %v8716_v11, 5  ;;  %v8722_v43 = vshll.u32 %v17911_v59, 16  ;;  %v12212_v33 = vrot.slane %v17921_v8, 9  ;;  %v17975_v8 = vld [vmem:[#allocation3 + $0x28] sm:$0xf] }
 0x2f5   : > { %13621 = vmatmul.mubr.bf16.gmra.mxu0 %v12236_v55  ;;  %13664 = vmatprep.mubr.bf16.mxu1 %v14152_v3  ;;  %v17942_v55 = vsel %vm14845_vm14, %v12211_v32, %v7944_v21  ;;  %v7954_v31 = vrot.slane %v17754_v9, 5  ;;  %v8726_v40 = vshrl.u32 %v17911_v59, 16  ;;  %v8737_v49 = vshrl.u32 %v8667_v54, 16  ;;  %v17962_v9 = vld [vmem:[%s19802_s2 + $0x1b8] sm:$0xff]   ;;  %v14154_v24 = vld [vmem:[#allocation3 + $0x48] sm:$0xff]  }
 0x2f6   : > { %13624 = vmatprep.mubr.bf16.mxu0 %v12237_v47  ;;  %13701 = vmatpush3.bf16.msra.mxu0 %v14164_v14  ;;  %v8670_v47 = vld [vmem:[#allocation3 + $0x24] sm:$0xf]  ;;  %v7953_v52 = vrot.slane %v7951_v25, 4  ;;  %v17954_v7 = vrot.slane %v8722_v43, 5  ;;  %v8740_v45 = vshll.u32 %v8667_v54, 16  ;;  %v8746_v3 = vshll.u32 %v17945_v17, 16 }
 0x2f7   : > { %13741 = vmatpush3.bf16.msra.mxu1 %v14166_v22  ;;  %13702 = vmatprep.subr.bf16.mxu0 %v14169_v44  ;;  %v14171_v14 = vld [vmem:[%s19802_s2 + $0x158] sm:$0xff]   ;;  %v17966_v22 = vsel %vm14845_vm14, %v7946_v35, %v7947_v30  ;;  %v8728_v21 = vrot.slane %v8726_v40, 4  ;;  %v8739_v13 = vrot.slane %v8737_v49, 4  ;;  %v8719_v38 = vor.u32 %v8718_v18, %v8715_v51  ;;  %v14155_v40 = vld [vmem:[#allocation3 + $0x54] sm:$0xff]  }
 0x2f8   : > { %13742 = vmatprep.subr.bf16.mxu1 %v14168_v36  ;;  %v8732_v62 = vshll.u32 %v17936_v10, 16  ;;  %v8742_v32 = vrot.slane %v8740_v45, 5  ;;  %v8750_v54 = vshrl.u32 %v17945_v17, 16  ;;  %v17978_v35 = vrot.slane %v8746_v3, 5  ;;  %v14173_v18 = vld [vmem:[%s19802_s2 + $0x150] sm:$0xff]  }
 0x2f9   : > { %v8729_v11 = vor.u32 %v8728_v21, %v17954_v7  ;;  %v8761_v30 = vshrl.u32 %v8670_v47, 16  ;;  %v8764_v43 = vshll.u32 %v8670_v47, 16  ;;  %v17982_v51 = vsel %vm14845_vm14, %v7953_v52, %v7954_v31  ;;  %v17993_v21 = vpop.f32.mrf.mxu1 }
 0x2fa   : > { %13703 = vmatpush3.bf16.msra.mxu0 %v14169_v44  ;;  %v8743_v49 = vor.u32 %v8742_v32, %v8739_v13  ;;  %v8752_v45 = vrot.slane %v8750_v54, 4  ;;  %v8770_v52 = vshll.u32 %v17975_v8, 16  ;;  %20132 = vst [vmem:[#allocation20_spill] sm:$0xff] %v17993_v21  ;;  %v18004_v46 = vsel %vm14845_vm14, %v12212_v33, %v7951_v25  ;;  %v9419_v21 = vld [vmem:[#allocation3 + $0x18] sm:$0xe] }
 0x2fb   : > { %13743 = vmatpush3.bf16.msra.mxu1 %v14168_v36  ;;  %v8756_v36 = vshll.u32 %v17968_v34, 16  ;;  %13784 = vmatprep.subr.bf16.mxu0 %v17962_v9  ;;  %v8730_v44 = vrot.slane %v8729_v11, 4  ;;  %v8763_v47 = vrot.slane %v8761_v30, 4  ;;  %v8766_v31 = vrot.slane %v8764_v43, 5  ;;  %v14176_v11 = vld [vmem:[%s19802_s2 + $0x148] sm:$0xff]  }
 0x2fc   : > { %13744 = vmatprep.subr.bf16.mxu1 %v14171_v14  ;;  %13665 = vmatmul.mubr.bf16.gmra.mxu1 %v14154_v24  ;;  %v8753_v50 = vor.u32 %v8752_v45, %v17978_v35  ;;  %v8774_v3 = vshrl.u32 %v17975_v8, 16  ;;  %v8720_v32 = vrot.slane %v8719_v38, 4  ;;  %v8734_v54 = vrot.slane %v8732_v62, 5  ;;  %v18017_v30 = vld [vmem:[#allocation3 + $0xc] sm:$0xe]  ;;  %v18025_v45 = vpop.f32.mrf.mxu1 }
 0x2fd   : > { %13625 = vmatmul.mubr.bf16.gmra.mxu0 %v12238_v37  ;;  %13668 = vmatprep.mubr.bf16.mxu1 %v14155_v40  ;;  %v18007_v37 = vld [vmem:[#allocation3 + $0x2c] sm:$0x1]  ;;  %v8767_v61 = vor.u32 %v8766_v31, %v8763_v47  ;;  %v18010_v2 = vrot.slane %v8770_v52, 5  ;;  %v8758_v25 = vrot.slane %v8756_v36, 5  ;;  %v8744_v38 = vrot.slane %v8743_v49, 4  ;;  %20133 = vst [vmem:[#allocation26_spill] sm:$0xff] %v18025_v45 }
 0x2fe   : > { %13628 = vmatprep.mubr.bf16.mxu0 %v12239_v57  ;;  %v8673_v57 = vld [vmem:[#allocation3 + $0x30] sm:$0xf]  ;;  %v8754_v24 = vrot.slane %v8753_v50, 4  ;;  %v8776_v33 = vrot.slane %v8774_v3, 4  ;;  %v8780_v62 = vshll.u32 %v18007_v37, 16  ;;  %v19842_v43 = vrot.slane %v17911_v59, 5 }
 0x2ff   : > { %13745 = vmatpush3.bf16.msra.mxu1 %v14171_v14  ;;  %v8735_v14 = vsel %vm14380_vm8, %v8730_v44, %v8734_v54  ;;  %v18023_v40 = vld [vmem:[#allocation3 + $0x34] sm:$0xf]  ;;  %v18027_v36 = vrot.slane %v8767_v61, 4  ;;  %v8785_v31 = vshrl.u32 %v8673_v57, 16  ;;  %v8788_v52 = vshll.u32 %v8673_v57, 16  ;;  %v14157_v50 = vld [vmem:[#allocation3 + $0x60] sm:$0xff]  }
 0x300   : > { %13746 = vmatprep.subr.bf16.mxu1 %v14173_v18  ;;  %v8777_v47 = vor.u32 %v8776_v33, %v18010_v2  ;;  %v14158_v3 = vld [vmem:[#allocation3 + $0x6c] sm:$0xff]   ;;  %v8725_v49 = vsel %vm14380_vm8, %v8720_v32, %v17954_v7  ;;  %v8759_v44 = vsel %vm14380_vm8, %v8754_v24, %v8758_v25  ;;  %v9486_v61 = vrot.slane %v19842_v43, 4  ;;  %v8676_v32 = vld [vmem:[#allocation3 + $0x3c] sm:$0xf]  ;;  %v18054_v54 = vld [vmem:[#allocation3 + $0x40] sm:$0xf] }
 0x301   : > { %v18040_v33 = vcombine.low %v8725_v49, %v8735_v14  ;;  %v14177_v57 = vld [vmem:[%s19802_s2 + $0x140] sm:$0xff]   ;;  %v8787_v13 = vrot.slane %v8785_v31, 4  ;;  %v8790_v7 = vrot.slane %v8788_v52, 5  ;;  %v8749_v24 = vsel %vm14380_vm8, %v8744_v38, %v17978_v35  ;;  %v18056_v31 = vpop.f32.mrf.mxu1 }
 0x302   : > { %v8782_v25 = vrot.slane %v8780_v62, 5  ;;  %v9487_v14 = vrot.slane %v17936_v10, 5  ;;  %v8798_v49 = vshrl.u32 %v18023_v40, 16  ;;  %20134 = vst [vmem:[#allocation29_spill] sm:$0xff] %v18056_v31  ;;  %v18061_v39 = vcombine.low %v8749_v24, %v8759_v44  ;;  %v6329_v35 = vld [vmem:[%s19804_s4 + $0x1] sm:$0x1] }
 0x303   : > { %13747 = vmatpush3.bf16.msra.mxu1 %v14173_v18  ;;  %v8794_v18 = vshll.u32 %v18023_v40, 16  ;;  %v8773_v23 = vsel %vm14380_vm8, %v18027_v36, %v18010_v2  ;;  %v6330_v38 = vld [vmem:[%s19804_s4 + $0x2] sm:$0x1]  ;;  %v8791_v12 = vor.u32 %v8790_v7, %v8787_v13  ;;  %v6332_v62 = vlaneseq  ;;  %v18087_v7 = vpop.f32.mrf.mxu1 }
 0x304   : > { %13748 = vmatprep.subr.bf16.mxu1 %v14176_v11  ;;  %13669 = vmatmul.mubr.bf16.gmra.mxu1 %v14157_v50  ;;  %v18075_v42 = vsel %vm14845_vm14, %v9486_v61, %v9487_v14  ;;  %v8804_v2 = vshll.u32 %v18038_v48, 16  ;;  %v8809_v36 = vshrl.u32 %v8676_v32, 16  ;;  %v8818_v52 = vshll.u32 %v18054_v54, 16  ;;  %v18082_v50 = vld [vmem:[%s19802_s2 + $0x1f8] sm:$0xff]   ;;  %20135 = vst [vmem:[#allocation13_spill] sm:$0xff] %v18087_v7 }
 0x305   : > { %13629 = vmatmul.mubr.bf16.gmra.mxu0 %v12240_v63  ;;  %13672 = vmatprep.mubr.bf16.mxu1 %v14158_v3  ;;  %v8778_v63 = vrot.slane %v8777_v47, 4  ;;  %v8796_v10 = vrot.slane %v8794_v18, 5  ;;  %v8812_v47 = vshll.u32 %v8676_v32, 16  ;;  %v6331_v3 = vadd.f32 %v6330_v38, %v6329_v35  ;;  %v18084_v61 = vld [vmem:[#allocation3 + $0x44] sm:$0x1] }
 0x306   : > { %13632 = vmatprep.mubr.bf16.mxu0 %v12241_v15  ;;  %v8800_v15 = vrot.slane %v8798_v49, 4  ;;  %v6333_v44 = vshrl.u32 %v6332_v62, 7  ;;  %v8822_v13 = vshrl.u32 %v18054_v54, 16  ;;  %v8811_v32 = vrot.slane %v8809_v36, 4  ;;  %v14160_v49 = vld [vmem:[#allocation3 + $0x78] sm:$0xff]   ;;  %v14162_v38 = vld [vmem:[#allocation3 + $0x84] sm:$0xff]  }
 0x307   : > { %13749 = vmatpush3.bf16.msra.mxu1 %v14176_v11  ;;  %v8783_v18 = vsel %vm14380_vm8, %v8778_v63, %v8782_v25  ;;  %v8814_v24 = vrot.slane %v8812_v47, 5  ;;  %v18091_v14 = vrot.slane %v8818_v52, 5  ;;  %v8792_v43 = vrot.slane %v8791_v12, 4  ;;  %v18112_v47 = vpop.f32.mrf.mxu1 }
 0x308   : > { %13750 = vmatprep.subr.bf16.mxu1 %v14177_v57  ;;  %v8801_v11 = vor.u32 %v8800_v15, %v8796_v10  ;;  %v6334_v15 = vsub.s32 0, %v6333_v44  ;;  %v8824_v35 = vrot.slane %v8822_v13, 4  ;;  %v8806_v62 = vrot.slane %v8804_v2, 5 }
 0x309   : > { %v8815_v31 = vor.u32 %v8814_v24, %v8811_v32  ;;  %v8828_v45 = vshll.u32 %v18084_v61, 16  ;;  %v9491_v7 = vrot.slane %v17945_v17, 5  ;;  %v20136_v25 = vcombine.low %v17929_v58, %v17933_v20  ;;  %v18110_v17 = vld [vmem:[#allocation3 + $0x24] sm:$0xe]  ;;  %v8679_v32 = vld [vmem:[#allocation3 + $0x48] sm:$0xf] }
 0x30a   : > { %v8802_v28 = vrot.slane %v8801_v11, 4  ;;  %v20138_v63 = vrot.slane %v18017_v30, 9  ;;  %v18107_v2 = vrot.slane %v6331_v3, %v6334_v15  ;;  %v8825_v36 = vor.u32 %v8824_v35, %v18091_v14  ;;  %v18130_v15 = vld [vmem:[#allocation3 + $0x4c] sm:$0xf] }
 0x30b   : > { %13751 = vmatpush3.bf16.msra.mxu1 %v14177_v57  ;;  %v20137_v57 = vrot.slane %v17911_v59, 5  ;;  %v20140_v58 = vcombine.low %v17942_v55, %v17966_v22  ;;  %v18121_v30 = vrot.slane %v8815_v31, 4  ;;  %v9493_v52 = vrot.slane %v9491_v7, 4 }
 0x30c   : > { %13832 = vmatprep.subr.bf16.mxu1 %v18082_v50  ;;  %13673 = vmatmul.mubr.bf16.gmra.mxu1 %v14160_v49  ;;  %20139 = vst [vmem:[#allocation35_spill] sm:$0xff] %v18107_v2  ;;  %v8807_v20 = vsel %vm14380_vm8, %v8802_v28, %v8806_v62  ;;  %v18123_v11 = vcombine.low %v8773_v23, %v8783_v18  ;;  %v12334_v44 = vrot.slane %v9419_v21, 9  ;;  %v9498_v13 = vrot.slane %v17975_v8, 5  ;;  %v18153_v23 = vld [vmem:[#allocation3 + $0x50] sm:$0x1] }
 0x30d   : > { %13633 = vmatmul.mubr.bf16.gmra.mxu0 %v20136_v25  ;;  %v18105_v12 = vsel %vm14845_vm14, %v20138_v63, %v20137_v57  ;;  %13676 = vmatprep.mubr.bf16.mxu1 %v14162_v38  ;;  %v8797_v3 = vsel %vm14380_vm8, %v8792_v43, %v8796_v10  ;;  %v8826_v55 = vrot.slane %v8825_v36, 4  ;;  %v8830_v22 = vrot.slane %v8828_v45, 5  ;;  %v18143_v43 = vpop.f32.mrf.mxu1  ;;  %v8682_v18 = vld [vmem:[#allocation3 + $0x54] sm:$0xf]  ;;  %v14167_v25 = vld [vmem:[#allocation3 + $0x9c] sm:$0xff]  }
 0x30e   : > { %13636 = vmatprep.mubr.bf16.mxu0 %v20140_v58  ;;  %v9494_v24 = vrot.slane %v17968_v34, 5  ;;  %v12335_v49 = vrot.slane %v18110_v17, 9  ;;  %v18132_v28 = vcombine.low %v8797_v3, %v8807_v20  ;;  %v18136_v31 = vadd.f32 %v17728_v4, %v18107_v2 }
 0x30f   : > { %v18140_v21 = vsel %vm14845_vm14, %v12334_v44, %v9491_v7  ;;  %v9501_v8 = vrot.slane %v18007_v37, 5  ;;  %v8821_v34 = vsel %vm14380_vm8, %v18121_v30, %v18091_v14  ;;  %v8833_v4 = vshrl.u32 %v8679_v32, 16  ;;  %v14165_v7 = vld [vmem:[#allocation3 + $0x90] sm:$0xff]   ;;  %v18161_v14 = vld [vmem:[#allocation3 + $0x58] sm:$0xf]  ;;  %v18175_v44 = vpop.f32.mrf.mxu1 }
 0x310   : > { %v18151_v45 = vsel %vm14845_vm14, %v9493_v52, %v9494_v24  ;;  %v8836_v10 = vshll.u32 %v8679_v32, 16  ;;  %v9500_v35 = vrot.slane %v9498_v13, 4  ;;  %v18157_v37 = vadd.f32 %v17738_v26, %v18107_v2  ;;  %v18173_v52 = vld [vmem:[#allocation3 + $0x5c] sm:$0x1] }
 0x311   : > { %v8842_v38 = vshll.u32 %v18130_v15, 16  ;;  %v8846_v62 = vshrl.u32 %v18130_v15, 16  ;;  %v8831_v57 = vsel %vm14380_vm8, %v8826_v55, %v8830_v22  ;;  %v18167_v63 = vadd.f32 %v17748_v16, %v18107_v2 }
 0x312   : > { %20141 = vst [vmem:[#allocation17_spill] sm:$0xff] %v18157_v37  ;;  %v8835_v36 = vrot.slane %v8833_v4, 4  ;;  %v8838_v17 = vrot.slane %v8836_v10, 5  ;;  %v20143_v26 = vcombine.low %v18004_v46, %v17982_v51  ;;  %v8852_v30 = vshll.u32 %v18153_v23, 16 }
 0x313   : > { %20142 = vst [vmem:[#allocation37_spill] sm:$0xff] %v18167_v63  ;;  %v8844_v58 = vrot.slane %v8842_v38, 5  ;;  %v8848_v20 = vrot.slane %v8846_v62, 4  ;;  %v8857_v3 = vshrl.u32 %v8682_v18, 16  ;;  %v8860_v32 = vshll.u32 %v8682_v18, 16 }
 0x314   : > { %13677 = vmatmul.mubr.bf16.gmra.mxu1 %v14165_v7  ;;  %v8839_v16 = vor.u32 %v8838_v17, %v8835_v36  ;;  %v8866_v55 = vshll.u32 %v18161_v14, 16  ;;  %v8870_v22 = vshrl.u32 %v18161_v14, 16  ;;  %v18184_v46 = vsel %vm14845_vm14, %v9500_v35, %v9501_v8  ;;  %v9421_v36 = vld [vmem:[#allocation3 + $0x30] sm:$0xe] }
 0x315   : > { %13637 = vmatmul.mubr.bf16.gmra.mxu0 %v20143_v26  ;;  %13680 = vmatprep.mubr.bf16.mxu1 %v14167_v25  ;;  %v8849_v24 = vor.u32 %v8848_v20, %v8844_v58  ;;  %v8859_v4 = vrot.slane %v8857_v3, 4  ;;  %v8862_v10 = vrot.slane %v8860_v32, 5  ;;  %v8854_v25 = vrot.slane %v8852_v30, 5  ;;  %v18190_v26 = vpop.f32.mrf.mxu1  ;;  %v9422_v3 = vld [vmem:[#allocation3 + $0x3c] sm:$0xe]  ;;  %v14170_v32 = vld [vmem:[#allocation3 + $0xa8] sm:$0xff]  }
 0x316   : > { %13704 = vmatprep.mubr.bf16.mxu0 %v18040_v33  ;;  %v18186_v7 = vrot.slane %v8866_v55, 5  ;;  %v8872_v38 = vrot.slane %v8870_v22, 4  ;;  %v8876_v33 = vshll.u32 %v18173_v52, 16  ;;  %v8840_v18 = vrot.slane %v8839_v16, 4  ;;  %v14172_v55 = vld [vmem:[#allocation3 + $0xb4] sm:$0xff]  }
 0x317   : > { %v8850_v62 = vrot.slane %v8849_v24, 4  ;;  %v9505_v17 = vrot.slane %v18023_v40, 5  ;;  %v18192_v51 = vcombine.low %v8821_v34, %v8831_v57  ;;  %v18196_v8 = vsel %vm14845_vm14, %v12335_v49, %v9498_v13  ;;  %v8685_v57 = vld [vmem:[#allocation3 + $0x60] sm:$0xf]  ;;  %v14178_v13 = vld [vmem:[%s19802_s2 + $0x1b0] sm:$0xff]   ;;  %v18223_v49 = vpop.f32.mrf.mxu0 }
 0x318   : > { %v8863_v35 = vor.u32 %v8862_v10, %v8859_v4  ;;  %v8873_v20 = vor.u32 %v8872_v38, %v18186_v7  ;;  %v18201_v16 = vadd.f32 %v17760_v5, %v18107_v2  ;;  %v9512_v34 = vrot.slane %v18054_v54, 5 }
 0x319   : > { %v8855_v40 = vsel %vm14380_vm8, %v8850_v62, %v8854_v25  ;;  %v9507_v30 = vrot.slane %v9505_v17, 4  ;;  %v18213_v22 = vadd.f32 %v17773_v60, %v18107_v2  ;;  %v8878_v5 = vrot.slane %v8876_v33, 5  ;;  %v18219_v62 = vld [vmem:[#allocation3 + $0x64] sm:$0xf]  ;;  %v18221_v25 = vpop.f32.mrf.mxu1 }
 0x31a   : > { %20144 = vst [vmem:[#allocation32_spill] sm:$0xff] %v18201_v16  ;;  %v12336_v24 = vrot.slane %v9421_v36, 9  ;;  %v8845_v54 = vsel %vm14380_vm8, %v8840_v18, %v8844_v58  ;;  %v8874_v4 = vrot.slane %v8873_v20, 4  ;;  %v9508_v10 = vrot.slane %v18038_v48, 5  ;;  %v18232_v58 = vld [vmem:[#allocation3 + $0x68] sm:$0x1] }
 0x31b   : > { %20145 = vst [vmem:[#allocation16_spill] sm:$0xff] %v18213_v22  ;;  %v12337_v38 = vrot.slane %v9422_v3, 9  ;;  %v18226_v60 = vcombine.low %v8845_v54, %v8855_v40  ;;  %v8864_v33 = vrot.slane %v8863_v35, 4  ;;  %v8881_v48 = vshrl.u32 %v8685_v57, 16  ;;  %v8688_v18 = vld [vmem:[#allocation3 + $0x6c] sm:$0xf]  ;;  %v18258_v54 = vpop.f32.mrf.mxu1 }
 0x31c   : > { %13681 = vmatmul.mubr.bf16.gmra.mxu1 %v14170_v32  ;;  %v18237_v36 = vsel %vm14845_vm14, %v9507_v30, %v9508_v10  ;;  %v9514_v20 = vrot.slane %v9512_v34, 4  ;;  %v9515_v35 = vrot.slane %v18084_v61, 5  ;;  %v18244_v3 = vld [vmem:[#allocation3 + $0x70] sm:$0xf]  ;;  %v8884_v40 = vshll.u32 %v8685_v57, 16  ;;  %v18260_v10 = vpop.f32.mrf.mxu0  ;;  %v14175_v57 = vld [vmem:[#allocation3 + $0xc0] sm:$0xff]  }
 0x31d   : > { %13705 = vmatmul.mubr.bf16.vlgmr.msra.gmra.mxu0 %v18061_v39  ;;  %13684 = vmatprep.mubr.bf16.mxu1 %v14172_v55  ;;  %v18230_v39 = vsel %vm14845_vm14, %v12336_v24, %v9505_v17  ;;  %v14179_v17 = vld [vmem:[%s19802_s2 + $0x1a8] sm:$0xff]   ;;  %v8883_v32 = vrot.slane %v8881_v48, 4  ;;  %v8890_v30 = vshll.u32 %v18219_v62, 16  ;;  %v8894_v61 = vshrl.u32 %v18219_v62, 16  ;;  %20147 = vst [vmem:[#allocation22_spill] sm:$0xff] %v18260_v10  ;;  %v18278_v10 = vpop.f32.mrf.mxu1 }
 0x31e   : > { %13708 = vmatprep.mubr.bf16.mxu0 %v18123_v11  ;;  %13785 = vmatpush3.bf16.msra.mxu0 %v17962_v9  ;;  %v18241_v11 = vsel %vm14845_vm14, %v12337_v38, %v9512_v34  ;;  %v18251_v9 = vadd.f32 %v17792_v29, %v18107_v2  ;;  %v8879_v34 = vsel %vm14380_vm8, %v8874_v4, %v8878_v5  ;;  %v8900_v55 = vshll.u32 %v18232_v58, 16  ;;  %v18266_v16 = vld [vmem:[#allocation3 + $0x74] sm:$0x1]  ;;  %v18280_v37 = vpop.f32.mrf.mxu0 }
 0x31f   : > { %13786 = vmatprep.subr.bf16.mxu0 %v14178_v13  ;;  %v8905_v24 = vshrl.u32 %v8688_v18, 16  ;;  %v8886_v38 = vrot.slane %v8884_v40, 5  ;;  %v8892_v59 = vrot.slane %v8890_v30, 5  ;;  %v8908_v29 = vshll.u32 %v8688_v18, 16  ;;  %v14180_v18 = vld [vmem:[%s19802_s2 + $0x1a0] sm:$0xff]  }
 0x320   : > { %20146 = vst [vmem:[#allocation10_spill] sm:$0xff] %v18251_v9  ;;  %v8914_v48 = vshll.u32 %v18244_v3, 16  ;;  %v8869_v5 = vsel %vm14380_vm8, %v8864_v33, %v18186_v7  ;;  %v8896_v4 = vrot.slane %v8894_v61, 4  ;;  %v8918_v22 = vshrl.u32 %v18244_v3, 16  ;;  %v18376_v40 = vld [vmem:[#allocation3 + $0x8c] sm:$0x1] }
 0x321   : > { %v8907_v9 = vrot.slane %v8905_v24, 4  ;;  %v8887_v30 = vor.u32 %v8886_v38, %v8883_v32  ;;  %v12315_v7 = vcombine.low %v8869_v5, %v8879_v34  ;;  %v9519_v24 = vrot.slane %v18130_v15, 5 }
 0x322   : > { %13787 = vmatpush3.bf16.msra.mxu0 %v14178_v13  ;;  %v8910_v13 = vrot.slane %v8908_v29, 5  ;;  %v18274_v63 = vrot.slane %v8914_v48, 5  ;;  %v8897_v33 = vor.u32 %v8896_v4, %v8892_v59  ;;  %v8920_v61 = vrot.slane %v8918_v22, 4  ;;  %v9423_v29 = vld [vmem:[#allocation3 + $0x48] sm:$0xe] }
 0x323   : > { %13788 = vmatprep.subr.bf16.mxu0 %v14179_v17  ;;  %v20148_v32 = vcombine.low %v18105_v12, %v18075_v42  ;;  %v18288_v38 = vsel %vm14845_vm14, %v9514_v20, %v9515_v35  ;;  %v8924_v22 = vshll.u32 %v18266_v16, 16  ;;  %v8888_v15 = vrot.slane %v8887_v30, 4  ;;  %v9424_v35 = vld [vmem:[#allocation3 + $0x54] sm:$0xe]  ;;  %v8691_v4 = vld [vmem:[#allocation3 + $0x78] sm:$0xf]  ;;  %v18311_v30 = vpop.f32.mrf.mxu1 }
 0x324   : > { %13685 = vmatmul.mubr.bf16.gmra.mxu1 %v14175_v57  ;;  %v8911_v34 = vor.u32 %v8910_v13, %v8907_v9  ;;  %v8898_v48 = vrot.slane %v8897_v33, 4  ;;  %v8921_v57 = vor.u32 %v8920_v61, %v18274_v63  ;;  %v9521_v5 = vrot.slane %v9519_v24, 4  ;;  %v18313_v13 = vpop.f32.mrf.mxu0 }
 0x325   : > { %13709 = vmatmul.mubr.bf16.gmra.mxu0 %v18132_v28  ;;  %13752 = vmatprep.mubr.bf16.mxu1 %v20148_v32  ;;  %v8902_v28 = vrot.slane %v8900_v55, 5  ;;  %v18294_v42 = vadd.f32 %v17809_v53, %v18107_v2  ;;  %v18298_v12 = vadd.f32 %v17827_v41, %v18107_v2  ;;  %v9522_v20 = vrot.slane %v18153_v23, 5  ;;  %20151 = vst [vmem:[#allocation31_spill] sm:$0xff] %v18313_v13 }
 0x326   : > { %13712 = vmatprep.mubr.bf16.mxu0 %v18192_v51  ;;  %13789 = vmatpush3.bf16.msra.mxu0 %v14179_v17  ;;  %v18300_v51 = vrot.slane %v8911_v34, 4  ;;  %v14181_v17 = vld [vmem:[%s19802_s2 + $0x198] sm:$0xff]   ;;  %v12338_v55 = vrot.slane %v9423_v29, 9  ;;  %v9526_v41 = vrot.slane %v18161_v14, 5  ;;  %v18317_v23 = vadd.f32 %v17858_v27, %v18107_v2 }
 0x327   : > { %20149 = vst [vmem:[#allocation24_spill] sm:$0xff] %v18294_v42  ;;  %20150 = vst [vmem:[#allocation28_spill] sm:$0xff] %v18298_v12  ;;  %13790 = vmatprep.subr.bf16.mxu0 %v14180_v18  ;;  %v8903_v53 = vsel %vm14380_vm8, %v8898_v48, %v8902_v28  ;;  %v18319_v33 = vrot.slane %v8921_v57, 4  ;;  %v18321_v61 = vrot.slane %v8924_v22, 5  ;;  %v18325_v32 = vsel %vm14845_vm14, %v9521_v5, %v9522_v20  ;;  %v18327_v28 = vld [vmem:[#allocation3 + $0x7c] sm:$0xf] }
 0x328   : > { %20152 = vst [vmem:[#allocation34_spill] sm:$0xff] %v18317_v23  ;;  %v8893_v14 = vsel %vm14380_vm8, %v8888_v15, %v8892_v59  ;;  %v18333_v34 = vsel %vm14845_vm14, %v12338_v55, %v9519_v24  ;;  %v12339_v27 = vrot.slane %v9424_v35, 9  ;;  %v18336_v48 = vld [vmem:[#allocation3 + $0x80] sm:$0x1]  ;;  %v8917_v57 = vsel %vm14380_vm8, %v18300_v51, %v18274_v63  ;;  %v8694_v59 = vld [vmem:[#allocation3 + $0x84] sm:$0xf] }
 0x329   : > { %v12316_v22 = vcombine.low %v8893_v14, %v8903_v53  ;;  %v8929_v5 = vshrl.u32 %v8691_v4, 16  ;;  %v8932_v20 = vshll.u32 %v8691_v4, 16  ;;  %v14182_v24 = vld [vmem:[%s19802_s2 + $0x190] sm:$0xff]   ;;  %v20153_v15 = vcombine.low %v18140_v21, %v18151_v45  ;;  %v18360_v55 = vld [vmem:[#allocation3 + $0x88] sm:$0xf]  ;;  %v18362_v4 = vpop.f32.mrf.mxu1  ;;  %v18364_v14 = vpop.f32.mrf.mxu0 }
 0x32a   : > { %13791 = vmatpush3.bf16.msra.mxu0 %v14180_v18  ;;  %v14184_v18 = vld [vmem:[%s19802_s2 + $0x1f0] sm:$0xff]   ;;  %v18356_v51 = vsel %vm14845_vm14, %v12339_v27, %v9526_v41  ;;  %v8938_v35 = vshll.u32 %v18327_v28, 16  ;;  %v8942_v53 = vshrl.u32 %v18327_v28, 16  ;;  %v20154_v21 = vcombine.low %v18196_v8, %v18184_v46 }
 0x32b   : > { %13792 = vmatprep.subr.bf16.mxu0 %v14181_v17  ;;  %v8927_v45 = vsel %vm14380_vm8, %v18319_v33, %v18321_v61  ;;  %v8931_v27 = vrot.slane %v8929_v5, 4  ;;  %v8948_v29 = vshll.u32 %v18336_v48, 16  ;;  %v8953_v12 = vshrl.u32 %v8694_v59, 16  ;;  %v14186_v61 = vld [vmem:[%s19802_s2 + $0x1e8] sm:$0xff]  }
 0x32c   : > { %13753 = vmatmul.mubr.bf16.vlgmr.msra.gmra.mxu1 %v20153_v15  ;;  %v8934_v15 = vrot.slane %v8932_v20, 5  ;;  %v18373_v63 = vrot.slane %v8938_v35, 5  ;;  %v8944_v9 = vrot.slane %v8942_v53, 4  ;;  %v8956_v8 = vshll.u32 %v8694_v59, 16  ;;  %v18396_v59 = vpop.f32.mrf.mxu1  ;;  %v18398_v35 = vpop.f32.mrf.mxu0 }
 0x32d   : > { %13713 = vmatmul.mubr.bf16.gmra.mxu0 %v18226_v60  ;;  %13756 = vmatprep.mubr.bf16.mxu1 %v20154_v21  ;;  %v9528_v60 = vrot.slane %v9526_v41, 4  ;;  %v8966_v33 = vshrl.u32 %v18360_v55, 16  ;;  %v14185_v41 = vld [vmem:[%s19802_s2 + $0x188] sm:$0xff]   ;;  %v8955_v20 = vrot.slane %v8953_v12, 4  ;;  %v9533_v42 = vrot.slane %v18219_v62, 5 }
 0x32e   : > { %13716 = vmatprep.mubr.bf16.mxu0 %v12315_v7  ;;  %13793 = vmatpush3.bf16.msra.mxu0 %v14181_v17  ;;  %v8935_v46 = vor.u32 %v8934_v15, %v8931_v27  ;;  %v8962_v7 = vshll.u32 %v18360_v55, 16  ;;  %v18389_v17 = vadd.f32 %v17899_v1, %v18107_v2  ;;  %v8945_v5 = vor.u32 %v8944_v9, %v18373_v63 }
 0x32f   : > { %13833 = vmatpush3.bf16.msra.mxu1 %v18082_v50  ;;  %13794 = vmatprep.subr.bf16.mxu0 %v14182_v24  ;;  %v18393_v50 = vadd.f32 %v17938_v56, %v18107_v2  ;;  %v8958_v53 = vrot.slane %v8956_v8, 5  ;;  %v8968_v27 = vrot.slane %v8966_v33, 4  ;;  %v8972_v15 = vshll.u32 %v18376_v40, 16  ;;  %v14187_v8 = vld [vmem:[%s19802_s2 + $0x1e0] sm:$0xff]   ;;  %v8697_v33 = vld [vmem:[#allocation3 + $0x90] sm:$0xf] }
 0x330   : > { %13834 = vmatprep.subr.bf16.mxu1 %v14184_v18  ;;  %20155 = vst [vmem:[#allocation11_spill] sm:$0xff] %v18389_v17  ;;  %v8964_v21 = vrot.slane %v8962_v7, 5  ;;  %v8936_v23 = vrot.slane %v8935_v46, 4  ;;  %v8946_v13 = vrot.slane %v8945_v5, 4  ;;  %v8950_v1 = vrot.slane %v8948_v29, 5  ;;  %v18420_v7 = vpop.f32.mrf.mxu1 }
 0x331   : > { %20156 = vst [vmem:[#allocation12_spill] sm:$0xff] %v18393_v50  ;;  %v9425_v17 = vld [vmem:[#allocation3 + $0x60] sm:$0xe]  ;;  %v12317_v56 = vcombine.low %v8917_v57, %v8927_v45  ;;  %v8959_v9 = vor.u32 %v8958_v53, %v8955_v20  ;;  %v9426_v50 = vld [vmem:[#allocation3 + $0x6c] sm:$0xe]  ;;  %v20157_v46 = vcombine.low %v18230_v39, %v18237_v36  ;;  %v20158_v29 = vrot.slane %v18173_v52, 5  ;;  %v18422_v39 = vpop.f32.mrf.mxu0 }
 0x332   : > { %13795 = vmatpush3.bf16.msra.mxu0 %v14182_v24  ;;  %v8969_v12 = vor.u32 %v8968_v27, %v8964_v21  ;;  %v8951_v57 = vsel %vm14380_vm8, %v8946_v13, %v8950_v1  ;;  %v9535_v24 = vrot.slane %v9533_v42, 4  ;;  %v14188_v45 = vld [vmem:[%s19802_s2 + $0x180] sm:$0xff]   ;;  %v20159_v52 = vcombine.low %v18241_v11, %v18288_v38  ;;  %v18435_v27 = vld [vmem:[#allocation3 + $0x94] sm:$0xf]  ;;  %v18437_v11 = vld [vmem:[#allocation3 + $0x98] sm:$0x1] }
 0x333   : > { %13835 = vmatpush3.bf16.msra.mxu1 %v14184_v18  ;;  %13796 = vmatprep.subr.bf16.mxu0 %v14185_v41  ;;  %v18412_v62 = vsel %vm14845_vm14, %v9528_v60, %v20158_v29  ;;  %v9540_v18 = vrot.slane %v18244_v3, 5  ;;  %v8960_v36 = vrot.slane %v8959_v9, 4  ;;  %v8974_v60 = vrot.slane %v8972_v15, 5  ;;  %v18466_v1 = vpop.f32.mrf.mxu0  ;;  %v18472_v29 = vld [vmem:[#allocation3 + $0xa0] sm:$0xf] }
 0x334   : > { %13836 = vmatprep.subr.bf16.mxu1 %v14186_v61  ;;  %13757 = vmatmul.mubr.bf16.gmra.mxu1 %v20157_v46  ;;  %v12340_v13 = vrot.slane %v9425_v17, 9  ;;  %v18429_v3 = vadd.f32 %v17971_v0, %v18107_v2  ;;  %v8941_v5 = vsel %vm14380_vm8, %v8936_v23, %v18373_v63  ;;  %v9536_v20 = vrot.slane %v18232_v58, 5  ;;  %v8700_v23 = vld [vmem:[#allocation3 + $0x9c] sm:$0xf]  ;;  %v14190_v58 = vld [vmem:[%s19802_s2 + $0x1d8] sm:$0xff]  }
 0x335   : > { %13717 = vmatmul.mubr.bf16.gmra.mxu0 %v12316_v22  ;;  %13760 = vmatprep.mubr.bf16.mxu1 %v20159_v52  ;;  %v8970_v22 = vrot.slane %v8969_v12, 4  ;;  %v12341_v53 = vrot.slane %v9426_v50, 9  ;;  %v12371_v38 = vcombine.low %v18356_v51, %v18412_v62  ;;  %v12318_v17 = vcombine.low %v8941_v5, %v8951_v57  ;;  %v18453_v63 = vld [vmem:[%s19802_s2 + $0x238] sm:$0xff]   ;;  %v18464_v50 = vpop.f32.mrf.mxu1 }
 0x336   : > { %13720 = vmatprep.mubr.bf16.mxu0 %v12317_v56  ;;  %20160 = vst [vmem:[#allocation36_spill] sm:$0xff] %v18429_v3  ;;  %13797 = vmatpush3.bf16.msra.mxu0 %v14185_v41  ;;  %v18445_v15 = vsel %vm14845_vm14, %v12340_v13, %v9533_v42  ;;  %v18457_v51 = vsel %vm14845_vm14, %v9535_v24, %v9536_v20  ;;  %v9543_v42 = vrot.slane %v18266_v16, 5  ;;  %20161 = vst [vmem:[#allocation19_spill] sm:$0xff] %v18464_v50  ;;  %v18475_v24 = vld [vmem:[#allocation3 + $0xa4] sm:$0x1] }
 0x337   : > { %13837 = vmatpush3.bf16.msra.mxu1 %v14186_v61  ;;  %v8975_v0 = vsel %vm14380_vm8, %v8970_v22, %v8974_v60  ;;  %v18461_v41 = vsel %vm14845_vm14, %v12341_v53, %v9540_v18  ;;  %v8977_v61 = vshrl.u32 %v8697_v33, 16  ;;  %13798 = vmatprep.subr.bf16.mxu0 %v14188_v45  ;;  %v8965_v56 = vsel %vm14380_vm8, %v8960_v36, %v8964_v21  ;;  %v14191_v36 = vld [vmem:[%s19802_s2 + $0x1d0] sm:$0xff]   ;;  %v18486_v53 = vpop.f32.mrf.mxu1 }
 0x338   : > { %13838 = vmatprep.subr.bf16.mxu1 %v14187_v8  ;;  %v8980_v9 = vshll.u32 %v8697_v33, 16  ;;  %v8986_v12 = vshll.u32 %v18435_v27, 16  ;;  %v8990_v46 = vshrl.u32 %v18435_v27, 16  ;;  %v12319_v62 = vcombine.low %v8965_v56, %v8975_v0  ;;  %v18488_v0 = vpop.f32.mrf.mxu0 }
 0x339   : > { %v8979_v57 = vrot.slane %v8977_v61, 4  ;;  %v8996_v16 = vshll.u32 %v18437_v11, 16  ;;  %v9001_v52 = vshrl.u32 %v8700_v23, 16  ;;  %v9004_v21 = vshll.u32 %v8700_v23, 16 }
 0x33a   : > { %13799 = vmatpush3.bf16.msra.mxu0 %v14188_v45  ;;  %v8982_v22 = vrot.slane %v8980_v9, 5  ;;  %v8988_v60 = vrot.slane %v8986_v12, 5  ;;  %v8992_v13 = vrot.slane %v8990_v46, 4  ;;  %v20162_v33 = vcombine.low %v18333_v34, %v18325_v32  ;;  %v9427_v34 = vld [vmem:[#allocation3 + $0x78] sm:$0xe] }
 0x33b   : > { %13839 = vmatpush3.bf16.msra.mxu1 %v14187_v8  ;;  %13880 = vmatprep.subr.bf16.mxu0 %v18453_v63  ;;  %v9542_v5 = vrot.slane %v9540_v18, 4  ;;  %v9003_v20 = vrot.slane %v9001_v52, 4  ;;  %v9010_v8 = vshll.u32 %v18472_v29, 16  ;;  %v9014_v45 = vshrl.u32 %v18472_v29, 16 }
 0x33c   : > { %13840 = vmatprep.subr.bf16.mxu1 %v14190_v58  ;;  %13761 = vmatmul.mubr.bf16.gmra.mxu1 %v20162_v33  ;;  %v12372_v23 = vcombine.low %v18445_v15, %v18457_v51  ;;  %v8983_v61 = vor.u32 %v8982_v22, %v8979_v57  ;;  %v8993_v56 = vor.u32 %v8992_v13, %v8988_v60  ;;  %v9006_v32 = vrot.slane %v9004_v21, 5  ;;  %v18499_v22 = vpop.f32.mrf.mxu1  ;;  %v18501_v13 = vpop.f32.mrf.mxu0 }
 0x33d   : > { %13721 = vmatmul.mubr.bf16.gmra.mxu0 %v12318_v17  ;;  %13764 = vmatprep.mubr.bf16.mxu1 %v12371_v38  ;;  %v9012_v17 = vrot.slane %v9010_v8, 5  ;;  %v9016_v18 = vrot.slane %v9014_v45, 4  ;;  %v9020_v9 = vshll.u32 %v18475_v24, 16  ;;  %v9547_v12 = vrot.slane %v18327_v28, 5  ;;  %v14195_v38 = vld [vmem:[%s19802_s2 + $0x1c8] sm:$0xff]  }
 0x33e   : > { %13724 = vmatprep.mubr.bf16.mxu0 %v12319_v62  ;;  %v8984_v46 = vrot.slane %v8983_v61, 4  ;;  %v8994_v52 = vrot.slane %v8993_v56, 4  ;;  %v8998_v33 = vrot.slane %v8996_v16, 5  ;;  %v9007_v50 = vor.u32 %v9006_v32, %v9003_v20  ;;  %v9428_v20 = vld [vmem:[#allocation3 + $0x84] sm:$0xe]  ;;  %v20163_v56 = vld [vmem:[#allocation20_spill] sm:$0xff] }
 0x33f   : > { %13841 = vmatpush3.bf16.msra.mxu1 %v14190_v58  ;;  %v9544_v15 = vsel %vm14845_vm14, %v9542_v5, %v9543_v42  ;;  %v9017_v51 = vor.u32 %v9016_v18, %v9012_v17  ;;  %v12342_v62 = vrot.slane %v9427_v34, 9  ;;  %v9549_v57 = vrot.slane %v9547_v12, 4  ;;  %v8703_v61 = vld [vmem:[#allocation3 + $0xa8] sm:$0xf] }
 0x340   : > { %13842 = vmatprep.subr.bf16.mxu1 %v14191_v36  ;;  %v8989_v28 = vsel %vm14380_vm8, %v8984_v46, %v8988_v60  ;;  %v8999_v58 = vsel %vm14380_vm8, %v8994_v52, %v8998_v33  ;;  %v9008_v16 = vrot.slane %v9007_v50, 4  ;;  %v9550_v21 = vrot.slane %v18336_v48, 5  ;;  %v18518_v50 = vld [vmem:[#allocation3 + $0xac] sm:$0xf]  ;;  %v18529_v46 = vpop.f32.mrf.mxu1  ;;  %v18531_v52 = vpop.f32.mrf.mxu0 }
 0x341   : > { %v12320_v8 = vcombine.low %v8989_v28, %v8999_v58  ;;  %v9018_v45 = vrot.slane %v9017_v51, 4  ;;  %v9022_v42 = vrot.slane %v9020_v9, 5  ;;  %v9554_v5 = vrot.slane %v18360_v55, 5  ;;  %v14196_v55 = vld [vmem:[%s19802_s2 + $0x1c0] sm:$0xff]   ;;  %20165 = vst [vmem:[#allocation14_spill] sm:$0xff] %v18531_v52 }
 0x342   : > { %v18511_v32 = vadd.f32 %v20163_v56, %v18107_v2  ;;  %v12373_v60 = vcombine.low %v18461_v41, %v9544_v15  ;;  %v9548_v34 = vsel %vm14845_vm14, %v12342_v62, %v9547_v12  ;;  %v9551_v48 = vsel %vm14845_vm14, %v9549_v57, %v9550_v21  ;;  %v18527_v12 = vld [vmem:[#allocation3 + $0xb0] sm:$0x1]  ;;  %v8706_v62 = vld [vmem:[#allocation3 + $0xb4] sm:$0xf]  ;;  %v18540_v21 = vld [vmem:[#allocation3 + $0xb8] sm:$0xf] }
 0x343   : > { %13843 = vmatpush3.bf16.msra.mxu1 %v14191_v36  ;;  %v9013_v36 = vsel %vm14380_vm8, %v9008_v16, %v9012_v17  ;;  %v9023_v41 = vsel %vm14380_vm8, %v9018_v45, %v9022_v42  ;;  %v12343_v18 = vrot.slane %v9428_v20, 9  ;;  %v9556_v9 = vrot.slane %v9554_v5, 4  ;;  %v20166_v17 = vld [vmem:[#allocation26_spill] sm:$0xff]  ;;  %v18546_v42 = vld [vmem:[#allocation3 + $0xbc] sm:$0x1] }
 0x344   : > { %20164 = vst [vmem:[#allocation4_spill] sm:$0xff] %v18511_v32  ;;  %13844 = vmatprep.subr.bf16.mxu1 %v14195_v38  ;;  %13765 = vmatmul.mubr.bf16.gmra.mxu1 %v12372_v23  ;;  %v12321_v33 = vcombine.low %v9013_v36, %v9023_v41  ;;  %v9557_v15 = vrot.slane %v18376_v40, 5  ;;  %v9025_v23 = vshrl.u32 %v8703_v61, 16  ;;  %v9028_v51 = vshll.u32 %v8703_v61, 16 }
 0x345   : > { %13725 = vmatmul.mubr.bf16.gmra.mxu0 %v12320_v8  ;;  %13768 = vmatprep.mubr.bf16.mxu1 %v12373_v60  ;;  %v18536_v57 = vadd.f32 %v20166_v17, %v18107_v2  ;;  %v12374_v28 = vcombine.low %v9548_v34, %v9551_v48  ;;  %v9034_v58 = vshll.u32 %v18518_v50, 16  ;;  %v9038_v16 = vshrl.u32 %v18518_v50, 16  ;;  %v18549_v48 = vpop.f32.mrf.mxu1 }
 0x346   : > { %13728 = vmatprep.mubr.bf16.mxu0 %v12321_v33  ;;  %v9555_v20 = vsel %vm14845_vm14, %v12343_v18, %v9554_v5  ;;  %v9558_v40 = vsel %vm14845_vm14, %v9556_v9, %v9557_v15  ;;  %v9027_v8 = vrot.slane %v9025_v23, 4  ;;  %v9030_v45 = vrot.slane %v9028_v51, 5  ;;  %v9429_v9 = vld [vmem:[#allocation3 + $0x90] sm:$0xe] }
 0x347   : > { %20167 = vst [vmem:[#allocation15_spill] sm:$0xff] %v18536_v57  ;;  %13845 = vmatpush3.bf16.msra.mxu1 %v14195_v38  ;;  %v9036_v61 = vrot.slane %v9034_v58, 5  ;;  %v9040_v56 = vrot.slane %v9038_v16, 4  ;;  %v9044_v60 = vshll.u32 %v18527_v12, 16  ;;  %v9049_v34 = vshrl.u32 %v8706_v62, 16  ;;  %v18551_v38 = vpop.f32.mrf.mxu0  ;;  %v18557_v57 = vpop.f32.mrf.mxu1 }
 0x348   : > { %13846 = vmatprep.subr.bf16.mxu1 %v14196_v55  ;;  %20168 = vst [vmem:[#allocation8_spill] sm:$0xff] %v18551_v38  ;;  %v9031_v36 = vor.u32 %v9030_v45, %v9027_v8  ;;  %v9052_v41 = vshll.u32 %v8706_v62, 16  ;;  %v9058_v5 = vshll.u32 %v18540_v21, 16  ;;  %v9062_v18 = vshrl.u32 %v18540_v21, 16  ;;  %v9430_v45 = vld [vmem:[#allocation3 + $0x9c] sm:$0xe] }
 0x349   : > { %v12375_v33 = vcombine.low %v9555_v20, %v9558_v40  ;;  %v9041_v15 = vor.u32 %v9040_v56, %v9036_v61  ;;  %v9051_v23 = vrot.slane %v9049_v34, 4  ;;  %v9068_v51 = vshll.u32 %v18546_v42, 16  ;;  %v18559_v32 = vpop.f32.mrf.mxu0 }
 0x34a   : > { %v9032_v17 = vrot.slane %v9031_v36, 4  ;;  %v9054_v58 = vrot.slane %v9052_v41, 5  ;;  %v9060_v16 = vrot.slane %v9058_v5, 5  ;;  %v9064_v3 = vrot.slane %v9062_v18, 4 }
 0x34b   : > { %13847 = vmatpush3.bf16.msra.mxu1 %v14196_v55  ;;  %v9042_v52 = vrot.slane %v9041_v15, 4  ;;  %v9046_v38 = vrot.slane %v9044_v60, 5  ;;  %v12344_v8 = vrot.slane %v9429_v9, 9  ;;  %v9561_v62 = vrot.slane %v18435_v27, 5  ;;  %v8709_v9 = vld [vmem:[#allocation3 + $0xc0] sm:$0xf] }
 0x34c   : > { %13769 = vmatmul.mubr.bf16.gmra.mxu1 %v12374_v28  ;;  %v9055_v20 = vor.u32 %v9054_v58, %v9051_v23  ;;  %v9065_v40 = vor.u32 %v9064_v3, %v9060_v16  ;;  %v9070_v56 = vrot.slane %v9068_v51, 5  ;;  %v9564_v55 = vrot.slane %v18437_v11, 5  ;;  %v18574_v23 = vld [vmem:[#allocation3 + $0xc4] sm:$0xf] }
 0x34d   : > { %13772 = vmatprep.mubr.bf16.mxu1 %v12375_v33  ;;  %v9037_v34 = vsel %vm14380_vm8, %v9032_v17, %v9036_v61  ;;  %v9047_v28 = vsel %vm14380_vm8, %v9042_v52, %v9046_v38  ;;  %v9563_v60 = vrot.slane %v9561_v62, 4  ;;  %v9568_v27 = vrot.slane %v18472_v29, 5  ;;  %v20169_v33 = vld [vmem:[#allocation29_spill] sm:$0xff]  ;;  %v18576_v52 = vpop.f32.mrf.mxu1  ;;  %v18578_v29 = vpop.f32.mrf.mxu0 }
 0x34e   : > { %v12322_v36 = vcombine.low %v9037_v34, %v9047_v28  ;;  %v9056_v41 = vrot.slane %v9055_v20, 4  ;;  %v9066_v5 = vrot.slane %v9065_v40, 4  ;;  %v12345_v18 = vrot.slane %v9430_v45, 9 }
 0x34f   : > { %v18569_v3 = vadd.f32 %v20169_v33, %v18107_v2  ;;  %v9565_v11 = vsel %vm14845_vm14, %v9563_v60, %v9564_v55  ;;  %v9570_v15 = vrot.slane %v9568_v27, 4  ;;  %v9571_v61 = vrot.slane %v18475_v24, 5  ;;  %v18588_v24 = vld [vmem:[#allocation3 + $0xc8] sm:$0x1]  ;;  %v9431_v60 = vld [vmem:[#allocation3 + $0xa8] sm:$0xe] }
 0x350   : > { %13729 = vmatmul.mubr.bf16.gmra.mxu0 %v12322_v36  ;;  %v9061_v38 = vsel %vm14380_vm8, %v9056_v41, %v9060_v16  ;;  %v9071_v51 = vsel %vm14380_vm8, %v9066_v5, %v9070_v56  ;;  %v9562_v17 = vsel %vm14845_vm14, %v12344_v8, %v9561_v62  ;;  %v9569_v58 = vsel %vm14845_vm14, %v12345_v18, %v9568_v27  ;;  %v20170_v8 = vld [vmem:[#allocation13_spill] sm:$0xff]  ;;  %v18603_v5 = vpop.f32.mrf.mxu1  ;;  %v18605_v18 = vpop.f32.mrf.mxu0 }
 0x351   : > { %v12323_v45 = vcombine.low %v9061_v38, %v9071_v51  ;;  %v12376_v20 = vcombine.low %v9562_v17, %v9565_v11  ;;  %v9572_v40 = vsel %vm14845_vm14, %v9570_v15, %v9571_v61  ;;  %v9073_v55 = vshrl.u32 %v8709_v9, 16  ;;  %v9432_v61 = vld [vmem:[#allocation3 + $0xb4] sm:$0xe] }
 0x352   : > { %v12377_v34 = vcombine.low %v9569_v58, %v9572_v40  ;;  %v9076_v28 = vshll.u32 %v8709_v9, 16  ;;  %v9082_v16 = vshll.u32 %v18574_v23, 16  ;;  %v9086_v56 = vshrl.u32 %v18574_v23, 16 }
 0x353   : > { %v18596_v62 = vadd.f32 %v20170_v8, %v18107_v2  ;;  %v18600_v27 = vadd.f32 %v18112_v47, %v18107_v2  ;;  %13732 = vmatprep.mubr.bf16.mxu0 %v12323_v45  ;;  %v9075_v36 = vrot.slane %v9073_v55, 4  ;;  %v9092_v41 = vshll.u32 %v18588_v24, 16 }
 0x354   : > { %13773 = vmatmul.mubr.bf16.gmra.mxu1 %v12376_v20  ;;  %v9078_v9 = vrot.slane %v9076_v28, 5  ;;  %v9084_v33 = vrot.slane %v9082_v16, 5  ;;  %v9088_v11 = vrot.slane %v9086_v56, 4  ;;  %v9575_v15 = vrot.slane %v18518_v50, 5  ;;  %v18619_v16 = vpop.f32.mrf.mxu1 }
 0x355   : > { %13776 = vmatprep.mubr.bf16.mxu1 %v12377_v34  ;;  %v18610_v47 = vadd.f32 %v18143_v43, %v18107_v2  ;;  %v18614_v38 = vadd.f32 %v18175_v44, %v18107_v2  ;;  %v12346_v51 = vrot.slane %v9431_v60, 9  ;;  %v9582_v17 = vrot.slane %v18540_v21, 5  ;;  %v18621_v43 = vpop.f32.mrf.mxu0 }
 0x356   : > { %v9079_v58 = vor.u32 %v9078_v9, %v9075_v36  ;;  %v9089_v45 = vor.u32 %v9088_v11, %v9084_v33  ;;  %v9577_v20 = vrot.slane %v9575_v15, 4  ;;  %v9578_v40 = vrot.slane %v18527_v12, 5  ;;  %v18635_v9 = vld [vmem:[#allocation3 + $0x1c] sm:$0xf] }
 0x357   : > { %v9094_v55 = vrot.slane %v9092_v41, 5  ;;  %v12347_v34 = vrot.slane %v9432_v61, 9  ;;  %v9584_v50 = vrot.slane %v9582_v17, 4  ;;  %v9585_v28 = vrot.slane %v18546_v42, 5  ;;  %v10303_v41 = vld [vmem:[#allocation3 + $0x18] sm:$0xf] }
 0x358   : > { %v9080_v56 = vrot.slane %v9079_v58, 4  ;;  %v9090_v44 = vrot.slane %v9089_v45, 4  ;;  %v9576_v60 = vsel %vm14845_vm14, %v12346_v51, %v9575_v15  ;;  %v9579_v21 = vsel %vm14845_vm14, %v9577_v20, %v9578_v40  ;;  %v9433_v45 = vld [vmem:[#allocation3 + $0xc0] sm:$0xe] }
 0x359   : > { %v18629_v12 = vadd.f32 %v18190_v26, %v18107_v2  ;;  %v12378_v8 = vcombine.low %v9576_v60, %v9579_v21  ;;  %v9583_v42 = vsel %vm14845_vm14, %v12347_v34, %v9582_v17  ;;  %v9586_v36 = vsel %vm14845_vm14, %v9584_v50, %v9585_v28  ;;  %v18654_v20 = vpop.f32.mrf.mxu1 }
 0x35a   : > { %v18639_v11 = vadd.f32 %v18221_v25, %v18107_v2  ;;  %v9085_v15 = vsel %vm14380_vm8, %v9080_v56, %v9084_v33  ;;  %v9095_v26 = vsel %vm14380_vm8, %v9090_v44, %v9094_v55  ;;  %v12379_v61 = vcombine.low %v9583_v42, %v9586_v36  ;;  %v18656_v33 = vpop.f32.mrf.mxu0  ;;  %v14189_v55 = vld [vmem:[#allocation3 + $0x18] sm:$0xff]  }
 0x35b   : > { %20171 = vst [vmem:[#allocation7_spill] sm:$0xff] %v18629_v12  ;;  %v18647_v51 = vadd.f32 %v18258_v54, %v18107_v2  ;;  %v18651_v17 = vadd.f32 %v18278_v10, %v18107_v2  ;;  %v12324_v58 = vcombine.low %v9085_v15, %v9095_v26  ;;  %v9589_v25 = vrot.slane %v18574_v23, 5  ;;  %v18662_v54 = vld [vmem:[#allocation3 + $0x20] sm:$0x1]  ;;  %v10306_v15 = vld [vmem:[#allocation3 + $0x24] sm:$0xf] }
 0x35c   : > { %13777 = vmatmul.mubr.bf16.gmra.mxu1 %v12378_v8  ;;  %v18660_v40 = vadd.f32 %v18311_v30, %v18107_v2  ;;  %20173 = vst [vmem:[#allocation5_spill] sm:$0xff] %v18662_v54  ;;  %v10352_v34 = vshrl.u32 %v10303_v41, 16  ;;  %v10355_v10 = vshll.u32 %v10303_v41, 16  ;;  %v10361_v50 = vshll.u32 %v18635_v9, 16  ;;  %v18676_v26 = vld [vmem:[#allocation3 + $0x28] sm:$0xf] }
 0x35d   : > { %13780 = vmatprep.mubr.bf16.mxu1 %v12379_v61  ;;  %13733 = vmatmul.mubr.bf16.gmra.mxu0 %v12324_v58  ;;  %v18667_v23 = vadd.f32 %v18362_v4, %v18107_v2  ;;  %v9591_v28 = vrot.slane %v9589_v25, 4  ;;  %v9592_v56 = vrot.slane %v18588_v24, 5  ;;  %v10365_v44 = vshrl.u32 %v18635_v9, 16  ;;  %20174 = vst [vmem:[#allocation33_spill] sm:$0xff] %v18676_v26  ;;  %v18678_v24 = vpop.f32.mrf.mxu1  ;;  %v18680_v61 = vpop.f32.mrf.mxu0 }
 0x35e   : > { %20172 = vst [vmem:[#allocation18_spill] sm:$0xff] %v18660_v40  ;;  %13800 = vmatprep.mubr.bf16.mxu0 %v14189_v55  ;;  %v12348_v30 = vrot.slane %v9433_v45, 9  ;;  %v10354_v60 = vrot.slane %v10352_v34, 4  ;;  %v10357_v21 = vrot.slane %v10355_v10, 5  ;;  %v10363_v8 = vrot.slane %v10361_v50, 5  ;;  %v14192_v55 = vld [vmem:[#allocation3 + $0x24] sm:$0xff]  }
 0x35f   : > { %v6996_v42 = vadd.f32 %v18223_v49, %v18136_v31  ;;  %v9593_v36 = vsel %vm14845_vm14, %v9591_v28, %v9592_v56  ;;  %v10367_v41 = vrot.slane %v10365_v44, 4  ;;  %v10371_v4 = vshll.u32 %v18662_v54, 16  ;;  %v14194_v56 = vld [vmem:[#allocation3 + $0x30] sm:$0xff]  }
 0x360   : > { %v18684_v58 = vadd.f32 %v18396_v59, %v18107_v2  ;;  %v18688_v31 = vadd.f32 %v18420_v7, %v18107_v2  ;;  %v9590_v49 = vsel %vm14845_vm14, %v12348_v30, %v9589_v25  ;;  %v10358_v45 = vor.u32 %v10357_v21, %v10354_v60  ;;  %v18699_v59 = vld [vmem:[#allocation3 + $0x2c] sm:$0x1]  ;;  %v10309_v25 = vld [vmem:[#allocation3 + $0x30] sm:$0xf]  ;;  %v20178_v30 = vld [vmem:[#allocation17_spill] sm:$0xff] }
 0x361   : > { %v18694_v34 = vadd.f32 %v18486_v53, %v18107_v2  ;;  %v12380_v10 = vcombine.low %v9590_v49, %v9593_v36  ;;  %v10368_v50 = vor.u32 %v10367_v41, %v10363_v8  ;;  %v18697_v28 = vadd.f32 %v18557_v57, %v6996_v42  ;;  %20177 = vst [vmem:[#allocation30_spill] sm:$0xff] %v18699_v59  ;;  %v20179_v60 = vld [vmem:[#allocation22_spill] sm:$0xff]  ;;  %v14198_v57 = vld [vmem:[%s19802_s2 + $0x230] sm:$0xff]   ;;  %v18710_v41 = vld [vmem:[#allocation3 + $0x34] sm:$0xf]  ;;  %v18712_v49 = vpop.f32.mrf.mxu1 }
 0x362   : > { %v10359_v44 = vrot.slane %v10358_v45, 4  ;;  %v10376_v7 = vshrl.u32 %v10306_v15, 16  ;;  %v10379_v40 = vshll.u32 %v10306_v15, 16  ;;  %v10385_v12 = vshll.u32 %v18676_v26, 16  ;;  %20180 = vst [vmem:[#allocation25_spill] sm:$0xff] %v18710_v41  ;;  %v18714_v15 = vpop.f32.mrf.mxu0 }
 0x363   : > { %20175 = vst [vmem:[#allocation21_spill] sm:$0xff] %v18694_v34  ;;  %20176 = vst [vmem:[#allocation23_spill] sm:$0xff] %v18697_v28  ;;  %v18704_v21 = vadd.f32 %v20179_v60, %v20178_v30  ;;  %v10369_v53 = vrot.slane %v10368_v50, 4  ;;  %v10373_v36 = vrot.slane %v10371_v4, 5  ;;  %v10389_v42 = vshrl.u32 %v18676_v26, 16 }
 0x364   : > { %13781 = vmatmul.mubr.bf16.gmra.mxu1 %v12380_v10  ;;  %v10378_v45 = vrot.slane %v10376_v7, 4  ;;  %v10381_v10 = vrot.slane %v10379_v40, 5  ;;  %v10387_v28 = vrot.slane %v10385_v12, 5  ;;  %v10395_v30 = vshll.u32 %v18699_v59, 16  ;;  %v18717_v60 = vld [vmem:[#allocation3 + $0x38] sm:$0x1] }
 0x365   : > { %20181 = vst [vmem:[#allocation27_spill] sm:$0xff] %v18717_v60  ;;  %13801 = vmatmul.mubr.bf16.vlgmr.msra.gmra.mxu0 %v14192_v55  ;;  %v10364_v4 = vsel %vm14380_vm8, %v10359_v44, %v10363_v8  ;;  %v10374_v50 = vsel %vm14380_vm8, %v10369_v53, %v10373_v36  ;;  %v10391_v26 = vrot.slane %v10389_v42, 4  ;;  %v10400_v34 = vshrl.u32 %v10309_v25, 16  ;;  %v14201_v44 = vld [vmem:[%s19802_s2 + $0x228] sm:$0xff]   ;;  %v18730_v53 = vpop.f32.mrf.mxu1  ;;  %v20184_v36 = vld [vmem:[#allocation37_spill] sm:$0xff] }
 0x366   : > { %13804 = vmatprep.mubr.bf16.mxu0 %v14194_v56  ;;  %13881 = vmatpush3.bf16.msra.mxu0 %v18453_v63  ;;  %v12445_v6 = vcombine.low %v10364_v4, %v10374_v50  ;;  %v10382_v7 = vor.u32 %v10381_v10, %v10378_v45  ;;  %v10403_v40 = vshll.u32 %v10309_v25, 16  ;;  %v10409_v12 = vshll.u32 %v18710_v41, 16  ;;  %v18732_v56 = vpop.f32.mrf.mxu0  ;;  %v10312_v50 = vld [vmem:[#allocation3 + $0x3c] sm:$0xf] }
 0x367   : > { %13882 = vmatprep.subr.bf16.mxu0 %v14198_v57  ;;  %v10392_v59 = vor.u32 %v10391_v26, %v10387_v28  ;;  %v10402_v54 = vrot.slane %v10400_v34, 4  ;;  %v10413_v55 = vshrl.u32 %v18710_v41, 16  ;;  %v10419_v8 = vshll.u32 %v18717_v60, 16  ;;  %20182 = vst [vmem:[#allocation6_spill] sm:$0xff] %v18732_v56 }
 0x368   : > { %13848 = vmatprep.mubr.bf16.mxu1 %v12445_v6  ;;  %v18736_v63 = vadd.f32 %v18499_v22, %v18107_v2  ;;  %v10383_v25 = vrot.slane %v10382_v7, 4  ;;  %v10405_v26 = vrot.slane %v10403_v40, 5  ;;  %v10411_v34 = vrot.slane %v10409_v12, 5  ;;  %v20186_v6 = vld [vmem:[#allocation16_spill] sm:$0xff]  ;;  %v20187_v22 = vld [vmem:[#allocation10_spill] sm:$0xff] }
 0x369   : > { %v18740_v42 = vadd.f32 %v18280_v37, %v20184_v36  ;;  %v10393_v45 = vrot.slane %v10392_v59, 4  ;;  %v10397_v10 = vrot.slane %v10395_v30, 5  ;;  %v10415_v4 = vrot.slane %v10413_v55, 4  ;;  %v18750_v12 = vld [vmem:[#allocation3 + $0x40] sm:$0xf] }
 0x36a   : > { %20183 = vst [vmem:[#allocation38_spill] sm:$0xff] %v18736_v63  ;;  %v18744_v60 = vadd.f32 %v18529_v46, %v18107_v2  ;;  %v7000_v56 = vadd.f32 %v18364_v14, %v20186_v6  ;;  %13883 = vmatpush3.bf16.msra.mxu0 %v14198_v57  ;;  %v6998_v7 = vadd.f32 %v18398_v35, %v20187_v22  ;;  %20188 = vst [vmem:[#allocation26_spill] sm:$0xff] %v18750_v12  ;;  %v14197_v37 = vld [vmem:[#allocation3 + $0x3c] sm:$0xff]   ;;  %v18756_v36 = vld [vmem:[#allocation3 + $0x44] sm:$0x1]  ;;  %v18760_v57 = vpop.f32.mrf.mxu0 }
 0x36b   : > { %v10406_v40 = vor.u32 %v10405_v26, %v10402_v54  ;;  %v10388_v59 = vsel %vm14380_vm8, %v10383_v25, %v10387_v28  ;;  %v10398_v30 = vsel %vm14380_vm8, %v10393_v45, %v10397_v10  ;;  %v10416_v55 = vor.u32 %v10415_v4, %v10411_v34  ;;  %13884 = vmatprep.subr.bf16.mxu0 %v14201_v44  ;;  %v14199_v35 = vld [vmem:[#allocation3 + $0x48] sm:$0xff]  }
 0x36c   : > { %20185 = vst [vmem:[#allocation20_spill] sm:$0xff] %v18744_v60  ;;  %v10421_v46 = vrot.slane %v10419_v8, 5  ;;  %20189 = vst [vmem:[#allocation29_spill] sm:$0xff] %v18756_v36  ;;  %v18758_v14 = vpop.f32.mrf.mxu1  ;;  %v12446_v54 = vcombine.low %v10388_v59, %v10398_v30  ;;  %v18763_v6 = vadd.f32 %v18654_v20, %v7000_v56  ;;  %v10424_v22 = vshrl.u32 %v10312_v50, 16  ;;  %v14204_v28 = vld [vmem:[%s19802_s2 + $0x220] sm:$0xff]   ;;  %v20191_v20 = vld [vmem:[#allocation24_spill] sm:$0xff] }
 0x36d   : > { %v10407_v26 = vrot.slane %v10406_v40, 4  ;;  %13805 = vmatmul.mubr.bf16.gmra.mxu0 %v14197_v37  ;;  %v10417_v8 = vrot.slane %v10416_v55, 4  ;;  %v10427_v25 = vshll.u32 %v10312_v50, 16  ;;  %v10433_v45 = vshll.u32 %v18750_v12, 16  ;;  %v10315_v4 = vld [vmem:[#allocation3 + $0x48] sm:$0xf] }
 0x36e   : > { %20190 = vst [vmem:[#allocation13_spill] sm:$0xff] %v18763_v6  ;;  %v10437_v10 = vshrl.u32 %v18750_v12, 16  ;;  %13808 = vmatprep.mubr.bf16.mxu0 %v14199_v35  ;;  %13849 = vmatmul.mubr.bf16.vlgmr.msra.gmra.mxu1 %v12446_v54  ;;  %v7001_v56 = vadd.f32 %v18422_v39, %v20191_v20  ;;  %v10426_v59 = vrot.slane %v10424_v22, 4  ;;  %v10443_v30 = vshll.u32 %v18756_v36, 16  ;;  %v18775_v6 = vld [vmem:[#allocation3 + $0x4c] sm:$0xf]  ;;  %v18777_v37 = vpop.f32.mrf.mxu1 }
 0x36f   : > { %v10412_v40 = vsel %vm14380_vm8, %v10407_v26, %v10411_v34  ;;  %20192 = vst [vmem:[#allocation17_spill] sm:$0xff] %v18775_v6  ;;  %v10422_v50 = vsel %vm14380_vm8, %v10417_v8, %v10421_v46  ;;  %v10429_v55 = vrot.slane %v10427_v25, 5  ;;  %v10435_v12 = vrot.slane %v10433_v45, 5  ;;  %13885 = vmatpush3.bf16.msra.mxu0 %v14201_v44  ;;  %v18781_v54 = vld [vmem:[#allocation3 + $0x50] sm:$0x1]  ;;  %v18783_v34 = vpop.f32.mrf.mxu0  ;;  %v14207_v36 = vld [vmem:[%s19802_s2 + $0x218] sm:$0xff]  }
 0x370   : > { %v10439_v35 = vrot.slane %v10437_v10, 4  ;;  %20193 = vst [vmem:[#allocation22_spill] sm:$0xff] %v18781_v54  ;;  %v12447_v26 = vcombine.low %v10412_v40, %v10422_v50  ;;  %v10445_v39 = vrot.slane %v10443_v30, 5  ;;  %v10448_v22 = vshrl.u32 %v10315_v4, 16  ;;  %13886 = vmatprep.subr.bf16.mxu0 %v14204_v28  ;;  %v14200_v40 = vld [vmem:[#allocation3 + $0x54] sm:$0xff]  }
 0x371   : > { %v10451_v20 = vshll.u32 %v10315_v4, 16  ;;  %v10430_v41 = vor.u32 %v10429_v55, %v10426_v59  ;;  %v10457_v46 = vshll.u32 %v18775_v6, 16  ;;  %v10461_v8 = vshrl.u32 %v18775_v6, 16  ;;  %v18794_v4 = vpop.f32.mrf.mxu1  ;;  %v18796_v55 = vpop.f32.mrf.mxu0  ;;  %v20195_v6 = vld [vmem:[#allocation31_spill] sm:$0xff] }
 0x372   : > { %v10440_v60 = vor.u32 %v10439_v35, %v10435_v12  ;;  %13852 = vmatprep.mubr.bf16.mxu1 %v12447_v26  ;;  %v10450_v44 = vrot.slane %v10448_v22, 4  ;;  %v10467_v45 = vshll.u32 %v18781_v54, 16  ;;  %v18792_v10 = vadd.f32 %v18678_v24, %v6998_v7  ;;  %v20194_v35 = vld [vmem:[#allocation32_spill] sm:$0xff]  ;;  %v14202_v24 = vld [vmem:[#allocation3 + $0x60] sm:$0xff]  }
 0x373   : > { %v10453_v25 = vrot.slane %v10451_v20, 5  ;;  %v10431_v30 = vrot.slane %v10430_v41, 4  ;;  %v10459_v63 = vrot.slane %v10457_v46, 5  ;;  %v10463_v59 = vrot.slane %v10461_v8, 4  ;;  %13887 = vmatpush3.bf16.msra.mxu0 %v14204_v28  ;;  %v10318_v41 = vld [vmem:[#allocation3 + $0x54] sm:$0xf] }
 0x374   : > { %v10441_v50 = vrot.slane %v10440_v60, 4  ;;  %v18800_v26 = vadd.f32 %v20195_v6, %v20194_v35  ;;  %v18804_v22 = vadd.f32 %v18549_v48, %v18107_v2  ;;  %v18807_v20 = vadd.f32 %v18712_v49, %v7001_v56  ;;  %13888 = vmatprep.subr.bf16.mxu0 %v14207_v36  ;;  %v14210_v60 = vld [vmem:[%s19802_s2 + $0x210] sm:$0xff]   ;;  %v20196_v28 = vld [vmem:[#allocation34_spill] sm:$0xff]  ;;  %v10321_v2 = vld [vmem:[#allocation3 + $0x60] sm:$0xf] }
 0x375   : > { %v10454_v7 = vor.u32 %v10453_v25, %v10450_v44  ;;  %v7004_v46 = vadd.f32 %v18488_v0, %v20196_v28  ;;  %13809 = vmatmul.mubr.bf16.gmra.mxu0 %v14200_v40  ;;  %v10436_v6 = vsel %vm14380_vm8, %v10431_v30, %v10435_v12  ;;  %v10464_v8 = vor.u32 %v10463_v59, %v10459_v63  ;;  %v18818_v44 = vld [vmem:[#allocation3 + $0x58] sm:$0xf]  ;;  %v18824_v0 = vpop.f32.mrf.mxu1  ;;  %v18829_v30 = vld [vmem:[#allocation3 + $0x5c] sm:$0x1]  ;;  %v18831_v59 = vpop.f32.mrf.mxu0 }
 0x376   : > { %v10446_v48 = vsel %vm14380_vm8, %v10441_v50, %v10445_v39  ;;  %20197 = vst [vmem:[#allocation37_spill] sm:$0xff] %v18818_v44  ;;  %v18822_v49 = vadd.f32 %v18576_v52, %v18704_v21  ;;  %13812 = vmatprep.mubr.bf16.mxu0 %v14202_v24  ;;  %v10469_v35 = vrot.slane %v10467_v45, 5  ;;  %v10472_v39 = vshrl.u32 %v10318_v41, 16  ;;  %20199 = vst [vmem:[#allocation10_spill] sm:$0xff] %v18831_v59  ;;  %v20200_v21 = vld [vmem:[#allocation11_spill] sm:$0xff] }
 0x377   : > { %v12448_v56 = vcombine.low %v10436_v6, %v10446_v48  ;;  %v10455_v25 = vrot.slane %v10454_v7, 4  ;;  %v10465_v40 = vrot.slane %v10464_v8, 4  ;;  %v18827_v12 = vadd.f32 %v18758_v14, %v7004_v46  ;;  %13889 = vmatpush3.bf16.msra.mxu0 %v14207_v36  ;;  %v18841_v7 = vld [vmem:[#allocation3 + $0x64] sm:$0xf]  ;;  %v14213_v36 = vld [vmem:[%s19802_s2 + $0x208] sm:$0xff]  }
 0x378   : > { %v10475_v50 = vshll.u32 %v10318_v41, 16  ;;  %v18835_v52 = vadd.f32 %v18603_v5, %v18740_v42  ;;  %v7002_v45 = vadd.f32 %v18501_v13, %v20200_v21  ;;  %v10481_v24 = vshll.u32 %v18818_v44, 16  ;;  %13890 = vmatprep.subr.bf16.mxu0 %v14210_v60  ;;  %v18850_v13 = vld [vmem:[#allocation3 + $0x68] sm:$0x1]  ;;  %v14203_v21 = vld [vmem:[#allocation3 + $0x6c] sm:$0xff]  }
 0x379   : > { %20198 = vst [vmem:[#allocation16_spill] sm:$0xff] %v18827_v12  ;;  %13853 = vmatmul.mubr.bf16.gmra.mxu1 %v12448_v56  ;;  %v10485_v14 = vshrl.u32 %v18818_v44, 16  ;;  %v10460_v41 = vsel %vm14380_vm8, %v10455_v25, %v10459_v63  ;;  %v10470_v5 = vsel %vm14380_vm8, %v10465_v40, %v10469_v35  ;;  %v10474_v42 = vrot.slane %v10472_v39, 4  ;;  %20201 = vst [vmem:[#allocation24_spill] sm:$0xff] %v18850_v13  ;;  %v18854_v63 = vpop.f32.mrf.mxu0  ;;  %v14205_v25 = vld [vmem:[#allocation3 + $0x78] sm:$0xff]  }
 0x37a   : > { %v10477_v28 = vrot.slane %v10475_v50, 5  ;;  %v12449_v46 = vcombine.low %v10460_v41, %v10470_v5  ;;  %v10483_v6 = vrot.slane %v10481_v24, 5  ;;  %v10491_v8 = vshll.u32 %v18829_v30, 16 }
 0x37b   : > { %v10487_v48 = vrot.slane %v10485_v14, 4  ;;  %v10496_v44 = vshrl.u32 %v10321_v2, 16  ;;  %v10499_v12 = vshll.u32 %v10321_v2, 16  ;;  %v10505_v54 = vshll.u32 %v18841_v7, 16  ;;  %13891 = vmatpush3.bf16.msra.mxu0 %v14210_v60  ;;  %v14216_v2 = vld [vmem:[%s19802_s2 + $0x200] sm:$0xff]  }
 0x37c   : > { %v13574_v56 = vpop.f32.mrf.mxu1  ;;  %v10478_v59 = vor.u32 %v10477_v28, %v10474_v42  ;;  %13856 = vmatprep.mubr.bf16.mxu1 %v12449_v46  ;;  %v10509_v40 = vshrl.u32 %v18841_v7, 16  ;;  %v10515_v39 = vshll.u32 %v18850_v13, 16  ;;  %v18859_v50 = vadd.f32 %v18777_v37, %v7002_v45  ;;  %13892 = vmatprep.subr.bf16.mxu0 %v14213_v36  ;;  %v20203_v42 = vld [vmem:[#allocation28_spill] sm:$0xff] }
 0x37d   : > { %v10488_v35 = vor.u32 %v10487_v48, %v10483_v6  ;;  %13813 = vmatmul.mubr.bf16.gmra.mxu0 %v14203_v21  ;;  %v10498_v14 = vrot.slane %v10496_v44, 4  ;;  %v10501_v41 = vrot.slane %v10499_v12, 5  ;;  %v10507_v5 = vrot.slane %v10505_v54, 5  ;;  %v10324_v48 = vld [vmem:[#allocation3 + $0x6c] sm:$0xf]  ;;  %v20204_v21 = vld [vmem:[#allocation4_spill] sm:$0xff] }
 0x37e   : > { %20202 = vst [vmem:[#allocation32_spill] sm:$0xff] %v18859_v50  ;;  %v18861_v24 = vpop.f32.mrf.mxu1  ;;  %v10479_v60 = vrot.slane %v10478_v59, 4  ;;  %v18868_v28 = vadd.f32 %v18466_v1, %v20203_v42  ;;  %13816 = vmatprep.mubr.bf16.mxu0 %v14205_v25  ;;  %v10493_v37 = vrot.slane %v10491_v8, 5  ;;  %v10511_v45 = vrot.slane %v10509_v40, 4  ;;  %v20205_v12 = vld [vmem:[#allocation15_spill] sm:$0xff]  ;;  %v18882_v25 = vpop.f32.mrf.mxu0 }
 0x37f   : > { %v10489_v46 = vrot.slane %v10488_v35, 4  ;;  %v18874_v50 = vadd.f32 %v18619_v16, %v18800_v26  ;;  %v7008_v44 = vadd.f32 %v18559_v32, %v20204_v21  ;;  %v7006_v54 = vadd.f32 %v18578_v29, %v20205_v12  ;;  %v18880_v1 = vld [vmem:[#allocation3 + $0x70] sm:$0xf]  ;;  %13893 = vmatpush3.bf16.msra.mxu0 %v14213_v36  ;;  %v18888_v40 = vld [vmem:[#allocation3 + $0x74] sm:$0x1] }
 0x380   : > { %v18870_v13 = vpop.f32.mrf.mxu1  ;;  %v10502_v59 = vor.u32 %v10501_v41, %v10498_v14  ;;  %20206 = vst [vmem:[#allocation31_spill] sm:$0xff] %v18880_v1  ;;  %v10484_v8 = vsel %vm14380_vm8, %v10479_v60, %v10483_v6  ;;  %v10512_v16 = vor.u32 %v10511_v45, %v10507_v5  ;;  %v10517_v26 = vrot.slane %v10515_v39, 5  ;;  %20207 = vst [vmem:[#allocation34_spill] sm:$0xff] %v18888_v40  ;;  %v10327_v60 = vld [vmem:[#allocation3 + $0x78] sm:$0xf] }
 0x381   : > { %v10494_v35 = vsel %vm14380_vm8, %v10489_v46, %v10493_v37  ;;  %13894 = vmatprep.subr.bf16.mxu0 %v14216_v2  ;;  %v18890_v29 = vadd.f32 %v13574_v56, %v7008_v44  ;;  %v10520_v14 = vshrl.u32 %v10324_v48, 16  ;;  %v10523_v21 = vshll.u32 %v10324_v48, 16  ;;  %v14206_v37 = vld [vmem:[#allocation3 + $0x84] sm:$0xff]   ;;  %v18901_v44 = vld [vmem:[#allocation3 + $0x7c] sm:$0xf] }
 0x382   : > { %v12450_v32 = vcombine.low %v10484_v8, %v10494_v35  ;;  %v10503_v42 = vrot.slane %v10502_v59, 4  ;;  %v18892_v41 = vpop.f32.mrf.mxu1  ;;  %v10513_v36 = vrot.slane %v10512_v16, 4  ;;  %v10529_v12 = vshll.u32 %v18880_v1, 16  ;;  %20210 = vst [vmem:[#allocation4_spill] sm:$0xff] %v18901_v44  ;;  %v18903_v59 = vpop.f32.mrf.mxu0  ;;  %v14208_v8 = vld [vmem:[#allocation3 + $0x90] sm:$0xff]  }
 0x383   : > { %20208 = vst [vmem:[#allocation11_spill] sm:$0xff] %v18890_v29  ;;  %20209 = vst [vmem:[#allocation28_spill] sm:$0xff] %v18892_v41  ;;  %v10533_v6 = vshrl.u32 %v18880_v1, 16  ;;  %v7009_v46 = vadd.f32 %v18605_v18, %v18569_v3  ;;  %v10522_v56 = vrot.slane %v10520_v14, 4  ;;  %v10539_v45 = vshll.u32 %v18888_v40, 16  ;;  %13895 = vmatpush3.bf16.msra.mxu0 %v14216_v2 }
 0x384   : > { %13857 = vmatmul.mubr.bf16.gmra.mxu1 %v12450_v32  ;;  %v10508_v39 = vsel %vm14380_vm8, %v10503_v42, %v10507_v5  ;;  %v10518_v48 = vsel %vm14380_vm8, %v10513_v36, %v10517_v26  ;;  %v10525_v35 = vrot.slane %v10523_v21, 5  ;;  %v10531_v16 = vrot.slane %v10529_v12, 5  ;;  %v18907_v5 = vld [vmem:[#allocation3 + $0x80] sm:$0x1] }
 0x385   : > { %v10535_v32 = vrot.slane %v10533_v6, 4  ;;  %v12451_v42 = vcombine.low %v10508_v39, %v10518_v48  ;;  %13817 = vmatmul.mubr.bf16.gmra.mxu0 %v14206_v37  ;;  %v10541_v3 = vrot.slane %v10539_v45, 5  ;;  %v10544_v18 = vshrl.u32 %v10327_v60, 16  ;;  %v18915_v39 = vpop.f32.mrf.mxu0  ;;  %v20212_v48 = vld [vmem:[#allocation12_spill] sm:$0xff] }
 0x386   : > { %v10547_v14 = vshll.u32 %v10327_v60, 16  ;;  %13820 = vmatprep.mubr.bf16.mxu0 %v14208_v8  ;;  %v10526_v1 = vor.u32 %v10525_v35, %v10522_v56  ;;  %v10553_v2 = vshll.u32 %v18901_v44, 16  ;;  %v10557_v41 = vshrl.u32 %v18901_v44, 16  ;;  %20211 = vst [vmem:[#allocation15_spill] sm:$0xff] %v18915_v39  ;;  %v20213_v8 = vld [vmem:[#allocation14_spill] sm:$0xff]  ;;  %v20215_v44 = vld [vmem:[#allocation8_spill] sm:$0xff] }
 0x387   : > { %v13578_v40 = vpop.f32.mrf.mxu1  ;;  %v10536_v29 = vor.u32 %v10535_v32, %v10531_v16  ;;  %13860 = vmatprep.mubr.bf16.mxu1 %v12451_v42  ;;  %v10546_v26 = vrot.slane %v10544_v18, 4  ;;  %v10563_v21 = vshll.u32 %v18907_v5, 16  ;;  %v18913_v12 = vadd.f32 %v18861_v24, %v7006_v54  ;;  %v20214_v32 = vld [vmem:[#allocation36_spill] sm:$0xff]  ;;  %v10330_v24 = vld [vmem:[#allocation3 + $0x84] sm:$0xf] }
 0x388   : > { %v10549_v36 = vrot.slane %v10547_v14, 5  ;;  %v10527_v60 = vrot.slane %v10526_v1, 4  ;;  %v10555_v45 = vrot.slane %v10553_v2, 5  ;;  %v10559_v56 = vrot.slane %v10557_v41, 4 }
 0x389   : > { %v7685_v6 = vpop.f32.mrf.mxu1  ;;  %v10537_v37 = vrot.slane %v10536_v29, 4  ;;  %v7005_v35 = vadd.f32 %v20213_v8, %v20212_v48  ;;  %v18921_v42 = vadd.f32 %v20215_v44, %v20214_v32  ;;  %v18924_v14 = vadd.f32 %v18870_v13, %v7009_v46  ;;  %v18934_v48 = vld [vmem:[#allocation3 + $0x88] sm:$0xf] }
 0x38a   : > { %v10550_v18 = vor.u32 %v10549_v36, %v10546_v26  ;;  %v7012_v1 = vadd.f32 %v18656_v33, %v18600_v27  ;;  %v10532_v29 = vsel %vm14380_vm8, %v10527_v60, %v10531_v16  ;;  %v10560_v2 = vor.u32 %v10559_v56, %v10555_v45  ;;  %20216 = vst [vmem:[#allocation12_spill] sm:$0xff] %v18934_v48  ;;  %v14209_v36 = vld [vmem:[#allocation3 + $0x9c] sm:$0xff]   ;;  %v18942_v27 = vpop.f32.mrf.mxu0  ;;  %v14211_v60 = vld [vmem:[#allocation3 + $0xa8] sm:$0xff]  }
 0x38b   : > { %v18926_v54 = vpop.f32.mrf.mxu1  ;;  %v10542_v41 = vsel %vm14380_vm8, %v10537_v37, %v10541_v3  ;;  %v18938_v44 = vadd.f32 %v18730_v53, %v18868_v28  ;;  %v10565_v26 = vrot.slane %v10563_v21, 5  ;;  %v18946_v3 = vld [vmem:[#allocation3 + $0x8c] sm:$0x1]  ;;  %v10568_v37 = vshrl.u32 %v10330_v24, 16 }
 0x38c   : > { %v12452_v13 = vcombine.low %v10532_v29, %v10542_v41  ;;  %v10551_v46 = vrot.slane %v10550_v18, 4  ;;  %v10561_v33 = vrot.slane %v10560_v2, 4  ;;  %v18944_v16 = vadd.f32 %v13578_v40, %v7012_v1  ;;  %20219 = vst [vmem:[#allocation8_spill] sm:$0xff] %v18946_v3  ;;  %v10333_v18 = vld [vmem:[#allocation3 + $0x90] sm:$0xf]  ;;  %v18965_v39 = vpop.f32.mrf.mxu0 }
 0x38d   : > { %v18940_v8 = vpop.f32.mrf.mxu1  ;;  %v10571_v56 = vshll.u32 %v10330_v24, 16  ;;  %v7010_v53 = vadd.f32 %v18680_v61, %v18610_v47  ;;  %v7013_v28 = vadd.f32 %v18714_v15, %v18614_v38  ;;  %13821 = vmatmul.mubr.bf16.gmra.mxu0 %v14209_v36  ;;  %v10577_v21 = vshll.u32 %v18934_v48, 16  ;;  %v18954_v40 = vld [vmem:[#allocation3 + $0x94] sm:$0xf]  ;;  %v18960_v41 = vld [vmem:[#allocation3 + $0x98] sm:$0x1] }
 0x38e   : > { %20217 = vst [vmem:[#allocation14_spill] sm:$0xff] %v18940_v8  ;;  %20218 = vst [vmem:[#allocation36_spill] sm:$0xff] %v18944_v16  ;;  %13861 = vmatmul.mubr.bf16.gmra.mxu1 %v12452_v13  ;;  %v10581_v32 = vshrl.u32 %v18934_v48, 16  ;;  %v10556_v29 = vsel %vm14380_vm8, %v10551_v46, %v10555_v45  ;;  %v10566_v24 = vsel %vm14380_vm8, %v10561_v33, %v10565_v26  ;;  %13824 = vmatprep.mubr.bf16.mxu0 %v14211_v60 }
 0x38f   : > { %20220 = vst [vmem:[#allocation39_spill] sm:$0xff] %v18954_v40  ;;  %v13582_v1 = vpop.f32.mrf.mxu1  ;;  %v10570_v47 = vrot.slane %v10568_v37, 4  ;;  %v10573_v61 = vrot.slane %v10571_v56, 5  ;;  %20221 = vst [vmem:[#allocation40_spill] sm:$0xff] %v18960_v41  ;;  %v12453_v38 = vcombine.low %v10556_v29, %v10566_v24  ;;  %v10579_v15 = vrot.slane %v10577_v21, 5 }
 0x390   : > { %v10583_v2 = vrot.slane %v10581_v32, 4  ;;  %v10587_v13 = vshll.u32 %v18946_v3, 16  ;;  %v10592_v16 = vshrl.u32 %v10333_v18, 16  ;;  %v10595_v45 = vshll.u32 %v10333_v18, 16 }
 0x391   : > { %v18963_v36 = vpop.f32.mrf.mxu1  ;;  %v10574_v48 = vor.u32 %v10573_v61, %v10570_v47  ;;  %v10601_v46 = vshll.u32 %v18954_v40, 16  ;;  %13864 = vmatprep.mubr.bf16.mxu1 %v12453_v38  ;;  %v10605_v33 = vshrl.u32 %v18954_v40, 16  ;;  %v10611_v60 = vshll.u32 %v18960_v41, 16  ;;  %v14212_v38 = vld [vmem:[#allocation3 + $0xb4] sm:$0xff]   ;;  %v18979_v40 = vpop.f32.mrf.mxu0 }
 0x392   : > { %v10584_v26 = vor.u32 %v10583_v2, %v10579_v15  ;;  %v18970_v37 = vadd.f32 %v7685_v6, %v7010_v53  ;;  %v10594_v32 = vrot.slane %v10592_v16, 4  ;;  %v10597_v29 = vrot.slane %v10595_v45, 5  ;;  %v10336_v2 = vld [vmem:[#allocation3 + $0x9c] sm:$0xf] }
 0x393   : > { %v18972_v56 = vpop.f32.mrf.mxu1  ;;  %v10575_v21 = vrot.slane %v10574_v48, 4  ;;  %v10603_v24 = vrot.slane %v10601_v46, 5  ;;  %v18975_v47 = vadd.f32 %v18794_v4, %v7005_v35  ;;  %v10589_v61 = vrot.slane %v10587_v13, 5  ;;  %v14214_v4 = vld [vmem:[#allocation3 + $0xc0] sm:$0xff]  }
 0x394   : > { %v10585_v18 = vrot.slane %v10584_v26, 4  ;;  %v10607_v3 = vrot.slane %v10605_v33, 4  ;;  %v7016_v6 = vadd.f32 %v18760_v57, %v18639_v11  ;;  %v7014_v48 = vadd.f32 %v18783_v34, %v18647_v51  ;;  %v18988_v35 = vld [vmem:[#allocation3 + $0xa0] sm:$0xf]  ;;  %v18994_v11 = vld [vmem:[#allocation3 + $0xa4] sm:$0x1] }
 0x395   : > { %v18977_v8 = vpop.f32.mrf.mxu1  ;;  %v10598_v16 = vor.u32 %v10597_v29, %v10594_v32  ;;  %v18986_v53 = vadd.f32 %v18926_v54, %v7013_v28  ;;  %20223 = vst [vmem:[#allocation42_spill] sm:$0xff] %v18988_v35  ;;  %v10580_v13 = vsel %vm14380_vm8, %v10575_v21, %v10579_v15  ;;  %v10613_v26 = vrot.slane %v10611_v60, 5  ;;  %13825 = vmatmul.mubr.bf16.gmra.mxu0 %v14212_v38  ;;  %v10339_v21 = vld [vmem:[#allocation3 + $0xa8] sm:$0xf]  ;;  %v19007_v38 = vld [vmem:[#allocation3 + $0xac] sm:$0xf] }
 0x396   : > { %20222 = vst [vmem:[#allocation41_spill] sm:$0xff] %v18977_v8  ;;  %v10590_v45 = vsel %vm14380_vm8, %v10585_v18, %v10589_v61  ;;  %v10608_v46 = vor.u32 %v10607_v3, %v10603_v24  ;;  %20224 = vst [vmem:[#allocation43_spill] sm:$0xff] %v18994_v11  ;;  %v18996_v34 = vadd.f32 %v13582_v1, %v7016_v6  ;;  %13828 = vmatprep.mubr.bf16.mxu0 %v14214_v4  ;;  %v19000_v18 = vpop.f32.mrf.mxu0 }
 0x397   : > { %v12454_v57 = vcombine.low %v10580_v13, %v10590_v45  ;;  %v10599_v51 = vrot.slane %v10598_v16, 4  ;;  %v10616_v54 = vshrl.u32 %v10336_v2, 16  ;;  %v13586_v28 = vpop.f32.mrf.mxu1  ;;  %v10619_v32 = vshll.u32 %v10336_v2, 16  ;;  %20226 = vst [vmem:[#allocation45_spill] sm:$0xff] %v19007_v38  ;;  %v19013_v45 = vld [vmem:[#allocation3 + $0xb0] sm:$0x1] }
 0x398   : > { %20225 = vst [vmem:[#allocation44_spill] sm:$0xff] %v18996_v34  ;;  %v10609_v33 = vrot.slane %v10608_v46, 4  ;;  %v10625_v29 = vshll.u32 %v18988_v35, 16  ;;  %v10629_v15 = vshrl.u32 %v18988_v35, 16  ;;  %v7017_v1 = vadd.f32 %v18796_v55, %v18651_v17  ;;  %20227 = vst [vmem:[#allocation46_spill] sm:$0xff] %v19013_v45  ;;  %v14215_v46 = vld [vmem:[#allocation3 + $0xcc] sm:$0xff]  }
 0x399   : > { %13865 = vmatmul.mubr.bf16.gmra.mxu1 %v12454_v57  ;;  %v10604_v3 = vsel %vm14380_vm8, %v10599_v51, %v10603_v24  ;;  %v10618_v60 = vrot.slane %v10616_v54, 4  ;;  %v10635_v61 = vshll.u32 %v18994_v11, 16  ;;  %v19009_v2 = vpop.f32.mrf.mxu1  ;;  %v10621_v16 = vrot.slane %v10619_v32, 5 }
 0x39a   : > { %v10614_v6 = vsel %vm14380_vm8, %v10609_v33, %v10613_v26  ;;  %v10627_v4 = vrot.slane %v10625_v29, 5  ;;  %v10631_v13 = vrot.slane %v10629_v15, 4  ;;  %v10640_v51 = vshrl.u32 %v10339_v21, 16 }
 0x39b   : > { %v12455_v24 = vcombine.low %v10604_v3, %v10614_v6  ;;  %v10637_v57 = vrot.slane %v10635_v61, 5  ;;  %v10643_v17 = vshll.u32 %v10339_v21, 16  ;;  %v10622_v55 = vor.u32 %v10621_v16, %v10618_v60  ;;  %v19017_v41 = vpop.f32.mrf.mxu1 }
 0x39c   : > { %v10632_v54 = vor.u32 %v10631_v13, %v10627_v4  ;;  %v10649_v11 = vshll.u32 %v19007_v38, 16  ;;  %v10653_v35 = vshrl.u32 %v19007_v38, 16  ;;  %v10642_v26 = vrot.slane %v10640_v51, 4  ;;  %v10348_v38 = vld [vmem:[#allocation3 + $0xcc] sm:$0xf] }
 0x39d   : > { %v19019_v8 = vpop.f32.mrf.mxu0  ;;  %13868 = vmatprep.mubr.bf16.mxu1 %v12455_v24  ;;  %v10645_v33 = vrot.slane %v10643_v17, 5  ;;  %v10659_v32 = vshll.u32 %v19013_v45, 16  ;;  %v19023_v29 = vadd.f32 %v18963_v36, %v7014_v48  ;;  %v10623_v15 = vrot.slane %v10622_v55, 4  ;;  %13829 = vmatmul.mubr.bf16.gmra.mxu0 %v14215_v46  ;;  %v10342_v36 = vld [vmem:[#allocation3 + $0xb4] sm:$0xf] }
 0x39e   : > { %v10633_v21 = vrot.slane %v10632_v54, 4  ;;  %v10651_v3 = vrot.slane %v10649_v11, 5  ;;  %v10655_v60 = vrot.slane %v10653_v35, 4  ;;  %v19029_v6 = vadd.f32 %v18621_v43, %v18596_v62  ;;  %v19044_v43 = vld [vmem:[#allocation3 + $0xb8] sm:$0xf] }
 0x39f   : > { %20228 = vst [vmem:[#allocation47_spill] sm:$0xff] %v19023_v29  ;;  %v19025_v61 = vpop.f32.mrf.mxu0  ;;  %v19033_v16 = vadd.f32 %v18824_v0, %v18921_v42  ;;  %v10646_v13 = vor.u32 %v10645_v33, %v10642_v26  ;;  %v19036_v24 = vadd.f32 %v18972_v56, %v7017_v1  ;;  %v7020_v48 = vadd.f32 %v18854_v63, %v18667_v23  ;;  %v19046_v46 = vld [vmem:[#allocation3 + $0xbc] sm:$0x1]  ;;  %v19048_v0 = vpop.f32.mrf.mxu1  ;;  %v11057_v55 = vld [vmem:[#allocation3 + $0x18] sm:$0xe] }
 0x3a0   : > { %v10628_v35 = vsel %vm14380_vm8, %v10623_v15, %v10627_v4  ;;  %v10638_v11 = vsel %vm14380_vm8, %v10633_v21, %v10637_v57  ;;  %v10656_v62 = vor.u32 %v10655_v60, %v10651_v3  ;;  %20230 = vst [vmem:[#allocation49_spill] sm:$0xff] %v19044_v43  ;;  %20231 = vst [vmem:[#allocation50_spill] sm:$0xff] %v19046_v46  ;;  %v10661_v63 = vrot.slane %v10659_v32, 5  ;;  %v10345_v60 = vld [vmem:[#allocation3 + $0xc0] sm:$0xf] }
 0x3a1   : > { %20229 = vst [vmem:[#allocation48_spill] sm:$0xff] %v19036_v24  ;;  %20232 = vst [vmem:[#allocation51_spill] sm:$0xff] %v19048_v0  ;;  %v19050_v42 = vpop.f32.mrf.mxu0  ;;  %v12456_v56 = vcombine.low %v10628_v35, %v10638_v11  ;;  %v7018_v1 = vadd.f32 %v18882_v25, %v18684_v58  ;;  %v10647_v23 = vrot.slane %v10646_v13, 4  ;;  %v19054_v4 = vadd.f32 %v13586_v28, %v7020_v48  ;;  %v19067_v13 = vld [vmem:[#allocation3 + $0xc4] sm:$0xf] }
 0x3a2   : > { %v10657_v51 = vrot.slane %v10656_v62, 4  ;;  %v10664_v17 = vshrl.u32 %v10342_v36, 16  ;;  %v10667_v57 = vshll.u32 %v10342_v36, 16  ;;  %v7021_v26 = vadd.f32 %v18903_v59, %v18688_v31  ;;  %20234 = vst [vmem:[#allocation53_spill] sm:$0xff] %v19067_v13 }
 0x3a3   : > { %20233 = vst [vmem:[#allocation52_spill] sm:$0xff] %v19054_v4  ;;  %v19056_v54 = vpop.f32.mrf.mxu0  ;;  %13869 = vmatmul.mubr.bf16.gmra.mxu1 %v12456_v56  ;;  %v10673_v33 = vshll.u32 %v19044_v43, 16  ;;  %v10677_v15 = vshrl.u32 %v19044_v43, 16  ;;  %v10683_v58 = vshll.u32 %v19046_v46, 16  ;;  %v10652_v25 = vsel %vm14380_vm8, %v10647_v23, %v10651_v3  ;;  %v20235_v3 = vld [vmem:[#allocation5_spill] sm:$0xff] }
 0x3a4   : > { %v10662_v28 = vsel %vm14380_vm8, %v10657_v51, %v10661_v63  ;;  %v10666_v32 = vrot.slane %v10664_v17, 4  ;;  %v10669_v21 = vrot.slane %v10667_v57, 5  ;;  %v13590_v36 = vpop.f32.mrf.mxu1  ;;  %v12469_v11 = vrot.slane %v11057_v55, 9  ;;  %v19077_v17 = vld [vmem:[#allocation3 + $0xc8] sm:$0x1] }
 0x3a5   : > { %v19069_v48 = vpop.f32.mrf.mxu0  ;;  %v12457_v31 = vcombine.low %v10652_v25, %v10662_v28  ;;  %v10675_v59 = vrot.slane %v10673_v33, 5  ;;  %v10679_v35 = vrot.slane %v10677_v15, 4  ;;  %v10685_v56 = vrot.slane %v10683_v58, 5  ;;  %20236 = vst [vmem:[#allocation5_spill] sm:$0xff] %v19077_v17 }
 0x3a6   : > { %v10670_v62 = vor.u32 %v10669_v21, %v10666_v32  ;;  %v11123_v46 = vrot.slane %v18635_v9, 5  ;;  %v11126_v23 = vrot.slane %v20235_v3, 5  ;;  %v19073_v43 = vpop.f32.mrf.mxu1  ;;  %v10688_v57 = vshrl.u32 %v10345_v60, 16 }
 0x3a7   : > { %v19075_v63 = vpop.f32.mrf.mxu0  ;;  %13872 = vmatprep.mubr.bf16.mxu1 %v12457_v31  ;;  %v10680_v51 = vor.u32 %v10679_v35, %v10675_v59  ;;  %v10691_v45 = vshll.u32 %v10345_v60, 16  ;;  %v10697_v33 = vshll.u32 %v19067_v13, 16  ;;  %v10701_v9 = vshrl.u32 %v19067_v13, 16 }
 0x3a8   : > { %v10671_v15 = vrot.slane %v10670_v62, 4  ;;  %v11124_v58 = vsel %vm14845_vm14, %v12469_v11, %v11123_v46  ;;  %v11125_v25 = vrot.slane %v11123_v46, 4  ;;  %v19083_v28 = vpop.f32.mrf.mxu1  ;;  %v10690_v31 = vrot.slane %v10688_v57, 4 }
 0x3a9   : > { %v19085_v32 = vpop.f32.mrf.mxu0  ;;  %v10681_v21 = vrot.slane %v10680_v51, 4  ;;  %v10693_v35 = vrot.slane %v10691_v45, 5  ;;  %v10699_v3 = vrot.slane %v10697_v33, 5  ;;  %v10703_v0 = vrot.slane %v10701_v9, 4  ;;  %v20239_v33 = vld [vmem:[#allocation21_spill] sm:$0xff] }
 0x3aa   : > { %v10676_v60 = vsel %vm14380_vm8, %v10671_v15, %v10675_v59  ;;  %v11127_v62 = vsel %vm14845_vm14, %v11125_v25, %v11126_v23  ;;  %v10707_v11 = vshll.u32 %v19077_v17, 16  ;;  %v19092_v46 = vpop.f32.mrf.mxu1  ;;  %v19099_v45 = vadd.f32 %v19009_v2, %v7018_v1  ;;  %v20240_v23 = vld [vmem:[#allocation38_spill] sm:$0xff]  ;;  %v11058_v17 = vld [vmem:[#allocation3 + $0x24] sm:$0xe] }
 0x3ab   : > { %v19094_v13 = vpop.f32.mrf.mxu0  ;;  %v10686_v4 = vsel %vm14380_vm8, %v10681_v21, %v10685_v56  ;;  %v12501_v51 = vcombine.low %v11124_v58, %v11127_v62  ;;  %v10694_v57 = vor.u32 %v10693_v35, %v10690_v31  ;;  %v7024_v59 = vadd.f32 %v18942_v27, %v20239_v33  ;;  %v20244_v31 = vld [vmem:[#allocation33_spill] sm:$0xff] }
 0x3ac   : > { %20238 = vst [vmem:[#allocation9_spill] sm:$0xff] %v19099_v45  ;;  %v12458_v15 = vcombine.low %v10676_v60, %v10686_v4  ;;  %v7022_v25 = vadd.f32 %v18965_v39, %v20240_v23  ;;  %v10704_v9 = vor.u32 %v10703_v0, %v10699_v3  ;;  %v19105_v24 = vpop.f32.mrf.mxu1  ;;  %v10709_v58 = vrot.slane %v10707_v11, 5  ;;  %v20242_v4 = vld [vmem:[#allocation20_spill] sm:$0xff]  ;;  %v20243_v0 = vld [vmem:[#allocation23_spill] sm:$0xff] }
 0x3ad   : > { %v19107_v29 = vpop.f32.mrf.mxu0  ;;  %13896 = vmatprep.mubr.bf16.mxu0 %v12501_v51  ;;  %v10695_v56 = vrot.slane %v10694_v57, 4  ;;  %v19110_v2 = vadd.f32 %v19017_v41, %v7021_v26  ;;  %v7023_v27 = vadd.f32 %v19000_v18, %v18804_v22  ;;  %v7025_v39 = vadd.f32 %v18979_v40, %v20242_v4  ;;  %v19121_v60 = vld [vmem:[#allocation3 + $0xd0] sm:$0xf]  ;;  %v19131_v11 = vld [vmem:[#allocation3 + $0xd4] sm:$0x1]  ;;  %v20248_v57 = vld [vmem:[#allocation30_spill] sm:$0xff] }
 0x3ae   : > { %13873 = vmatmul.mubr.bf16.gmra.mxu1 %v12458_v15  ;;  %v10705_v1 = vrot.slane %v10704_v9, 4  ;;  %v19118_v21 = vadd.f32 %v19019_v8, %v20243_v0  ;;  %v11130_v35 = vrot.slane %v20244_v31, 5  ;;  %20245 = vst [vmem:[#allocation38_spill] sm:$0xff] %v19121_v60  ;;  %v19123_v62 = vpop.f32.mrf.mxu1  ;;  %v12470_v18 = vrot.slane %v11058_v17, 9  ;;  %20247 = vst [vmem:[#allocation23_spill] sm:$0xff] %v19131_v11 }
 0x3af   : > { %20241 = vst [vmem:[#allocation21_spill] sm:$0xff] %v19110_v2  ;;  %v19125_v41 = vpop.f32.mrf.mxu0  ;;  %v10700_v22 = vsel %vm14380_vm8, %v10695_v56, %v10699_v3  ;;  %v19129_v26 = vadd.f32 %v13590_v36, %v7024_v59  ;;  %v10712_v40 = vshrl.u32 %v10348_v38, 16  ;;  %v11133_v33 = vrot.slane %v20248_v57, 5  ;;  %v11059_v3 = vld [vmem:[#allocation3 + $0x30] sm:$0xe]  ;;  %v20249_v57 = vld [vmem:[#allocation25_spill] sm:$0xff] }
 0x3b0   : > { %v10710_v8 = vsel %vm14380_vm8, %v10705_v1, %v10709_v58  ;;  %v11132_v51 = vrot.slane %v11130_v35, 4  ;;  %v10715_v15 = vshll.u32 %v10348_v38, 16  ;;  %v19136_v23 = vpop.f32.mrf.mxu1  ;;  %v10721_v17 = vshll.u32 %v19121_v60, 16 }
 0x3b1   : > { %20246 = vst [vmem:[#allocation20_spill] sm:$0xff] %v19129_v26  ;;  %v19138_v9 = vpop.f32.mrf.mxu0  ;;  %v12459_v4 = vcombine.low %v10700_v22, %v10710_v8  ;;  %v10714_v0 = vrot.slane %v10712_v40, 4  ;;  %v10725_v36 = vshrl.u32 %v19121_v60, 16  ;;  %v11131_v59 = vsel %vm14845_vm14, %v12470_v18, %v11130_v35 }
 0x3b2   : > { %v11134_v56 = vsel %vm14845_vm14, %v11132_v51, %v11133_v33  ;;  %v10717_v58 = vrot.slane %v10715_v15, 5  ;;  %v10731_v38 = vshll.u32 %v19131_v11, 16  ;;  %v8508_v1 = vpop.f32.mrf.mxu1  ;;  %v10723_v40 = vrot.slane %v10721_v17, 5  ;;  %v20250_v11 = vld [vmem:[#allocation27_spill] sm:$0xff] }
 0x3b3   : > { %v19147_v31 = vpop.f32.mrf.mxu0  ;;  %13876 = vmatprep.mubr.bf16.mxu1 %v12459_v4  ;;  %v12502_v22 = vcombine.low %v11131_v59, %v11134_v56  ;;  %v10727_v8 = vrot.slane %v10725_v36, 4  ;;  %v11137_v26 = vrot.slane %v20249_v57, 5  ;;  %v12471_v45 = vrot.slane %v11059_v3, 9 }
 0x3b4   : > { %v10718_v60 = vor.u32 %v10717_v58, %v10714_v0  ;;  %v10733_v2 = vrot.slane %v10731_v38, 5  ;;  %v8246_v35 = vadd.f32 %v19025_v61, %v18822_v49  ;;  %v13662_v18 = vpop.f32.mrf.mxu1  ;;  %v11140_v34 = vrot.slane %v20250_v11, 5  ;;  %v11060_v61 = vld [vmem:[#allocation3 + $0x3c] sm:$0xe] }
 0x3b5   : > { %v19152_v51 = vpop.f32.mrf.mxu0  ;;  %13897 = vmatmul.mubr.bf16.vlgmr.msra.gmra.mxu0 %v12502_v22  ;;  %v10728_v33 = vor.u32 %v10727_v8, %v10723_v40  ;;  %v11139_v15 = vrot.slane %v11137_v26, 4  ;;  %v19156_v4 = vadd.f32 %v19073_v43, %v7022_v25  ;;  %v11138_v0 = vsel %vm14845_vm14, %v12471_v45, %v11137_v26  ;;  %v20251_v25 = vld [vmem:[#allocation13_spill] sm:$0xff] }
 0x3b6   : > { %v10719_v17 = vrot.slane %v10718_v60, 4  ;;  %v8249_v36 = vadd.f32 %v19050_v42, %v18835_v52  ;;  %v19163_v49 = vadd.f32 %v19083_v28, %v7025_v39  ;;  %v8521_v3 = vpop.f32.mrf.mxu1  ;;  %v19170_v43 = vadd.f32 %v19092_v46, %v7023_v27  ;;  %v11061_v60 = vld [vmem:[#allocation3 + $0x48] sm:$0xe]  ;;  %v20253_v27 = vld [vmem:[#allocation29_spill] sm:$0xff] }
 0x3b7   : > { %v19165_v59 = vpop.f32.mrf.mxu0  ;;  %v10729_v56 = vrot.slane %v10728_v33, 4  ;;  %v11141_v11 = vsel %vm14845_vm14, %v11139_v15, %v11140_v34  ;;  %v8252_v45 = vadd.f32 %v19069_v48, %v20251_v25  ;;  %v8247_v28 = vadd.f32 %v19056_v54, %v18874_v50  ;;  %v20252_v39 = vld [vmem:[#allocation26_spill] sm:$0xff]  ;;  %v20254_v50 = vld [vmem:[#allocation17_spill] sm:$0xff]  ;;  %v11062_v25 = vld [vmem:[#allocation3 + $0x54] sm:$0xe] }
 0x3b8   : > { %v10724_v52 = vsel %vm14380_vm8, %v10719_v17, %v10723_v40  ;;  %v12503_v42 = vcombine.low %v11138_v0, %v11141_v11  ;;  %v11144_v26 = vrot.slane %v20252_v39, 5  ;;  %v13663_v58 = vpop.f32.mrf.mxu1  ;;  %v12472_v46 = vrot.slane %v11060_v61, 9  ;;  %v20255_v61 = vld [vmem:[#allocation22_spill] sm:$0xff] }
 0x3b9   : > { %v19179_v38 = vpop.f32.mrf.mxu0  ;;  %v10734_v34 = vsel %vm14380_vm8, %v10729_v56, %v10733_v2  ;;  %v11147_v22 = vrot.slane %v20253_v27, 5  ;;  %v19186_v48 = vadd.f32 %v19105_v24, %v19118_v21  ;;  %v12473_v57 = vrot.slane %v11061_v60, 9  ;;  %v20258_v39 = vld [vmem:[#allocation6_spill] sm:$0xff] }
 0x3ba   : > { %v12460_v40 = vcombine.low %v10724_v52, %v10734_v34  ;;  %13900 = vmatprep.mubr.bf16.mxu0 %v12503_v42  ;;  %v11146_v8 = vrot.slane %v11144_v26, 4  ;;  %v11151_v54 = vrot.slane %v20254_v50, 5  ;;  %v8524_v33 = vpop.f32.mrf.mxu1  ;;  %v11145_v19 = vsel %vm14845_vm14, %v12472_v46, %v11144_v26  ;;  %v20257_v42 = vld [vmem:[#allocation7_spill] sm:$0xff]  ;;  %v20259_v34 = vld [vmem:[#allocation37_spill] sm:$0xff] }
 0x3bb   : > { %v19189_v15 = vpop.f32.mrf.mxu0  ;;  %v8250_v2 = vadd.f32 %v19075_v63, %v18792_v10  ;;  %v19196_v17 = vadd.f32 %v19123_v62, %v8246_v35  ;;  %v8253_v24 = vadd.f32 %v19085_v32, %v18807_v20  ;;  %v11154_v56 = vrot.slane %v20255_v61, 5  ;;  %v20256_v20 = vld [vmem:[#allocation16_spill] sm:$0xff]  ;;  %v11063_v35 = vld [vmem:[#allocation3 + $0x60] sm:$0xe] }
 0x3bc   : > { %13877 = vmatmul.mubr.bf16.gmra.mxu1 %v12460_v40  ;;  %v11148_v21 = vsel %vm14845_vm14, %v11146_v8, %v11147_v22  ;;  %v11153_v0 = vrot.slane %v11151_v54, 4  ;;  %v19204_v11 = vadd.f32 %v19136_v23, %v8249_v36  ;;  %v13666_v60 = vpop.f32.mrf.mxu1  ;;  %v8251_v63 = vadd.f32 %v19094_v13, %v18938_v44 }
 0x3bd   : > { %v19206_v52 = vpop.f32.mrf.mxu0  ;;  %v12504_v10 = vcombine.low %v11145_v19, %v11148_v21  ;;  %v19210_v62 = vadd.f32 %v8508_v1, %v8247_v28  ;;  %v8256_v32 = vadd.f32 %v19107_v29, %v20256_v20  ;;  %v7011_v26 = vadd.f32 %v20258_v39, %v20257_v42  ;;  %v20262_v20 = vld [vmem:[#allocation28_spill] sm:$0xff] }
 0x3be   : > { %v11152_v23 = vsel %vm14845_vm14, %v12473_v57, %v11151_v54  ;;  %v11155_v36 = vsel %vm14845_vm14, %v11153_v0, %v11154_v56  ;;  %v11158_v46 = vrot.slane %v20259_v34, 5  ;;  %v8537_v27 = vpop.f32.mrf.mxu1  ;;  %v12474_v13 = vrot.slane %v11062_v25, 9  ;;  %v20260_v57 = vld [vmem:[#allocation32_spill] sm:$0xff] }
 0x3bf   : > { %v19221_v22 = vpop.f32.mrf.mxu0  ;;  %13901 = vmatmul.mubr.bf16.gmra.mxu0 %v12504_v10  ;;  %v12505_v44 = vcombine.low %v11152_v23, %v11155_v36  ;;  %v19223_v1 = vadd.f32 %v13662_v18, %v8252_v45  ;;  %v11165_v29 = vrot.slane %v18841_v7, 5  ;;  %v11161_v40 = vrot.slane %v18829_v30, 5  ;;  %v20261_v0 = vld [vmem:[#allocation24_spill] sm:$0xff]  ;;  %v11064_v23 = vld [vmem:[#allocation3 + $0x6c] sm:$0xe] }
 0x3c0   : > { %v11160_v28 = vrot.slane %v11158_v46, 4  ;;  %v12475_v8 = vrot.slane %v11063_v35, 9  ;;  %v8254_v50 = vadd.f32 %v19125_v41, %v20260_v57  ;;  %v13667_v54 = vpop.f32.mrf.mxu1  ;;  %v11168_v61 = vrot.slane %v20261_v0, 5  ;;  %v20265_v36 = vld [vmem:[#allocation34_spill] sm:$0xff] }
 0x3c1   : > { %v19229_v19 = vpop.f32.mrf.mxu0  ;;  %13904 = vmatprep.mubr.bf16.mxu0 %v12505_v44  ;;  %v11167_v21 = vrot.slane %v11165_v29, 4  ;;  %v19232_v56 = vadd.f32 %v8521_v3, %v8250_v2  ;;  %v8257_v18 = vadd.f32 %v19138_v9, %v18975_v47  ;;  %v19238_v30 = vadd.f32 %v13663_v58, %v8253_v24  ;;  %v20263_v9 = vld [vmem:[#allocation11_spill] sm:$0xff]  ;;  %v11065_v2 = vld [vmem:[#allocation3 + $0x78] sm:$0xe] }
 0x3c2   : > { %v11162_v7 = vsel %vm14845_vm14, %v11160_v28, %v11161_v40  ;;  %v8255_v41 = vadd.f32 %v19147_v31, %v19033_v16  ;;  %v19242_v45 = vadd.f32 %v8524_v33, %v8251_v63  ;;  %v8540_v25 = vpop.f32.mrf.mxu1  ;;  %v7761_v35 = vadd.f32 %v20262_v20, %v19029_v6  ;;  %v20264_v31 = vld [vmem:[#allocation31_spill] sm:$0xff] }
 0x3c3   : > { %v8186_v10 = vpop.f32.mrf.mxu0  ;;  %v11159_v3 = vsel %vm14845_vm14, %v12474_v13, %v11158_v46  ;;  %v11169_v47 = vsel %vm14845_vm14, %v11167_v21, %v11168_v61  ;;  %v8260_v58 = vadd.f32 %v19152_v51, %v20263_v9  ;;  %v11166_v16 = vsel %vm14845_vm14, %v12475_v8, %v11165_v29  ;;  %v20266_v46 = vld [vmem:[#allocation4_spill] sm:$0xff]  ;;  %v11066_v61 = vld [vmem:[#allocation3 + $0x84] sm:$0xe] }
 0x3c4   : > { %v12506_v24 = vcombine.low %v11159_v3, %v11162_v7  ;;  %v11172_v33 = vrot.slane %v20264_v31, 5  ;;  %v19255_v63 = vadd.f32 %v13666_v60, %v8256_v32  ;;  %v13670_v42 = vpop.f32.mrf.mxu1  ;;  %v12507_v39 = vcombine.low %v11166_v16, %v11169_v47  ;;  %v20267_v7 = vld [vmem:[#allocation14_spill] sm:$0xff]  ;;  %v20271_v16 = vld [vmem:[#allocation39_spill] sm:$0xff] }
 0x3c5   : > { %v13630_v6 = vpop.f32.mrf.mxu0  ;;  %v11175_v34 = vrot.slane %v20265_v36, 5  ;;  %v11179_v44 = vrot.slane %v20266_v46, 5  ;;  %v8258_v51 = vadd.f32 %v19165_v59, %v18913_v12  ;;  %v12477_v28 = vrot.slane %v11065_v2, 9  ;;  %v20270_v2 = vld [vmem:[#allocation8_spill] sm:$0xff] }
 0x3c6   : > { %v11174_v13 = vrot.slane %v11172_v33, 4  ;;  %v19261_v40 = vadd.f32 %v8537_v27, %v8254_v50  ;;  %v8261_v29 = vadd.f32 %v19179_v38, %v18924_v14  ;;  %v8553_v60 = vpop.f32.mrf.mxu1  ;;  %v11182_v57 = vrot.slane %v18907_v5, 5  ;;  %v20268_v50 = vld [vmem:[#allocation36_spill] sm:$0xff] }
 0x3c7   : > { %v8199_v32 = vpop.f32.mrf.mxu0  ;;  %13905 = vmatmul.mubr.bf16.gmra.mxu0 %v12506_v24  ;;  %v11181_v8 = vrot.slane %v11179_v44, 4  ;;  %v19266_v21 = vadd.f32 %v13667_v54, %v8257_v18  ;;  %v8259_v0 = vadd.f32 %v19189_v15, %v7761_v35  ;;  %v7765_v12 = vadd.f32 %v20267_v7, %v7011_v26  ;;  %v20269_v54 = vld [vmem:[#allocation12_spill] sm:$0xff] }
 0x3c8   : > { %13908 = vmatprep.mubr.bf16.mxu0 %v12507_v39  ;;  %v12476_v59 = vrot.slane %v11064_v23, 9  ;;  %v19270_v27 = vadd.f32 %v8540_v25, %v8255_v41  ;;  %v8264_v14 = vadd.f32 %v19206_v52, %v20268_v50  ;;  %v13671_v38 = vpop.f32.mrf.mxu1  ;;  %v11176_v3 = vsel %vm14845_vm14, %v11174_v13, %v11175_v34  ;;  %v20275_v50 = vld [vmem:[#allocation41_spill] sm:$0xff] }
 0x3c9   : > { %v13631_v20 = vpop.f32.mrf.mxu0  ;;  %v11180_v5 = vsel %vm14845_vm14, %v12477_v28, %v11179_v44  ;;  %v11183_v15 = vsel %vm14845_vm14, %v11181_v8, %v11182_v57  ;;  %v11186_v26 = vrot.slane %v20269_v54, 5  ;;  %v12478_v25 = vrot.slane %v11066_v61, 9  ;;  %v20274_v61 = vld [vmem:[#allocation44_spill] sm:$0xff] }
 0x3ca   : > { %v11173_v18 = vsel %vm14845_vm14, %v12476_v59, %v11172_v33  ;;  %v12509_v41 = vcombine.low %v11180_v5, %v11183_v15  ;;  %v19283_v35 = vadd.f32 %v13670_v42, %v8260_v58  ;;  %v8556_v52 = vpop.f32.mrf.mxu1  ;;  %v11189_v24 = vrot.slane %v20270_v2, 5  ;;  %v20278_v5 = vld [vmem:[#allocation19_spill] sm:$0xff]  ;;  %v20279_v54 = vld [vmem:[#allocation40_spill] sm:$0xff] }
 0x3cb   : > { %v8202_v47 = vpop.f32.mrf.mxu0  ;;  %v11188_v9 = vrot.slane %v11186_v26, 4  ;;  %v11193_v31 = vrot.slane %v20271_v16, 5  ;;  %v8262_v39 = vadd.f32 %v19221_v22, %v18970_v37  ;;  %v12508_v23 = vcombine.low %v11173_v18, %v11176_v3  ;;  %v20272_v37 = vld [vmem:[#allocation18_spill] sm:$0xff]  ;;  %v20280_v18 = vld [vmem:[#allocation48_spill] sm:$0xff] }
 0x3cc   : > { %v11187_v36 = vsel %vm14845_vm14, %v12478_v25, %v11186_v26  ;;  %v19291_v34 = vadd.f32 %v8553_v60, %v8258_v51  ;;  %v8265_v58 = vadd.f32 %v19229_v19, %v18986_v53  ;;  %v13674_v33 = vpop.f32.mrf.mxu1  ;;  %v19297_v44 = vadd.f32 %v13671_v38, %v8261_v29  ;;  %v20273_v22 = vld [vmem:[#allocation10_spill] sm:$0xff]  ;;  %v11067_v53 = vld [vmem:[#allocation3 + $0x90] sm:$0xe] }
 0x3cd   : > { %v13634_v42 = vpop.f32.mrf.mxu0  ;;  %v11190_v46 = vsel %vm14845_vm14, %v11188_v9, %v11189_v24  ;;  %v8263_v13 = vadd.f32 %v8186_v10, %v7765_v12  ;;  %v19299_v28 = vadd.f32 %v8556_v52, %v8259_v0  ;;  %v7015_v8 = vadd.f32 %v20273_v22, %v20272_v37  ;;  %v20276_v29 = vld [vmem:[#allocation47_spill] sm:$0xff]  ;;  %v20281_v9 = vld [vmem:[#allocation42_spill] sm:$0xff] }
 0x3ce   : > { %v12510_v57 = vcombine.low %v11187_v36, %v11190_v46  ;;  %v8268_v51 = vadd.f32 %v13630_v6, %v20274_v61  ;;  %v8569_v60 = vpop.f32.mrf.mxu1  ;;  %v11195_v19 = vrot.slane %v11193_v31, 4  ;;  %v19304_v59 = vadd.f32 %v13674_v33, %v8264_v14  ;;  %v20277_v38 = vld [vmem:[#allocation35_spill] sm:$0xff]  ;;  %v20283_v46 = vld [vmem:[#allocation52_spill] sm:$0xff] }
 0x3cf   : > { %v8215_v7 = vpop.f32.mrf.mxu0  ;;  %13909 = vmatmul.mubr.bf16.gmra.mxu0 %v12508_v23  ;;  %v7769_v3 = vadd.f32 %v20275_v50, %v7015_v8  ;;  %v8266_v10 = vadd.f32 %v8199_v32, %v20276_v29  ;;  %v6614_v15 = vadd.f32 %v20278_v5, %v20277_v38  ;;  %v11196_v26 = vrot.slane %v20279_v54, 5  ;;  %v20282_v23 = vld [vmem:[#allocation45_spill] sm:$0xff]  ;;  %v20284_v37 = vld [vmem:[#allocation15_spill] sm:$0xff]  ;;  %v11068_v50 = vld [vmem:[#allocation3 + $0x9c] sm:$0xe] }
 0x3d0   : > { %13912 = vmatprep.mubr.bf16.mxu0 %v12509_v41  ;;  %v13675_v0 = vpop.f32.mrf.mxu1  ;;  %v19311_v6 = vadd.f32 %v8569_v60, %v8262_v39  ;;  %v8269_v25 = vadd.f32 %v13631_v20, %v20280_v18  ;;  %v12479_v52 = vrot.slane %v11067_v53, 9  ;;  %v11200_v14 = vrot.slane %v20281_v9, 5  ;;  %v20286_v29 = vld [vmem:[#allocation9_spill] sm:$0xff] }
 0x3d1   : > { %v13635_v12 = vpop.f32.mrf.mxu0  ;;  %v19315_v2 = vadd.f32 %v13675_v0, %v8265_v58  ;;  %v8267_v24 = vadd.f32 %v8202_v47, %v7769_v3  ;;  %v11197_v32 = vsel %vm14845_vm14, %v11195_v19, %v11196_v26  ;;  %v11207_v36 = vrot.slane %v20282_v23, 5  ;;  %v20285_v47 = vld [vmem:[#allocation51_spill] sm:$0xff]  ;;  %v11069_v3 = vld [vmem:[#allocation3 + $0xa8] sm:$0xe] }
 0x3d2   : > { %v8572_v41 = vpop.f32.mrf.mxu1  ;;  %v8272_v39 = vadd.f32 %v13634_v42, %v20283_v46  ;;  %v7019_v22 = vadd.f32 %v20284_v37, %v6614_v15  ;;  %v11194_v58 = vsel %vm14845_vm14, %v12479_v52, %v11193_v31  ;;  %v11202_v19 = vrot.slane %v11200_v14, 4  ;;  %v20287_v15 = vld [vmem:[#allocation21_spill] sm:$0xff]  ;;  %v20288_v31 = vld [vmem:[#allocation43_spill] sm:$0xff]  ;;  %v20289_v52 = vld [vmem:[#allocation20_spill] sm:$0xff] }
 0x3d3   : > { %v8218_v16 = vpop.f32.mrf.mxu0  ;;  %v19320_v33 = vadd.f32 %v8572_v41, %v8263_v13  ;;  %v12511_v53 = vcombine.low %v11194_v58, %v11197_v32  ;;  %v8270_v13 = vadd.f32 %v8215_v7, %v20286_v29  ;;  %v11209_v42 = vrot.slane %v11207_v36, 4  ;;  %v20290_v46 = vld [vmem:[#allocation46_spill] sm:$0xff] }
 0x3d4   : > { %v13678_v20 = vpop.f32.mrf.mxu1  ;;  %v7773_v60 = vadd.f32 %v20285_v47, %v7019_v22  ;;  %v8273_v54 = vadd.f32 %v13635_v12, %v20287_v15  ;;  %v12480_v32 = vrot.slane %v11068_v50, 9  ;;  %v12481_v23 = vrot.slane %v11069_v3, 9  ;;  %v20292_v47 = vld [vmem:[#allocation53_spill] sm:$0xff] }
 0x3d5   : > { %v13638_v8 = vpop.f32.mrf.mxu0  ;;  %v19326_v61 = vadd.f32 %v13678_v20, %v8268_v51  ;;  %v11203_v51 = vrot.slane %v20288_v31, 5  ;;  %v11210_v7 = vrot.slane %v20290_v46, 5 }
 0x3d6   : > { %v8585_v0 = vpop.f32.mrf.mxu1  ;;  %v8271_v18 = vadd.f32 %v8218_v16, %v7773_v60  ;;  %v8276_v9 = vadd.f32 %v13638_v8, %v20289_v52  ;;  %v11221_v60 = vrot.slane %v20292_v47, 5  ;;  %v11201_v50 = vsel %vm14845_vm14, %v12480_v32, %v11200_v14  ;;  %v20294_v52 = vld [vmem:[#allocation38_spill] sm:$0xff] }
 0x3d7   : > { %v8231_v38 = vpop.f32.mrf.mxu0  ;;  %13913 = vmatmul.mubr.bf16.gmra.mxu0 %v12510_v57  ;;  %v19330_v5 = vadd.f32 %v8585_v0, %v8266_v10  ;;  %v11204_v57 = vsel %vm14845_vm14, %v11202_v19, %v11203_v51  ;;  %v20291_v10 = vld [vmem:[#allocation49_spill] sm:$0xff]  ;;  %v11211_v8 = vsel %vm14845_vm14, %v11209_v42, %v11210_v7  ;;  %v11072_v7 = vld [vmem:[#allocation3 + $0xcc] sm:$0xe] }
 0x3d8   : > { %13916 = vmatprep.mubr.bf16.mxu0 %v12511_v53  ;;  %v13679_v26 = vpop.f32.mrf.mxu1  ;;  %v11214_v22 = vrot.slane %v20291_v10, 5  ;;  %v8274_v20 = vadd.f32 %v8231_v38, %v19156_v4  ;;  %v12512_v29 = vcombine.low %v11201_v50, %v11204_v57  ;;  %v11208_v4 = vsel %vm14845_vm14, %v12481_v23, %v11207_v36  ;;  %v20295_v23 = vld [vmem:[#allocation5_spill] sm:$0xff] }
 0x3d9   : > { %v13639_v41 = vpop.f32.mrf.mxu0  ;;  %v19336_v37 = vadd.f32 %v13679_v26, %v8269_v25  ;;  %v12513_v38 = vcombine.low %v11208_v4, %v11211_v8  ;;  %v11223_v31 = vrot.slane %v11221_v60, 4  ;;  %v20293_v26 = vld [vmem:[#allocation50_spill] sm:$0xff]  ;;  %v11224_v46 = vrot.slane %v20295_v23, 5 }
 0x3da   : > { %v8588_v12 = vpop.f32.mrf.mxu1  ;;  %v8277_v58 = vadd.f32 %v13639_v41, %v19163_v49  ;;  %v11216_v42 = vrot.slane %v11214_v22, 4  ;;  %v11217_v36 = vrot.slane %v20293_v26, 5  ;;  %v11228_v41 = vrot.slane %v20294_v52, 5 }
 0x3db   : > { %v8234_v16 = vpop.f32.mrf.mxu0  ;;  %v19346_v53 = vadd.f32 %v8588_v12, %v8267_v24  ;;  %v11225_v47 = vsel %vm14845_vm14, %v11223_v31, %v11224_v46 }
 0x3dc   : > { %v8275_v25 = vadd.f32 %v8234_v16, %v19170_v43  ;;  %v13682_v19 = vpop.f32.mrf.mxu1  ;;  %v11070_v43 = vld [vmem:[#allocation3 + $0xb4] sm:$0xe] }
 0x3dd   : > { %v13706_v3 = vpop.f32.mrf.mxu0  ;;  %v19353_v49 = vadd.f32 %v13682_v19, %v8272_v39  ;;  %v11071_v39 = vld [vmem:[#allocation3 + $0xc0] sm:$0xe] }
 0x3de   : > { %v19356_v0 = vadd.f32 %v13706_v3, %v19186_v48  ;;  %v8601_v24 = vpop.f32.mrf.mxu1  ;;  %v12483_v8 = vrot.slane %v11071_v39, 9  ;;  %v11230_v3 = vrot.slane %v11228_v41, 4 }
 0x3df   : > { %v9259_v15 = vpop.f32.mrf.mxu0  ;;  %13917 = vmatmul.mubr.bf16.gmra.mxu0 %v12512_v29  ;;  %v19358_v51 = vadd.f32 %v8601_v24, %v8270_v13  ;;  %v12482_v13 = vrot.slane %v11070_v43, 9  ;;  %v20296_v29 = vld [vmem:[#allocation23_spill] sm:$0xff] }
 0x3e0   : > { %v19361_v14 = vadd.f32 %v9259_v15, %v19196_v17  ;;  %13920 = vmatprep.mubr.bf16.mxu0 %v12513_v38  ;;  %v13683_v48 = vpop.f32.mrf.mxu1  ;;  %v11218_v17 = vsel %vm14845_vm14, %v11216_v42, %v11217_v36  ;;  %v11231_v4 = vrot.slane %v20296_v29, 5  ;;  %v11222_v15 = vsel %vm14845_vm14, %v12483_v8, %v11221_v60 }
 0x3e1   : > { %v13707_v32 = vpop.f32.mrf.mxu0  ;;  %v19366_v57 = vadd.f32 %v13683_v48, %v8273_v54  ;;  %v11215_v54 = vsel %vm14845_vm14, %v12482_v13, %v11214_v22 }
 0x3e2   : > { %v19369_v10 = vadd.f32 %v13707_v32, %v19204_v11  ;;  %v8604_v12 = vpop.f32.mrf.mxu1  ;;  %v12484_v11 = vrot.slane %v11072_v7, 9  ;;  %v12514_v24 = vcombine.low %v11215_v54, %v11218_v17 }
 0x3e3   : > { %v9262_v16 = vpop.f32.mrf.mxu0  ;;  %v19375_v50 = vadd.f32 %v8604_v12, %v8271_v18 }
 0x3e4   : > { %v19378_v19 = vadd.f32 %v9262_v16, %v19210_v62  ;;  %v13686_v38 = vpop.f32.mrf.mxu1  ;;  %v12515_v62 = vcombine.low %v11222_v15, %v11225_v47  ;;  %v11229_v39 = vsel %vm14845_vm14, %v12484_v11, %v11228_v41 }
 0x3e5   : > { %v13710_v42 = vpop.f32.mrf.mxu0  ;;  %v19385_v43 = vadd.f32 %v13686_v38, %v8276_v9  ;;  %v11232_v9 = vsel %vm14845_vm14, %v11230_v3, %v11231_v4 }
 0x3e6   : > { %v19388_v18 = vadd.f32 %v13710_v42, %v19223_v1  ;;  %v8617_v31 = vpop.f32.mrf.mxu1  ;;  %v12516_v23 = vcombine.low %v11229_v39, %v11232_v9 }
 0x3e7   : > { %v9275_v26 = vpop.f32.mrf.mxu0  ;;  %13921 = vmatmul.mubr.bf16.gmra.mxu0 %v12514_v24  ;;  %v19390_v22 = vadd.f32 %v8617_v31, %v8274_v20 }
 0x3e8   : > { %v19393_v36 = vadd.f32 %v9275_v26, %v19232_v56  ;;  %13924 = vmatprep.mubr.bf16.mxu0 %v12515_v62  ;;  %v13687_v60 = vpop.f32.mrf.mxu1 }
 0x3e9   : > { %v13711_v52 = vpop.f32.mrf.mxu0  ;;  %v19399_v1 = vadd.f32 %v13687_v60, %v8277_v58 }
 0x3ea   : > { %v19402_v48 = vadd.f32 %v13711_v52, %v19238_v30  ;;  %v8620_v32 = vpop.f32.mrf.mxu1 }
 0x3eb   : > { %v9278_v20 = vpop.f32.mrf.mxu0  ;;  %v19404_v46 = vadd.f32 %v8620_v32, %v8275_v25 }
 0x3ec   : > { %v19407_v56 = vadd.f32 %v9278_v20, %v19242_v45  ;;  %v19409_v7 = vpop.f32.mrf.mxu1 }
 0x3ed   : > { %v13714_v41 = vpop.f32.mrf.mxu0 }
 0x3ee   : > { %v19412_v55 = vadd.f32 %v13714_v41, %v19255_v63  ;;  %v19414_v13 = vpop.f32.mrf.mxu1 }
 0x3ef   : > { %v9291_v58 = vpop.f32.mrf.mxu0  ;;  %13925 = vmatmul.mubr.bf16.gmra.mxu0 %v12516_v23 }
 0x3f0   : > { %v19417_v30 = vadd.f32 %v9291_v58, %v19261_v40  ;;  %v19419_v17 = vpop.f32.mrf.mxu1 }
 0x3f1   : > { %v13715_v25 = vpop.f32.mrf.mxu0 }
 0x3f2   : > { %v19422_v12 = vadd.f32 %v13715_v25, %v19266_v21  ;;  %v19424_v45 = vpop.f32.mrf.mxu1 }
 0x3f3   : > { %v9294_v16 = vpop.f32.mrf.mxu0 }
 0x3f4   : > { %v19427_v8 = vadd.f32 %v9294_v16, %v19270_v27  ;;  %v19429_v63 = vpop.f32.mrf.mxu1 }
 0x3f5   : > { %v13718_v47 = vpop.f32.mrf.mxu0 }
 0x3f6   : > { %v19432_v54 = vadd.f32 %v13718_v47, %v19283_v35  ;;  %v19434_v40 = vpop.f32.mrf.mxu1 }
 0x3f7   : > { %v9307_v11 = vpop.f32.mrf.mxu0 }
 0x3f8   : > { %v19437_v3 = vadd.f32 %v9307_v11, %v19291_v34  ;;  %v19439_v21 = vpop.f32.mrf.mxu1 }
 0x3f9   : > { %v13719_v29 = vpop.f32.mrf.mxu0 }
 0x3fa   : > { %v19442_v4 = vadd.f32 %v13719_v29, %v19297_v44  ;;  %v19444_v27 = vpop.f32.mrf.mxu1 }
 0x3fb   : > { %v9310_v38 = vpop.f32.mrf.mxu0 }
 0x3fc   : > { %20297 = vst [vmem:[#allocation33_spill] sm:$0xff] %v19442_v4  ;;  %v19447_v42 = vadd.f32 %v9310_v38, %v19299_v28  ;;  %v19449_v35 = vpop.f32.mrf.mxu1 }
 0x3fd   : > { %v13722_v24 = vpop.f32.mrf.mxu0 }
 0x3fe   : > { %20298 = vst [vmem:[#allocation30_spill] sm:$0xff] %v19447_v42  ;;  %v19452_v15 = vadd.f32 %v13722_v24, %v19304_v59  ;;  %v19454_v34 = vpop.f32.mrf.mxu1 }
 0x3ff   : > { %v9323_v62 = vpop.f32.mrf.mxu0 }
 0x400   : > { %20299 = vst [vmem:[#allocation25_spill] sm:$0xff] %v19452_v15  ;;  %v19457_v31 = vadd.f32 %v9323_v62, %v19311_v6  ;;  %v19459_v44 = vpop.f32.mrf.mxu1 }
 0x401   : > { %v13723_v26 = vpop.f32.mrf.mxu0 }
 0x402   : > { %20300 = vst [vmem:[#allocation27_spill] sm:$0xff] %v19457_v31  ;;  %v19462_v39 = vadd.f32 %v13723_v26, %v19315_v2  ;;  %v19464_v28 = vpop.f32.mrf.mxu1 }
 0x403   : > { %v9326_v9 = vpop.f32.mrf.mxu0 }
 0x404   : > { %20301 = vst [vmem:[#allocation13_spill] sm:$0xff] %v19462_v39  ;;  %v19467_v60 = vadd.f32 %v9326_v9, %v19320_v33  ;;  %v19469_v59 = vpop.f32.mrf.mxu1 }
 0x405   : > { %v13726_v52 = vpop.f32.mrf.mxu0 }
 0x406   : > { %20302 = vst [vmem:[#allocation26_spill] sm:$0xff] %v19467_v60  ;;  %v19472_v32 = vadd.f32 %v13726_v52, %v19326_v61  ;;  %v19474_v6 = vpop.f32.mrf.mxu1 }
 0x407   : > { %v9339_v20 = vpop.f32.mrf.mxu0 }
 0x408   : > { %20303 = vst [vmem:[#allocation29_spill] sm:$0xff] %v19472_v32  ;;  %v19477_v23 = vadd.f32 %v9339_v20, %v19330_v5  ;;  %v19479_v2 = vpop.f32.mrf.mxu1 }
 0x409   : > { %20305 = vst [vmem:[#allocation22_spill] sm:$0xff] %v19479_v2  ;;  %v13727_v41 = vpop.f32.mrf.mxu0 }
 0x40a   : > { %20304 = vst [vmem:[#allocation17_spill] sm:$0xff] %v19477_v23  ;;  %v19482_v58 = vadd.f32 %v13727_v41, %v19336_v37  ;;  %v19484_v33 = vpop.f32.mrf.mxu1 }
 0x40b   : > { %20307 = vst [vmem:[#allocation7_spill] sm:$0xff] %v19484_v33  ;;  %v9342_v25 = vpop.f32.mrf.mxu0 }
 0x40c   : > { %20306 = vst [vmem:[#allocation16_spill] sm:$0xff] %v19482_v58  ;;  %v19487_v16 = vadd.f32 %v9342_v25, %v19346_v53  ;;  %v19489_v61 = vpop.f32.mrf.mxu1 }
 0x40d   : > { %20309 = vst [vmem:[#allocation37_spill] sm:$0xff] %v19489_v61 }
 0x40e   : > { %20308 = vst [vmem:[#allocation6_spill] sm:$0xff] %v19487_v16  ;;  %v19491_v47 = vpop.f32.mrf.mxu1 }
 0x40f   : > { %20310 = vst [vmem:[#allocation32_spill] sm:$0xff] %v19491_v47 }
 0x410   : > { %v19493_v11 = vpop.f32.mrf.mxu1  ;;  %v13730_v5 = vpop.f32.mrf.mxu0 }
 0x411   : > { %20311 = vst [vmem:[#allocation24_spill] sm:$0xff] %v19493_v11  ;;  %v19498_v38 = vadd.f32 %v13730_v5, %v19353_v49 }
 0x412   : > { %v19495_v29 = vpop.f32.mrf.mxu1  ;;  %v9355_v37 = vpop.f32.mrf.mxu0 }
 0x413   : > { %20312 = vst [vmem:[#allocation28_spill] sm:$0xff] %v19495_v29  ;;  %20313 = vst [vmem:[#allocation11_spill] sm:$0xff] %v19498_v38  ;;  %v19503_v62 = vadd.f32 %v9355_v37, %v19358_v51 }
 0x414   : > { %v19500_v24 = vpop.f32.mrf.mxu1  ;;  %v13731_v53 = vpop.f32.mrf.mxu0 }
 0x415   : > { %20314 = vst [vmem:[#allocation31_spill] sm:$0xff] %v19500_v24  ;;  %20315 = vst [vmem:[#allocation34_spill] sm:$0xff] %v19503_v62  ;;  %v19508_v9 = vadd.f32 %v13731_v53, %v19366_v57 }
 0x416   : > { %v19505_v26 = vpop.f32.mrf.mxu1  ;;  %v9358_v52 = vpop.f32.mrf.mxu0 }
 0x417   : > { %20316 = vst [vmem:[#allocation4_spill] sm:$0xff] %v19505_v26  ;;  %20317 = vst [vmem:[#allocation14_spill] sm:$0xff] %v19508_v9  ;;  %v19513_v41 = vadd.f32 %v9358_v52, %v19375_v50 }
 0x418   : > { %v19510_v20 = vpop.f32.mrf.mxu1 }
 0x419   : > { %20318 = vst [vmem:[#allocation36_spill] sm:$0xff] %v19510_v20  ;;  %20319 = vst [vmem:[#allocation12_spill] sm:$0xff] %v19513_v41 }
 0x41a   : > { %v19515_v49 = vpop.f32.mrf.mxu1 }
 0x41b   : > { %20320 = vst [vmem:[#allocation8_spill] sm:$0xff] %v19515_v49 }
 0x41c   : > { %v19517_v25 = vpop.f32.mrf.mxu1 }
 0x41d   : > { %20321 = vst [vmem:[#allocation39_spill] sm:$0xff] %v19517_v25  ;;  %v13734_v5 = vpop.f32.mrf.mxu0 }
 0x41e   : > { %v19519_v38 = vpop.f32.mrf.mxu1  ;;  %v19522_v51 = vadd.f32 %v13734_v5, %v19385_v43 }
 0x41f   : > { %20322 = vst [vmem:[#allocation18_spill] sm:$0xff] %v19519_v38  ;;  %v9371_v37 = vpop.f32.mrf.mxu0 }
 0x420   : > { %20323 = vst [vmem:[#allocation10_spill] sm:$0xff] %v19522_v51  ;;  %v19524_v62 = vpop.f32.mrf.mxu1  ;;  %v19527_v57 = vadd.f32 %v9371_v37, %v19390_v22 }
 0x421   : > { %20324 = vst [vmem:[#allocation44_spill] sm:$0xff] %v19524_v62  ;;  %v13735_v53 = vpop.f32.mrf.mxu0 }
 0x422   : > { %20325 = vst [vmem:[#allocation41_spill] sm:$0xff] %v19527_v57  ;;  %v19529_v9 = vpop.f32.mrf.mxu1  ;;  %v19532_v50 = vadd.f32 %v13735_v53, %v19399_v1 }
 0x423   : > { %20326 = vst [vmem:[#allocation47_spill] sm:$0xff] %v19529_v9  ;;  %v9374_v52 = vpop.f32.mrf.mxu0 }
 0x424   : > { %20327 = vst [vmem:[#allocation35_spill] sm:$0xff] %v19532_v50  ;;  %v19535_v41 = vadd.f32 %v9374_v52, %v19404_v46  ;;  %v19537_v38 = vpop.f32.mrf.mxu1 }
 0x425   : > { %20329 = vst [vmem:[#allocation40_spill] sm:$0xff] %v19537_v38  ;;  %v13802_v43 = vpop.f32.mrf.mxu0 }
 0x426   : > { %20328 = vst [vmem:[#allocation19_spill] sm:$0xff] %v19535_v41  ;;  %v19539_v51 = vpop.f32.mrf.mxu1 }
 0x427   : > { %v10144_v5 = vpop.f32.mrf.mxu0  ;;  %20330 = vst [vmem:[#allocation48_spill] sm:$0xff] %v19539_v51 }
 0x428   : > { %v19543_v22 = vpop.f32.mrf.mxu1 }
 0x429   : > { %v13803_v62 = vpop.f32.mrf.mxu0  ;;  %20331 = vst [vmem:[#allocation42_spill] sm:$0xff] %v19543_v22 }
 0x42a   : > { %v19549_v1 = vpop.f32.mrf.mxu1 }
 0x42b   : > { %v19541_v25 = vpop.f32.mrf.mxu0  ;;  %20332 = vst [vmem:[#allocation45_spill] sm:$0xff] %v19549_v1 }
 0x42d   : > { %v19545_v37 = vpop.f32.mrf.mxu0 }
 0x42e   : > { %v13850_v52 = vpop.f32.mrf.mxu1 }
 0x42f   : > { %v19547_v57 = vpop.f32.mrf.mxu0 }
 0x430   : > { %v10898_v51 = vpop.f32.mrf.mxu1 }
 0x431   : > { %v19551_v53 = vpop.f32.mrf.mxu0 }
 0x432   : > { %v13851_v22 = vpop.f32.mrf.mxu1 }
 0x433   : > { %v19553_v46 = vpop.f32.mrf.mxu0 }
 0x434   : > { %v10901_v1 = vpop.f32.mrf.mxu1 }
 0x435   : > { %v19555_v41 = vpop.f32.mrf.mxu0 }
 0x437   : > { %v19557_v50 = vpop.f32.mrf.mxu0 }
 0x439   : > { %v19559_v38 = vpop.f32.mrf.mxu0  ;;  %v19571_v26 = vpop.f32.mrf.mxu1 }
 0x43b   : > { %v19561_v9 = vpop.f32.mrf.mxu0  ;;  %v19577_v32 = vpop.f32.mrf.mxu1 }
 0x43d   : > { %v19563_v49 = vpop.f32.mrf.mxu0  ;;  %v19583_v11 = vpop.f32.mrf.mxu1 }
 0x43f   : > { %v19565_v16 = vpop.f32.mrf.mxu0  ;;  %v19589_v31 = vpop.f32.mrf.mxu1 }
 0x440   : > { %20333 = vst [vmem:[#allocation52_spill] sm:$0xff] %v19565_v16 }
 0x441   : > { %v19567_v20 = vpop.f32.mrf.mxu0 }
 0x442   : > { %20334 = vst [vmem:[#allocation15_spill] sm:$0xff] %v19567_v20 }
 0x443   : > { %v19569_v58 = vpop.f32.mrf.mxu0 }
 0x444   : > { %20335 = vst [vmem:[#allocation51_spill] sm:$0xff] %v19569_v58 }
 0x445   : > { %v19573_v23 = vpop.f32.mrf.mxu0 }
 0x446   : > { %20336 = vst [vmem:[#allocation9_spill] sm:$0xff] %v19573_v23 }
 0x447   : > { %v19575_v24 = vpop.f32.mrf.mxu0 }
 0x448   : > { %20337 = vst [vmem:[#allocation21_spill] sm:$0xff] %v19575_v24  ;;  %v19595_v24 = vpop.f32.mrf.mxu1 }
 0x449   : > { %v19579_v29 = vpop.f32.mrf.mxu0 }
 0x44a   : > { %20338 = vst [vmem:[#allocation43_spill] sm:$0xff] %v19579_v29  ;;  %v19599_v29 = vpop.f32.mrf.mxu1 }
 0x44b   : > { %v19581_v60 = vpop.f32.mrf.mxu0 }
 0x44c   : > { %20339 = vst [vmem:[#allocation20_spill] sm:$0xff] %v19581_v60  ;;  %v19603_v15 = vpop.f32.mrf.mxu1 }
 0x44d   : > { %v19585_v39 = vpop.f32.mrf.mxu0 }
 0x44e   : > { %20340 = vst [vmem:[#allocation46_spill] sm:$0xff] %v19585_v39 }
 0x44f   : > { %v19587_v47 = vpop.f32.mrf.mxu0 }
 0x450   : > { %20341 = vst [vmem:[#allocation49_spill] sm:$0xff] %v19587_v47  ;;  %v19607_v47 = vpop.f32.mrf.mxu1 }
 0x451   : > { %v19591_v58 = vpop.f32.mrf.mxu0 }
 0x452   : > { %20342 = vst [vmem:[#allocation53_spill] sm:$0xff] %v19591_v58  ;;  %v19611_v33 = vpop.f32.mrf.mxu1 }
 0x453   : > { %v19593_v23 = vpop.f32.mrf.mxu0  ;;  %20348 = vst [vmem:[#allocation55_spill] sm:$0xff] %v19611_v33 }
 0x454   : > { %20343 = vst [vmem:[#allocation50_spill] sm:$0xff] %v19593_v23  ;;  %v19615_v23 = vpop.f32.mrf.mxu1 }
 0x455   : > { %v19597_v61 = vpop.f32.mrf.mxu0  ;;  %20350 = vst [vmem:[#allocation57_spill] sm:$0xff] %v19615_v23 }
 0x456   : > { %20344 = vst [vmem:[#allocation38_spill] sm:$0xff] %v19597_v61  ;;  %v19620_v61 = vpop.f32.mrf.mxu1 }
 0x457   : > { %v19601_v60 = vpop.f32.mrf.mxu0  ;;  %20352 = vst [vmem:[#allocation59_spill] sm:$0xff] %v19620_v61 }
 0x458   : > { %20345 = vst [vmem:[#allocation5_spill] sm:$0xff] %v19601_v60  ;;  %v19626_v16 = vpop.f32.mrf.mxu1 }
 0x459   : > { %v19605_v39 = vpop.f32.mrf.mxu0  ;;  %20354 = vst [vmem:[#allocation61_spill] sm:$0xff] %v19626_v16 }
 0x45a   : > { %20346 = vst [vmem:[#allocation23_spill] sm:$0xff] %v19605_v39  ;;  %v9886_v39 = vadd.f32 %v19409_v7, %v19356_v0  ;;  %v19634_v61 = vpop.f32.mrf.mxu1  ;;  %v9885_v0 = vadd.f32 %v19424_v45, %v19378_v19  ;;  %v9890_v19 = vadd.f32 %v19429_v63, %v19388_v18 }
 0x45b   : > { %v19609_v20 = vpop.f32.mrf.mxu0 }
 0x45c   : > { %20347 = vst [vmem:[#allocation54_spill] sm:$0xff] %v19609_v20  ;;  %v10273_v23 = vadd.f32 %v13802_v43, %v9886_v39 }
 0x45d   : > { %v19613_v58 = vpop.f32.mrf.mxu0 }
 0x45e   : > { %20349 = vst [vmem:[#allocation56_spill] sm:$0xff] %v19613_v58  ;;  %v9884_v58 = vadd.f32 %v19414_v13, %v19361_v14  ;;  %v11027_v2 = vadd.f32 %v13850_v52, %v10273_v23  ;;  %v19644_v23 = vpop.f32.mrf.mxu1 }
 0x45f   : > { %v19617_v42 = vpop.f32.mrf.mxu0 }
 0x460   : > { %20351 = vst [vmem:[#allocation58_spill] sm:$0xff] %v19617_v42  ;;  %v9887_v42 = vadd.f32 %v19419_v17, %v19369_v10  ;;  %v10271_v33 = vadd.f32 %v10144_v5, %v9884_v58  ;;  %v10272_v10 = vadd.f32 %v19541_v25, %v9885_v0  ;;  %v19653_v25 = vpop.f32.mrf.mxu1 }
 0x461   : > { %v19622_v60 = vpop.f32.mrf.mxu0 }
 0x462   : > { %20353 = vst [vmem:[#allocation60_spill] sm:$0xff] %v19622_v60  ;;  %v10274_v7 = vadd.f32 %v13803_v62, %v9887_v42  ;;  %v11025_v16 = vadd.f32 %v10898_v51, %v10271_v33  ;;  %v11026_v45 = vadd.f32 %v10901_v1, %v10272_v10  ;;  %v9888_v33 = vadd.f32 %v19434_v40, %v19393_v36 }
 0x463   : > { %v19628_v20 = vpop.f32.mrf.mxu0  ;;  %v10277_v62 = vadd.f32 %v19545_v37, %v9890_v19  ;;  %v9891_v51 = vadd.f32 %v19439_v21, %v19402_v48  ;;  %v9889_v36 = vadd.f32 %v19444_v27, %v19407_v56  ;;  %v9894_v48 = vadd.f32 %v19449_v35, %v19412_v55  ;;  %v19667_v21 = vpop.f32.mrf.mxu1 }
 0x464   : > { %v11028_v13 = vadd.f32 %v13851_v22, %v10274_v7  ;;  %v10275_v18 = vadd.f32 %v19547_v57, %v9888_v33  ;;  %v9892_v27 = vadd.f32 %v19454_v34, %v19417_v30 }
 0x465   : > { %v11031_v63 = vadd.f32 %v19571_v26, %v10277_v62  ;;  %v10278_v40 = vadd.f32 %v19551_v53, %v9891_v51  ;;  %v10276_v26 = vadd.f32 %v19553_v46, %v9889_v36  ;;  %v9895_v46 = vadd.f32 %v19459_v44, %v19422_v12  ;;  %v19678_v7 = vpop.f32.mrf.mxu1  ;;  %v20357_v62 = vld [vmem:[#allocation52_spill] sm:$0xff]  ;;  %v20362_v36 = vld [vmem:[#allocation57_spill] sm:$0xff] }
 0x466   : > { %v11029_v22 = vadd.f32 %v19577_v32, %v10275_v18  ;;  %v10281_v32 = vadd.f32 %v19555_v41, %v9894_v48  ;;  %v20363_v48 = vld [vmem:[#allocation25_spill] sm:$0xff] }
 0x467   : > { %v11032_v1 = vadd.f32 %v19583_v11, %v10278_v40  ;;  %v11030_v0 = vadd.f32 %v19589_v31, %v10276_v26  ;;  %v9893_v31 = vadd.f32 %v19464_v28, %v19427_v8 }
 0x468   : > { %v11035_v10 = vadd.f32 %v19595_v24, %v10281_v32  ;;  %v19690_v24 = vpop.f32.mrf.mxu1 }
 0x475   : > { %v13898_v60 = vpop.f32.mrf.mxu0 }
 0x476   : > { %v11525_v4 = vadd.f32 %v13898_v60, %v11027_v2 }
 0x477   : > { %v11396_v14 = vpop.f32.mrf.mxu0 }
 0x478   : > { %v11557_v17 = vmax.f32 %v11525_v4, 0.0  ;;  %v11523_v39 = vadd.f32 %v11396_v14, %v11025_v16  ;;  %v10279_v14 = vadd.f32 %v19557_v50, %v9892_v27  ;;  %v9898_v50 = vadd.f32 %v19469_v59, %v19432_v54 }
 0x479   : > { %v13899_v58 = vpop.f32.mrf.mxu0 }
 0x47a   : > { %11589 = vst [vmem:[%s19641_s29 + $0x10] sm:$0xff] %v11557_v17  ;;  %v11555_v42 = vmax.f32 %v11523_v39, 0.0  ;;  %v11526_v60 = vadd.f32 %v13899_v58, %v11028_v13  ;;  %v10282_v13 = vadd.f32 %v19559_v38, %v9895_v46  ;;  %v11033_v17 = vadd.f32 %v19599_v29, %v10279_v14  ;;  %v20368_v46 = vld [vmem:[#allocation32_spill] sm:$0xff] }
 0x47b   : > { %v11399_v2 = vpop.f32.mrf.mxu0  ;;  %v10280_v58 = vadd.f32 %v19561_v9, %v9893_v31  ;;  %v9896_v29 = vadd.f32 %v19474_v6, %v19437_v3  ;;  %v20356_v9 = vld [vmem:[#allocation22_spill] sm:$0xff] }
 0x47c   : > { %11587 = vst [vmem:[%s19641_s29] sm:$0xff] %v11555_v42  ;;  %v11558_v4 = vmax.f32 %v11526_v60, 0.0  ;;  %v11524_v16 = vadd.f32 %v11399_v2, %v11026_v45  ;;  %v11036_v19 = vadd.f32 %v19603_v15, %v10282_v13  ;;  %v10285_v45 = vadd.f32 %v19563_v49, %v9898_v50  ;;  %v20355_v60 = vld [vmem:[#allocation33_spill] sm:$0xff]  ;;  %v19702_v15 = vpop.f32.mrf.mxu1  ;;  %v20359_v49 = vld [vmem:[#allocation30_spill] sm:$0xff] }
 0x47d   : > { %v11034_v42 = vadd.f32 %v19607_v47, %v10280_v58  ;;  %v9899_v2 = vadd.f32 %v20356_v9, %v20355_v60  ;;  %v20360_v47 = vld [vmem:[#allocation7_spill] sm:$0xff]  ;;  %v20373_v58 = vld [vmem:[#allocation21_spill] sm:$0xff] }
 0x47e   : > { %11590 = vst [vmem:[%s19641_s29 + $0x18] sm:$0xff] %v11558_v4  ;;  %v11556_v43 = vmax.f32 %v11524_v16, 0.0  ;;  %v10283_v4 = vadd.f32 %v20357_v62, %v9896_v29  ;;  %v20358_v16 = vld [vmem:[#allocation55_spill] sm:$0xff]  ;;  %v9897_v18 = vadd.f32 %v20360_v47, %v20359_v49  ;;  %v20377_v62 = vld [vmem:[#allocation29_spill] sm:$0xff] }
 0x47f   : > { %v13902_v5 = vpop.f32.mrf.mxu0  ;;  %v11039_v51 = vadd.f32 %v20358_v16, %v10285_v45  ;;  %v20375_v45 = vld [vmem:[#allocation28_spill] sm:$0xff] }
 0x480   : > { %11588 = vst [vmem:[%s19641_s29 + $0x8] sm:$0xff] %v11556_v43  ;;  %v11529_v37 = vadd.f32 %v13902_v5, %v11031_v63  ;;  %v20361_v43 = vld [vmem:[#allocation15_spill] sm:$0xff]  ;;  %v11037_v40 = vadd.f32 %v20362_v36, %v10283_v4  ;;  %v20382_v36 = vld [vmem:[#allocation46_spill] sm:$0xff] }
 0x481   : > { %v11412_v57 = vpop.f32.mrf.mxu0  ;;  %v10286_v5 = vadd.f32 %v20361_v43, %v9899_v2  ;;  %v20378_v4 = vld [vmem:[#allocation31_spill] sm:$0xff]  ;;  %v20381_v43 = vld [vmem:[#allocation4_spill] sm:$0xff] }
 0x482   : > { %v11561_v52 = vmax.f32 %v11529_v37, 0.0  ;;  %v11527_v56 = vadd.f32 %v11412_v57, %v11029_v22  ;;  %v20364_v57 = vld [vmem:[#allocation37_spill] sm:$0xff]  ;;  %v9906_v16 = vadd.f32 %v20378_v4, %v20377_v62 }
 0x483   : > { %v13903_v53 = vpop.f32.mrf.mxu0  ;;  %v9902_v26 = vadd.f32 %v20364_v57, %v20363_v48  ;;  %v20383_v57 = vld [vmem:[#allocation16_spill] sm:$0xff]  ;;  %v20397_v4 = vld [vmem:[#allocation5_spill] sm:$0xff] }
 0x484   : > { %11593 = vst [vmem:[%s19641_s29 + $0x30] sm:$0xff] %v11561_v52  ;;  %v11559_v55 = vmax.f32 %v11527_v56, 0.0  ;;  %v11530_v35 = vadd.f32 %v13903_v53, %v11032_v1  ;;  %v19714_v1 = vpop.f32.mrf.mxu1  ;;  %v20365_v56 = vld [vmem:[#allocation51_spill] sm:$0xff] }
 0x485   : > { %v11415_v11 = vpop.f32.mrf.mxu0  ;;  %v10284_v27 = vadd.f32 %v20365_v56, %v9897_v18  ;;  %v20366_v53 = vld [vmem:[#allocation59_spill] sm:$0xff] }
 0x486   : > { %11591 = vst [vmem:[%s19641_s29 + $0x20] sm:$0xff] %v11559_v55  ;;  %v11562_v30 = vmax.f32 %v11530_v35, 0.0  ;;  %v11528_v34 = vadd.f32 %v11415_v11, %v11030_v0  ;;  %v11040_v32 = vadd.f32 %v20366_v53, %v10286_v5  ;;  %v20367_v35 = vld [vmem:[#allocation27_spill] sm:$0xff]  ;;  %v19726_v50 = vpop.f32.mrf.mxu1 }
 0x487   : > { %v13906_v41 = vpop.f32.mrf.mxu0  ;;  %v9900_v11 = vadd.f32 %v20368_v46, %v20367_v35  ;;  %v20386_v35 = vld [vmem:[#allocation6_spill] sm:$0xff]  ;;  %v20387_v46 = vld [vmem:[#allocation8_spill] sm:$0xff] }
 0x488   : > { %11594 = vst [vmem:[%s19641_s29 + $0x38] sm:$0xff] %v11562_v30  ;;  %v11560_v12 = vmax.f32 %v11528_v34, 0.0  ;;  %v11533_v44 = vadd.f32 %v13906_v41, %v11035_v10  ;;  %v20369_v10 = vld [vmem:[#allocation9_spill] sm:$0xff] }
 0x489   : > { %v11428_v39 = vpop.f32.mrf.mxu0  ;;  %v10289_v30 = vadd.f32 %v20369_v10, %v9902_v26  ;;  %v20370_v34 = vld [vmem:[#allocation61_spill] sm:$0xff]  ;;  %v20384_v26 = vld [vmem:[#allocation36_spill] sm:$0xff] }
 0x48a   : > { %11592 = vst [vmem:[%s19641_s29 + $0x28] sm:$0xff] %v11560_v12  ;;  %v11565_v8 = vmax.f32 %v11533_v44, 0.0  ;;  %v11531_v28 = vadd.f32 %v11428_v39, %v11033_v17  ;;  %v11038_v31 = vadd.f32 %v20370_v34, %v10284_v27  ;;  %v20371_v17 = vld [vmem:[#allocation13_spill] sm:$0xff]  ;;  %v20372_v12 = vld [vmem:[#allocation24_spill] sm:$0xff] }
 0x48b   : > { %v13907_v38 = vpop.f32.mrf.mxu0  ;;  %v9903_v44 = vadd.f32 %v20372_v12, %v20371_v17  ;;  %v20385_v27 = vld [vmem:[#allocation49_spill] sm:$0xff] }
 0x48c   : > { %11597 = vst [vmem:[%s19641_s29 + $0x50] sm:$0xff] %v11565_v8  ;;  %v11563_v54 = vmax.f32 %v11531_v28, 0.0  ;;  %v11534_v59 = vadd.f32 %v13907_v38, %v11036_v19  ;;  %v10287_v19 = vadd.f32 %v20373_v58, %v9900_v11  ;;  %v11043_v8 = vadd.f32 %v19634_v61, %v10289_v30  ;;  %v20374_v38 = vld [vmem:[#allocation26_spill] sm:$0xff]  ;;  %v10994_v61 = vpop.f32.mrf.mxu1 }
 0x48d   : > { %v11431_v33 = vpop.f32.mrf.mxu0 }
 0x48e   : > { %11595 = vst [vmem:[%s19641_s29 + $0x40] sm:$0xff] %v11563_v54  ;;  %v11566_v3 = vmax.f32 %v11534_v59, 0.0  ;;  %v11532_v6 = vadd.f32 %v11431_v33, %v11034_v42  ;;  %v9901_v42 = vadd.f32 %v20375_v45, %v20374_v38  ;;  %v20376_v59 = vld [vmem:[#allocation43_spill] sm:$0xff]  ;;  %v11041_v9 = vadd.f32 %v19644_v23, %v10287_v19  ;;  %v20394_v45 = vld [vmem:[#allocation38_spill] sm:$0xff] }
 0x48f   : > { %v13910_v63 = vpop.f32.mrf.mxu0  ;;  %v10290_v60 = vadd.f32 %v20376_v59, %v9903_v44  ;;  %v20391_v44 = vld [vmem:[#allocation50_spill] sm:$0xff] }
 0x490   : > { %11598 = vst [vmem:[%s19641_s29 + $0x58] sm:$0xff] %v11566_v3  ;;  %v11564_v22 = vmax.f32 %v11532_v6, 0.0  ;;  %v11537_v37 = vadd.f32 %v13910_v63, %v11039_v51  ;;  %v20379_v3 = vld [vmem:[#allocation20_spill] sm:$0xff]  ;;  %v20380_v63 = vld [vmem:[#allocation17_spill] sm:$0xff] }
 0x491   : > { %v11444_v52 = vpop.f32.mrf.mxu0  ;;  %v10288_v6 = vadd.f32 %v20379_v3, %v9901_v42  ;;  %v11044_v49 = vadd.f32 %v19653_v25, %v10290_v60  ;;  %v9904_v23 = vadd.f32 %v20381_v43, %v20380_v63  ;;  %v13875_v25 = vpop.f32.mrf.mxu1  ;;  %v20400_v63 = vld [vmem:[#allocation23_spill] sm:$0xff] }
 0x492   : > { %11596 = vst [vmem:[%s19641_s29 + $0x48] sm:$0xff] %v11564_v22  ;;  %v11569_v0 = vmax.f32 %v11537_v37, 0.0  ;;  %v11535_v55 = vadd.f32 %v11444_v52, %v11037_v40  ;;  %v10293_v40 = vadd.f32 %v20382_v36, %v9906_v16  ;;  %v9907_v52 = vadd.f32 %v20384_v26, %v20383_v57  ;;  %v20403_v57 = vld [vmem:[#allocation54_spill] sm:$0xff] }
 0x493   : > { %v13911_v14 = vpop.f32.mrf.mxu0  ;;  %v11042_v22 = vadd.f32 %v19667_v21, %v10288_v6  ;;  %v10291_v53 = vadd.f32 %v20385_v27, %v9904_v23  ;;  %v9905_v21 = vadd.f32 %v20387_v46, %v20386_v35 }
 0x494   : > { %11601 = vst [vmem:[%s19641_s29 + $0x70] sm:$0xff] %v11569_v0  ;;  %v11567_v41 = vmax.f32 %v11535_v55, 0.0  ;;  %v11538_v13 = vadd.f32 %v13911_v14, %v11040_v32  ;;  %v11047_v32 = vadd.f32 %v19678_v7, %v10293_v40  ;;  %v20388_v14 = vld [vmem:[#allocation53_spill] sm:$0xff]  ;;  %v10997_v7 = vpop.f32.mrf.mxu1  ;;  %v20401_v40 = vld [vmem:[#allocation10_spill] sm:$0xff] }
 0x495   : > { %v11447_v39 = vpop.f32.mrf.mxu0  ;;  %v10294_v10 = vadd.f32 %v20388_v14, %v9907_v52  ;;  %v11045_v30 = vadd.f32 %v19690_v24, %v10291_v53  ;;  %v20404_v53 = vld [vmem:[#allocation41_spill] sm:$0xff]  ;;  %v20407_v14 = vld [vmem:[#allocation35_spill] sm:$0xff] }
 0x496   : > { %11599 = vst [vmem:[%s19641_s29 + $0x60] sm:$0xff] %v11567_v41  ;;  %v11570_v28 = vmax.f32 %v11538_v13, 0.0  ;;  %v11536_v29 = vadd.f32 %v11447_v39, %v11038_v31  ;;  %v20389_v41 = vld [vmem:[#allocation11_spill] sm:$0xff]  ;;  %v10292_v39 = vadd.f32 %v20391_v44, %v9905_v21 }
 0x497   : > { %v13914_v54 = vpop.f32.mrf.mxu0  ;;  %v20390_v13 = vld [vmem:[#allocation39_spill] sm:$0xff]  ;;  %v11048_v58 = vadd.f32 %v19702_v15, %v10294_v10  ;;  %v13878_v15 = vpop.f32.mrf.mxu1  ;;  %v20408_v10 = vld [vmem:[#allocation42_spill] sm:$0xff] }
 0x498   : > { %11602 = vst [vmem:[%s19641_s29 + $0x78] sm:$0xff] %v11570_v28  ;;  %v11568_v2 = vmax.f32 %v11536_v29, 0.0  ;;  %v11541_v33 = vadd.f32 %v13914_v54, %v11043_v8  ;;  %v9910_v17 = vadd.f32 %v20390_v13, %v20389_v41  ;;  %v20392_v28 = vld [vmem:[#allocation34_spill] sm:$0xff]  ;;  %v11046_v54 = vadd.f32 %v19714_v1, %v10292_v39  ;;  %v20410_v44 = vld [vmem:[#allocation19_spill] sm:$0xff]  ;;  %v20411_v39 = vld [vmem:[#allocation45_spill] sm:$0xff] }
 0x499   : > { %v11460_v51 = vpop.f32.mrf.mxu0  ;;  %v20393_v29 = vld [vmem:[#allocation18_spill] sm:$0xff] }
 0x49a   : > { %11600 = vst [vmem:[%s19641_s29 + $0x68] sm:$0xff] %v11568_v2  ;;  %v11573_v47 = vmax.f32 %v11541_v33, 0.0  ;;  %v11539_v18 = vadd.f32 %v11460_v51, %v11041_v9  ;;  %v9908_v24 = vadd.f32 %v20393_v29, %v20392_v28  ;;  %v10297_v42 = vadd.f32 %v20394_v45, %v9910_v17  ;;  %v20395_v9 = vld [vmem:[#allocation14_spill] sm:$0xff]  ;;  %v20396_v2 = vld [vmem:[#allocation44_spill] sm:$0xff] }
 0x49b   : > { %v13915_v5 = vpop.f32.mrf.mxu0  ;;  %v9911_v33 = vadd.f32 %v20396_v2, %v20395_v9 }
 0x49c   : > { %11605 = vst [vmem:[%s19641_s29 + $0x90] sm:$0xff] %v11573_v47  ;;  %v11571_v37 = vmax.f32 %v11539_v18, 0.0  ;;  %v11542_v48 = vadd.f32 %v13915_v5, %v11044_v49  ;;  %v10295_v16 = vadd.f32 %v20397_v4, %v9908_v24  ;;  %v11051_v51 = vadd.f32 %v19726_v50, %v10297_v42  ;;  %v20398_v49 = vld [vmem:[#allocation12_spill] sm:$0xff]  ;;  %v20399_v47 = vld [vmem:[#allocation47_spill] sm:$0xff] }
 0x49d   : > { %v11463_v56 = vpop.f32.mrf.mxu0  ;;  %v9909_v1 = vadd.f32 %v20399_v47, %v20398_v49  ;;  %v10298_v43 = vadd.f32 %v20400_v63, %v9911_v33 }
 0x49e   : > { %11603 = vst [vmem:[%s19641_s29 + $0x80] sm:$0xff] %v11571_v37  ;;  %v11574_v0 = vmax.f32 %v11542_v48, 0.0  ;;  %v11540_v55 = vadd.f32 %v11463_v56, %v11042_v22  ;;  %v11049_v23 = vadd.f32 %v10994_v61, %v10295_v16  ;;  %v20402_v22 = vld [vmem:[#allocation40_spill] sm:$0xff]  ;;  %v11010_v48 = vpop.f32.mrf.mxu1 }
 0x49f   : > { %v13918_v11 = vpop.f32.mrf.mxu0  ;;  %v9914_v37 = vadd.f32 %v20402_v22, %v20401_v40  ;;  %v10296_v26 = vadd.f32 %v20403_v57, %v9909_v1  ;;  %v11052_v52 = vadd.f32 %v13875_v25, %v10298_v43 }
 0x4a0   : > { %11606 = vst [vmem:[%s19641_s29 + $0x98] sm:$0xff] %v11574_v0  ;;  %v11572_v34 = vmax.f32 %v11540_v55, 0.0  ;;  %v11545_v31 = vadd.f32 %v13918_v11, %v11047_v32  ;;  %v20405_v32 = vld [vmem:[#allocation48_spill] sm:$0xff] }
 0x4a1   : > { %v11476_v12 = vpop.f32.mrf.mxu0  ;;  %v9912_v0 = vadd.f32 %v20405_v32, %v20404_v53  ;;  %v20406_v55 = vld [vmem:[#allocation56_spill] sm:$0xff]  ;;  %v11050_v46 = vadd.f32 %v10997_v7, %v10296_v26 }
 0x4a2   : > { %11604 = vst [vmem:[%s19641_s29 + $0x88] sm:$0xff] %v11572_v34  ;;  %v11577_v19 = vmax.f32 %v11545_v31, 0.0  ;;  %v11543_v8 = vadd.f32 %v11476_v12, %v11045_v30  ;;  %v10301_v35 = vadd.f32 %v20406_v55, %v9914_v37  ;;  %v9915_v30 = vadd.f32 %v20408_v10, %v20407_v14  ;;  %v13879_v34 = vpop.f32.mrf.mxu1  ;;  %v20409_v31 = vld [vmem:[#allocation58_spill] sm:$0xff] }
 0x4a3   : > { %v13919_v38 = vpop.f32.mrf.mxu0  ;;  %v10299_v41 = vadd.f32 %v20409_v31, %v9912_v0 }
 0x4a4   : > { %11609 = vst [vmem:[%s19641_s29 + $0xb0] sm:$0xff] %v11577_v19  ;;  %v11575_v59 = vmax.f32 %v11543_v8, 0.0  ;;  %v11546_v60 = vadd.f32 %v13919_v38, %v11048_v58  ;;  %v11055_v13 = vadd.f32 %v13878_v15, %v10301_v35  ;;  %v9913_v58 = vadd.f32 %v20411_v39, %v20410_v44  ;;  %v20412_v19 = vld [vmem:[#allocation60_spill] sm:$0xff]  ;;  %v11013_v38 = vpop.f32.mrf.mxu1 }
 0x4a5   : > { %v11479_v62 = vpop.f32.mrf.mxu0  ;;  %v10302_v8 = vadd.f32 %v20412_v19, %v9915_v30  ;;  %v11053_v28 = vadd.f32 %v11010_v48, %v10299_v41 }
 0x4a6   : > { %11607 = vst [vmem:[%s19641_s29 + $0xa0] sm:$0xff] %v11575_v59  ;;  %v11578_v3 = vmax.f32 %v11546_v60, 0.0  ;;  %v11544_v6 = vadd.f32 %v11479_v62, %v11046_v54  ;;  %v10300_v42 = vadd.f32 %v19628_v20, %v9913_v58 }
 0x4a7   : > { %v13922_v18 = vpop.f32.mrf.mxu0  ;;  %v11056_v54 = vadd.f32 %v13879_v34, %v10302_v8 }
 0x4a8   : > { %11610 = vst [vmem:[%s19641_s29 + $0xb8] sm:$0xff] %v11578_v3  ;;  %v11576_v5 = vmax.f32 %v11544_v6, 0.0  ;;  %v11549_v36 = vadd.f32 %v13922_v18, %v11051_v51  ;;  %v11054_v2 = vadd.f32 %v11013_v38, %v10300_v42 }
 0x4a9   : > { %v11492_v50 = vpop.f32.mrf.mxu0 }
 0x4aa   : > { %11608 = vst [vmem:[%s19641_s29 + $0xa8] sm:$0xff] %v11576_v5  ;;  %v11581_v56 = vmax.f32 %v11549_v36, 0.0  ;;  %v11547_v27 = vadd.f32 %v11492_v50, %v11049_v23 }
 0x4ab   : > { %v13923_v61 = vpop.f32.mrf.mxu0 }
 0x4ac   : > { %11613 = vst [vmem:[%s19641_s29 + $0xd0] sm:$0xff] %v11581_v56  ;;  %v11579_v21 = vmax.f32 %v11547_v27, 0.0  ;;  %v11550_v11 = vadd.f32 %v13923_v61, %v11052_v52 }
 0x4ad   : > { %v11495_v25 = vpop.f32.mrf.mxu0 }
 0x4ae   : > { %11611 = vst [vmem:[%s19641_s29 + $0xc0] sm:$0xff] %v11579_v21  ;;  %v11582_v17 = vmax.f32 %v11550_v11, 0.0  ;;  %v11548_v12 = vadd.f32 %v11495_v25, %v11050_v46 }
 0x4af   : > { %v13926_v7 = vpop.f32.mrf.mxu0 }
 0x4b0   : > { %11614 = vst [vmem:[%s19641_s29 + $0xd8] sm:$0xff] %v11582_v17  ;;  %v11580_v29 = vmax.f32 %v11548_v12, 0.0  ;;  %v11553_v24 = vadd.f32 %v13926_v7, %v11055_v13 }
 0x4b1   : > { %v11508_v45 = vpop.f32.mrf.mxu0 }
 0x4b2   : > { %11612 = vst [vmem:[%s19641_s29 + $0xc8] sm:$0xff] %v11580_v29  ;;  %v11585_v59 = vmax.f32 %v11553_v24, 0.0  ;;  %v11551_v60 = vadd.f32 %v11508_v45, %v11053_v28 }
 0x4b3   : > { %v13927_v9 = vpop.f32.mrf.mxu0 }
 0x4b4   : > { %11617 = vst [vmem:[%s19641_s29 + $0xf0] sm:$0xff] %v11585_v59  ;;  %v11583_v33 = vmax.f32 %v11551_v60, 0.0  ;;  %v11554_v15 = vadd.f32 %v13927_v9, %v11056_v54 }
 0x4b5   : > { %v11511_v62 = vpop.f32.mrf.mxu0 }
 0x4b6   : > { %11615 = vst [vmem:[%s19641_s29 + $0xe0] sm:$0xff] %v11583_v33  ;;  %v11586_v4 = vmax.f32 %v11554_v15, 0.0  ;;  %v11552_v16 = vadd.f32 %v11511_v62, %v11054_v2 }
 0x4b8   : > { %11618 = vst [vmem:[%s19641_s29 + $0xf8] sm:$0xff] %v11586_v4  ;;  %v11584_v51 = vmax.f32 %v11552_v16, 0.0 }
 0x4ba   : > { %11616 = vst [vmem:[%s19641_s29 + $0xe8] sm:$0xff] %v11584_v51 }
 0x4bb PF: > { %s15_s18 = sadd.s32 1, %s14289_s18  }
 0x4bc   : > { %p12_p5 = scmp.ge.s32.totalorder %s15_s18, 4  }
 0x4be   :  { %14 = sbr.rel (!%p12_p5) target bundleno = 1 (0x1), region = 92 }

</bundles_post_ra>
